<compile_context>
chip_gen: v5e
topology: v5e:2x2
jax: 0.10.0
libtpu: 0.0.40
codegen_flags: <defaults>
</compile_context>

<pallas_src>
import functools

import numpy as np
import jax
import jax.numpy as jnp
from jax.experimental import pallas as pl
from jax.experimental.pallas import tpu as pltpu


_VMEM = pl.BlockSpec(memory_space=pltpu.MemorySpace.VMEM)


# ----------------------------------------------------------------------------
# Fused whole-network kernel
# ----------------------------------------------------------------------------
def make_fused_kernel(T, B, hidden_sizes):
    n_layers = len(hidden_sizes)

    def kernel(*refs):
        # ---- unpack refs: inputs..., output, scratch... ----
        idx = 0
        x_ref = refs[idx]; idx += 1
        layer_refs = []
        for i in range(n_layers):
            wih_ref, whh_ref, b_ref = refs[idx], refs[idx + 1], refs[idx + 2]
            idx += 3
            if i > 0:
                rw_ref, rb_ref = refs[idx], refs[idx + 1]
                idx += 2
            else:
                rw_ref = rb_ref = None
            layer_refs.append((wih_ref, whh_ref, b_ref, rw_ref, rb_ref))
        fcw_ref, fcb_ref = refs[idx], refs[idx + 1]; idx += 2
        o_ref = refs[idx]; idx += 1
        seq_scratch = refs[idx:idx + (n_layers - 1)]   # (T, B, H_i) per non-last layer

        x_last = None
        for i, (wih_ref, whh_ref, b_ref, rw_ref, rb_ref) in enumerate(layer_refs):
            H = hidden_sizes[i]
            is_last = (i == n_layers - 1)

            # Layer input sequence (time-major), resident in VMEM.
            inp = x_ref[...] if i == 0 else seq_scratch[i - 1][...]   # (T, B, D)
            D = inp.shape[-1]
            inp2 = inp.reshape(T * B, D)

            wih = wih_ref[...]    # (D, 4H), gate column order [i, f, o, g]
            whh = whh_ref[...]    # (H, 4H)
            b = b_ref[...]        # (1, 4H)  (= b_ih + b_hh), loaded once

            # Hoisted input projection + bias: one big matmul for all timesteps.
            xw = (jnp.dot(inp2, wih, preferred_element_type=jnp.float32)
                  + b).reshape(T, B, 4 * H)

            # Hoisted dynamic-residual term.
            add_seq = None
            add_last = None
            if rw_ref is not None:
                rw = rw_ref[...]          # (D, H)
                rb = rb_ref[...]          # (1, H)
                if is_last:
                    # Only the final timestep feeds the fc head.
                    r_last = inp[T - 1]                                   # (B, D)
                    proj = jnp.dot(r_last, rw,
                                   preferred_element_type=jnp.float32) + rb
                    res = r_last if D == H else proj
                    add_last = jax.nn.sigmoid(proj) * res                 # (B, H)
                else:
                    proj = (jnp.dot(inp2, rw,
                                    preferred_element_type=jnp.float32)
                            + rb)                                         # (T*B, H)
                    res = inp2 if D == H else proj
                    add_seq = (jax.nn.sigmoid(proj) * res).reshape(T, B, H)

            # Recurrence: only h @ Whh stays in the loop.  T is static & tiny,
            # so the Python loop is fully unrolled at trace time.
            h = jnp.zeros((B, H), jnp.float32)
            c = jnp.zeros((B, H), jnp.float32)
            for t in range(T):
                gates = xw[t] + jnp.dot(h, whh,
                                        preferred_element_type=jnp.float32)  # (B, 4H)
                ifo = jax.nn.sigmoid(gates[:, :3 * H])   # one EUP slab for i, f, o
                g_g = jnp.tanh(gates[:, 3 * H:])
                i_g = ifo[:, :H]
                f_g = ifo[:, H:2 * H]
                o_g = ifo[:, 2 * H:]
                c = f_g * c + i_g * g_g
                h = o_g * jnp.tanh(c)
                # dropout: inference-mode identity
                if not is_last:
                    if add_seq is not None:
                        seq_scratch[i][t] = h + add_seq[t]   # fused residual + store
                    else:
                        seq_scratch[i][t] = h
            if is_last:
                x_last = h + add_last if add_last is not None else h

        # fc head: (H_last, 1) weight -> VPU multiply + lane reduce (no N=1 MXU op).
        fcw = fcw_ref[...]    # (1, H_last)
        fcb = fcb_ref[...]    # (1, 1)
        out = jnp.sum(x_last * fcw, axis=-1, keepdims=True) + fcb
        o_ref[...] = out.astype(o_ref.dtype)

    return kernel


# ----------------------------------------------------------------------------
# Wrapper
# ----------------------------------------------------------------------------
@jax.jit
def forward(x_btd, params):
    """Pallas forward pass. x_btd: (B, T, D) like PyTorch batch_first."""
    B, T, _ = x_btd.shape
    layers = params["layers"]
    hidden_sizes = tuple(int(l["whh"].shape[0]) for l in layers)
    n_layers = len(layers)

    x_tbd = jnp.transpose(x_btd, (1, 0, 2))   # -> (T, B, D) time-major

    args = [x_tbd]
    for i, l in enumerate(layers):
        args += [l["wih"], l["whh"], l["b"]]
        if i > 0:
            args += [l["res_w"], l["res_b"]]
    args += [params["fc_w"], params["fc_b"]]

    kernel = make_fused_kernel(T, B, hidden_sizes)
    scratch = [pltpu.VMEM((T, B, hidden_sizes[i]), jnp.float32)
               for i in range(n_layers - 1)]

    return pl.pallas_call(
        kernel,
        out_shape=jax.ShapeDtypeStruct((B, 1), jnp.float32),
        in_specs=[_VMEM] * len(args),
        out_specs=_VMEM,
        scratch_shapes=scratch,
    )(*args)


# ----------------------------------------------------------------------------
# Pure-JAX reference (for numerical verification)
# ----------------------------------------------------------------------------
def forward_ref(x_btd, params):
    x = jnp.transpose(x_btd, (1, 0, 2))   # (T, B, D)
    for i, l in enumerate(params["layers"]):
        residual = x
        T, B, _ = x.shape
        H = l["whh"].shape[0]
        h = jnp.zeros((B, H), jnp.float32)
        c = jnp.zeros((B, H), jnp.float32)
        ys = []
        for t in range(T):
            pre = x[t] @ l["wih"] + h @ l["whh"] + l["b"]   # gate order [i, f, o, g]
            i_g = jax.nn.sigmoid(pre[:, :H])
            f_g = jax.nn.sigmoid(pre[:, H:2 * H])
            o_g = jax.nn.sigmoid(pre[:, 2 * H:3 * H])
            g_g = jnp.tanh(pre[:, 3 * H:])
            c = f_g * c + i_g * g_g
            h = o_g * jnp.tanh(c)
            ys.append(h)
        x_new = jnp.stack(ys, 0)
        if i > 0:
            proj = residual @ l["res_w"] + l["res_b"]
            dyn = jax.nn.sigmoid(proj)
            res = residual if residual.shape[-1] == x_new.shape[-1] else proj
            x_new = x_new + dyn * res
        x = x_new
    return jnp.sum(x[-1] * params["fc_w"], axis=-1, keepdims=True) + params["fc_b"]


# ----------------------------------------------------------------------------
# Deterministic parameter init (mirrors nn.LSTM / nn.Linear shapes, but with
# fused gate weights laid out as columns [i, f, o, g]).
# ----------------------------------------------------------------------------
def init_params(key, input_size=64, hidden_sizes=(128, 64, 32, 16, 8)):
    layers = []
    for i, H in enumerate(hidden_sizes):
        D = input_size if i == 0 else hidden_sizes[i - 1]
        k = 1.0 / np.sqrt(H)
        key, k1, k2, k3, k4 = jax.random.split(key, 5)
        wih = jax.random.uniform(k1, (D, 4 * H), jnp.float32, -k, k)
        whh = jax.random.uniform(k2, (H, 4 * H), jnp.float32, -k, k)
        b_ih = jax.random.uniform(k3, (1, 4 * H), jnp.float32, -k, k)
        b_hh = jax.random.uniform(k4, (1, 4 * H), jnp.float32, -k, k)
        layer = dict(wih=wih, whh=whh, b=b_ih + b_hh)
        if i > 0:
            kl = 1.0 / np.sqrt(D)
            key, k5, k6 = jax.random.split(key, 3)
            layer["res_w"] = jax.random.uniform(k5, (D, H), jnp.float32, -kl, kl)
            layer["res_b"] = jax.random.uniform(k6, (1, H), jnp.float32, -kl, kl)
        layers.append(layer)
    H_last = hidden_sizes[-1]
    kf = 1.0 / np.sqrt(H_last)
    key, k7, k8 = jax.random.split(key, 3)
    fc_w = jax.random.uniform(k7, (1, H_last), jnp.float32, -kf, kf)
    fc_b = jax.random.uniform(k8, (1, 1), jnp.float32, -kf, kf)
    return dict(layers=layers, fc_w=fc_w, fc_b=fc_b)


# ----------------------------------------------------------------------------
if __name__ == "__main__":
    key = jax.random.PRNGKey(0)
    pkey, xkey = jax.random.split(key)

    params = init_params(pkey, input_size=64,
                         hidden_sizes=(128, 64, 32, 16, 8))

    B, T, D = 2, 8, 64
    x = jax.random.normal(xkey, (B, T, D), jnp.float32)

    out = forward(x, params)
    out = jax.block_until_ready(out)
    assert out.shape == (B, 1)

    ref = forward_ref(x, params)
    np.testing.assert_allclose(np.asarray(out), np.asarray(ref),
                               atol=1e-2, rtol=1e-2)

    print("KERNEL_OK")
</pallas_src>

<mosaic_0001>
module attributes {stable_mosaic.version = 11 : i64} {
  func.func @kernel(%arg0: memref<8x2x64xf32, #tpu.memory_space<vmem>>, %arg1: memref<64x512xf32, #tpu.memory_space<vmem>>, %arg2: memref<128x512xf32, #tpu.memory_space<vmem>>, %arg3: memref<1x512xf32, #tpu.memory_space<vmem>>, %arg4: memref<128x256xf32, #tpu.memory_space<vmem>>, %arg5: memref<64x256xf32, #tpu.memory_space<vmem>>, %arg6: memref<1x256xf32, #tpu.memory_space<vmem>>, %arg7: memref<128x64xf32, #tpu.memory_space<vmem>>, %arg8: memref<1x64xf32, #tpu.memory_space<vmem>>, %arg9: memref<64x128xf32, #tpu.memory_space<vmem>>, %arg10: memref<32x128xf32, #tpu.memory_space<vmem>>, %arg11: memref<1x128xf32, #tpu.memory_space<vmem>>, %arg12: memref<64x32xf32, #tpu.memory_space<vmem>>, %arg13: memref<1x32xf32, #tpu.memory_space<vmem>>, %arg14: memref<32x64xf32, #tpu.memory_space<vmem>>, %arg15: memref<16x64xf32, #tpu.memory_space<vmem>>, %arg16: memref<1x64xf32, #tpu.memory_space<vmem>>, %arg17: memref<32x16xf32, #tpu.memory_space<vmem>>, %arg18: memref<1x16xf32, #tpu.memory_space<vmem>>, %arg19: memref<16x32xf32, #tpu.memory_space<vmem>>, %arg20: memref<8x32xf32, #tpu.memory_space<vmem>>, %arg21: memref<1x32xf32, #tpu.memory_space<vmem>>, %arg22: memref<16x8xf32, #tpu.memory_space<vmem>>, %arg23: memref<1x8xf32, #tpu.memory_space<vmem>>, %arg24: memref<1x8xf32, #tpu.memory_space<vmem>>, %arg25: memref<1x1xf32, #tpu.memory_space<vmem>>, %arg26: memref<2x1xf32, #tpu.memory_space<vmem>>, %arg27: memref<8x2x128xf32, #tpu.memory_space<vmem>>, %arg28: memref<8x2x64xf32, #tpu.memory_space<vmem>>, %arg29: memref<8x2x32xf32, #tpu.memory_space<vmem>>, %arg30: memref<8x2x16xf32, #tpu.memory_space<vmem>>) attributes {dimension_semantics = [], scalar_prefetch = 0 : i64, scratch_operands = 4 : i64, tpu.core_type = #tpu.core_type<tc>} {
    %c0 = arith.constant 0 : index
    %c0_0 = arith.constant 0 : index
    %c0_1 = arith.constant 0 : index
    %0 = vector.load %arg0[%c0, %c0_0, %c0_1] : memref<8x2x64xf32, #tpu.memory_space<vmem>>, vector<8x2x64xf32>
    %1 = vector.shape_cast %0 : vector<8x2x64xf32> to vector<16x64xf32>
    %c0_2 = arith.constant 0 : index
    %c0_3 = arith.constant 0 : index
    %2 = vector.load %arg1[%c0_2, %c0_3] : memref<64x512xf32, #tpu.memory_space<vmem>>, vector<64x512xf32>
    %c0_4 = arith.constant 0 : index
    %c0_5 = arith.constant 0 : index
    %3 = vector.load %arg2[%c0_4, %c0_5] : memref<128x512xf32, #tpu.memory_space<vmem>>, vector<128x512xf32>
    %c0_6 = arith.constant 0 : index
    %c0_7 = arith.constant 0 : index
    %4 = vector.load %arg3[%c0_6, %c0_7] : memref<1x512xf32, #tpu.memory_space<vmem>>, vector<1x512xf32>
    %cst = arith.constant dense<0.000000e+00> : vector<16x512xf32>
    %5 = tpu.matmul %1, %2, %cst {dimension_numbers = #tpu.dot_dimension_numbers<[1], [0], [0], [1], [0, 0, 1, 1], [], []>} : vector<16x64xf32>, vector<64x512xf32>, vector<16x512xf32> -> vector<16x512xf32>
    %6 = vector.broadcast %4 : vector<1x512xf32> to vector<16x512xf32>
    %7 = arith.addf %5, %6 : vector<16x512xf32>
    %8 = vector.shape_cast %7 : vector<16x512xf32> to vector<8x2x512xf32>
    %cst_8 = arith.constant 0.000000e+00 : f32
    %9 = vector.broadcast %cst_8 : f32 to vector<2x128xf32>
    %cst_9 = arith.constant 0.000000e+00 : f32
    %10 = vector.broadcast %cst_9 : f32 to vector<2x128xf32>
    %11 = vector.extract_strided_slice %8 {offsets = [0, 0, 0], sizes = [1, 2, 512], strides = [1, 1, 1]} : vector<8x2x512xf32> to vector<1x2x512xf32>
    %12 = vector.shape_cast %11 : vector<1x2x512xf32> to vector<2x512xf32>
    %cst_10 = arith.constant dense<0.000000e+00> : vector<2x512xf32>
    %13 = tpu.matmul %9, %3, %cst_10 {dimension_numbers = #tpu.dot_dimension_numbers<[1], [0], [0], [1], [0, 0, 1, 1], [], []>} : vector<2x128xf32>, vector<128x512xf32>, vector<2x512xf32> -> vector<2x512xf32>
    %14 = arith.addf %12, %13 : vector<2x512xf32>
    %15 = vector.extract_strided_slice %14 {offsets = [0, 0], sizes = [2, 384], strides = [1, 1]} : vector<2x512xf32> to vector<2x384xf32>
    %16 = arith.negf %15 : vector<2x384xf32>
    %17 = math.exp %16 : vector<2x384xf32>
    %cst_11 = arith.constant 1.000000e+00 : f32
    %18 = vector.broadcast %cst_11 : f32 to vector<2x384xf32>
    %19 = arith.addf %18, %17 : vector<2x384xf32>
    %20 = arith.divf %18, %19 : vector<2x384xf32>
    %21 = vector.extract_strided_slice %14 {offsets = [0, 384], sizes = [2, 128], strides = [1, 1]} : vector<2x512xf32> to vector<2x128xf32>
    %22 = math.tanh %21 : vector<2x128xf32>
    %23 = vector.extract_strided_slice %20 {offsets = [0, 0], sizes = [2, 128], strides = [1, 1]} : vector<2x384xf32> to vector<2x128xf32>
    %24 = vector.extract_strided_slice %20 {offsets = [0, 128], sizes = [2, 128], strides = [1, 1]} : vector<2x384xf32> to vector<2x128xf32>
    %25 = vector.extract_strided_slice %20 {offsets = [0, 256], sizes = [2, 128], strides = [1, 1]} : vector<2x384xf32> to vector<2x128xf32>
    %26 = arith.mulf %24, %10 : vector<2x128xf32>
    %27 = arith.mulf %23, %22 : vector<2x128xf32>
    %28 = arith.addf %26, %27 : vector<2x128xf32>
    %29 = math.tanh %28 : vector<2x128xf32>
    %30 = arith.mulf %25, %29 : vector<2x128xf32>
    %c0_12 = arith.constant 0 : index
    %c0_13 = arith.constant 0 : index
    %c0_14 = arith.constant 0 : index
    %31 = vector.load %arg27[%c0_12, %c0_13, %c0_14] : memref<8x2x128xf32, #tpu.memory_space<vmem>>, vector<1x2x128xf32>
    %32 = vector.shape_cast %31 : vector<1x2x128xf32> to vector<2x128xf32>
    %33 = vector.shape_cast %30 : vector<2x128xf32> to vector<1x2x128xf32>
    tpu.vector_store %arg27[%c0_12, %c0_13, %c0_14], %33 {strides = array<i32>} : memref<8x2x128xf32, #tpu.memory_space<vmem>>, vector<1x2x128xf32>,
    %34 = vector.extract_strided_slice %8 {offsets = [1, 0, 0], sizes = [1, 2, 512], strides = [1, 1, 1]} : vector<8x2x512xf32> to vector<1x2x512xf32>
    %35 = vector.shape_cast %34 : vector<1x2x512xf32> to vector<2x512xf32>
    %cst_15 = arith.constant dense<0.000000e+00> : vector<2x512xf32>
    %36 = tpu.matmul %30, %3, %cst_15 {dimension_numbers = #tpu.dot_dimension_numbers<[1], [0], [0], [1], [0, 0, 1, 1], [], []>} : vector<2x128xf32>, vector<128x512xf32>, vector<2x512xf32> -> vector<2x512xf32>
    %37 = arith.addf %35, %36 : vector<2x512xf32>
    %38 = vector.extract_strided_slice %37 {offsets = [0, 0], sizes = [2, 384], strides = [1, 1]} : vector<2x512xf32> to vector<2x384xf32>
    %39 = arith.negf %38 : vector<2x384xf32>
    %40 = math.exp %39 : vector<2x384xf32>
    %cst_16 = arith.constant 1.000000e+00 : f32
    %41 = vector.broadcast %cst_16 : f32 to vector<2x384xf32>
    %42 = arith.addf %41, %40 : vector<2x384xf32>
    %43 = arith.divf %41, %42 : vector<2x384xf32>
    %44 = vector.extract_strided_slice %37 {offsets = [0, 384], sizes = [2, 128], strides = [1, 1]} : vector<2x512xf32> to vector<2x128xf32>
    %45 = math.tanh %44 : vector<2x128xf32>
    %46 = vector.extract_strided_slice %43 {offsets = [0, 0], sizes = [2, 128], strides = [1, 1]} : vector<2x384xf32> to vector<2x128xf32>
    %47 = vector.extract_strided_slice %43 {offsets = [0, 128], sizes = [2, 128], strides = [1, 1]} : vector<2x384xf32> to vector<2x128xf32>
    %48 = vector.extract_strided_slice %43 {offsets = [0, 256], sizes = [2, 128], strides = [1, 1]} : vector<2x384xf32> to vector<2x128xf32>
    %49 = arith.mulf %47, %28 : vector<2x128xf32>
    %50 = arith.mulf %46, %45 : vector<2x128xf32>
    %51 = arith.addf %49, %50 : vector<2x128xf32>
    %52 = math.tanh %51 : vector<2x128xf32>
    %53 = arith.mulf %48, %52 : vector<2x128xf32>
    %c1 = arith.constant 1 : index
    %c0_17 = arith.constant 0 : index
    %c0_18 = arith.constant 0 : index
    %54 = vector.load %arg27[%c1, %c0_17, %c0_18] : memref<8x2x128xf32, #tpu.memory_space<vmem>>, vector<1x2x128xf32>
    %55 = vector.shape_cast %54 : vector<1x2x128xf32> to vector<2x128xf32>
    %56 = vector.shape_cast %53 : vector<2x128xf32> to vector<1x2x128xf32>
    tpu.vector_store %arg27[%c1, %c0_17, %c0_18], %56 {strides = array<i32>} : memref<8x2x128xf32, #tpu.memory_space<vmem>>, vector<1x2x128xf32>,
    %57 = vector.extract_strided_slice %8 {offsets = [2, 0, 0], sizes = [1, 2, 512], strides = [1, 1, 1]} : vector<8x2x512xf32> to vector<1x2x512xf32>
    %58 = vector.shape_cast %57 : vector<1x2x512xf32> to vector<2x512xf32>
    %cst_19 = arith.constant dense<0.000000e+00> : vector<2x512xf32>
    %59 = tpu.matmul %53, %3, %cst_19 {dimension_numbers = #tpu.dot_dimension_numbers<[1], [0], [0], [1], [0, 0, 1, 1], [], []>} : vector<2x128xf32>, vector<128x512xf32>, vector<2x512xf32> -> vector<2x512xf32>
    %60 = arith.addf %58, %59 : vector<2x512xf32>
    %61 = vector.extract_strided_slice %60 {offsets = [0, 0], sizes = [2, 384], strides = [1, 1]} : vector<2x512xf32> to vector<2x384xf32>
    %62 = arith.negf %61 : vector<2x384xf32>
    %63 = math.exp %62 : vector<2x384xf32>
    %cst_20 = arith.constant 1.000000e+00 : f32
    %64 = vector.broadcast %cst_20 : f32 to vector<2x384xf32>
    %65 = arith.addf %64, %63 : vector<2x384xf32>
    %66 = arith.divf %64, %65 : vector<2x384xf32>
    %67 = vector.extract_strided_slice %60 {offsets = [0, 384], sizes = [2, 128], strides = [1, 1]} : vector<2x512xf32> to vector<2x128xf32>
    %68 = math.tanh %67 : vector<2x128xf32>
    %69 = vector.extract_strided_slice %66 {offsets = [0, 0], sizes = [2, 128], strides = [1, 1]} : vector<2x384xf32> to vector<2x128xf32>
    %70 = vector.extract_strided_slice %66 {offsets = [0, 128], sizes = [2, 128], strides = [1, 1]} : vector<2x384xf32> to vector<2x128xf32>
    %71 = vector.extract_strided_slice %66 {offsets = [0, 256], sizes = [2, 128], strides = [1, 1]} : vector<2x384xf32> to vector<2x128xf32>
    %72 = arith.mulf %70, %51 : vector<2x128xf32>
    %73 = arith.mulf %69, %68 : vector<2x128xf32>
    %74 = arith.addf %72, %73 : vector<2x128xf32>
    %75 = math.tanh %74 : vector<2x128xf32>
    %76 = arith.mulf %71, %75 : vector<2x128xf32>
    %c2 = arith.constant 2 : index
    %c0_21 = arith.constant 0 : index
    %c0_22 = arith.constant 0 : index
    %77 = vector.load %arg27[%c2, %c0_21, %c0_22] : memref<8x2x128xf32, #tpu.memory_space<vmem>>, vector<1x2x128xf32>
    %78 = vector.shape_cast %77 : vector<1x2x128xf32> to vector<2x128xf32>
    %79 = vector.shape_cast %76 : vector<2x128xf32> to vector<1x2x128xf32>
    tpu.vector_store %arg27[%c2, %c0_21, %c0_22], %79 {strides = array<i32>} : memref<8x2x128xf32, #tpu.memory_space<vmem>>, vector<1x2x128xf32>,
    %80 = vector.extract_strided_slice %8 {offsets = [3, 0, 0], sizes = [1, 2, 512], strides = [1, 1, 1]} : vector<8x2x512xf32> to vector<1x2x512xf32>
    %81 = vector.shape_cast %80 : vector<1x2x512xf32> to vector<2x512xf32>
    %cst_23 = arith.constant dense<0.000000e+00> : vector<2x512xf32>
    %82 = tpu.matmul %76, %3, %cst_23 {dimension_numbers = #tpu.dot_dimension_numbers<[1], [0], [0], [1], [0, 0, 1, 1], [], []>} : vector<2x128xf32>, vector<128x512xf32>, vector<2x512xf32> -> vector<2x512xf32>
    %83 = arith.addf %81, %82 : vector<2x512xf32>
    %84 = vector.extract_strided_slice %83 {offsets = [0, 0], sizes = [2, 384], strides = [1, 1]} : vector<2x512xf32> to vector<2x384xf32>
    %85 = arith.negf %84 : vector<2x384xf32>
    %86 = math.exp %85 : vector<2x384xf32>
    %cst_24 = arith.constant 1.000000e+00 : f32
    %87 = vector.broadcast %cst_24 : f32 to vector<2x384xf32>
    %88 = arith.addf %87, %86 : vector<2x384xf32>
    %89 = arith.divf %87, %88 : vector<2x384xf32>
    %90 = vector.extract_strided_slice %83 {offsets = [0, 384], sizes = [2, 128], strides = [1, 1]} : vector<2x512xf32> to vector<2x128xf32>
    %91 = math.tanh %90 : vector<2x128xf32>
    %92 = vector.extract_strided_slice %89 {offsets = [0, 0], sizes = [2, 128], strides = [1, 1]} : vector<2x384xf32> to vector<2x128xf32>
    %93 = vector.extract_strided_slice %89 {offsets = [0, 128], sizes = [2, 128], strides = [1, 1]} : vector<2x384xf32> to vector<2x128xf32>
    %94 = vector.extract_strided_slice %89 {offsets = [0, 256], sizes = [2, 128], strides = [1, 1]} : vector<2x384xf32> to vector<2x128xf32>
    %95 = arith.mulf %93, %74 : vector<2x128xf32>
    %96 = arith.mulf %92, %91 : vector<2x128xf32>
    %97 = arith.addf %95, %96 : vector<2x128xf32>
    %98 = math.tanh %97 : vector<2x128xf32>
    %99 = arith.mulf %94, %98 : vector<2x128xf32>
    %c3 = arith.constant 3 : index
    %c0_25 = arith.constant 0 : index
    %c0_26 = arith.constant 0 : index
    %100 = vector.load %arg27[%c3, %c0_25, %c0_26] : memref<8x2x128xf32, #tpu.memory_space<vmem>>, vector<1x2x128xf32>
    %101 = vector.shape_cast %100 : vector<1x2x128xf32> to vector<2x128xf32>
    %102 = vector.shape_cast %99 : vector<2x128xf32> to vector<1x2x128xf32>
    tpu.vector_store %arg27[%c3, %c0_25, %c0_26], %102 {strides = array<i32>} : memref<8x2x128xf32, #tpu.memory_space<vmem>>, vector<1x2x128xf32>,
    %103 = vector.extract_strided_slice %8 {offsets = [4, 0, 0], sizes = [1, 2, 512], strides = [1, 1, 1]} : vector<8x2x512xf32> to vector<1x2x512xf32>
    %104 = vector.shape_cast %103 : vector<1x2x512xf32> to vector<2x512xf32>
    %cst_27 = arith.constant dense<0.000000e+00> : vector<2x512xf32>
    %105 = tpu.matmul %99, %3, %cst_27 {dimension_numbers = #tpu.dot_dimension_numbers<[1], [0], [0], [1], [0, 0, 1, 1], [], []>} : vector<2x128xf32>, vector<128x512xf32>, vector<2x512xf32> -> vector<2x512xf32>
    %106 = arith.addf %104, %105 : vector<2x512xf32>
    %107 = vector.extract_strided_slice %106 {offsets = [0, 0], sizes = [2, 384], strides = [1, 1]} : vector<2x512xf32> to vector<2x384xf32>
    %108 = arith.negf %107 : vector<2x384xf32>
    %109 = math.exp %108 : vector<2x384xf32>
    %cst_28 = arith.constant 1.000000e+00 : f32
    %110 = vector.broadcast %cst_28 : f32 to vector<2x384xf32>
    %111 = arith.addf %110, %109 : vector<2x384xf32>
    %112 = arith.divf %110, %111 : vector<2x384xf32>
    %113 = vector.extract_strided_slice %106 {offsets = [0, 384], sizes = [2, 128], strides = [1, 1]} : vector<2x512xf32> to vector<2x128xf32>
    %114 = math.tanh %113 : vector<2x128xf32>
    %115 = vector.extract_strided_slice %112 {offsets = [0, 0], sizes = [2, 128], strides = [1, 1]} : vector<2x384xf32> to vector<2x128xf32>
    %116 = vector.extract_strided_slice %112 {offsets = [0, 128], sizes = [2, 128], strides = [1, 1]} : vector<2x384xf32> to vector<2x128xf32>
    %117 = vector.extract_strided_slice %112 {offsets = [0, 256], sizes = [2, 128], strides = [1, 1]} : vector<2x384xf32> to vector<2x128xf32>
    %118 = arith.mulf %116, %97 : vector<2x128xf32>
    %119 = arith.mulf %115, %114 : vector<2x128xf32>
    %120 = arith.addf %118, %119 : vector<2x128xf32>
    %121 = math.tanh %120 : vector<2x128xf32>
    %122 = arith.mulf %117, %121 : vector<2x128xf32>
    %c4 = arith.constant 4 : index
    %c0_29 = arith.constant 0 : index
    %c0_30 = arith.constant 0 : index
    %123 = vector.load %arg27[%c4, %c0_29, %c0_30] : memref<8x2x128xf32, #tpu.memory_space<vmem>>, vector<1x2x128xf32>
    %124 = vector.shape_cast %123 : vector<1x2x128xf32> to vector<2x128xf32>
    %125 = vector.shape_cast %122 : vector<2x128xf32> to vector<1x2x128xf32>
    tpu.vector_store %arg27[%c4, %c0_29, %c0_30], %125 {strides = array<i32>} : memref<8x2x128xf32, #tpu.memory_space<vmem>>, vector<1x2x128xf32>,
    %126 = vector.extract_strided_slice %8 {offsets = [5, 0, 0], sizes = [1, 2, 512], strides = [1, 1, 1]} : vector<8x2x512xf32> to vector<1x2x512xf32>
    %127 = vector.shape_cast %126 : vector<1x2x512xf32> to vector<2x512xf32>
    %cst_31 = arith.constant dense<0.000000e+00> : vector<2x512xf32>
    %128 = tpu.matmul %122, %3, %cst_31 {dimension_numbers = #tpu.dot_dimension_numbers<[1], [0], [0], [1], [0, 0, 1, 1], [], []>} : vector<2x128xf32>, vector<128x512xf32>, vector<2x512xf32> -> vector<2x512xf32>
    %129 = arith.addf %127, %128 : vector<2x512xf32>
    %130 = vector.extract_strided_slice %129 {offsets = [0, 0], sizes = [2, 384], strides = [1, 1]} : vector<2x512xf32> to vector<2x384xf32>
    %131 = arith.negf %130 : vector<2x384xf32>
    %132 = math.exp %131 : vector<2x384xf32>
    %cst_32 = arith.constant 1.000000e+00 : f32
    %133 = vector.broadcast %cst_32 : f32 to vector<2x384xf32>
    %134 = arith.addf %133, %132 : vector<2x384xf32>
    %135 = arith.divf %133, %134 : vector<2x384xf32>
    %136 = vector.extract_strided_slice %129 {offsets = [0, 384], sizes = [2, 128], strides = [1, 1]} : vector<2x512xf32> to vector<2x128xf32>
    %137 = math.tanh %136 : vector<2x128xf32>
    %138 = vector.extract_strided_slice %135 {offsets = [0, 0], sizes = [2, 128], strides = [1, 1]} : vector<2x384xf32> to vector<2x128xf32>
    %139 = vector.extract_strided_slice %135 {offsets = [0, 128], sizes = [2, 128], strides = [1, 1]} : vector<2x384xf32> to vector<2x128xf32>
    %140 = vector.extract_strided_slice %135 {offsets = [0, 256], sizes = [2, 128], strides = [1, 1]} : vector<2x384xf32> to vector<2x128xf32>
    %141 = arith.mulf %139, %120 : vector<2x128xf32>
    %142 = arith.mulf %138, %137 : vector<2x128xf32>
    %143 = arith.addf %141, %142 : vector<2x128xf32>
    %144 = math.tanh %143 : vector<2x128xf32>
    %145 = arith.mulf %140, %144 : vector<2x128xf32>
    %c5 = arith.constant 5 : index
    %c0_33 = arith.constant 0 : index
    %c0_34 = arith.constant 0 : index
    %146 = vector.load %arg27[%c5, %c0_33, %c0_34] : memref<8x2x128xf32, #tpu.memory_space<vmem>>, vector<1x2x128xf32>
    %147 = vector.shape_cast %146 : vector<1x2x128xf32> to vector<2x128xf32>
    %148 = vector.shape_cast %145 : vector<2x128xf32> to vector<1x2x128xf32>
    tpu.vector_store %arg27[%c5, %c0_33, %c0_34], %148 {strides = array<i32>} : memref<8x2x128xf32, #tpu.memory_space<vmem>>, vector<1x2x128xf32>,
    %149 = vector.extract_strided_slice %8 {offsets = [6, 0, 0], sizes = [1, 2, 512], strides = [1, 1, 1]} : vector<8x2x512xf32> to vector<1x2x512xf32>
    %150 = vector.shape_cast %149 : vector<1x2x512xf32> to vector<2x512xf32>
    %cst_35 = arith.constant dense<0.000000e+00> : vector<2x512xf32>
    %151 = tpu.matmul %145, %3, %cst_35 {dimension_numbers = #tpu.dot_dimension_numbers<[1], [0], [0], [1], [0, 0, 1, 1], [], []>} : vector<2x128xf32>, vector<128x512xf32>, vector<2x512xf32> -> vector<2x512xf32>
    %152 = arith.addf %150, %151 : vector<2x512xf32>
    %153 = vector.extract_strided_slice %152 {offsets = [0, 0], sizes = [2, 384], strides = [1, 1]} : vector<2x512xf32> to vector<2x384xf32>
    %154 = arith.negf %153 : vector<2x384xf32>
    %155 = math.exp %154 : vector<2x384xf32>
    %cst_36 = arith.constant 1.000000e+00 : f32
    %156 = vector.broadcast %cst_36 : f32 to vector<2x384xf32>
    %157 = arith.addf %156, %155 : vector<2x384xf32>
    %158 = arith.divf %156, %157 : vector<2x384xf32>
    %159 = vector.extract_strided_slice %152 {offsets = [0, 384], sizes = [2, 128], strides = [1, 1]} : vector<2x512xf32> to vector<2x128xf32>
    %160 = math.tanh %159 : vector<2x128xf32>
    %161 = vector.extract_strided_slice %158 {offsets = [0, 0], sizes = [2, 128], strides = [1, 1]} : vector<2x384xf32> to vector<2x128xf32>
    %162 = vector.extract_strided_slice %158 {offsets = [0, 128], sizes = [2, 128], strides = [1, 1]} : vector<2x384xf32> to vector<2x128xf32>
    %163 = vector.extract_strided_slice %158 {offsets = [0, 256], sizes = [2, 128], strides = [1, 1]} : vector<2x384xf32> to vector<2x128xf32>
    %164 = arith.mulf %162, %143 : vector<2x128xf32>
    %165 = arith.mulf %161, %160 : vector<2x128xf32>
    %166 = arith.addf %164, %165 : vector<2x128xf32>
    %167 = math.tanh %166 : vector<2x128xf32>
    %168 = arith.mulf %163, %167 : vector<2x128xf32>
    %c6 = arith.constant 6 : index
    %c0_37 = arith.constant 0 : index
    %c0_38 = arith.constant 0 : index
    %169 = vector.load %arg27[%c6, %c0_37, %c0_38] : memref<8x2x128xf32, #tpu.memory_space<vmem>>, vector<1x2x128xf32>
    %170 = vector.shape_cast %169 : vector<1x2x128xf32> to vector<2x128xf32>
    %171 = vector.shape_cast %168 : vector<2x128xf32> to vector<1x2x128xf32>
    tpu.vector_store %arg27[%c6, %c0_37, %c0_38], %171 {strides = array<i32>} : memref<8x2x128xf32, #tpu.memory_space<vmem>>, vector<1x2x128xf32>,
    %172 = vector.extract_strided_slice %8 {offsets = [7, 0, 0], sizes = [1, 2, 512], strides = [1, 1, 1]} : vector<8x2x512xf32> to vector<1x2x512xf32>
    %173 = vector.shape_cast %172 : vector<1x2x512xf32> to vector<2x512xf32>
    %cst_39 = arith.constant dense<0.000000e+00> : vector<2x512xf32>
    %174 = tpu.matmul %168, %3, %cst_39 {dimension_numbers = #tpu.dot_dimension_numbers<[1], [0], [0], [1], [0, 0, 1, 1], [], []>} : vector<2x128xf32>, vector<128x512xf32>, vector<2x512xf32> -> vector<2x512xf32>
    %175 = arith.addf %173, %174 : vector<2x512xf32>
    %176 = vector.extract_strided_slice %175 {offsets = [0, 0], sizes = [2, 384], strides = [1, 1]} : vector<2x512xf32> to vector<2x384xf32>
    %177 = arith.negf %176 : vector<2x384xf32>
    %178 = math.exp %177 : vector<2x384xf32>
    %cst_40 = arith.constant 1.000000e+00 : f32
    %179 = vector.broadcast %cst_40 : f32 to vector<2x384xf32>
    %180 = arith.addf %179, %178 : vector<2x384xf32>
    %181 = arith.divf %179, %180 : vector<2x384xf32>
    %182 = vector.extract_strided_slice %175 {offsets = [0, 384], sizes = [2, 128], strides = [1, 1]} : vector<2x512xf32> to vector<2x128xf32>
    %183 = math.tanh %182 : vector<2x128xf32>
    %184 = vector.extract_strided_slice %181 {offsets = [0, 0], sizes = [2, 128], strides = [1, 1]} : vector<2x384xf32> to vector<2x128xf32>
    %185 = vector.extract_strided_slice %181 {offsets = [0, 128], sizes = [2, 128], strides = [1, 1]} : vector<2x384xf32> to vector<2x128xf32>
    %186 = vector.extract_strided_slice %181 {offsets = [0, 256], sizes = [2, 128], strides = [1, 1]} : vector<2x384xf32> to vector<2x128xf32>
    %187 = arith.mulf %185, %166 : vector<2x128xf32>
    %188 = arith.mulf %184, %183 : vector<2x128xf32>
    %189 = arith.addf %187, %188 : vector<2x128xf32>
    %190 = math.tanh %189 : vector<2x128xf32>
    %191 = arith.mulf %186, %190 : vector<2x128xf32>
    %c7 = arith.constant 7 : index
    %c0_41 = arith.constant 0 : index
    %c0_42 = arith.constant 0 : index
    %192 = vector.load %arg27[%c7, %c0_41, %c0_42] : memref<8x2x128xf32, #tpu.memory_space<vmem>>, vector<1x2x128xf32>
    %193 = vector.shape_cast %192 : vector<1x2x128xf32> to vector<2x128xf32>
    %194 = vector.shape_cast %191 : vector<2x128xf32> to vector<1x2x128xf32>
    tpu.vector_store %arg27[%c7, %c0_41, %c0_42], %194 {strides = array<i32>} : memref<8x2x128xf32, #tpu.memory_space<vmem>>, vector<1x2x128xf32>,
    %c0_43 = arith.constant 0 : index
    %c0_44 = arith.constant 0 : index
    %c0_45 = arith.constant 0 : index
    %195 = vector.load %arg27[%c0_43, %c0_44, %c0_45] : memref<8x2x128xf32, #tpu.memory_space<vmem>>, vector<8x2x128xf32>
    %196 = vector.shape_cast %195 : vector<8x2x128xf32> to vector<16x128xf32>
    %c0_46 = arith.constant 0 : index
    %c0_47 = arith.constant 0 : index
    %197 = vector.load %arg4[%c0_46, %c0_47] : memref<128x256xf32, #tpu.memory_space<vmem>>, vector<128x256xf32>
    %c0_48 = arith.constant 0 : index
    %c0_49 = arith.constant 0 : index
    %198 = vector.load %arg5[%c0_48, %c0_49] : memref<64x256xf32, #tpu.memory_space<vmem>>, vector<64x256xf32>
    %c0_50 = arith.constant 0 : index
    %c0_51 = arith.constant 0 : index
    %199 = vector.load %arg6[%c0_50, %c0_51] : memref<1x256xf32, #tpu.memory_space<vmem>>, vector<1x256xf32>
    %cst_52 = arith.constant dense<0.000000e+00> : vector<16x256xf32>
    %200 = tpu.matmul %196, %197, %cst_52 {dimension_numbers = #tpu.dot_dimension_numbers<[1], [0], [0], [1], [0, 0, 1, 1], [], []>} : vector<16x128xf32>, vector<128x256xf32>, vector<16x256xf32> -> vector<16x256xf32>
    %201 = vector.broadcast %199 : vector<1x256xf32> to vector<16x256xf32>
    %202 = arith.addf %200, %201 : vector<16x256xf32>
    %203 = vector.shape_cast %202 : vector<16x256xf32> to vector<8x2x256xf32>
    %c0_53 = arith.constant 0 : index
    %c0_54 = arith.constant 0 : index
    %204 = vector.load %arg7[%c0_53, %c0_54] : memref<128x64xf32, #tpu.memory_space<vmem>>, vector<128x64xf32>
    %c0_55 = arith.constant 0 : index
    %c0_56 = arith.constant 0 : index
    %205 = vector.load %arg8[%c0_55, %c0_56] : memref<1x64xf32, #tpu.memory_space<vmem>>, vector<1x64xf32>
    %cst_57 = arith.constant dense<0.000000e+00> : vector<16x64xf32>
    %206 = tpu.matmul %196, %204, %cst_57 {dimension_numbers = #tpu.dot_dimension_numbers<[1], [0], [0], [1], [0, 0, 1, 1], [], []>} : vector<16x128xf32>, vector<128x64xf32>, vector<16x64xf32> -> vector<16x64xf32>
    %207 = vector.broadcast %205 : vector<1x64xf32> to vector<16x64xf32>
    %208 = arith.addf %206, %207 : vector<16x64xf32>
    %209 = arith.negf %208 : vector<16x64xf32>
    %210 = math.exp %209 : vector<16x64xf32>
    %cst_58 = arith.constant 1.000000e+00 : f32
    %211 = vector.broadcast %cst_58 : f32 to vector<16x64xf32>
    %212 = arith.addf %211, %210 : vector<16x64xf32>
    %213 = arith.divf %211, %212 : vector<16x64xf32>
    %214 = arith.mulf %213, %208 : vector<16x64xf32>
    %215 = vector.shape_cast %214 : vector<16x64xf32> to vector<8x2x64xf32>
    %cst_59 = arith.constant 0.000000e+00 : f32
    %216 = vector.broadcast %cst_59 : f32 to vector<2x64xf32>
    %cst_60 = arith.constant 0.000000e+00 : f32
    %217 = vector.broadcast %cst_60 : f32 to vector<2x64xf32>
    %218 = vector.extract_strided_slice %203 {offsets = [0, 0, 0], sizes = [1, 2, 256], strides = [1, 1, 1]} : vector<8x2x256xf32> to vector<1x2x256xf32>
    %219 = vector.shape_cast %218 : vector<1x2x256xf32> to vector<2x256xf32>
    %cst_61 = arith.constant dense<0.000000e+00> : vector<2x256xf32>
    %220 = tpu.matmul %216, %198, %cst_61 {dimension_numbers = #tpu.dot_dimension_numbers<[1], [0], [0], [1], [0, 0, 1, 1], [], []>} : vector<2x64xf32>, vector<64x256xf32>, vector<2x256xf32> -> vector<2x256xf32>
    %221 = arith.addf %219, %220 : vector<2x256xf32>
    %222 = vector.extract_strided_slice %221 {offsets = [0, 0], sizes = [2, 192], strides = [1, 1]} : vector<2x256xf32> to vector<2x192xf32>
    %223 = arith.negf %222 : vector<2x192xf32>
    %224 = math.exp %223 : vector<2x192xf32>
    %cst_62 = arith.constant 1.000000e+00 : f32
    %225 = vector.broadcast %cst_62 : f32 to vector<2x192xf32>
    %226 = arith.addf %225, %224 : vector<2x192xf32>
    %227 = arith.divf %225, %226 : vector<2x192xf32>
    %228 = vector.extract_strided_slice %221 {offsets = [0, 192], sizes = [2, 64], strides = [1, 1]} : vector<2x256xf32> to vector<2x64xf32>
    %229 = math.tanh %228 : vector<2x64xf32>
    %230 = vector.extract_strided_slice %227 {offsets = [0, 0], sizes = [2, 64], strides = [1, 1]} : vector<2x192xf32> to vector<2x64xf32>
    %231 = vector.extract_strided_slice %227 {offsets = [0, 64], sizes = [2, 64], strides = [1, 1]} : vector<2x192xf32> to vector<2x64xf32>
    %232 = vector.extract_strided_slice %227 {offsets = [0, 128], sizes = [2, 64], strides = [1, 1]} : vector<2x192xf32> to vector<2x64xf32>
    %233 = arith.mulf %231, %217 : vector<2x64xf32>
    %234 = arith.mulf %230, %229 : vector<2x64xf32>
    %235 = arith.addf %233, %234 : vector<2x64xf32>
    %236 = math.tanh %235 : vector<2x64xf32>
    %237 = arith.mulf %232, %236 : vector<2x64xf32>
    %238 = vector.extract_strided_slice %215 {offsets = [0, 0, 0], sizes = [1, 2, 64], strides = [1, 1, 1]} : vector<8x2x64xf32> to vector<1x2x64xf32>
    %239 = vector.shape_cast %238 : vector<1x2x64xf32> to vector<2x64xf32>
    %240 = arith.addf %237, %239 : vector<2x64xf32>
    %c0_63 = arith.constant 0 : index
    %c0_64 = arith.constant 0 : index
    %c0_65 = arith.constant 0 : index
    %241 = vector.load %arg28[%c0_63, %c0_64, %c0_65] : memref<8x2x64xf32, #tpu.memory_space<vmem>>, vector<1x2x64xf32>
    %242 = vector.shape_cast %241 : vector<1x2x64xf32> to vector<2x64xf32>
    %243 = vector.shape_cast %240 : vector<2x64xf32> to vector<1x2x64xf32>
    tpu.vector_store %arg28[%c0_63, %c0_64, %c0_65], %243 {strides = array<i32>} : memref<8x2x64xf32, #tpu.memory_space<vmem>>, vector<1x2x64xf32>,
    %244 = vector.extract_strided_slice %203 {offsets = [1, 0, 0], sizes = [1, 2, 256], strides = [1, 1, 1]} : vector<8x2x256xf32> to vector<1x2x256xf32>
    %245 = vector.shape_cast %244 : vector<1x2x256xf32> to vector<2x256xf32>
    %cst_66 = arith.constant dense<0.000000e+00> : vector<2x256xf32>
    %246 = tpu.matmul %237, %198, %cst_66 {dimension_numbers = #tpu.dot_dimension_numbers<[1], [0], [0], [1], [0, 0, 1, 1], [], []>} : vector<2x64xf32>, vector<64x256xf32>, vector<2x256xf32> -> vector<2x256xf32>
    %247 = arith.addf %245, %246 : vector<2x256xf32>
    %248 = vector.extract_strided_slice %247 {offsets = [0, 0], sizes = [2, 192], strides = [1, 1]} : vector<2x256xf32> to vector<2x192xf32>
    %249 = arith.negf %248 : vector<2x192xf32>
    %250 = math.exp %249 : vector<2x192xf32>
    %cst_67 = arith.constant 1.000000e+00 : f32
    %251 = vector.broadcast %cst_67 : f32 to vector<2x192xf32>
    %252 = arith.addf %251, %250 : vector<2x192xf32>
    %253 = arith.divf %251, %252 : vector<2x192xf32>
    %254 = vector.extract_strided_slice %247 {offsets = [0, 192], sizes = [2, 64], strides = [1, 1]} : vector<2x256xf32> to vector<2x64xf32>
    %255 = math.tanh %254 : vector<2x64xf32>
    %256 = vector.extract_strided_slice %253 {offsets = [0, 0], sizes = [2, 64], strides = [1, 1]} : vector<2x192xf32> to vector<2x64xf32>
    %257 = vector.extract_strided_slice %253 {offsets = [0, 64], sizes = [2, 64], strides = [1, 1]} : vector<2x192xf32> to vector<2x64xf32>
    %258 = vector.extract_strided_slice %253 {offsets = [0, 128], sizes = [2, 64], strides = [1, 1]} : vector<2x192xf32> to vector<2x64xf32>
    %259 = arith.mulf %257, %235 : vector<2x64xf32>
    %260 = arith.mulf %256, %255 : vector<2x64xf32>
    %261 = arith.addf %259, %260 : vector<2x64xf32>
    %262 = math.tanh %261 : vector<2x64xf32>
    %263 = arith.mulf %258, %262 : vector<2x64xf32>
    %264 = vector.extract_strided_slice %215 {offsets = [1, 0, 0], sizes = [1, 2, 64], strides = [1, 1, 1]} : vector<8x2x64xf32> to vector<1x2x64xf32>
    %265 = vector.shape_cast %264 : vector<1x2x64xf32> to vector<2x64xf32>
    %266 = arith.addf %263, %265 : vector<2x64xf32>
    %c1_68 = arith.constant 1 : index
    %c0_69 = arith.constant 0 : index
    %c0_70 = arith.constant 0 : index
    %267 = vector.load %arg28[%c1_68, %c0_69, %c0_70] : memref<8x2x64xf32, #tpu.memory_space<vmem>>, vector<1x2x64xf32>
    %268 = vector.shape_cast %267 : vector<1x2x64xf32> to vector<2x64xf32>
    %269 = vector.shape_cast %266 : vector<2x64xf32> to vector<1x2x64xf32>
    tpu.vector_store %arg28[%c1_68, %c0_69, %c0_70], %269 {strides = array<i32>} : memref<8x2x64xf32, #tpu.memory_space<vmem>>, vector<1x2x64xf32>,
    %270 = vector.extract_strided_slice %203 {offsets = [2, 0, 0], sizes = [1, 2, 256], strides = [1, 1, 1]} : vector<8x2x256xf32> to vector<1x2x256xf32>
    %271 = vector.shape_cast %270 : vector<1x2x256xf32> to vector<2x256xf32>
    %cst_71 = arith.constant dense<0.000000e+00> : vector<2x256xf32>
    %272 = tpu.matmul %263, %198, %cst_71 {dimension_numbers = #tpu.dot_dimension_numbers<[1], [0], [0], [1], [0, 0, 1, 1], [], []>} : vector<2x64xf32>, vector<64x256xf32>, vector<2x256xf32> -> vector<2x256xf32>
    %273 = arith.addf %271, %272 : vector<2x256xf32>
    %274 = vector.extract_strided_slice %273 {offsets = [0, 0], sizes = [2, 192], strides = [1, 1]} : vector<2x256xf32> to vector<2x192xf32>
    %275 = arith.negf %274 : vector<2x192xf32>
    %276 = math.exp %275 : vector<2x192xf32>
    %cst_72 = arith.constant 1.000000e+00 : f32
    %277 = vector.broadcast %cst_72 : f32 to vector<2x192xf32>
    %278 = arith.addf %277, %276 : vector<2x192xf32>
    %279 = arith.divf %277, %278 : vector<2x192xf32>
    %280 = vector.extract_strided_slice %273 {offsets = [0, 192], sizes = [2, 64], strides = [1, 1]} : vector<2x256xf32> to vector<2x64xf32>
    %281 = math.tanh %280 : vector<2x64xf32>
    %282 = vector.extract_strided_slice %279 {offsets = [0, 0], sizes = [2, 64], strides = [1, 1]} : vector<2x192xf32> to vector<2x64xf32>
    %283 = vector.extract_strided_slice %279 {offsets = [0, 64], sizes = [2, 64], strides = [1, 1]} : vector<2x192xf32> to vector<2x64xf32>
    %284 = vector.extract_strided_slice %279 {offsets = [0, 128], sizes = [2, 64], strides = [1, 1]} : vector<2x192xf32> to vector<2x64xf32>
    %285 = arith.mulf %283, %261 : vector<2x64xf32>
    %286 = arith.mulf %282, %281 : vector<2x64xf32>
    %287 = arith.addf %285, %286 : vector<2x64xf32>
    %288 = math.tanh %287 : vector<2x64xf32>
    %289 = arith.mulf %284, %288 : vector<2x64xf32>
    %290 = vector.extract_strided_slice %215 {offsets = [2, 0, 0], sizes = [1, 2, 64], strides = [1, 1, 1]} : vector<8x2x64xf32> to vector<1x2x64xf32>
    %291 = vector.shape_cast %290 : vector<1x2x64xf32> to vector<2x64xf32>
    %292 = arith.addf %289, %291 : vector<2x64xf32>
    %c2_73 = arith.constant 2 : index
    %c0_74 = arith.constant 0 : index
    %c0_75 = arith.constant 0 : index
    %293 = vector.load %arg28[%c2_73, %c0_74, %c0_75] : memref<8x2x64xf32, #tpu.memory_space<vmem>>, vector<1x2x64xf32>
    %294 = vector.shape_cast %293 : vector<1x2x64xf32> to vector<2x64xf32>
    %295 = vector.shape_cast %292 : vector<2x64xf32> to vector<1x2x64xf32>
    tpu.vector_store %arg28[%c2_73, %c0_74, %c0_75], %295 {strides = array<i32>} : memref<8x2x64xf32, #tpu.memory_space<vmem>>, vector<1x2x64xf32>,
    %296 = vector.extract_strided_slice %203 {offsets = [3, 0, 0], sizes = [1, 2, 256], strides = [1, 1, 1]} : vector<8x2x256xf32> to vector<1x2x256xf32>
    %297 = vector.shape_cast %296 : vector<1x2x256xf32> to vector<2x256xf32>
    %cst_76 = arith.constant dense<0.000000e+00> : vector<2x256xf32>
    %298 = tpu.matmul %289, %198, %cst_76 {dimension_numbers = #tpu.dot_dimension_numbers<[1], [0], [0], [1], [0, 0, 1, 1], [], []>} : vector<2x64xf32>, vector<64x256xf32>, vector<2x256xf32> -> vector<2x256xf32>
    %299 = arith.addf %297, %298 : vector<2x256xf32>
    %300 = vector.extract_strided_slice %299 {offsets = [0, 0], sizes = [2, 192], strides = [1, 1]} : vector<2x256xf32> to vector<2x192xf32>
    %301 = arith.negf %300 : vector<2x192xf32>
    %302 = math.exp %301 : vector<2x192xf32>
    %cst_77 = arith.constant 1.000000e+00 : f32
    %303 = vector.broadcast %cst_77 : f32 to vector<2x192xf32>
    %304 = arith.addf %303, %302 : vector<2x192xf32>
    %305 = arith.divf %303, %304 : vector<2x192xf32>
    %306 = vector.extract_strided_slice %299 {offsets = [0, 192], sizes = [2, 64], strides = [1, 1]} : vector<2x256xf32> to vector<2x64xf32>
    %307 = math.tanh %306 : vector<2x64xf32>
    %308 = vector.extract_strided_slice %305 {offsets = [0, 0], sizes = [2, 64], strides = [1, 1]} : vector<2x192xf32> to vector<2x64xf32>
    %309 = vector.extract_strided_slice %305 {offsets = [0, 64], sizes = [2, 64], strides = [1, 1]} : vector<2x192xf32> to vector<2x64xf32>
    %310 = vector.extract_strided_slice %305 {offsets = [0, 128], sizes = [2, 64], strides = [1, 1]} : vector<2x192xf32> to vector<2x64xf32>
    %311 = arith.mulf %309, %287 : vector<2x64xf32>
    %312 = arith.mulf %308, %307 : vector<2x64xf32>
    %313 = arith.addf %311, %312 : vector<2x64xf32>
    %314 = math.tanh %313 : vector<2x64xf32>
    %315 = arith.mulf %310, %314 : vector<2x64xf32>
    %316 = vector.extract_strided_slice %215 {offsets = [3, 0, 0], sizes = [1, 2, 64], strides = [1, 1, 1]} : vector<8x2x64xf32> to vector<1x2x64xf32>
    %317 = vector.shape_cast %316 : vector<1x2x64xf32> to vector<2x64xf32>
    %318 = arith.addf %315, %317 : vector<2x64xf32>
    %c3_78 = arith.constant 3 : index
    %c0_79 = arith.constant 0 : index
    %c0_80 = arith.constant 0 : index
    %319 = vector.load %arg28[%c3_78, %c0_79, %c0_80] : memref<8x2x64xf32, #tpu.memory_space<vmem>>, vector<1x2x64xf32>
    %320 = vector.shape_cast %319 : vector<1x2x64xf32> to vector<2x64xf32>
    %321 = vector.shape_cast %318 : vector<2x64xf32> to vector<1x2x64xf32>
    tpu.vector_store %arg28[%c3_78, %c0_79, %c0_80], %321 {strides = array<i32>} : memref<8x2x64xf32, #tpu.memory_space<vmem>>, vector<1x2x64xf32>,
    %322 = vector.extract_strided_slice %203 {offsets = [4, 0, 0], sizes = [1, 2, 256], strides = [1, 1, 1]} : vector<8x2x256xf32> to vector<1x2x256xf32>
    %323 = vector.shape_cast %322 : vector<1x2x256xf32> to vector<2x256xf32>
    %cst_81 = arith.constant dense<0.000000e+00> : vector<2x256xf32>
    %324 = tpu.matmul %315, %198, %cst_81 {dimension_numbers = #tpu.dot_dimension_numbers<[1], [0], [0], [1], [0, 0, 1, 1], [], []>} : vector<2x64xf32>, vector<64x256xf32>, vector<2x256xf32> -> vector<2x256xf32>
    %325 = arith.addf %323, %324 : vector<2x256xf32>
    %326 = vector.extract_strided_slice %325 {offsets = [0, 0], sizes = [2, 192], strides = [1, 1]} : vector<2x256xf32> to vector<2x192xf32>
    %327 = arith.negf %326 : vector<2x192xf32>
    %328 = math.exp %327 : vector<2x192xf32>
    %cst_82 = arith.constant 1.000000e+00 : f32
    %329 = vector.broadcast %cst_82 : f32 to vector<2x192xf32>
    %330 = arith.addf %329, %328 : vector<2x192xf32>
    %331 = arith.divf %329, %330 : vector<2x192xf32>
    %332 = vector.extract_strided_slice %325 {offsets = [0, 192], sizes = [2, 64], strides = [1, 1]} : vector<2x256xf32> to vector<2x64xf32>
    %333 = math.tanh %332 : vector<2x64xf32>
    %334 = vector.extract_strided_slice %331 {offsets = [0, 0], sizes = [2, 64], strides = [1, 1]} : vector<2x192xf32> to vector<2x64xf32>
    %335 = vector.extract_strided_slice %331 {offsets = [0, 64], sizes = [2, 64], strides = [1, 1]} : vector<2x192xf32> to vector<2x64xf32>
    %336 = vector.extract_strided_slice %331 {offsets = [0, 128], sizes = [2, 64], strides = [1, 1]} : vector<2x192xf32> to vector<2x64xf32>
    %337 = arith.mulf %335, %313 : vector<2x64xf32>
    %338 = arith.mulf %334, %333 : vector<2x64xf32>
    %339 = arith.addf %337, %338 : vector<2x64xf32>
    %340 = math.tanh %339 : vector<2x64xf32>
    %341 = arith.mulf %336, %340 : vector<2x64xf32>
    %342 = vector.extract_strided_slice %215 {offsets = [4, 0, 0], sizes = [1, 2, 64], strides = [1, 1, 1]} : vector<8x2x64xf32> to vector<1x2x64xf32>
    %343 = vector.shape_cast %342 : vector<1x2x64xf32> to vector<2x64xf32>
    %344 = arith.addf %341, %343 : vector<2x64xf32>
    %c4_83 = arith.constant 4 : index
    %c0_84 = arith.constant 0 : index
    %c0_85 = arith.constant 0 : index
    %345 = vector.load %arg28[%c4_83, %c0_84, %c0_85] : memref<8x2x64xf32, #tpu.memory_space<vmem>>, vector<1x2x64xf32>
    %346 = vector.shape_cast %345 : vector<1x2x64xf32> to vector<2x64xf32>
    %347 = vector.shape_cast %344 : vector<2x64xf32> to vector<1x2x64xf32>
    tpu.vector_store %arg28[%c4_83, %c0_84, %c0_85], %347 {strides = array<i32>} : memref<8x2x64xf32, #tpu.memory_space<vmem>>, vector<1x2x64xf32>,
    %348 = vector.extract_strided_slice %203 {offsets = [5, 0, 0], sizes = [1, 2, 256], strides = [1, 1, 1]} : vector<8x2x256xf32> to vector<1x2x256xf32>
    %349 = vector.shape_cast %348 : vector<1x2x256xf32> to vector<2x256xf32>
    %cst_86 = arith.constant dense<0.000000e+00> : vector<2x256xf32>
    %350 = tpu.matmul %341, %198, %cst_86 {dimension_numbers = #tpu.dot_dimension_numbers<[1], [0], [0], [1], [0, 0, 1, 1], [], []>} : vector<2x64xf32>, vector<64x256xf32>, vector<2x256xf32> -> vector<2x256xf32>
    %351 = arith.addf %349, %350 : vector<2x256xf32>
    %352 = vector.extract_strided_slice %351 {offsets = [0, 0], sizes = [2, 192], strides = [1, 1]} : vector<2x256xf32> to vector<2x192xf32>
    %353 = arith.negf %352 : vector<2x192xf32>
    %354 = math.exp %353 : vector<2x192xf32>
    %cst_87 = arith.constant 1.000000e+00 : f32
    %355 = vector.broadcast %cst_87 : f32 to vector<2x192xf32>
    %356 = arith.addf %355, %354 : vector<2x192xf32>
    %357 = arith.divf %355, %356 : vector<2x192xf32>
    %358 = vector.extract_strided_slice %351 {offsets = [0, 192], sizes = [2, 64], strides = [1, 1]} : vector<2x256xf32> to vector<2x64xf32>
    %359 = math.tanh %358 : vector<2x64xf32>
    %360 = vector.extract_strided_slice %357 {offsets = [0, 0], sizes = [2, 64], strides = [1, 1]} : vector<2x192xf32> to vector<2x64xf32>
    %361 = vector.extract_strided_slice %357 {offsets = [0, 64], sizes = [2, 64], strides = [1, 1]} : vector<2x192xf32> to vector<2x64xf32>
    %362 = vector.extract_strided_slice %357 {offsets = [0, 128], sizes = [2, 64], strides = [1, 1]} : vector<2x192xf32> to vector<2x64xf32>
    %363 = arith.mulf %361, %339 : vector<2x64xf32>
    %364 = arith.mulf %360, %359 : vector<2x64xf32>
    %365 = arith.addf %363, %364 : vector<2x64xf32>
    %366 = math.tanh %365 : vector<2x64xf32>
    %367 = arith.mulf %362, %366 : vector<2x64xf32>
    %368 = vector.extract_strided_slice %215 {offsets = [5, 0, 0], sizes = [1, 2, 64], strides = [1, 1, 1]} : vector<8x2x64xf32> to vector<1x2x64xf32>
    %369 = vector.shape_cast %368 : vector<1x2x64xf32> to vector<2x64xf32>
    %370 = arith.addf %367, %369 : vector<2x64xf32>
    %c5_88 = arith.constant 5 : index
    %c0_89 = arith.constant 0 : index
    %c0_90 = arith.constant 0 : index
    %371 = vector.load %arg28[%c5_88, %c0_89, %c0_90] : memref<8x2x64xf32, #tpu.memory_space<vmem>>, vector<1x2x64xf32>
    %372 = vector.shape_cast %371 : vector<1x2x64xf32> to vector<2x64xf32>
    %373 = vector.shape_cast %370 : vector<2x64xf32> to vector<1x2x64xf32>
    tpu.vector_store %arg28[%c5_88, %c0_89, %c0_90], %373 {strides = array<i32>} : memref<8x2x64xf32, #tpu.memory_space<vmem>>, vector<1x2x64xf32>,
    %374 = vector.extract_strided_slice %203 {offsets = [6, 0, 0], sizes = [1, 2, 256], strides = [1, 1, 1]} : vector<8x2x256xf32> to vector<1x2x256xf32>
    %375 = vector.shape_cast %374 : vector<1x2x256xf32> to vector<2x256xf32>
    %cst_91 = arith.constant dense<0.000000e+00> : vector<2x256xf32>
    %376 = tpu.matmul %367, %198, %cst_91 {dimension_numbers = #tpu.dot_dimension_numbers<[1], [0], [0], [1], [0, 0, 1, 1], [], []>} : vector<2x64xf32>, vector<64x256xf32>, vector<2x256xf32> -> vector<2x256xf32>
    %377 = arith.addf %375, %376 : vector<2x256xf32>
    %378 = vector.extract_strided_slice %377 {offsets = [0, 0], sizes = [2, 192], strides = [1, 1]} : vector<2x256xf32> to vector<2x192xf32>
    %379 = arith.negf %378 : vector<2x192xf32>
    %380 = math.exp %379 : vector<2x192xf32>
    %cst_92 = arith.constant 1.000000e+00 : f32
    %381 = vector.broadcast %cst_92 : f32 to vector<2x192xf32>
    %382 = arith.addf %381, %380 : vector<2x192xf32>
    %383 = arith.divf %381, %382 : vector<2x192xf32>
    %384 = vector.extract_strided_slice %377 {offsets = [0, 192], sizes = [2, 64], strides = [1, 1]} : vector<2x256xf32> to vector<2x64xf32>
    %385 = math.tanh %384 : vector<2x64xf32>
    %386 = vector.extract_strided_slice %383 {offsets = [0, 0], sizes = [2, 64], strides = [1, 1]} : vector<2x192xf32> to vector<2x64xf32>
    %387 = vector.extract_strided_slice %383 {offsets = [0, 64], sizes = [2, 64], strides = [1, 1]} : vector<2x192xf32> to vector<2x64xf32>
    %388 = vector.extract_strided_slice %383 {offsets = [0, 128], sizes = [2, 64], strides = [1, 1]} : vector<2x192xf32> to vector<2x64xf32>
    %389 = arith.mulf %387, %365 : vector<2x64xf32>
    %390 = arith.mulf %386, %385 : vector<2x64xf32>
    %391 = arith.addf %389, %390 : vector<2x64xf32>
    %392 = math.tanh %391 : vector<2x64xf32>
    %393 = arith.mulf %388, %392 : vector<2x64xf32>
    %394 = vector.extract_strided_slice %215 {offsets = [6, 0, 0], sizes = [1, 2, 64], strides = [1, 1, 1]} : vector<8x2x64xf32> to vector<1x2x64xf32>
    %395 = vector.shape_cast %394 : vector<1x2x64xf32> to vector<2x64xf32>
    %396 = arith.addf %393, %395 : vector<2x64xf32>
    %c6_93 = arith.constant 6 : index
    %c0_94 = arith.constant 0 : index
    %c0_95 = arith.constant 0 : index
    %397 = vector.load %arg28[%c6_93, %c0_94, %c0_95] : memref<8x2x64xf32, #tpu.memory_space<vmem>>, vector<1x2x64xf32>
    %398 = vector.shape_cast %397 : vector<1x2x64xf32> to vector<2x64xf32>
    %399 = vector.shape_cast %396 : vector<2x64xf32> to vector<1x2x64xf32>
    tpu.vector_store %arg28[%c6_93, %c0_94, %c0_95], %399 {strides = array<i32>} : memref<8x2x64xf32, #tpu.memory_space<vmem>>, vector<1x2x64xf32>,
    %400 = vector.extract_strided_slice %203 {offsets = [7, 0, 0], sizes = [1, 2, 256], strides = [1, 1, 1]} : vector<8x2x256xf32> to vector<1x2x256xf32>
    %401 = vector.shape_cast %400 : vector<1x2x256xf32> to vector<2x256xf32>
    %cst_96 = arith.constant dense<0.000000e+00> : vector<2x256xf32>
    %402 = tpu.matmul %393, %198, %cst_96 {dimension_numbers = #tpu.dot_dimension_numbers<[1], [0], [0], [1], [0, 0, 1, 1], [], []>} : vector<2x64xf32>, vector<64x256xf32>, vector<2x256xf32> -> vector<2x256xf32>
    %403 = arith.addf %401, %402 : vector<2x256xf32>
    %404 = vector.extract_strided_slice %403 {offsets = [0, 0], sizes = [2, 192], strides = [1, 1]} : vector<2x256xf32> to vector<2x192xf32>
    %405 = arith.negf %404 : vector<2x192xf32>
    %406 = math.exp %405 : vector<2x192xf32>
    %cst_97 = arith.constant 1.000000e+00 : f32
    %407 = vector.broadcast %cst_97 : f32 to vector<2x192xf32>
    %408 = arith.addf %407, %406 : vector<2x192xf32>
    %409 = arith.divf %407, %408 : vector<2x192xf32>
    %410 = vector.extract_strided_slice %403 {offsets = [0, 192], sizes = [2, 64], strides = [1, 1]} : vector<2x256xf32> to vector<2x64xf32>
    %411 = math.tanh %410 : vector<2x64xf32>
    %412 = vector.extract_strided_slice %409 {offsets = [0, 0], sizes = [2, 64], strides = [1, 1]} : vector<2x192xf32> to vector<2x64xf32>
    %413 = vector.extract_strided_slice %409 {offsets = [0, 64], sizes = [2, 64], strides = [1, 1]} : vector<2x192xf32> to vector<2x64xf32>
    %414 = vector.extract_strided_slice %409 {offsets = [0, 128], sizes = [2, 64], strides = [1, 1]} : vector<2x192xf32> to vector<2x64xf32>
    %415 = arith.mulf %413, %391 : vector<2x64xf32>
    %416 = arith.mulf %412, %411 : vector<2x64xf32>
    %417 = arith.addf %415, %416 : vector<2x64xf32>
    %418 = math.tanh %417 : vector<2x64xf32>
    %419 = arith.mulf %414, %418 : vector<2x64xf32>
    %420 = vector.extract_strided_slice %215 {offsets = [7, 0, 0], sizes = [1, 2, 64], strides = [1, 1, 1]} : vector<8x2x64xf32> to vector<1x2x64xf32>
    %421 = vector.shape_cast %420 : vector<1x2x64xf32> to vector<2x64xf32>
    %422 = arith.addf %419, %421 : vector<2x64xf32>
    %c7_98 = arith.constant 7 : index
    %c0_99 = arith.constant 0 : index
    %c0_100 = arith.constant 0 : index
    %423 = vector.load %arg28[%c7_98, %c0_99, %c0_100] : memref<8x2x64xf32, #tpu.memory_space<vmem>>, vector<1x2x64xf32>
    %424 = vector.shape_cast %423 : vector<1x2x64xf32> to vector<2x64xf32>
    %425 = vector.shape_cast %422 : vector<2x64xf32> to vector<1x2x64xf32>
    tpu.vector_store %arg28[%c7_98, %c0_99, %c0_100], %425 {strides = array<i32>} : memref<8x2x64xf32, #tpu.memory_space<vmem>>, vector<1x2x64xf32>,
    %c0_101 = arith.constant 0 : index
    %c0_102 = arith.constant 0 : index
    %c0_103 = arith.constant 0 : index
    %426 = vector.load %arg28[%c0_101, %c0_102, %c0_103] : memref<8x2x64xf32, #tpu.memory_space<vmem>>, vector<8x2x64xf32>
    %427 = vector.shape_cast %426 : vector<8x2x64xf32> to vector<16x64xf32>
    %c0_104 = arith.constant 0 : index
    %c0_105 = arith.constant 0 : index
    %428 = vector.load %arg9[%c0_104, %c0_105] : memref<64x128xf32, #tpu.memory_space<vmem>>, vector<64x128xf32>
    %c0_106 = arith.constant 0 : index
    %c0_107 = arith.constant 0 : index
    %429 = vector.load %arg10[%c0_106, %c0_107] : memref<32x128xf32, #tpu.memory_space<vmem>>, vector<32x128xf32>
    %c0_108 = arith.constant 0 : index
    %c0_109 = arith.constant 0 : index
    %430 = vector.load %arg11[%c0_108, %c0_109] : memref<1x128xf32, #tpu.memory_space<vmem>>, vector<1x128xf32>
    %cst_110 = arith.constant dense<0.000000e+00> : vector<16x128xf32>
    %431 = tpu.matmul %427, %428, %cst_110 {dimension_numbers = #tpu.dot_dimension_numbers<[1], [0], [0], [1], [0, 0, 1, 1], [], []>} : vector<16x64xf32>, vector<64x128xf32>, vector<16x128xf32> -> vector<16x128xf32>
    %432 = vector.broadcast %430 : vector<1x128xf32> to vector<16x128xf32>
    %433 = arith.addf %431, %432 : vector<16x128xf32>
    %434 = vector.shape_cast %433 : vector<16x128xf32> to vector<8x2x128xf32>
    %c0_111 = arith.constant 0 : index
    %c0_112 = arith.constant 0 : index
    %435 = vector.load %arg12[%c0_111, %c0_112] : memref<64x32xf32, #tpu.memory_space<vmem>>, vector<64x32xf32>
    %c0_113 = arith.constant 0 : index
    %c0_114 = arith.constant 0 : index
    %436 = vector.load %arg13[%c0_113, %c0_114] : memref<1x32xf32, #tpu.memory_space<vmem>>, vector<1x32xf32>
    %cst_115 = arith.constant dense<0.000000e+00> : vector<16x32xf32>
    %437 = tpu.matmul %427, %435, %cst_115 {dimension_numbers = #tpu.dot_dimension_numbers<[1], [0], [0], [1], [0, 0, 1, 1], [], []>} : vector<16x64xf32>, vector<64x32xf32>, vector<16x32xf32> -> vector<16x32xf32>
    %438 = vector.broadcast %436 : vector<1x32xf32> to vector<16x32xf32>
    %439 = arith.addf %437, %438 : vector<16x32xf32>
    %440 = arith.negf %439 : vector<16x32xf32>
    %441 = math.exp %440 : vector<16x32xf32>
    %cst_116 = arith.constant 1.000000e+00 : f32
    %442 = vector.broadcast %cst_116 : f32 to vector<16x32xf32>
    %443 = arith.addf %442, %441 : vector<16x32xf32>
    %444 = arith.divf %442, %443 : vector<16x32xf32>
    %445 = arith.mulf %444, %439 : vector<16x32xf32>
    %446 = vector.shape_cast %445 : vector<16x32xf32> to vector<8x2x32xf32>
    %cst_117 = arith.constant 0.000000e+00 : f32
    %447 = vector.broadcast %cst_117 : f32 to vector<2x32xf32>
    %cst_118 = arith.constant 0.000000e+00 : f32
    %448 = vector.broadcast %cst_118 : f32 to vector<2x32xf32>
    %449 = vector.extract_strided_slice %434 {offsets = [0, 0, 0], sizes = [1, 2, 128], strides = [1, 1, 1]} : vector<8x2x128xf32> to vector<1x2x128xf32>
    %450 = vector.shape_cast %449 : vector<1x2x128xf32> to vector<2x128xf32>
    %cst_119 = arith.constant dense<0.000000e+00> : vector<2x128xf32>
    %451 = tpu.matmul %447, %429, %cst_119 {dimension_numbers = #tpu.dot_dimension_numbers<[1], [0], [0], [1], [0, 0, 1, 1], [], []>} : vector<2x32xf32>, vector<32x128xf32>, vector<2x128xf32> -> vector<2x128xf32>
    %452 = arith.addf %450, %451 : vector<2x128xf32>
    %453 = vector.extract_strided_slice %452 {offsets = [0, 0], sizes = [2, 96], strides = [1, 1]} : vector<2x128xf32> to vector<2x96xf32>
    %454 = arith.negf %453 : vector<2x96xf32>
    %455 = math.exp %454 : vector<2x96xf32>
    %cst_120 = arith.constant 1.000000e+00 : f32
    %456 = vector.broadcast %cst_120 : f32 to vector<2x96xf32>
    %457 = arith.addf %456, %455 : vector<2x96xf32>
    %458 = arith.divf %456, %457 : vector<2x96xf32>
    %459 = vector.extract_strided_slice %452 {offsets = [0, 96], sizes = [2, 32], strides = [1, 1]} : vector<2x128xf32> to vector<2x32xf32>
    %460 = math.tanh %459 : vector<2x32xf32>
    %461 = vector.extract_strided_slice %458 {offsets = [0, 0], sizes = [2, 32], strides = [1, 1]} : vector<2x96xf32> to vector<2x32xf32>
    %462 = vector.extract_strided_slice %458 {offsets = [0, 32], sizes = [2, 32], strides = [1, 1]} : vector<2x96xf32> to vector<2x32xf32>
    %463 = vector.extract_strided_slice %458 {offsets = [0, 64], sizes = [2, 32], strides = [1, 1]} : vector<2x96xf32> to vector<2x32xf32>
    %464 = arith.mulf %462, %448 : vector<2x32xf32>
    %465 = arith.mulf %461, %460 : vector<2x32xf32>
    %466 = arith.addf %464, %465 : vector<2x32xf32>
    %467 = math.tanh %466 : vector<2x32xf32>
    %468 = arith.mulf %463, %467 : vector<2x32xf32>
    %469 = vector.extract_strided_slice %446 {offsets = [0, 0, 0], sizes = [1, 2, 32], strides = [1, 1, 1]} : vector<8x2x32xf32> to vector<1x2x32xf32>
    %470 = vector.shape_cast %469 : vector<1x2x32xf32> to vector<2x32xf32>
    %471 = arith.addf %468, %470 : vector<2x32xf32>
    %c0_121 = arith.constant 0 : index
    %c0_122 = arith.constant 0 : index
    %c0_123 = arith.constant 0 : index
    %472 = vector.load %arg29[%c0_121, %c0_122, %c0_123] : memref<8x2x32xf32, #tpu.memory_space<vmem>>, vector<1x2x32xf32>
    %473 = vector.shape_cast %472 : vector<1x2x32xf32> to vector<2x32xf32>
    %474 = vector.shape_cast %471 : vector<2x32xf32> to vector<1x2x32xf32>
    tpu.vector_store %arg29[%c0_121, %c0_122, %c0_123], %474 {strides = array<i32>} : memref<8x2x32xf32, #tpu.memory_space<vmem>>, vector<1x2x32xf32>,
    %475 = vector.extract_strided_slice %434 {offsets = [1, 0, 0], sizes = [1, 2, 128], strides = [1, 1, 1]} : vector<8x2x128xf32> to vector<1x2x128xf32>
    %476 = vector.shape_cast %475 : vector<1x2x128xf32> to vector<2x128xf32>
    %cst_124 = arith.constant dense<0.000000e+00> : vector<2x128xf32>
    %477 = tpu.matmul %468, %429, %cst_124 {dimension_numbers = #tpu.dot_dimension_numbers<[1], [0], [0], [1], [0, 0, 1, 1], [], []>} : vector<2x32xf32>, vector<32x128xf32>, vector<2x128xf32> -> vector<2x128xf32>
    %478 = arith.addf %476, %477 : vector<2x128xf32>
    %479 = vector.extract_strided_slice %478 {offsets = [0, 0], sizes = [2, 96], strides = [1, 1]} : vector<2x128xf32> to vector<2x96xf32>
    %480 = arith.negf %479 : vector<2x96xf32>
    %481 = math.exp %480 : vector<2x96xf32>
    %cst_125 = arith.constant 1.000000e+00 : f32
    %482 = vector.broadcast %cst_125 : f32 to vector<2x96xf32>
    %483 = arith.addf %482, %481 : vector<2x96xf32>
    %484 = arith.divf %482, %483 : vector<2x96xf32>
    %485 = vector.extract_strided_slice %478 {offsets = [0, 96], sizes = [2, 32], strides = [1, 1]} : vector<2x128xf32> to vector<2x32xf32>
    %486 = math.tanh %485 : vector<2x32xf32>
    %487 = vector.extract_strided_slice %484 {offsets = [0, 0], sizes = [2, 32], strides = [1, 1]} : vector<2x96xf32> to vector<2x32xf32>
    %488 = vector.extract_strided_slice %484 {offsets = [0, 32], sizes = [2, 32], strides = [1, 1]} : vector<2x96xf32> to vector<2x32xf32>
    %489 = vector.extract_strided_slice %484 {offsets = [0, 64], sizes = [2, 32], strides = [1, 1]} : vector<2x96xf32> to vector<2x32xf32>
    %490 = arith.mulf %488, %466 : vector<2x32xf32>
    %491 = arith.mulf %487, %486 : vector<2x32xf32>
    %492 = arith.addf %490, %491 : vector<2x32xf32>
    %493 = math.tanh %492 : vector<2x32xf32>
    %494 = arith.mulf %489, %493 : vector<2x32xf32>
    %495 = vector.extract_strided_slice %446 {offsets = [1, 0, 0], sizes = [1, 2, 32], strides = [1, 1, 1]} : vector<8x2x32xf32> to vector<1x2x32xf32>
    %496 = vector.shape_cast %495 : vector<1x2x32xf32> to vector<2x32xf32>
    %497 = arith.addf %494, %496 : vector<2x32xf32>
    %c1_126 = arith.constant 1 : index
    %c0_127 = arith.constant 0 : index
    %c0_128 = arith.constant 0 : index
    %498 = vector.load %arg29[%c1_126, %c0_127, %c0_128] : memref<8x2x32xf32, #tpu.memory_space<vmem>>, vector<1x2x32xf32>
    %499 = vector.shape_cast %498 : vector<1x2x32xf32> to vector<2x32xf32>
    %500 = vector.shape_cast %497 : vector<2x32xf32> to vector<1x2x32xf32>
    tpu.vector_store %arg29[%c1_126, %c0_127, %c0_128], %500 {strides = array<i32>} : memref<8x2x32xf32, #tpu.memory_space<vmem>>, vector<1x2x32xf32>,
    %501 = vector.extract_strided_slice %434 {offsets = [2, 0, 0], sizes = [1, 2, 128], strides = [1, 1, 1]} : vector<8x2x128xf32> to vector<1x2x128xf32>
    %502 = vector.shape_cast %501 : vector<1x2x128xf32> to vector<2x128xf32>
    %cst_129 = arith.constant dense<0.000000e+00> : vector<2x128xf32>
    %503 = tpu.matmul %494, %429, %cst_129 {dimension_numbers = #tpu.dot_dimension_numbers<[1], [0], [0], [1], [0, 0, 1, 1], [], []>} : vector<2x32xf32>, vector<32x128xf32>, vector<2x128xf32> -> vector<2x128xf32>
    %504 = arith.addf %502, %503 : vector<2x128xf32>
    %505 = vector.extract_strided_slice %504 {offsets = [0, 0], sizes = [2, 96], strides = [1, 1]} : vector<2x128xf32> to vector<2x96xf32>
    %506 = arith.negf %505 : vector<2x96xf32>
    %507 = math.exp %506 : vector<2x96xf32>
    %cst_130 = arith.constant 1.000000e+00 : f32
    %508 = vector.broadcast %cst_130 : f32 to vector<2x96xf32>
    %509 = arith.addf %508, %507 : vector<2x96xf32>
    %510 = arith.divf %508, %509 : vector<2x96xf32>
    %511 = vector.extract_strided_slice %504 {offsets = [0, 96], sizes = [2, 32], strides = [1, 1]} : vector<2x128xf32> to vector<2x32xf32>
    %512 = math.tanh %511 : vector<2x32xf32>
    %513 = vector.extract_strided_slice %510 {offsets = [0, 0], sizes = [2, 32], strides = [1, 1]} : vector<2x96xf32> to vector<2x32xf32>
    %514 = vector.extract_strided_slice %510 {offsets = [0, 32], sizes = [2, 32], strides = [1, 1]} : vector<2x96xf32> to vector<2x32xf32>
    %515 = vector.extract_strided_slice %510 {offsets = [0, 64], sizes = [2, 32], strides = [1, 1]} : vector<2x96xf32> to vector<2x32xf32>
    %516 = arith.mulf %514, %492 : vector<2x32xf32>
    %517 = arith.mulf %513, %512 : vector<2x32xf32>
    %518 = arith.addf %516, %517 : vector<2x32xf32>
    %519 = math.tanh %518 : vector<2x32xf32>
    %520 = arith.mulf %515, %519 : vector<2x32xf32>
    %521 = vector.extract_strided_slice %446 {offsets = [2, 0, 0], sizes = [1, 2, 32], strides = [1, 1, 1]} : vector<8x2x32xf32> to vector<1x2x32xf32>
    %522 = vector.shape_cast %521 : vector<1x2x32xf32> to vector<2x32xf32>
    %523 = arith.addf %520, %522 : vector<2x32xf32>
    %c2_131 = arith.constant 2 : index
    %c0_132 = arith.constant 0 : index
    %c0_133 = arith.constant 0 : index
    %524 = vector.load %arg29[%c2_131, %c0_132, %c0_133] : memref<8x2x32xf32, #tpu.memory_space<vmem>>, vector<1x2x32xf32>
    %525 = vector.shape_cast %524 : vector<1x2x32xf32> to vector<2x32xf32>
    %526 = vector.shape_cast %523 : vector<2x32xf32> to vector<1x2x32xf32>
    tpu.vector_store %arg29[%c2_131, %c0_132, %c0_133], %526 {strides = array<i32>} : memref<8x2x32xf32, #tpu.memory_space<vmem>>, vector<1x2x32xf32>,
    %527 = vector.extract_strided_slice %434 {offsets = [3, 0, 0], sizes = [1, 2, 128], strides = [1, 1, 1]} : vector<8x2x128xf32> to vector<1x2x128xf32>
    %528 = vector.shape_cast %527 : vector<1x2x128xf32> to vector<2x128xf32>
    %cst_134 = arith.constant dense<0.000000e+00> : vector<2x128xf32>
    %529 = tpu.matmul %520, %429, %cst_134 {dimension_numbers = #tpu.dot_dimension_numbers<[1], [0], [0], [1], [0, 0, 1, 1], [], []>} : vector<2x32xf32>, vector<32x128xf32>, vector<2x128xf32> -> vector<2x128xf32>
    %530 = arith.addf %528, %529 : vector<2x128xf32>
    %531 = vector.extract_strided_slice %530 {offsets = [0, 0], sizes = [2, 96], strides = [1, 1]} : vector<2x128xf32> to vector<2x96xf32>
    %532 = arith.negf %531 : vector<2x96xf32>
    %533 = math.exp %532 : vector<2x96xf32>
    %cst_135 = arith.constant 1.000000e+00 : f32
    %534 = vector.broadcast %cst_135 : f32 to vector<2x96xf32>
    %535 = arith.addf %534, %533 : vector<2x96xf32>
    %536 = arith.divf %534, %535 : vector<2x96xf32>
    %537 = vector.extract_strided_slice %530 {offsets = [0, 96], sizes = [2, 32], strides = [1, 1]} : vector<2x128xf32> to vector<2x32xf32>
    %538 = math.tanh %537 : vector<2x32xf32>
    %539 = vector.extract_strided_slice %536 {offsets = [0, 0], sizes = [2, 32], strides = [1, 1]} : vector<2x96xf32> to vector<2x32xf32>
    %540 = vector.extract_strided_slice %536 {offsets = [0, 32], sizes = [2, 32], strides = [1, 1]} : vector<2x96xf32> to vector<2x32xf32>
    %541 = vector.extract_strided_slice %536 {offsets = [0, 64], sizes = [2, 32], strides = [1, 1]} : vector<2x96xf32> to vector<2x32xf32>
    %542 = arith.mulf %540, %518 : vector<2x32xf32>
    %543 = arith.mulf %539, %538 : vector<2x32xf32>
    %544 = arith.addf %542, %543 : vector<2x32xf32>
    %545 = math.tanh %544 : vector<2x32xf32>
    %546 = arith.mulf %541, %545 : vector<2x32xf32>
    %547 = vector.extract_strided_slice %446 {offsets = [3, 0, 0], sizes = [1, 2, 32], strides = [1, 1, 1]} : vector<8x2x32xf32> to vector<1x2x32xf32>
    %548 = vector.shape_cast %547 : vector<1x2x32xf32> to vector<2x32xf32>
    %549 = arith.addf %546, %548 : vector<2x32xf32>
    %c3_136 = arith.constant 3 : index
    %c0_137 = arith.constant 0 : index
    %c0_138 = arith.constant 0 : index
    %550 = vector.load %arg29[%c3_136, %c0_137, %c0_138] : memref<8x2x32xf32, #tpu.memory_space<vmem>>, vector<1x2x32xf32>
    %551 = vector.shape_cast %550 : vector<1x2x32xf32> to vector<2x32xf32>
    %552 = vector.shape_cast %549 : vector<2x32xf32> to vector<1x2x32xf32>
    tpu.vector_store %arg29[%c3_136, %c0_137, %c0_138], %552 {strides = array<i32>} : memref<8x2x32xf32, #tpu.memory_space<vmem>>, vector<1x2x32xf32>,
    %553 = vector.extract_strided_slice %434 {offsets = [4, 0, 0], sizes = [1, 2, 128], strides = [1, 1, 1]} : vector<8x2x128xf32> to vector<1x2x128xf32>
    %554 = vector.shape_cast %553 : vector<1x2x128xf32> to vector<2x128xf32>
    %cst_139 = arith.constant dense<0.000000e+00> : vector<2x128xf32>
    %555 = tpu.matmul %546, %429, %cst_139 {dimension_numbers = #tpu.dot_dimension_numbers<[1], [0], [0], [1], [0, 0, 1, 1], [], []>} : vector<2x32xf32>, vector<32x128xf32>, vector<2x128xf32> -> vector<2x128xf32>
    %556 = arith.addf %554, %555 : vector<2x128xf32>
    %557 = vector.extract_strided_slice %556 {offsets = [0, 0], sizes = [2, 96], strides = [1, 1]} : vector<2x128xf32> to vector<2x96xf32>
    %558 = arith.negf %557 : vector<2x96xf32>
    %559 = math.exp %558 : vector<2x96xf32>
    %cst_140 = arith.constant 1.000000e+00 : f32
    %560 = vector.broadcast %cst_140 : f32 to vector<2x96xf32>
    %561 = arith.addf %560, %559 : vector<2x96xf32>
    %562 = arith.divf %560, %561 : vector<2x96xf32>
    %563 = vector.extract_strided_slice %556 {offsets = [0, 96], sizes = [2, 32], strides = [1, 1]} : vector<2x128xf32> to vector<2x32xf32>
    %564 = math.tanh %563 : vector<2x32xf32>
    %565 = vector.extract_strided_slice %562 {offsets = [0, 0], sizes = [2, 32], strides = [1, 1]} : vector<2x96xf32> to vector<2x32xf32>
    %566 = vector.extract_strided_slice %562 {offsets = [0, 32], sizes = [2, 32], strides = [1, 1]} : vector<2x96xf32> to vector<2x32xf32>
    %567 = vector.extract_strided_slice %562 {offsets = [0, 64], sizes = [2, 32], strides = [1, 1]} : vector<2x96xf32> to vector<2x32xf32>
    %568 = arith.mulf %566, %544 : vector<2x32xf32>
    %569 = arith.mulf %565, %564 : vector<2x32xf32>
    %570 = arith.addf %568, %569 : vector<2x32xf32>
    %571 = math.tanh %570 : vector<2x32xf32>
    %572 = arith.mulf %567, %571 : vector<2x32xf32>
    %573 = vector.extract_strided_slice %446 {offsets = [4, 0, 0], sizes = [1, 2, 32], strides = [1, 1, 1]} : vector<8x2x32xf32> to vector<1x2x32xf32>
    %574 = vector.shape_cast %573 : vector<1x2x32xf32> to vector<2x32xf32>
    %575 = arith.addf %572, %574 : vector<2x32xf32>
    %c4_141 = arith.constant 4 : index
    %c0_142 = arith.constant 0 : index
    %c0_143 = arith.constant 0 : index
    %576 = vector.load %arg29[%c4_141, %c0_142, %c0_143] : memref<8x2x32xf32, #tpu.memory_space<vmem>>, vector<1x2x32xf32>
    %577 = vector.shape_cast %576 : vector<1x2x32xf32> to vector<2x32xf32>
    %578 = vector.shape_cast %575 : vector<2x32xf32> to vector<1x2x32xf32>
    tpu.vector_store %arg29[%c4_141, %c0_142, %c0_143], %578 {strides = array<i32>} : memref<8x2x32xf32, #tpu.memory_space<vmem>>, vector<1x2x32xf32>,
    %579 = vector.extract_strided_slice %434 {offsets = [5, 0, 0], sizes = [1, 2, 128], strides = [1, 1, 1]} : vector<8x2x128xf32> to vector<1x2x128xf32>
    %580 = vector.shape_cast %579 : vector<1x2x128xf32> to vector<2x128xf32>
    %cst_144 = arith.constant dense<0.000000e+00> : vector<2x128xf32>
    %581 = tpu.matmul %572, %429, %cst_144 {dimension_numbers = #tpu.dot_dimension_numbers<[1], [0], [0], [1], [0, 0, 1, 1], [], []>} : vector<2x32xf32>, vector<32x128xf32>, vector<2x128xf32> -> vector<2x128xf32>
    %582 = arith.addf %580, %581 : vector<2x128xf32>
    %583 = vector.extract_strided_slice %582 {offsets = [0, 0], sizes = [2, 96], strides = [1, 1]} : vector<2x128xf32> to vector<2x96xf32>
    %584 = arith.negf %583 : vector<2x96xf32>
    %585 = math.exp %584 : vector<2x96xf32>
    %cst_145 = arith.constant 1.000000e+00 : f32
    %586 = vector.broadcast %cst_145 : f32 to vector<2x96xf32>
    %587 = arith.addf %586, %585 : vector<2x96xf32>
    %588 = arith.divf %586, %587 : vector<2x96xf32>
    %589 = vector.extract_strided_slice %582 {offsets = [0, 96], sizes = [2, 32], strides = [1, 1]} : vector<2x128xf32> to vector<2x32xf32>
    %590 = math.tanh %589 : vector<2x32xf32>
    %591 = vector.extract_strided_slice %588 {offsets = [0, 0], sizes = [2, 32], strides = [1, 1]} : vector<2x96xf32> to vector<2x32xf32>
    %592 = vector.extract_strided_slice %588 {offsets = [0, 32], sizes = [2, 32], strides = [1, 1]} : vector<2x96xf32> to vector<2x32xf32>
    %593 = vector.extract_strided_slice %588 {offsets = [0, 64], sizes = [2, 32], strides = [1, 1]} : vector<2x96xf32> to vector<2x32xf32>
    %594 = arith.mulf %592, %570 : vector<2x32xf32>
    %595 = arith.mulf %591, %590 : vector<2x32xf32>
    %596 = arith.addf %594, %595 : vector<2x32xf32>
    %597 = math.tanh %596 : vector<2x32xf32>
    %598 = arith.mulf %593, %597 : vector<2x32xf32>
    %599 = vector.extract_strided_slice %446 {offsets = [5, 0, 0], sizes = [1, 2, 32], strides = [1, 1, 1]} : vector<8x2x32xf32> to vector<1x2x32xf32>
    %600 = vector.shape_cast %599 : vector<1x2x32xf32> to vector<2x32xf32>
    %601 = arith.addf %598, %600 : vector<2x32xf32>
    %c5_146 = arith.constant 5 : index
    %c0_147 = arith.constant 0 : index
    %c0_148 = arith.constant 0 : index
    %602 = vector.load %arg29[%c5_146, %c0_147, %c0_148] : memref<8x2x32xf32, #tpu.memory_space<vmem>>, vector<1x2x32xf32>
    %603 = vector.shape_cast %602 : vector<1x2x32xf32> to vector<2x32xf32>
    %604 = vector.shape_cast %601 : vector<2x32xf32> to vector<1x2x32xf32>
    tpu.vector_store %arg29[%c5_146, %c0_147, %c0_148], %604 {strides = array<i32>} : memref<8x2x32xf32, #tpu.memory_space<vmem>>, vector<1x2x32xf32>,
    %605 = vector.extract_strided_slice %434 {offsets = [6, 0, 0], sizes = [1, 2, 128], strides = [1, 1, 1]} : vector<8x2x128xf32> to vector<1x2x128xf32>
    %606 = vector.shape_cast %605 : vector<1x2x128xf32> to vector<2x128xf32>
    %cst_149 = arith.constant dense<0.000000e+00> : vector<2x128xf32>
    %607 = tpu.matmul %598, %429, %cst_149 {dimension_numbers = #tpu.dot_dimension_numbers<[1], [0], [0], [1], [0, 0, 1, 1], [], []>} : vector<2x32xf32>, vector<32x128xf32>, vector<2x128xf32> -> vector<2x128xf32>
    %608 = arith.addf %606, %607 : vector<2x128xf32>
    %609 = vector.extract_strided_slice %608 {offsets = [0, 0], sizes = [2, 96], strides = [1, 1]} : vector<2x128xf32> to vector<2x96xf32>
    %610 = arith.negf %609 : vector<2x96xf32>
    %611 = math.exp %610 : vector<2x96xf32>
    %cst_150 = arith.constant 1.000000e+00 : f32
    %612 = vector.broadcast %cst_150 : f32 to vector<2x96xf32>
    %613 = arith.addf %612, %611 : vector<2x96xf32>
    %614 = arith.divf %612, %613 : vector<2x96xf32>
    %615 = vector.extract_strided_slice %608 {offsets = [0, 96], sizes = [2, 32], strides = [1, 1]} : vector<2x128xf32> to vector<2x32xf32>
    %616 = math.tanh %615 : vector<2x32xf32>
    %617 = vector.extract_strided_slice %614 {offsets = [0, 0], sizes = [2, 32], strides = [1, 1]} : vector<2x96xf32> to vector<2x32xf32>
    %618 = vector.extract_strided_slice %614 {offsets = [0, 32], sizes = [2, 32], strides = [1, 1]} : vector<2x96xf32> to vector<2x32xf32>
    %619 = vector.extract_strided_slice %614 {offsets = [0, 64], sizes = [2, 32], strides = [1, 1]} : vector<2x96xf32> to vector<2x32xf32>
    %620 = arith.mulf %618, %596 : vector<2x32xf32>
    %621 = arith.mulf %617, %616 : vector<2x32xf32>
    %622 = arith.addf %620, %621 : vector<2x32xf32>
    %623 = math.tanh %622 : vector<2x32xf32>
    %624 = arith.mulf %619, %623 : vector<2x32xf32>
    %625 = vector.extract_strided_slice %446 {offsets = [6, 0, 0], sizes = [1, 2, 32], strides = [1, 1, 1]} : vector<8x2x32xf32> to vector<1x2x32xf32>
    %626 = vector.shape_cast %625 : vector<1x2x32xf32> to vector<2x32xf32>
    %627 = arith.addf %624, %626 : vector<2x32xf32>
    %c6_151 = arith.constant 6 : index
    %c0_152 = arith.constant 0 : index
    %c0_153 = arith.constant 0 : index
    %628 = vector.load %arg29[%c6_151, %c0_152, %c0_153] : memref<8x2x32xf32, #tpu.memory_space<vmem>>, vector<1x2x32xf32>
    %629 = vector.shape_cast %628 : vector<1x2x32xf32> to vector<2x32xf32>
    %630 = vector.shape_cast %627 : vector<2x32xf32> to vector<1x2x32xf32>
    tpu.vector_store %arg29[%c6_151, %c0_152, %c0_153], %630 {strides = array<i32>} : memref<8x2x32xf32, #tpu.memory_space<vmem>>, vector<1x2x32xf32>,
    %631 = vector.extract_strided_slice %434 {offsets = [7, 0, 0], sizes = [1, 2, 128], strides = [1, 1, 1]} : vector<8x2x128xf32> to vector<1x2x128xf32>
    %632 = vector.shape_cast %631 : vector<1x2x128xf32> to vector<2x128xf32>
    %cst_154 = arith.constant dense<0.000000e+00> : vector<2x128xf32>
    %633 = tpu.matmul %624, %429, %cst_154 {dimension_numbers = #tpu.dot_dimension_numbers<[1], [0], [0], [1], [0, 0, 1, 1], [], []>} : vector<2x32xf32>, vector<32x128xf32>, vector<2x128xf32> -> vector<2x128xf32>
    %634 = arith.addf %632, %633 : vector<2x128xf32>
    %635 = vector.extract_strided_slice %634 {offsets = [0, 0], sizes = [2, 96], strides = [1, 1]} : vector<2x128xf32> to vector<2x96xf32>
    %636 = arith.negf %635 : vector<2x96xf32>
    %637 = math.exp %636 : vector<2x96xf32>
    %cst_155 = arith.constant 1.000000e+00 : f32
    %638 = vector.broadcast %cst_155 : f32 to vector<2x96xf32>
    %639 = arith.addf %638, %637 : vector<2x96xf32>
    %640 = arith.divf %638, %639 : vector<2x96xf32>
    %641 = vector.extract_strided_slice %634 {offsets = [0, 96], sizes = [2, 32], strides = [1, 1]} : vector<2x128xf32> to vector<2x32xf32>
    %642 = math.tanh %641 : vector<2x32xf32>
    %643 = vector.extract_strided_slice %640 {offsets = [0, 0], sizes = [2, 32], strides = [1, 1]} : vector<2x96xf32> to vector<2x32xf32>
    %644 = vector.extract_strided_slice %640 {offsets = [0, 32], sizes = [2, 32], strides = [1, 1]} : vector<2x96xf32> to vector<2x32xf32>
    %645 = vector.extract_strided_slice %640 {offsets = [0, 64], sizes = [2, 32], strides = [1, 1]} : vector<2x96xf32> to vector<2x32xf32>
    %646 = arith.mulf %644, %622 : vector<2x32xf32>
    %647 = arith.mulf %643, %642 : vector<2x32xf32>
    %648 = arith.addf %646, %647 : vector<2x32xf32>
    %649 = math.tanh %648 : vector<2x32xf32>
    %650 = arith.mulf %645, %649 : vector<2x32xf32>
    %651 = vector.extract_strided_slice %446 {offsets = [7, 0, 0], sizes = [1, 2, 32], strides = [1, 1, 1]} : vector<8x2x32xf32> to vector<1x2x32xf32>
    %652 = vector.shape_cast %651 : vector<1x2x32xf32> to vector<2x32xf32>
    %653 = arith.addf %650, %652 : vector<2x32xf32>
    %c7_156 = arith.constant 7 : index
    %c0_157 = arith.constant 0 : index
    %c0_158 = arith.constant 0 : index
    %654 = vector.load %arg29[%c7_156, %c0_157, %c0_158] : memref<8x2x32xf32, #tpu.memory_space<vmem>>, vector<1x2x32xf32>
    %655 = vector.shape_cast %654 : vector<1x2x32xf32> to vector<2x32xf32>
    %656 = vector.shape_cast %653 : vector<2x32xf32> to vector<1x2x32xf32>
    tpu.vector_store %arg29[%c7_156, %c0_157, %c0_158], %656 {strides = array<i32>} : memref<8x2x32xf32, #tpu.memory_space<vmem>>, vector<1x2x32xf32>,
    %c0_159 = arith.constant 0 : index
    %c0_160 = arith.constant 0 : index
    %c0_161 = arith.constant 0 : index
    %657 = vector.load %arg29[%c0_159, %c0_160, %c0_161] : memref<8x2x32xf32, #tpu.memory_space<vmem>>, vector<8x2x32xf32>
    %658 = vector.shape_cast %657 : vector<8x2x32xf32> to vector<16x32xf32>
    %c0_162 = arith.constant 0 : index
    %c0_163 = arith.constant 0 : index
    %659 = vector.load %arg14[%c0_162, %c0_163] : memref<32x64xf32, #tpu.memory_space<vmem>>, vector<32x64xf32>
    %c0_164 = arith.constant 0 : index
    %c0_165 = arith.constant 0 : index
    %660 = vector.load %arg15[%c0_164, %c0_165] : memref<16x64xf32, #tpu.memory_space<vmem>>, vector<16x64xf32>
    %c0_166 = arith.constant 0 : index
    %c0_167 = arith.constant 0 : index
    %661 = vector.load %arg16[%c0_166, %c0_167] : memref<1x64xf32, #tpu.memory_space<vmem>>, vector<1x64xf32>
    %cst_168 = arith.constant dense<0.000000e+00> : vector<16x64xf32>
    %662 = tpu.matmul %658, %659, %cst_168 {dimension_numbers = #tpu.dot_dimension_numbers<[1], [0], [0], [1], [0, 0, 1, 1], [], []>} : vector<16x32xf32>, vector<32x64xf32>, vector<16x64xf32> -> vector<16x64xf32>
    %663 = vector.broadcast %661 : vector<1x64xf32> to vector<16x64xf32>
    %664 = arith.addf %662, %663 : vector<16x64xf32>
    %665 = vector.shape_cast %664 : vector<16x64xf32> to vector<8x2x64xf32>
    %c0_169 = arith.constant 0 : index
    %c0_170 = arith.constant 0 : index
    %666 = vector.load %arg17[%c0_169, %c0_170] : memref<32x16xf32, #tpu.memory_space<vmem>>, vector<32x16xf32>
    %c0_171 = arith.constant 0 : index
    %c0_172 = arith.constant 0 : index
    %667 = vector.load %arg18[%c0_171, %c0_172] : memref<1x16xf32, #tpu.memory_space<vmem>>, vector<1x16xf32>
    %cst_173 = arith.constant dense<0.000000e+00> : vector<16x16xf32>
    %668 = tpu.matmul %658, %666, %cst_173 {dimension_numbers = #tpu.dot_dimension_numbers<[1], [0], [0], [1], [0, 0, 1, 1], [], []>} : vector<16x32xf32>, vector<32x16xf32>, vector<16x16xf32> -> vector<16x16xf32>
    %669 = vector.broadcast %667 : vector<1x16xf32> to vector<16x16xf32>
    %670 = arith.addf %668, %669 : vector<16x16xf32>
    %671 = arith.negf %670 : vector<16x16xf32>
    %672 = math.exp %671 : vector<16x16xf32>
    %cst_174 = arith.constant 1.000000e+00 : f32
    %673 = vector.broadcast %cst_174 : f32 to vector<16x16xf32>
    %674 = arith.addf %673, %672 : vector<16x16xf32>
    %675 = arith.divf %673, %674 : vector<16x16xf32>
    %676 = arith.mulf %675, %670 : vector<16x16xf32>
    %677 = vector.shape_cast %676 : vector<16x16xf32> to vector<8x2x16xf32>
    %cst_175 = arith.constant 0.000000e+00 : f32
    %678 = vector.broadcast %cst_175 : f32 to vector<2x16xf32>
    %cst_176 = arith.constant 0.000000e+00 : f32
    %679 = vector.broadcast %cst_176 : f32 to vector<2x16xf32>
    %680 = vector.extract_strided_slice %665 {offsets = [0, 0, 0], sizes = [1, 2, 64], strides = [1, 1, 1]} : vector<8x2x64xf32> to vector<1x2x64xf32>
    %681 = vector.shape_cast %680 : vector<1x2x64xf32> to vector<2x64xf32>
    %cst_177 = arith.constant dense<0.000000e+00> : vector<2x64xf32>
    %682 = tpu.matmul %678, %660, %cst_177 {dimension_numbers = #tpu.dot_dimension_numbers<[1], [0], [0], [1], [0, 0, 1, 1], [], []>} : vector<2x16xf32>, vector<16x64xf32>, vector<2x64xf32> -> vector<2x64xf32>
    %683 = arith.addf %681, %682 : vector<2x64xf32>
    %684 = vector.extract_strided_slice %683 {offsets = [0, 0], sizes = [2, 48], strides = [1, 1]} : vector<2x64xf32> to vector<2x48xf32>
    %685 = arith.negf %684 : vector<2x48xf32>
    %686 = math.exp %685 : vector<2x48xf32>
    %cst_178 = arith.constant 1.000000e+00 : f32
    %687 = vector.broadcast %cst_178 : f32 to vector<2x48xf32>
    %688 = arith.addf %687, %686 : vector<2x48xf32>
    %689 = arith.divf %687, %688 : vector<2x48xf32>
    %690 = vector.extract_strided_slice %683 {offsets = [0, 48], sizes = [2, 16], strides = [1, 1]} : vector<2x64xf32> to vector<2x16xf32>
    %691 = math.tanh %690 : vector<2x16xf32>
    %692 = vector.extract_strided_slice %689 {offsets = [0, 0], sizes = [2, 16], strides = [1, 1]} : vector<2x48xf32> to vector<2x16xf32>
    %693 = vector.extract_strided_slice %689 {offsets = [0, 16], sizes = [2, 16], strides = [1, 1]} : vector<2x48xf32> to vector<2x16xf32>
    %694 = vector.extract_strided_slice %689 {offsets = [0, 32], sizes = [2, 16], strides = [1, 1]} : vector<2x48xf32> to vector<2x16xf32>
    %695 = arith.mulf %693, %679 : vector<2x16xf32>
    %696 = arith.mulf %692, %691 : vector<2x16xf32>
    %697 = arith.addf %695, %696 : vector<2x16xf32>
    %698 = math.tanh %697 : vector<2x16xf32>
    %699 = arith.mulf %694, %698 : vector<2x16xf32>
    %700 = vector.extract_strided_slice %677 {offsets = [0, 0, 0], sizes = [1, 2, 16], strides = [1, 1, 1]} : vector<8x2x16xf32> to vector<1x2x16xf32>
    %701 = vector.shape_cast %700 : vector<1x2x16xf32> to vector<2x16xf32>
    %702 = arith.addf %699, %701 : vector<2x16xf32>
    %c0_179 = arith.constant 0 : index
    %c0_180 = arith.constant 0 : index
    %c0_181 = arith.constant 0 : index
    %703 = vector.load %arg30[%c0_179, %c0_180, %c0_181] : memref<8x2x16xf32, #tpu.memory_space<vmem>>, vector<1x2x16xf32>
    %704 = vector.shape_cast %703 : vector<1x2x16xf32> to vector<2x16xf32>
    %705 = vector.shape_cast %702 : vector<2x16xf32> to vector<1x2x16xf32>
    tpu.vector_store %arg30[%c0_179, %c0_180, %c0_181], %705 {strides = array<i32>} : memref<8x2x16xf32, #tpu.memory_space<vmem>>, vector<1x2x16xf32>,
    %706 = vector.extract_strided_slice %665 {offsets = [1, 0, 0], sizes = [1, 2, 64], strides = [1, 1, 1]} : vector<8x2x64xf32> to vector<1x2x64xf32>
    %707 = vector.shape_cast %706 : vector<1x2x64xf32> to vector<2x64xf32>
    %cst_182 = arith.constant dense<0.000000e+00> : vector<2x64xf32>
    %708 = tpu.matmul %699, %660, %cst_182 {dimension_numbers = #tpu.dot_dimension_numbers<[1], [0], [0], [1], [0, 0, 1, 1], [], []>} : vector<2x16xf32>, vector<16x64xf32>, vector<2x64xf32> -> vector<2x64xf32>
    %709 = arith.addf %707, %708 : vector<2x64xf32>
    %710 = vector.extract_strided_slice %709 {offsets = [0, 0], sizes = [2, 48], strides = [1, 1]} : vector<2x64xf32> to vector<2x48xf32>
    %711 = arith.negf %710 : vector<2x48xf32>
    %712 = math.exp %711 : vector<2x48xf32>
    %cst_183 = arith.constant 1.000000e+00 : f32
    %713 = vector.broadcast %cst_183 : f32 to vector<2x48xf32>
    %714 = arith.addf %713, %712 : vector<2x48xf32>
    %715 = arith.divf %713, %714 : vector<2x48xf32>
    %716 = vector.extract_strided_slice %709 {offsets = [0, 48], sizes = [2, 16], strides = [1, 1]} : vector<2x64xf32> to vector<2x16xf32>
    %717 = math.tanh %716 : vector<2x16xf32>
    %718 = vector.extract_strided_slice %715 {offsets = [0, 0], sizes = [2, 16], strides = [1, 1]} : vector<2x48xf32> to vector<2x16xf32>
    %719 = vector.extract_strided_slice %715 {offsets = [0, 16], sizes = [2, 16], strides = [1, 1]} : vector<2x48xf32> to vector<2x16xf32>
    %720 = vector.extract_strided_slice %715 {offsets = [0, 32], sizes = [2, 16], strides = [1, 1]} : vector<2x48xf32> to vector<2x16xf32>
    %721 = arith.mulf %719, %697 : vector<2x16xf32>
    %722 = arith.mulf %718, %717 : vector<2x16xf32>
    %723 = arith.addf %721, %722 : vector<2x16xf32>
    %724 = math.tanh %723 : vector<2x16xf32>
    %725 = arith.mulf %720, %724 : vector<2x16xf32>
    %726 = vector.extract_strided_slice %677 {offsets = [1, 0, 0], sizes = [1, 2, 16], strides = [1, 1, 1]} : vector<8x2x16xf32> to vector<1x2x16xf32>
    %727 = vector.shape_cast %726 : vector<1x2x16xf32> to vector<2x16xf32>
    %728 = arith.addf %725, %727 : vector<2x16xf32>
    %c1_184 = arith.constant 1 : index
    %c0_185 = arith.constant 0 : index
    %c0_186 = arith.constant 0 : index
    %729 = vector.load %arg30[%c1_184, %c0_185, %c0_186] : memref<8x2x16xf32, #tpu.memory_space<vmem>>, vector<1x2x16xf32>
    %730 = vector.shape_cast %729 : vector<1x2x16xf32> to vector<2x16xf32>
    %731 = vector.shape_cast %728 : vector<2x16xf32> to vector<1x2x16xf32>
    tpu.vector_store %arg30[%c1_184, %c0_185, %c0_186], %731 {strides = array<i32>} : memref<8x2x16xf32, #tpu.memory_space<vmem>>, vector<1x2x16xf32>,
    %732 = vector.extract_strided_slice %665 {offsets = [2, 0, 0], sizes = [1, 2, 64], strides = [1, 1, 1]} : vector<8x2x64xf32> to vector<1x2x64xf32>
    %733 = vector.shape_cast %732 : vector<1x2x64xf32> to vector<2x64xf32>
    %cst_187 = arith.constant dense<0.000000e+00> : vector<2x64xf32>
    %734 = tpu.matmul %725, %660, %cst_187 {dimension_numbers = #tpu.dot_dimension_numbers<[1], [0], [0], [1], [0, 0, 1, 1], [], []>} : vector<2x16xf32>, vector<16x64xf32>, vector<2x64xf32> -> vector<2x64xf32>
    %735 = arith.addf %733, %734 : vector<2x64xf32>
    %736 = vector.extract_strided_slice %735 {offsets = [0, 0], sizes = [2, 48], strides = [1, 1]} : vector<2x64xf32> to vector<2x48xf32>
    %737 = arith.negf %736 : vector<2x48xf32>
    %738 = math.exp %737 : vector<2x48xf32>
    %cst_188 = arith.constant 1.000000e+00 : f32
    %739 = vector.broadcast %cst_188 : f32 to vector<2x48xf32>
    %740 = arith.addf %739, %738 : vector<2x48xf32>
    %741 = arith.divf %739, %740 : vector<2x48xf32>
    %742 = vector.extract_strided_slice %735 {offsets = [0, 48], sizes = [2, 16], strides = [1, 1]} : vector<2x64xf32> to vector<2x16xf32>
    %743 = math.tanh %742 : vector<2x16xf32>
    %744 = vector.extract_strided_slice %741 {offsets = [0, 0], sizes = [2, 16], strides = [1, 1]} : vector<2x48xf32> to vector<2x16xf32>
    %745 = vector.extract_strided_slice %741 {offsets = [0, 16], sizes = [2, 16], strides = [1, 1]} : vector<2x48xf32> to vector<2x16xf32>
    %746 = vector.extract_strided_slice %741 {offsets = [0, 32], sizes = [2, 16], strides = [1, 1]} : vector<2x48xf32> to vector<2x16xf32>
    %747 = arith.mulf %745, %723 : vector<2x16xf32>
    %748 = arith.mulf %744, %743 : vector<2x16xf32>
    %749 = arith.addf %747, %748 : vector<2x16xf32>
    %750 = math.tanh %749 : vector<2x16xf32>
    %751 = arith.mulf %746, %750 : vector<2x16xf32>
    %752 = vector.extract_strided_slice %677 {offsets = [2, 0, 0], sizes = [1, 2, 16], strides = [1, 1, 1]} : vector<8x2x16xf32> to vector<1x2x16xf32>
    %753 = vector.shape_cast %752 : vector<1x2x16xf32> to vector<2x16xf32>
    %754 = arith.addf %751, %753 : vector<2x16xf32>
    %c2_189 = arith.constant 2 : index
    %c0_190 = arith.constant 0 : index
    %c0_191 = arith.constant 0 : index
    %755 = vector.load %arg30[%c2_189, %c0_190, %c0_191] : memref<8x2x16xf32, #tpu.memory_space<vmem>>, vector<1x2x16xf32>
    %756 = vector.shape_cast %755 : vector<1x2x16xf32> to vector<2x16xf32>
    %757 = vector.shape_cast %754 : vector<2x16xf32> to vector<1x2x16xf32>
    tpu.vector_store %arg30[%c2_189, %c0_190, %c0_191], %757 {strides = array<i32>} : memref<8x2x16xf32, #tpu.memory_space<vmem>>, vector<1x2x16xf32>,
    %758 = vector.extract_strided_slice %665 {offsets = [3, 0, 0], sizes = [1, 2, 64], strides = [1, 1, 1]} : vector<8x2x64xf32> to vector<1x2x64xf32>
    %759 = vector.shape_cast %758 : vector<1x2x64xf32> to vector<2x64xf32>
    %cst_192 = arith.constant dense<0.000000e+00> : vector<2x64xf32>
    %760 = tpu.matmul %751, %660, %cst_192 {dimension_numbers = #tpu.dot_dimension_numbers<[1], [0], [0], [1], [0, 0, 1, 1], [], []>} : vector<2x16xf32>, vector<16x64xf32>, vector<2x64xf32> -> vector<2x64xf32>
    %761 = arith.addf %759, %760 : vector<2x64xf32>
    %762 = vector.extract_strided_slice %761 {offsets = [0, 0], sizes = [2, 48], strides = [1, 1]} : vector<2x64xf32> to vector<2x48xf32>
    %763 = arith.negf %762 : vector<2x48xf32>
    %764 = math.exp %763 : vector<2x48xf32>
    %cst_193 = arith.constant 1.000000e+00 : f32
    %765 = vector.broadcast %cst_193 : f32 to vector<2x48xf32>
    %766 = arith.addf %765, %764 : vector<2x48xf32>
    %767 = arith.divf %765, %766 : vector<2x48xf32>
    %768 = vector.extract_strided_slice %761 {offsets = [0, 48], sizes = [2, 16], strides = [1, 1]} : vector<2x64xf32> to vector<2x16xf32>
    %769 = math.tanh %768 : vector<2x16xf32>
    %770 = vector.extract_strided_slice %767 {offsets = [0, 0], sizes = [2, 16], strides = [1, 1]} : vector<2x48xf32> to vector<2x16xf32>
    %771 = vector.extract_strided_slice %767 {offsets = [0, 16], sizes = [2, 16], strides = [1, 1]} : vector<2x48xf32> to vector<2x16xf32>
    %772 = vector.extract_strided_slice %767 {offsets = [0, 32], sizes = [2, 16], strides = [1, 1]} : vector<2x48xf32> to vector<2x16xf32>
    %773 = arith.mulf %771, %749 : vector<2x16xf32>
    %774 = arith.mulf %770, %769 : vector<2x16xf32>
    %775 = arith.addf %773, %774 : vector<2x16xf32>
    %776 = math.tanh %775 : vector<2x16xf32>
    %777 = arith.mulf %772, %776 : vector<2x16xf32>
    %778 = vector.extract_strided_slice %677 {offsets = [3, 0, 0], sizes = [1, 2, 16], strides = [1, 1, 1]} : vector<8x2x16xf32> to vector<1x2x16xf32>
    %779 = vector.shape_cast %778 : vector<1x2x16xf32> to vector<2x16xf32>
    %780 = arith.addf %777, %779 : vector<2x16xf32>
    %c3_194 = arith.constant 3 : index
    %c0_195 = arith.constant 0 : index
    %c0_196 = arith.constant 0 : index
    %781 = vector.load %arg30[%c3_194, %c0_195, %c0_196] : memref<8x2x16xf32, #tpu.memory_space<vmem>>, vector<1x2x16xf32>
    %782 = vector.shape_cast %781 : vector<1x2x16xf32> to vector<2x16xf32>
    %783 = vector.shape_cast %780 : vector<2x16xf32> to vector<1x2x16xf32>
    tpu.vector_store %arg30[%c3_194, %c0_195, %c0_196], %783 {strides = array<i32>} : memref<8x2x16xf32, #tpu.memory_space<vmem>>, vector<1x2x16xf32>,
    %784 = vector.extract_strided_slice %665 {offsets = [4, 0, 0], sizes = [1, 2, 64], strides = [1, 1, 1]} : vector<8x2x64xf32> to vector<1x2x64xf32>
    %785 = vector.shape_cast %784 : vector<1x2x64xf32> to vector<2x64xf32>
    %cst_197 = arith.constant dense<0.000000e+00> : vector<2x64xf32>
    %786 = tpu.matmul %777, %660, %cst_197 {dimension_numbers = #tpu.dot_dimension_numbers<[1], [0], [0], [1], [0, 0, 1, 1], [], []>} : vector<2x16xf32>, vector<16x64xf32>, vector<2x64xf32> -> vector<2x64xf32>
    %787 = arith.addf %785, %786 : vector<2x64xf32>
    %788 = vector.extract_strided_slice %787 {offsets = [0, 0], sizes = [2, 48], strides = [1, 1]} : vector<2x64xf32> to vector<2x48xf32>
    %789 = arith.negf %788 : vector<2x48xf32>
    %790 = math.exp %789 : vector<2x48xf32>
    %cst_198 = arith.constant 1.000000e+00 : f32
    %791 = vector.broadcast %cst_198 : f32 to vector<2x48xf32>
    %792 = arith.addf %791, %790 : vector<2x48xf32>
    %793 = arith.divf %791, %792 : vector<2x48xf32>
    %794 = vector.extract_strided_slice %787 {offsets = [0, 48], sizes = [2, 16], strides = [1, 1]} : vector<2x64xf32> to vector<2x16xf32>
    %795 = math.tanh %794 : vector<2x16xf32>
    %796 = vector.extract_strided_slice %793 {offsets = [0, 0], sizes = [2, 16], strides = [1, 1]} : vector<2x48xf32> to vector<2x16xf32>
    %797 = vector.extract_strided_slice %793 {offsets = [0, 16], sizes = [2, 16], strides = [1, 1]} : vector<2x48xf32> to vector<2x16xf32>
    %798 = vector.extract_strided_slice %793 {offsets = [0, 32], sizes = [2, 16], strides = [1, 1]} : vector<2x48xf32> to vector<2x16xf32>
    %799 = arith.mulf %797, %775 : vector<2x16xf32>
    %800 = arith.mulf %796, %795 : vector<2x16xf32>
    %801 = arith.addf %799, %800 : vector<2x16xf32>
    %802 = math.tanh %801 : vector<2x16xf32>
    %803 = arith.mulf %798, %802 : vector<2x16xf32>
    %804 = vector.extract_strided_slice %677 {offsets = [4, 0, 0], sizes = [1, 2, 16], strides = [1, 1, 1]} : vector<8x2x16xf32> to vector<1x2x16xf32>
    %805 = vector.shape_cast %804 : vector<1x2x16xf32> to vector<2x16xf32>
    %806 = arith.addf %803, %805 : vector<2x16xf32>
    %c4_199 = arith.constant 4 : index
    %c0_200 = arith.constant 0 : index
    %c0_201 = arith.constant 0 : index
    %807 = vector.load %arg30[%c4_199, %c0_200, %c0_201] : memref<8x2x16xf32, #tpu.memory_space<vmem>>, vector<1x2x16xf32>
    %808 = vector.shape_cast %807 : vector<1x2x16xf32> to vector<2x16xf32>
    %809 = vector.shape_cast %806 : vector<2x16xf32> to vector<1x2x16xf32>
    tpu.vector_store %arg30[%c4_199, %c0_200, %c0_201], %809 {strides = array<i32>} : memref<8x2x16xf32, #tpu.memory_space<vmem>>, vector<1x2x16xf32>,
    %810 = vector.extract_strided_slice %665 {offsets = [5, 0, 0], sizes = [1, 2, 64], strides = [1, 1, 1]} : vector<8x2x64xf32> to vector<1x2x64xf32>
    %811 = vector.shape_cast %810 : vector<1x2x64xf32> to vector<2x64xf32>
    %cst_202 = arith.constant dense<0.000000e+00> : vector<2x64xf32>
    %812 = tpu.matmul %803, %660, %cst_202 {dimension_numbers = #tpu.dot_dimension_numbers<[1], [0], [0], [1], [0, 0, 1, 1], [], []>} : vector<2x16xf32>, vector<16x64xf32>, vector<2x64xf32> -> vector<2x64xf32>
    %813 = arith.addf %811, %812 : vector<2x64xf32>
    %814 = vector.extract_strided_slice %813 {offsets = [0, 0], sizes = [2, 48], strides = [1, 1]} : vector<2x64xf32> to vector<2x48xf32>
    %815 = arith.negf %814 : vector<2x48xf32>
    %816 = math.exp %815 : vector<2x48xf32>
    %cst_203 = arith.constant 1.000000e+00 : f32
    %817 = vector.broadcast %cst_203 : f32 to vector<2x48xf32>
    %818 = arith.addf %817, %816 : vector<2x48xf32>
    %819 = arith.divf %817, %818 : vector<2x48xf32>
    %820 = vector.extract_strided_slice %813 {offsets = [0, 48], sizes = [2, 16], strides = [1, 1]} : vector<2x64xf32> to vector<2x16xf32>
    %821 = math.tanh %820 : vector<2x16xf32>
    %822 = vector.extract_strided_slice %819 {offsets = [0, 0], sizes = [2, 16], strides = [1, 1]} : vector<2x48xf32> to vector<2x16xf32>
    %823 = vector.extract_strided_slice %819 {offsets = [0, 16], sizes = [2, 16], strides = [1, 1]} : vector<2x48xf32> to vector<2x16xf32>
    %824 = vector.extract_strided_slice %819 {offsets = [0, 32], sizes = [2, 16], strides = [1, 1]} : vector<2x48xf32> to vector<2x16xf32>
    %825 = arith.mulf %823, %801 : vector<2x16xf32>
    %826 = arith.mulf %822, %821 : vector<2x16xf32>
    %827 = arith.addf %825, %826 : vector<2x16xf32>
    %828 = math.tanh %827 : vector<2x16xf32>
    %829 = arith.mulf %824, %828 : vector<2x16xf32>
    %830 = vector.extract_strided_slice %677 {offsets = [5, 0, 0], sizes = [1, 2, 16], strides = [1, 1, 1]} : vector<8x2x16xf32> to vector<1x2x16xf32>
    %831 = vector.shape_cast %830 : vector<1x2x16xf32> to vector<2x16xf32>
    %832 = arith.addf %829, %831 : vector<2x16xf32>
    %c5_204 = arith.constant 5 : index
    %c0_205 = arith.constant 0 : index
    %c0_206 = arith.constant 0 : index
    %833 = vector.load %arg30[%c5_204, %c0_205, %c0_206] : memref<8x2x16xf32, #tpu.memory_space<vmem>>, vector<1x2x16xf32>
    %834 = vector.shape_cast %833 : vector<1x2x16xf32> to vector<2x16xf32>
    %835 = vector.shape_cast %832 : vector<2x16xf32> to vector<1x2x16xf32>
    tpu.vector_store %arg30[%c5_204, %c0_205, %c0_206], %835 {strides = array<i32>} : memref<8x2x16xf32, #tpu.memory_space<vmem>>, vector<1x2x16xf32>,
    %836 = vector.extract_strided_slice %665 {offsets = [6, 0, 0], sizes = [1, 2, 64], strides = [1, 1, 1]} : vector<8x2x64xf32> to vector<1x2x64xf32>
    %837 = vector.shape_cast %836 : vector<1x2x64xf32> to vector<2x64xf32>
    %cst_207 = arith.constant dense<0.000000e+00> : vector<2x64xf32>
    %838 = tpu.matmul %829, %660, %cst_207 {dimension_numbers = #tpu.dot_dimension_numbers<[1], [0], [0], [1], [0, 0, 1, 1], [], []>} : vector<2x16xf32>, vector<16x64xf32>, vector<2x64xf32> -> vector<2x64xf32>
    %839 = arith.addf %837, %838 : vector<2x64xf32>
    %840 = vector.extract_strided_slice %839 {offsets = [0, 0], sizes = [2, 48], strides = [1, 1]} : vector<2x64xf32> to vector<2x48xf32>
    %841 = arith.negf %840 : vector<2x48xf32>
    %842 = math.exp %841 : vector<2x48xf32>
    %cst_208 = arith.constant 1.000000e+00 : f32
    %843 = vector.broadcast %cst_208 : f32 to vector<2x48xf32>
    %844 = arith.addf %843, %842 : vector<2x48xf32>
    %845 = arith.divf %843, %844 : vector<2x48xf32>
    %846 = vector.extract_strided_slice %839 {offsets = [0, 48], sizes = [2, 16], strides = [1, 1]} : vector<2x64xf32> to vector<2x16xf32>
    %847 = math.tanh %846 : vector<2x16xf32>
    %848 = vector.extract_strided_slice %845 {offsets = [0, 0], sizes = [2, 16], strides = [1, 1]} : vector<2x48xf32> to vector<2x16xf32>
    %849 = vector.extract_strided_slice %845 {offsets = [0, 16], sizes = [2, 16], strides = [1, 1]} : vector<2x48xf32> to vector<2x16xf32>
    %850 = vector.extract_strided_slice %845 {offsets = [0, 32], sizes = [2, 16], strides = [1, 1]} : vector<2x48xf32> to vector<2x16xf32>
    %851 = arith.mulf %849, %827 : vector<2x16xf32>
    %852 = arith.mulf %848, %847 : vector<2x16xf32>
    %853 = arith.addf %851, %852 : vector<2x16xf32>
    %854 = math.tanh %853 : vector<2x16xf32>
    %855 = arith.mulf %850, %854 : vector<2x16xf32>
    %856 = vector.extract_strided_slice %677 {offsets = [6, 0, 0], sizes = [1, 2, 16], strides = [1, 1, 1]} : vector<8x2x16xf32> to vector<1x2x16xf32>
    %857 = vector.shape_cast %856 : vector<1x2x16xf32> to vector<2x16xf32>
    %858 = arith.addf %855, %857 : vector<2x16xf32>
    %c6_209 = arith.constant 6 : index
    %c0_210 = arith.constant 0 : index
    %c0_211 = arith.constant 0 : index
    %859 = vector.load %arg30[%c6_209, %c0_210, %c0_211] : memref<8x2x16xf32, #tpu.memory_space<vmem>>, vector<1x2x16xf32>
    %860 = vector.shape_cast %859 : vector<1x2x16xf32> to vector<2x16xf32>
    %861 = vector.shape_cast %858 : vector<2x16xf32> to vector<1x2x16xf32>
    tpu.vector_store %arg30[%c6_209, %c0_210, %c0_211], %861 {strides = array<i32>} : memref<8x2x16xf32, #tpu.memory_space<vmem>>, vector<1x2x16xf32>,
    %862 = vector.extract_strided_slice %665 {offsets = [7, 0, 0], sizes = [1, 2, 64], strides = [1, 1, 1]} : vector<8x2x64xf32> to vector<1x2x64xf32>
    %863 = vector.shape_cast %862 : vector<1x2x64xf32> to vector<2x64xf32>
    %cst_212 = arith.constant dense<0.000000e+00> : vector<2x64xf32>
    %864 = tpu.matmul %855, %660, %cst_212 {dimension_numbers = #tpu.dot_dimension_numbers<[1], [0], [0], [1], [0, 0, 1, 1], [], []>} : vector<2x16xf32>, vector<16x64xf32>, vector<2x64xf32> -> vector<2x64xf32>
    %865 = arith.addf %863, %864 : vector<2x64xf32>
    %866 = vector.extract_strided_slice %865 {offsets = [0, 0], sizes = [2, 48], strides = [1, 1]} : vector<2x64xf32> to vector<2x48xf32>
    %867 = arith.negf %866 : vector<2x48xf32>
    %868 = math.exp %867 : vector<2x48xf32>
    %cst_213 = arith.constant 1.000000e+00 : f32
    %869 = vector.broadcast %cst_213 : f32 to vector<2x48xf32>
    %870 = arith.addf %869, %868 : vector<2x48xf32>
    %871 = arith.divf %869, %870 : vector<2x48xf32>
    %872 = vector.extract_strided_slice %865 {offsets = [0, 48], sizes = [2, 16], strides = [1, 1]} : vector<2x64xf32> to vector<2x16xf32>
    %873 = math.tanh %872 : vector<2x16xf32>
    %874 = vector.extract_strided_slice %871 {offsets = [0, 0], sizes = [2, 16], strides = [1, 1]} : vector<2x48xf32> to vector<2x16xf32>
    %875 = vector.extract_strided_slice %871 {offsets = [0, 16], sizes = [2, 16], strides = [1, 1]} : vector<2x48xf32> to vector<2x16xf32>
    %876 = vector.extract_strided_slice %871 {offsets = [0, 32], sizes = [2, 16], strides = [1, 1]} : vector<2x48xf32> to vector<2x16xf32>
    %877 = arith.mulf %875, %853 : vector<2x16xf32>
    %878 = arith.mulf %874, %873 : vector<2x16xf32>
    %879 = arith.addf %877, %878 : vector<2x16xf32>
    %880 = math.tanh %879 : vector<2x16xf32>
    %881 = arith.mulf %876, %880 : vector<2x16xf32>
    %882 = vector.extract_strided_slice %677 {offsets = [7, 0, 0], sizes = [1, 2, 16], strides = [1, 1, 1]} : vector<8x2x16xf32> to vector<1x2x16xf32>
    %883 = vector.shape_cast %882 : vector<1x2x16xf32> to vector<2x16xf32>
    %884 = arith.addf %881, %883 : vector<2x16xf32>
    %c7_214 = arith.constant 7 : index
    %c0_215 = arith.constant 0 : index
    %c0_216 = arith.constant 0 : index
    %885 = vector.load %arg30[%c7_214, %c0_215, %c0_216] : memref<8x2x16xf32, #tpu.memory_space<vmem>>, vector<1x2x16xf32>
    %886 = vector.shape_cast %885 : vector<1x2x16xf32> to vector<2x16xf32>
    %887 = vector.shape_cast %884 : vector<2x16xf32> to vector<1x2x16xf32>
    tpu.vector_store %arg30[%c7_214, %c0_215, %c0_216], %887 {strides = array<i32>} : memref<8x2x16xf32, #tpu.memory_space<vmem>>, vector<1x2x16xf32>,
    %c0_217 = arith.constant 0 : index
    %c0_218 = arith.constant 0 : index
    %c0_219 = arith.constant 0 : index
    %888 = vector.load %arg30[%c0_217, %c0_218, %c0_219] : memref<8x2x16xf32, #tpu.memory_space<vmem>>, vector<8x2x16xf32>
    %889 = vector.shape_cast %888 : vector<8x2x16xf32> to vector<16x16xf32>
    %c0_220 = arith.constant 0 : index
    %c0_221 = arith.constant 0 : index
    %890 = vector.load %arg19[%c0_220, %c0_221] : memref<16x32xf32, #tpu.memory_space<vmem>>, vector<16x32xf32>
    %c0_222 = arith.constant 0 : index
    %c0_223 = arith.constant 0 : index
    %891 = vector.load %arg20[%c0_222, %c0_223] : memref<8x32xf32, #tpu.memory_space<vmem>>, vector<8x32xf32>
    %c0_224 = arith.constant 0 : index
    %c0_225 = arith.constant 0 : index
    %892 = vector.load %arg21[%c0_224, %c0_225] : memref<1x32xf32, #tpu.memory_space<vmem>>, vector<1x32xf32>
    %cst_226 = arith.constant dense<0.000000e+00> : vector<16x32xf32>
    %893 = tpu.matmul %889, %890, %cst_226 {dimension_numbers = #tpu.dot_dimension_numbers<[1], [0], [0], [1], [0, 0, 1, 1], [], []>} : vector<16x16xf32>, vector<16x32xf32>, vector<16x32xf32> -> vector<16x32xf32>
    %894 = vector.broadcast %892 : vector<1x32xf32> to vector<16x32xf32>
    %895 = arith.addf %893, %894 : vector<16x32xf32>
    %896 = vector.shape_cast %895 : vector<16x32xf32> to vector<8x2x32xf32>
    %c0_227 = arith.constant 0 : index
    %c0_228 = arith.constant 0 : index
    %897 = vector.load %arg22[%c0_227, %c0_228] : memref<16x8xf32, #tpu.memory_space<vmem>>, vector<16x8xf32>
    %c0_229 = arith.constant 0 : index
    %c0_230 = arith.constant 0 : index
    %898 = vector.load %arg23[%c0_229, %c0_230] : memref<1x8xf32, #tpu.memory_space<vmem>>, vector<1x8xf32>
    %899 = vector.extract_strided_slice %888 {offsets = [7, 0, 0], sizes = [1, 2, 16], strides = [1, 1, 1]} : vector<8x2x16xf32> to vector<1x2x16xf32>
    %900 = vector.shape_cast %899 : vector<1x2x16xf32> to vector<2x16xf32>
    %cst_231 = arith.constant dense<0.000000e+00> : vector<2x8xf32>
    %901 = tpu.matmul %900, %897, %cst_231 {dimension_numbers = #tpu.dot_dimension_numbers<[1], [0], [0], [1], [0, 0, 1, 1], [], []>} : vector<2x16xf32>, vector<16x8xf32>, vector<2x8xf32> -> vector<2x8xf32>
    %902 = vector.broadcast %898 : vector<1x8xf32> to vector<2x8xf32>
    %903 = arith.addf %901, %902 : vector<2x8xf32>
    %904 = arith.negf %903 : vector<2x8xf32>
    %905 = math.exp %904 : vector<2x8xf32>
    %cst_232 = arith.constant 1.000000e+00 : f32
    %906 = vector.broadcast %cst_232 : f32 to vector<2x8xf32>
    %907 = arith.addf %906, %905 : vector<2x8xf32>
    %908 = arith.divf %906, %907 : vector<2x8xf32>
    %909 = arith.mulf %908, %903 : vector<2x8xf32>
    %cst_233 = arith.constant 0.000000e+00 : f32
    %910 = vector.broadcast %cst_233 : f32 to vector<2x8xf32>
    %cst_234 = arith.constant 0.000000e+00 : f32
    %911 = vector.broadcast %cst_234 : f32 to vector<2x8xf32>
    %912 = vector.extract_strided_slice %896 {offsets = [0, 0, 0], sizes = [1, 2, 32], strides = [1, 1, 1]} : vector<8x2x32xf32> to vector<1x2x32xf32>
    %913 = vector.shape_cast %912 : vector<1x2x32xf32> to vector<2x32xf32>
    %cst_235 = arith.constant dense<0.000000e+00> : vector<2x32xf32>
    %914 = tpu.matmul %910, %891, %cst_235 {dimension_numbers = #tpu.dot_dimension_numbers<[1], [0], [0], [1], [0, 0, 1, 1], [], []>} : vector<2x8xf32>, vector<8x32xf32>, vector<2x32xf32> -> vector<2x32xf32>
    %915 = arith.addf %913, %914 : vector<2x32xf32>
    %916 = vector.extract_strided_slice %915 {offsets = [0, 0], sizes = [2, 24], strides = [1, 1]} : vector<2x32xf32> to vector<2x24xf32>
    %917 = arith.negf %916 : vector<2x24xf32>
    %918 = math.exp %917 : vector<2x24xf32>
    %cst_236 = arith.constant 1.000000e+00 : f32
    %919 = vector.broadcast %cst_236 : f32 to vector<2x24xf32>
    %920 = arith.addf %919, %918 : vector<2x24xf32>
    %921 = arith.divf %919, %920 : vector<2x24xf32>
    %922 = vector.extract_strided_slice %915 {offsets = [0, 24], sizes = [2, 8], strides = [1, 1]} : vector<2x32xf32> to vector<2x8xf32>
    %923 = math.tanh %922 : vector<2x8xf32>
    %924 = vector.extract_strided_slice %921 {offsets = [0, 0], sizes = [2, 8], strides = [1, 1]} : vector<2x24xf32> to vector<2x8xf32>
    %925 = vector.extract_strided_slice %921 {offsets = [0, 8], sizes = [2, 8], strides = [1, 1]} : vector<2x24xf32> to vector<2x8xf32>
    %926 = vector.extract_strided_slice %921 {offsets = [0, 16], sizes = [2, 8], strides = [1, 1]} : vector<2x24xf32> to vector<2x8xf32>
    %927 = arith.mulf %925, %911 : vector<2x8xf32>
    %928 = arith.mulf %924, %923 : vector<2x8xf32>
    %929 = arith.addf %927, %928 : vector<2x8xf32>
    %930 = math.tanh %929 : vector<2x8xf32>
    %931 = arith.mulf %926, %930 : vector<2x8xf32>
    %932 = vector.extract_strided_slice %896 {offsets = [1, 0, 0], sizes = [1, 2, 32], strides = [1, 1, 1]} : vector<8x2x32xf32> to vector<1x2x32xf32>
    %933 = vector.shape_cast %932 : vector<1x2x32xf32> to vector<2x32xf32>
    %cst_237 = arith.constant dense<0.000000e+00> : vector<2x32xf32>
    %934 = tpu.matmul %931, %891, %cst_237 {dimension_numbers = #tpu.dot_dimension_numbers<[1], [0], [0], [1], [0, 0, 1, 1], [], []>} : vector<2x8xf32>, vector<8x32xf32>, vector<2x32xf32> -> vector<2x32xf32>
    %935 = arith.addf %933, %934 : vector<2x32xf32>
    %936 = vector.extract_strided_slice %935 {offsets = [0, 0], sizes = [2, 24], strides = [1, 1]} : vector<2x32xf32> to vector<2x24xf32>
    %937 = arith.negf %936 : vector<2x24xf32>
    %938 = math.exp %937 : vector<2x24xf32>
    %cst_238 = arith.constant 1.000000e+00 : f32
    %939 = vector.broadcast %cst_238 : f32 to vector<2x24xf32>
    %940 = arith.addf %939, %938 : vector<2x24xf32>
    %941 = arith.divf %939, %940 : vector<2x24xf32>
    %942 = vector.extract_strided_slice %935 {offsets = [0, 24], sizes = [2, 8], strides = [1, 1]} : vector<2x32xf32> to vector<2x8xf32>
    %943 = math.tanh %942 : vector<2x8xf32>
    %944 = vector.extract_strided_slice %941 {offsets = [0, 0], sizes = [2, 8], strides = [1, 1]} : vector<2x24xf32> to vector<2x8xf32>
    %945 = vector.extract_strided_slice %941 {offsets = [0, 8], sizes = [2, 8], strides = [1, 1]} : vector<2x24xf32> to vector<2x8xf32>
    %946 = vector.extract_strided_slice %941 {offsets = [0, 16], sizes = [2, 8], strides = [1, 1]} : vector<2x24xf32> to vector<2x8xf32>
    %947 = arith.mulf %945, %929 : vector<2x8xf32>
    %948 = arith.mulf %944, %943 : vector<2x8xf32>
    %949 = arith.addf %947, %948 : vector<2x8xf32>
    %950 = math.tanh %949 : vector<2x8xf32>
    %951 = arith.mulf %946, %950 : vector<2x8xf32>
    %952 = vector.extract_strided_slice %896 {offsets = [2, 0, 0], sizes = [1, 2, 32], strides = [1, 1, 1]} : vector<8x2x32xf32> to vector<1x2x32xf32>
    %953 = vector.shape_cast %952 : vector<1x2x32xf32> to vector<2x32xf32>
    %cst_239 = arith.constant dense<0.000000e+00> : vector<2x32xf32>
    %954 = tpu.matmul %951, %891, %cst_239 {dimension_numbers = #tpu.dot_dimension_numbers<[1], [0], [0], [1], [0, 0, 1, 1], [], []>} : vector<2x8xf32>, vector<8x32xf32>, vector<2x32xf32> -> vector<2x32xf32>
    %955 = arith.addf %953, %954 : vector<2x32xf32>
    %956 = vector.extract_strided_slice %955 {offsets = [0, 0], sizes = [2, 24], strides = [1, 1]} : vector<2x32xf32> to vector<2x24xf32>
    %957 = arith.negf %956 : vector<2x24xf32>
    %958 = math.exp %957 : vector<2x24xf32>
    %cst_240 = arith.constant 1.000000e+00 : f32
    %959 = vector.broadcast %cst_240 : f32 to vector<2x24xf32>
    %960 = arith.addf %959, %958 : vector<2x24xf32>
    %961 = arith.divf %959, %960 : vector<2x24xf32>
    %962 = vector.extract_strided_slice %955 {offsets = [0, 24], sizes = [2, 8], strides = [1, 1]} : vector<2x32xf32> to vector<2x8xf32>
    %963 = math.tanh %962 : vector<2x8xf32>
    %964 = vector.extract_strided_slice %961 {offsets = [0, 0], sizes = [2, 8], strides = [1, 1]} : vector<2x24xf32> to vector<2x8xf32>
    %965 = vector.extract_strided_slice %961 {offsets = [0, 8], sizes = [2, 8], strides = [1, 1]} : vector<2x24xf32> to vector<2x8xf32>
    %966 = vector.extract_strided_slice %961 {offsets = [0, 16], sizes = [2, 8], strides = [1, 1]} : vector<2x24xf32> to vector<2x8xf32>
    %967 = arith.mulf %965, %949 : vector<2x8xf32>
    %968 = arith.mulf %964, %963 : vector<2x8xf32>
    %969 = arith.addf %967, %968 : vector<2x8xf32>
    %970 = math.tanh %969 : vector<2x8xf32>
    %971 = arith.mulf %966, %970 : vector<2x8xf32>
    %972 = vector.extract_strided_slice %896 {offsets = [3, 0, 0], sizes = [1, 2, 32], strides = [1, 1, 1]} : vector<8x2x32xf32> to vector<1x2x32xf32>
    %973 = vector.shape_cast %972 : vector<1x2x32xf32> to vector<2x32xf32>
    %cst_241 = arith.constant dense<0.000000e+00> : vector<2x32xf32>
    %974 = tpu.matmul %971, %891, %cst_241 {dimension_numbers = #tpu.dot_dimension_numbers<[1], [0], [0], [1], [0, 0, 1, 1], [], []>} : vector<2x8xf32>, vector<8x32xf32>, vector<2x32xf32> -> vector<2x32xf32>
    %975 = arith.addf %973, %974 : vector<2x32xf32>
    %976 = vector.extract_strided_slice %975 {offsets = [0, 0], sizes = [2, 24], strides = [1, 1]} : vector<2x32xf32> to vector<2x24xf32>
    %977 = arith.negf %976 : vector<2x24xf32>
    %978 = math.exp %977 : vector<2x24xf32>
    %cst_242 = arith.constant 1.000000e+00 : f32
    %979 = vector.broadcast %cst_242 : f32 to vector<2x24xf32>
    %980 = arith.addf %979, %978 : vector<2x24xf32>
    %981 = arith.divf %979, %980 : vector<2x24xf32>
    %982 = vector.extract_strided_slice %975 {offsets = [0, 24], sizes = [2, 8], strides = [1, 1]} : vector<2x32xf32> to vector<2x8xf32>
    %983 = math.tanh %982 : vector<2x8xf32>
    %984 = vector.extract_strided_slice %981 {offsets = [0, 0], sizes = [2, 8], strides = [1, 1]} : vector<2x24xf32> to vector<2x8xf32>
    %985 = vector.extract_strided_slice %981 {offsets = [0, 8], sizes = [2, 8], strides = [1, 1]} : vector<2x24xf32> to vector<2x8xf32>
    %986 = vector.extract_strided_slice %981 {offsets = [0, 16], sizes = [2, 8], strides = [1, 1]} : vector<2x24xf32> to vector<2x8xf32>
    %987 = arith.mulf %985, %969 : vector<2x8xf32>
    %988 = arith.mulf %984, %983 : vector<2x8xf32>
    %989 = arith.addf %987, %988 : vector<2x8xf32>
    %990 = math.tanh %989 : vector<2x8xf32>
    %991 = arith.mulf %986, %990 : vector<2x8xf32>
    %992 = vector.extract_strided_slice %896 {offsets = [4, 0, 0], sizes = [1, 2, 32], strides = [1, 1, 1]} : vector<8x2x32xf32> to vector<1x2x32xf32>
    %993 = vector.shape_cast %992 : vector<1x2x32xf32> to vector<2x32xf32>
    %cst_243 = arith.constant dense<0.000000e+00> : vector<2x32xf32>
    %994 = tpu.matmul %991, %891, %cst_243 {dimension_numbers = #tpu.dot_dimension_numbers<[1], [0], [0], [1], [0, 0, 1, 1], [], []>} : vector<2x8xf32>, vector<8x32xf32>, vector<2x32xf32> -> vector<2x32xf32>
    %995 = arith.addf %993, %994 : vector<2x32xf32>
    %996 = vector.extract_strided_slice %995 {offsets = [0, 0], sizes = [2, 24], strides = [1, 1]} : vector<2x32xf32> to vector<2x24xf32>
    %997 = arith.negf %996 : vector<2x24xf32>
    %998 = math.exp %997 : vector<2x24xf32>
    %cst_244 = arith.constant 1.000000e+00 : f32
    %999 = vector.broadcast %cst_244 : f32 to vector<2x24xf32>
    %1000 = arith.addf %999, %998 : vector<2x24xf32>
    %1001 = arith.divf %999, %1000 : vector<2x24xf32>
    %1002 = vector.extract_strided_slice %995 {offsets = [0, 24], sizes = [2, 8], strides = [1, 1]} : vector<2x32xf32> to vector<2x8xf32>
    %1003 = math.tanh %1002 : vector<2x8xf32>
    %1004 = vector.extract_strided_slice %1001 {offsets = [0, 0], sizes = [2, 8], strides = [1, 1]} : vector<2x24xf32> to vector<2x8xf32>
    %1005 = vector.extract_strided_slice %1001 {offsets = [0, 8], sizes = [2, 8], strides = [1, 1]} : vector<2x24xf32> to vector<2x8xf32>
    %1006 = vector.extract_strided_slice %1001 {offsets = [0, 16], sizes = [2, 8], strides = [1, 1]} : vector<2x24xf32> to vector<2x8xf32>
    %1007 = arith.mulf %1005, %989 : vector<2x8xf32>
    %1008 = arith.mulf %1004, %1003 : vector<2x8xf32>
    %1009 = arith.addf %1007, %1008 : vector<2x8xf32>
    %1010 = math.tanh %1009 : vector<2x8xf32>
    %1011 = arith.mulf %1006, %1010 : vector<2x8xf32>
    %1012 = vector.extract_strided_slice %896 {offsets = [5, 0, 0], sizes = [1, 2, 32], strides = [1, 1, 1]} : vector<8x2x32xf32> to vector<1x2x32xf32>
    %1013 = vector.shape_cast %1012 : vector<1x2x32xf32> to vector<2x32xf32>
    %cst_245 = arith.constant dense<0.000000e+00> : vector<2x32xf32>
    %1014 = tpu.matmul %1011, %891, %cst_245 {dimension_numbers = #tpu.dot_dimension_numbers<[1], [0], [0], [1], [0, 0, 1, 1], [], []>} : vector<2x8xf32>, vector<8x32xf32>, vector<2x32xf32> -> vector<2x32xf32>
    %1015 = arith.addf %1013, %1014 : vector<2x32xf32>
    %1016 = vector.extract_strided_slice %1015 {offsets = [0, 0], sizes = [2, 24], strides = [1, 1]} : vector<2x32xf32> to vector<2x24xf32>
    %1017 = arith.negf %1016 : vector<2x24xf32>
    %1018 = math.exp %1017 : vector<2x24xf32>
    %cst_246 = arith.constant 1.000000e+00 : f32
    %1019 = vector.broadcast %cst_246 : f32 to vector<2x24xf32>
    %1020 = arith.addf %1019, %1018 : vector<2x24xf32>
    %1021 = arith.divf %1019, %1020 : vector<2x24xf32>
    %1022 = vector.extract_strided_slice %1015 {offsets = [0, 24], sizes = [2, 8], strides = [1, 1]} : vector<2x32xf32> to vector<2x8xf32>
    %1023 = math.tanh %1022 : vector<2x8xf32>
    %1024 = vector.extract_strided_slice %1021 {offsets = [0, 0], sizes = [2, 8], strides = [1, 1]} : vector<2x24xf32> to vector<2x8xf32>
    %1025 = vector.extract_strided_slice %1021 {offsets = [0, 8], sizes = [2, 8], strides = [1, 1]} : vector<2x24xf32> to vector<2x8xf32>
    %1026 = vector.extract_strided_slice %1021 {offsets = [0, 16], sizes = [2, 8], strides = [1, 1]} : vector<2x24xf32> to vector<2x8xf32>
    %1027 = arith.mulf %1025, %1009 : vector<2x8xf32>
    %1028 = arith.mulf %1024, %1023 : vector<2x8xf32>
    %1029 = arith.addf %1027, %1028 : vector<2x8xf32>
    %1030 = math.tanh %1029 : vector<2x8xf32>
    %1031 = arith.mulf %1026, %1030 : vector<2x8xf32>
    %1032 = vector.extract_strided_slice %896 {offsets = [6, 0, 0], sizes = [1, 2, 32], strides = [1, 1, 1]} : vector<8x2x32xf32> to vector<1x2x32xf32>
    %1033 = vector.shape_cast %1032 : vector<1x2x32xf32> to vector<2x32xf32>
    %cst_247 = arith.constant dense<0.000000e+00> : vector<2x32xf32>
    %1034 = tpu.matmul %1031, %891, %cst_247 {dimension_numbers = #tpu.dot_dimension_numbers<[1], [0], [0], [1], [0, 0, 1, 1], [], []>} : vector<2x8xf32>, vector<8x32xf32>, vector<2x32xf32> -> vector<2x32xf32>
    %1035 = arith.addf %1033, %1034 : vector<2x32xf32>
    %1036 = vector.extract_strided_slice %1035 {offsets = [0, 0], sizes = [2, 24], strides = [1, 1]} : vector<2x32xf32> to vector<2x24xf32>
    %1037 = arith.negf %1036 : vector<2x24xf32>
    %1038 = math.exp %1037 : vector<2x24xf32>
    %cst_248 = arith.constant 1.000000e+00 : f32
    %1039 = vector.broadcast %cst_248 : f32 to vector<2x24xf32>
    %1040 = arith.addf %1039, %1038 : vector<2x24xf32>
    %1041 = arith.divf %1039, %1040 : vector<2x24xf32>
    %1042 = vector.extract_strided_slice %1035 {offsets = [0, 24], sizes = [2, 8], strides = [1, 1]} : vector<2x32xf32> to vector<2x8xf32>
    %1043 = math.tanh %1042 : vector<2x8xf32>
    %1044 = vector.extract_strided_slice %1041 {offsets = [0, 0], sizes = [2, 8], strides = [1, 1]} : vector<2x24xf32> to vector<2x8xf32>
    %1045 = vector.extract_strided_slice %1041 {offsets = [0, 8], sizes = [2, 8], strides = [1, 1]} : vector<2x24xf32> to vector<2x8xf32>
    %1046 = vector.extract_strided_slice %1041 {offsets = [0, 16], sizes = [2, 8], strides = [1, 1]} : vector<2x24xf32> to vector<2x8xf32>
    %1047 = arith.mulf %1045, %1029 : vector<2x8xf32>
    %1048 = arith.mulf %1044, %1043 : vector<2x8xf32>
    %1049 = arith.addf %1047, %1048 : vector<2x8xf32>
    %1050 = math.tanh %1049 : vector<2x8xf32>
    %1051 = arith.mulf %1046, %1050 : vector<2x8xf32>
    %1052 = vector.extract_strided_slice %896 {offsets = [7, 0, 0], sizes = [1, 2, 32], strides = [1, 1, 1]} : vector<8x2x32xf32> to vector<1x2x32xf32>
    %1053 = vector.shape_cast %1052 : vector<1x2x32xf32> to vector<2x32xf32>
    %cst_249 = arith.constant dense<0.000000e+00> : vector<2x32xf32>
    %1054 = tpu.matmul %1051, %891, %cst_249 {dimension_numbers = #tpu.dot_dimension_numbers<[1], [0], [0], [1], [0, 0, 1, 1], [], []>} : vector<2x8xf32>, vector<8x32xf32>, vector<2x32xf32> -> vector<2x32xf32>
    %1055 = arith.addf %1053, %1054 : vector<2x32xf32>
    %1056 = vector.extract_strided_slice %1055 {offsets = [0, 0], sizes = [2, 24], strides = [1, 1]} : vector<2x32xf32> to vector<2x24xf32>
    %1057 = arith.negf %1056 : vector<2x24xf32>
    %1058 = math.exp %1057 : vector<2x24xf32>
    %cst_250 = arith.constant 1.000000e+00 : f32
    %1059 = vector.broadcast %cst_250 : f32 to vector<2x24xf32>
    %1060 = arith.addf %1059, %1058 : vector<2x24xf32>
    %1061 = arith.divf %1059, %1060 : vector<2x24xf32>
    %1062 = vector.extract_strided_slice %1055 {offsets = [0, 24], sizes = [2, 8], strides = [1, 1]} : vector<2x32xf32> to vector<2x8xf32>
    %1063 = math.tanh %1062 : vector<2x8xf32>
    %1064 = vector.extract_strided_slice %1061 {offsets = [0, 0], sizes = [2, 8], strides = [1, 1]} : vector<2x24xf32> to vector<2x8xf32>
    %1065 = vector.extract_strided_slice %1061 {offsets = [0, 8], sizes = [2, 8], strides = [1, 1]} : vector<2x24xf32> to vector<2x8xf32>
    %1066 = vector.extract_strided_slice %1061 {offsets = [0, 16], sizes = [2, 8], strides = [1, 1]} : vector<2x24xf32> to vector<2x8xf32>
    %1067 = arith.mulf %1065, %1049 : vector<2x8xf32>
    %1068 = arith.mulf %1064, %1063 : vector<2x8xf32>
    %1069 = arith.addf %1067, %1068 : vector<2x8xf32>
    %1070 = math.tanh %1069 : vector<2x8xf32>
    %1071 = arith.mulf %1066, %1070 : vector<2x8xf32>
    %1072 = arith.addf %1071, %909 : vector<2x8xf32>
    %c0_251 = arith.constant 0 : index
    %c0_252 = arith.constant 0 : index
    %1073 = vector.load %arg24[%c0_251, %c0_252] : memref<1x8xf32, #tpu.memory_space<vmem>>, vector<1x8xf32>
    %c0_253 = arith.constant 0 : index
    %c0_254 = arith.constant 0 : index
    %1074 = vector.load %arg25[%c0_253, %c0_254] : memref<1x1xf32, #tpu.memory_space<vmem>>, vector<1x1xf32>
    %1075 = vector.broadcast %1073 : vector<1x8xf32> to vector<2x8xf32>
    %1076 = arith.mulf %1072, %1075 : vector<2x8xf32>
    %cst_255 = arith.constant dense<0.000000e+00> : vector<2xf32>
    %1077 = vector.multi_reduction <add>, %1076, %cst_255 [1] : vector<2x8xf32> to vector<2xf32>
    %1078 = vector.shape_cast %1077 : vector<2xf32> to vector<2x1xf32>
    %1079 = vector.broadcast %1074 : vector<1x1xf32> to vector<2x1xf32>
    %1080 = arith.addf %1078, %1079 : vector<2x1xf32>
    %c0_256 = arith.constant 0 : index
    %c0_257 = arith.constant 0 : index
    %1081 = vector.load %arg26[%c0_256, %c0_257] : memref<2x1xf32, #tpu.memory_space<vmem>>, vector<2x1xf32>
    tpu.vector_store %arg26[%c0_256, %c0_257], %1080 {strides = array<i32>} : memref<2x1xf32, #tpu.memory_space<vmem>>, vector<2x1xf32>,
    return
  }
}

</mosaic_0001>

<bundles_post_ra>
// kernel: forward.1
= control target key start
LH: loop header
LB: loop body
LE: loop exit
PB: predicated region body
PF: predicated region fallthrough
CT: control target
= control target key end

     0   :  { %s7979_s0 = inlined_call_operand.vmem [shape: f32[8,2,64], index: 0, kind: input, shape index: {}]   ;;  %s7980_s1 = inlined_call_operand.vmem [shape: f32[64,512], index: 1, kind: input, shape index: {}]   ;;  %s7981_s2 = inlined_call_operand.hbm [shape: f32[128,512], index: 2, kind: input, shape index: {}]   ;;  %s7982_s3 = inlined_call_operand.hbm [shape: f32[1,512], index: 3, kind: input, shape index: {}]   ;;  %s7983_s4 = inlined_call_operand.hbm [shape: f32[128,256], index: 4, kind: input, shape index: {}]   ;;  %s7984_s5 = inlined_call_operand.hbm [shape: f32[64,256], index: 5, kind: input, shape index: {}]   ;;  %s7985_s6 = inlined_call_operand.hbm [shape: f32[1,256], index: 6, kind: input, shape index: {}]   ;;  %s7986_s7 = inlined_call_operand.vmem [shape: f32[128,64], index: 7, kind: input, shape index: {}]   ;;  %s7987_s8 = inlined_call_operand.hbm [shape: f32[1,64], index: 8, kind: input, shape index: {}]   ;;  %s7988_s9 = inlined_call_operand.hbm [shape: f32[64,128], index: 9, kind: input, shape index: {}]   ;;  %s7989_s10 = inlined_call_operand.hbm [shape: f32[32,128], index: 10, kind: input, shape index: {}]   ;;  %s7990_s11 = inlined_call_operand.hbm [shape: f32[1,128], index: 11, kind: input, shape index: {}]   ;;  %s7991_s12 = inlined_call_operand.vmem [shape: f32[64,32], index: 12, kind: input, shape index: {}]   ;;  %s7992_s13 = inlined_call_operand.hbm [shape: f32[1,32], index: 13, kind: input, shape index: {}]   ;;  %s7993_s14 = inlined_call_operand.hbm [shape: f32[32,64], index: 14, kind: input, shape index: {}]   ;;  %s7994_s15 = inlined_call_operand.vmem [shape: f32[16,64], index: 15, kind: input, shape index: {}]   ;;  %s7995_s16 = inlined_call_operand.hbm [shape: f32[1,64], index: 16, kind: input, shape index: {}]   ;;  %s7996_s17 = inlined_call_operand.vmem [shape: f32[32,16], index: 17, kind: input, shape index: {}]   ;;  %s7997_s18 = inlined_call_operand.hbm [shape: f32[1,16], index: 18, kind: input, shape index: {}]   ;;  %s7998_s19 = inlined_call_operand.vmem [shape: f32[16,32], index: 19, kind: input, shape index: {}]   ;;  %s7999_s20 = inlined_call_operand.vmem [shape: f32[8,32], index: 20, kind: input, shape index: {}]   ;;  %s8000_s21 = inlined_call_operand.hbm [shape: f32[1,32], index: 21, kind: input, shape index: {}]   ;;  %s8001_s22 = inlined_call_operand.vmem [shape: f32[16,8], index: 22, kind: input, shape index: {}]   ;;  %s8002_s23 = inlined_call_operand.hbm [shape: f32[1,8], index: 23, kind: input, shape index: {}]   ;;  %s8003_s24 = inlined_call_operand.hbm [shape: f32[1,8], index: 24, kind: input, shape index: {}]   ;;  %s8004_s25 = inlined_call_operand.<no memory space> [shape: f32[1,1], index: 25, kind: input, shape index: {}]   ;;  %s8005_s26 = inlined_call_operand.vmem [shape: f32[2,1], index: 26, kind: output, shape index: {}]  }
   0x1   :  { %8115 = sst [smem:[#allocation76_spill]] %s7979_s0  ;;  %v31_v0 = vstv %s8004_s25 }
   0x2   :  { %8116 = sst [smem:[#allocation77_spill]] %s7980_s1  ;;  %32 = vst [vmem:[#allocation6] sm:$0x1] %v31_v0 }
   0x3   :  { %8117 = sst [smem:[#allocation78_spill]] %s7981_s2 }
   0x4   :  { %8118 = sst [smem:[#allocation79_spill]] %s7982_s3 }
   0x5   :  { %8119 = sst [smem:[#allocation80_spill]] %s7983_s4 }
   0x6   :  { %8120 = sst [smem:[#allocation81_spill]] %s7984_s5 }
   0x7   :  { %8121 = sst [smem:[#allocation82_spill]] %s7985_s6 }
   0x8   :  { %8122 = sst [smem:[#allocation83_spill]] %s7986_s7 }
   0x9   :  { %8123 = sst [smem:[#allocation84_spill]] %s7987_s8 }
   0xa   :  { %8124 = sst [smem:[#allocation85_spill]] %s7988_s9 }
   0xb   :  { %8125 = sst [smem:[#allocation86_spill]] %s7989_s10 }
   0xc   :  { %8126 = sst [smem:[#allocation87_spill]] %s8001_s22 }
   0xd   :  { %8127 = sst [smem:[#allocation88_spill]] %s8005_s26 }
   0xe   :  { %33 = vsyncpa [#allocation8], 0 }
   0xf   :  { %34 = vsyncpa [#allocation10], 0 }
  0x10   :  { %35 = vsyncpa [#allocation13], 0 }
  0x11   :  { %36 = vsyncpa [#allocation16], 0 }
  0x12   :  { %37 = vsyncpa [#allocation19], 0 }
  0x13   :  { %38 = vsyncpa [#allocation22], 0 }
  0x14   :  { %39 = vsyncpa [#allocation25], 0 }
  0x15   :  { %40 = vsyncpa [#allocation28], 0  ;;  %s8128_s8 = sld [smem:[#allocation79_spill]] }
  0x1b   :  { %s64_s4 = sshll.u32 %s8128_s8, 4  ;;  %s65_s4 = int_to_ptr.hbm [resolvable:$true] %s64_s4 }
  0x1c   :  { %41 = vsyncpa [#allocation31], 0  ;;  %s5887_s29 = smov [#allocation9]   ;;  %s8129_s30 = sld [smem:[#allocation81_spill]] }
  0x1d   :  { %s66_s0 = sshll.u32 %s5887_s29, 4  ;;  %s5888_s5 = smov [#allocation12]   ;;  %s67_s0 = int_to_ptr.vmem [resolvable:$true] %s66_s0 }
  0x1e   :  { %69 = dma.hbm_to_vmem [thread:$0]  %s65_s4, 64, %s67_s0, [#allocation10]  }
  0x1f   :  { %s89_s10 = sshll.u32 %s5888_s5, 4  ;;  %s8130_s27 = sld [smem:[#allocation84_spill]]  ;;  %s90_s10 = int_to_ptr.vmem [resolvable:$true] %s89_s10 }
  0x20   :  { %s5889_s7 = smov 256   ;;  %s5890_s28 = smov 16  }
  0x21   :  { %s5891_s8 = smov [#allocation15]   ;;  %s8131_s25 = sld [smem:[#allocation86_spill]] }
  0x22   :  { %s87_s2 = sshll.u32 %s8129_s30, 4  ;;  %s116_s4 = sshll.u32 %s5891_s8, 4  ;;  %s88_s2 = int_to_ptr.hbm [resolvable:$true] %s87_s2  ;;  %s117_s4 = int_to_ptr.vmem [resolvable:$true] %s116_s4 }
  0x23   :  { %95 = dma.hbm_to_vmem [thread:$0]  %s88_s2, 2048, %s90_s10, [#allocation13], %s5889_s7, %s5889_s7, %s5890_s28  }
  0x24   :  { %s5892_s30 = smov [#allocation18]   ;;  %s5893_s26 = smov 128  }
  0x25   :  { %s114_s3 = sshll.u32 %s8130_s27, 4  ;;  %s139_s5 = sshll.u32 %s5892_s30, 4  ;;  %s115_s3 = int_to_ptr.hbm [resolvable:$true] %s114_s3  ;;  %s140_s5 = int_to_ptr.vmem [resolvable:$true] %s139_s5 }
  0x26   :  { %119 = dma.hbm_to_vmem [thread:$0]  %s115_s3, 16, %s117_s4, [#allocation16]  }
  0x27   :  { %s137_s9 = sshll.u32 %s8131_s25, 4  ;;  %s164_s27 = sshll.u32 %s7992_s13, 4  ;;  %s138_s9 = int_to_ptr.hbm [resolvable:$true] %s137_s9  ;;  %s165_s27 = int_to_ptr.hbm [resolvable:$true] %s164_s27 }
  0x28   :  { %s5894_s22 = smov 8   ;;  %s190_s8 = sshll.u32 %s7995_s16, 4  ;;  %s191_s8 = int_to_ptr.hbm [resolvable:$true] %s190_s8 }
  0x29   :  { %145 = dma.hbm_to_vmem [thread:$0]  %s138_s9, 512, %s140_s5, [#allocation19], %s5893_s26, %s5893_s26, %s5894_s22  }
  0x2a   :  { %s5895_s3 = smov [#allocation21]   ;;  %s5896_s29 = smov [#allocation24]  }
  0x2b   :  { %s166_s4 = sshll.u32 %s5895_s3, 4  ;;  %s192_s0 = sshll.u32 %s5896_s29, 4  ;;  %s167_s4 = int_to_ptr.vmem [resolvable:$true] %s166_s4  ;;  %s193_s0 = int_to_ptr.vmem [resolvable:$true] %s192_s0 }
  0x2c   :  { %169 = dma.hbm_to_vmem [thread:$0]  %s165_s27, 16, %s167_s4, [#allocation22]  }
  0x2d   :  { %s218_s30 = sshll.u32 %s8000_s21, 4  ;;  %s8132_s5 = sld [smem:[#allocation78_spill]]  ;;  %s219_s30 = int_to_ptr.hbm [resolvable:$true] %s218_s30 }
  0x2e   :  { %195 = dma.hbm_to_vmem [thread:$0]  %s191_s8, 16, %s193_s0, [#allocation25]  }
  0x2f   :  { %s5897_s2 = smov [#allocation27]   ;;  %s5898_s10 = smov [#allocation7]  }
  0x30   :  { %s220_s16 = sshll.u32 %s5897_s2, 4  ;;  %s52_s27 = sshll.u32 %s5898_s10, 4  ;;  %s221_s16 = int_to_ptr.vmem [resolvable:$true] %s220_s16  ;;  %s53_s27 = int_to_ptr.vmem [resolvable:$true] %s52_s27 }
  0x31   :  { %223 = dma.hbm_to_vmem [thread:$0]  %s219_s30, 16, %s221_s16, [#allocation28]  }
  0x32   :  { %s5899_s3 = smov 512   ;;  %s5900_s4 = smov 32  }
  0x33   :  { %s50_s1 = sshll.u32 %s8132_s5, 4  ;;  %s8133_s13 = sld [smem:[#allocation80_spill]]  ;;  %s51_s1 = int_to_ptr.hbm [resolvable:$true] %s50_s1 }
  0x34   :  { %58 = dma.hbm_to_vmem [thread:$0]  %s51_s1, 8192, %s53_s27, [#allocation8], %s5899_s3, %s5899_s3, %s5900_s4  }
  0x35   :  { %s5901_s0 = smov [#allocation11]   ;;  %s8134_s5 = sld [smem:[#allocation82_spill]] }
  0x36   :  { %s76_s25 = sshll.u32 %s5901_s0, 4  ;;  %s5902_s30 = smov [#allocation14]   ;;  %s77_s25 = int_to_ptr.vmem [resolvable:$true] %s76_s25 }
  0x37   :  { %s103_s16 = sshll.u32 %s5902_s30, 4  ;;  %s8135_s27 = sld [smem:[#allocation85_spill]]  ;;  %s104_s16 = int_to_ptr.vmem [resolvable:$true] %s103_s16 }
  0x38   :  { %s5903_s0 = smov [#allocation17]   ;;  %s5906_s10 = smov [#allocation26]  }
  0x39   :  { %s74_s8 = sshll.u32 %s8133_s13, 4  ;;  %s151_s13 = sshll.u32 %s7990_s11, 4  ;;  %s75_s8 = int_to_ptr.hbm [resolvable:$true] %s74_s8  ;;  %s152_s13 = int_to_ptr.hbm [resolvable:$true] %s151_s13 }
  0x3a   :  { %82 = dma.hbm_to_vmem [thread:$0]  %s75_s8, 4096, %s77_s25, [#allocation10], %s5889_s7, %s5889_s7, %s5890_s28  }
  0x3b   :  { %s101_s2 = sshll.u32 %s8134_s5, 4  ;;  %s126_s6 = sshll.u32 %s5903_s0, 4  ;;  %s102_s2 = int_to_ptr.hbm [resolvable:$true] %s101_s2  ;;  %s127_s6 = int_to_ptr.vmem [resolvable:$true] %s126_s6 }
  0x3c   :  { %106 = dma.hbm_to_vmem [thread:$0]  %s102_s2, 32, %s104_s16, [#allocation13]  }
  0x3d   :  { %s124_s3 = sshll.u32 %s8135_s27, 4  ;;  %s5904_s7 = smov [#allocation20]   ;;  %s125_s3 = int_to_ptr.hbm [resolvable:$true] %s124_s3 }
  0x3e   :  { %132 = dma.hbm_to_vmem [thread:$0]  %s125_s3, 1024, %s127_s6, [#allocation16], %s5893_s26, %s5893_s26, %s5894_s22  }
  0x3f   :  { %s153_s8 = sshll.u32 %s5904_s7, 4  ;;  %s174_s5 = sshll.u32 %s7993_s14, 4  ;;  %s154_s8 = int_to_ptr.vmem [resolvable:$true] %s153_s8  ;;  %s175_s5 = int_to_ptr.hbm [resolvable:$true] %s174_s5 }
  0x40   :  { %156 = dma.hbm_to_vmem [thread:$0]  %s152_s13, 16, %s154_s8, [#allocation19]  }
  0x41   :  { %s203_s11 = sshll.u32 %s7997_s18, 4  ;;  %s5905_s16 = smov [#allocation23]   ;;  %s204_s11 = int_to_ptr.hbm [resolvable:$true] %s203_s11 }
  0x42   :  { %s176_s1 = sshll.u32 %s5905_s16, 4  ;;  %s205_s27 = sshll.u32 %s5906_s10, 4  ;;  %s177_s1 = int_to_ptr.vmem [resolvable:$true] %s176_s1  ;;  %s206_s27 = int_to_ptr.vmem [resolvable:$true] %s205_s27 }
  0x43   :  { %182 = dma.hbm_to_vmem [thread:$0]  %s175_s5, 512, %s177_s1, [#allocation22], %s5893_s26, %s5893_s26, %s5894_s22  }
  0x44   :  { %s231_s14 = sshll.u32 %s8002_s23, 4  ;;  %s242_s18 = sshll.u32 %s8003_s24, 4  ;;  %s232_s14 = int_to_ptr.hbm [resolvable:$true] %s231_s14  ;;  %s243_s18 = int_to_ptr.hbm [resolvable:$true] %s242_s18 }
  0x45   :  { %208 = dma.hbm_to_vmem [thread:$0]  %s204_s11, 16, %s206_s27, [#allocation25]  }
  0x46   :  { %s5907_s0 = smov [#allocation29]   ;;  %s5908_s7 = smov [#allocation30]  }
  0x47   :  { %s233_s6 = sshll.u32 %s5907_s0, 4  ;;  %s244_s26 = sshll.u32 %s5908_s7, 4  ;;  %s234_s6 = int_to_ptr.vmem [resolvable:$true] %s233_s6  ;;  %s245_s26 = int_to_ptr.vmem [resolvable:$true] %s244_s26 }
  0x48   :  { %236 = dma.hbm_to_vmem [thread:$0]  %s232_s14, 16, %s234_s6, [#allocation28]  }
  0x49   :  { %247 = dma.hbm_to_vmem [thread:$0]  %s243_s18, 16, %s245_s26, [#allocation31]  }
  0x4a   :  { %5869 = dma.done.wait [#allocation8], 8192  }
  0x4b   :  { %5870 = vsyncadd [#allocation8], 4294959104 }
  0x4c   :  { %5871 = dma.done.wait [#allocation10], 4160  }
  0x4d   :  { %5872 = vsyncadd [#allocation10], 4294963136 }
  0x4e   :  { %5873 = dma.done.wait [#allocation13], 2080  }
  0x4f   :  { %5874 = vsyncadd [#allocation13], 4294965216 }
  0x50   :  { %5875 = dma.done.wait [#allocation16], 1040  }
  0x51   :  { %5876 = vsyncadd [#allocation16], 4294966256 }
  0x52   :  { %5877 = dma.done.wait [#allocation19], 528  }
  0x53   :  { %5878 = vsyncadd [#allocation19], 4294966768 }
  0x54   :  { %5879 = dma.done.wait [#allocation22], 528  }
  0x55   :  { %5880 = vsyncadd [#allocation22], 4294966768 }
  0x56   :  { %5881 = dma.done.wait [#allocation25], 32  }
  0x57   :  { %5882 = vsyncadd [#allocation25], 4294967264 }
  0x58   :  { %5883 = dma.done.wait [#allocation28], 32  }
  0x59   :  { %5884 = vsyncadd [#allocation28], 4294967264 }
  0x5a   :  { %5885 = dma.done.wait [#allocation31], 16  }
  0x5b   :  { %5886 = vsyncadd [#allocation31], 4294967280  ;;  %s8136_s8 = sld [smem:[#allocation77_spill]]  ;;  %v6201_v29 = vld [vmem:[#allocation7 + $0x1f0] sm:$0xff]  ;;  %v6203_v30 = vld [vmem:[#allocation7 + $0x1f8] sm:$0xff]  ;;  %vm453_vm0 = vcmask 523264  }
  0x5c   :  { %v6211_v33 = vld [vmem:[#allocation7 + $0x1d0] sm:$0xff]  ;;  %v6213_v34 = vld [vmem:[#allocation7 + $0x1d8] sm:$0xff]  ;;  %v6227_v39 = vld [vmem:[#allocation7 + $0x1e8] sm:$0xff]  ;;  %s8137_s26 = sld [smem:[#allocation76_spill]]  ;;  %vm564_vm1 = vcmask 1041408   ;;  %vm570_vm2 = vcmask 1043458  }
  0x5d   :  { %v6223_v37 = vld [vmem:[#allocation7 + $0x1b0] sm:$0xff]  ;;  %v6225_v38 = vld [vmem:[#allocation7 + $0x1b8] sm:$0xff]  ;;  %v6235_v42 = vld [vmem:[#allocation7 + $0x1e0] sm:$0xff]  ;;  %vm572_vm3 = vcmask 1045504   ;;  %vm566_vm4 = vcmask 1045508   ;;  %vm568_vm5 = vcmask 1043456  }
  0x5e   :  { %v6231_v40 = vld [vmem:[#allocation7 + $0x190] sm:$0xff]  ;;  %v6233_v41 = vld [vmem:[#allocation7 + $0x198] sm:$0xff]  ;;  %v6248_v46 = vld [vmem:[#allocation7 + $0x1c8] sm:$0xff]  ;;  %vm574_vm6 = vcmask 1045506   ;;  %s8284_s13 = sld [smem:[#allocation83_spill]] }
  0x5f   :  { %v6250_v47 = vld [vmem:[#allocation7 + $0x1c0] sm:$0xff]  ;;  %v6257_v49 = vld [vmem:[#allocation7 + $0x170] sm:$0xff]  ;;  %v6259_v50 = vld [vmem:[#allocation7 + $0x178] sm:$0xff]  ;;  %s8289_s21 = sld [smem:[#allocation87_spill]] }
  0x60   :  { %v6263_v51 = vld [vmem:[#allocation7 + $0x1a8] sm:$0xff]  ;;  %v6265_v52 = vld [vmem:[#allocation7 + $0x1a0] sm:$0xff]  ;;  %v6269_v53 = vld [vmem:[#allocation7 + $0x150] sm:$0xff]  ;;  %s8290_s18 = sld [smem:[#allocation88_spill]] }
  0x61   :  { %v352_v1 = vld [vmem:[%s8136_s8 + $0xf0] sm:$0xff]  ;;  %v353_v2 = vld [vmem:[%s8136_s8 + $0xf8] sm:$0xff]  ;;  %v351_v7 = vld [vmem:[%s8136_s8 + $0xe8] sm:$0xff] }
  0x62   :  { %v348_v3 = vld [vmem:[%s8136_s8 + $0xd0] sm:$0xff]  ;;  %512 = vmatpush.msra.mxu2 %v352_v1  ;;  %535 = vmatpush.msra.mxu3 %v353_v2  ;;  %v349_v4 = vld [vmem:[%s8136_s8 + $0xd8] sm:$0xff]  ;;  %v350_v8 = vld [vmem:[%s8136_s8 + $0xe0] sm:$0xff] }
  0x63   :  { %v344_v5 = vld [vmem:[%s8136_s8 + $0xb0] sm:$0xff]  ;;  %v345_v6 = vld [vmem:[%s8136_s8 + $0xb8] sm:$0xff]  ;;  %v347_v9 = vld [vmem:[%s8136_s8 + $0xc8] sm:$0xff]  ;;  %489 = vmatpush.msra.mxu1 %v351_v7  ;;  %466 = vmatpush.msra.mxu0 %v350_v8 }
  0x64   :  { %513 = vmatpush.msra.mxu2 %v348_v3  ;;  %536 = vmatpush.msra.mxu3 %v349_v4  ;;  %v340_v10 = vld [vmem:[%s8136_s8 + $0x90] sm:$0xff]  ;;  %v341_v11 = vld [vmem:[%s8136_s8 + $0x98] sm:$0xff]  ;;  %v346_v12 = vld [vmem:[%s8136_s8 + $0xc0] sm:$0xff] }
  0x65   :  { %v343_v13 = vld [vmem:[%s8136_s8 + $0xa8] sm:$0xff]  ;;  %v342_v14 = vld [vmem:[%s8136_s8 + $0xa0] sm:$0xff]  ;;  %490 = vmatpush.msra.mxu1 %v347_v9  ;;  %v336_v15 = vld [vmem:[%s8136_s8 + $0x70] sm:$0xff]  ;;  %467 = vmatpush.msra.mxu0 %v346_v12 }
  0x66   :  { %514 = vmatpush.msra.mxu2 %v344_v5  ;;  %537 = vmatpush.msra.mxu3 %v345_v6  ;;  %v337_v16 = vld [vmem:[%s8136_s8 + $0x78] sm:$0xff]  ;;  %v339_v17 = vld [vmem:[%s8136_s8 + $0x88] sm:$0xff]  ;;  %v338_v18 = vld [vmem:[%s8136_s8 + $0x80] sm:$0xff] }
  0x67   :  { %491 = vmatpush.msra.mxu1 %v343_v13  ;;  %v332_v19 = vld [vmem:[%s8136_s8 + $0x50] sm:$0xff]  ;;  %v333_v20 = vld [vmem:[%s8136_s8 + $0x58] sm:$0xff]  ;;  %468 = vmatpush.msra.mxu0 %v342_v14  ;;  %v335_v21 = vld [vmem:[%s8136_s8 + $0x68] sm:$0xff] }
  0x68   :  { %515 = vmatpush.msra.mxu2 %v340_v10  ;;  %538 = vmatpush.msra.mxu3 %v341_v11  ;;  %v334_v22 = vld [vmem:[%s8136_s8 + $0x60] sm:$0xff]  ;;  %v328_v23 = vld [vmem:[%s8136_s8 + $0x30] sm:$0xff]  ;;  %v329_v24 = vld [vmem:[%s8136_s8 + $0x38] sm:$0xff] }
  0x69   :  { %492 = vmatpush.msra.mxu1 %v339_v17  ;;  %469 = vmatpush.msra.mxu0 %v338_v18  ;;  %v331_v25 = vld [vmem:[%s8136_s8 + $0x48] sm:$0xff]  ;;  %v330_v26 = vld [vmem:[%s8136_s8 + $0x40] sm:$0xff]  ;;  %v324_v27 = vld [vmem:[%s8136_s8 + $0x10] sm:$0xff] }
  0x6a   :  { %516 = vmatpush.msra.mxu2 %v336_v15  ;;  %539 = vmatpush.msra.mxu3 %v337_v16  ;;  %v325_v28 = vld [vmem:[%s8136_s8 + $0x18] sm:$0xff]  ;;  %v327_v31 = vld [vmem:[%s8136_s8 + $0x28] sm:$0xff]  ;;  %v326_v32 = vld [vmem:[%s8136_s8 + $0x20] sm:$0xff] }
  0x6b   :  { %493 = vmatpush.msra.mxu1 %v335_v21  ;;  %470 = vmatpush.msra.mxu0 %v334_v22  ;;  %v323_v35 = vld [vmem:[%s8136_s8 + $0x8] sm:$0xff]  ;;  %v322_v36 = vld [vmem:[%s8136_s8] sm:$0xff]  ;;  %v6275_v55 = vld [vmem:[#allocation7 + $0x188] sm:$0xff] }
  0x6c   :  { %517 = vmatpush.msra.mxu2 %v332_v19  ;;  %540 = vmatpush.msra.mxu3 %v333_v20  ;;  %v314_v43 = vld [vmem:[%s8137_s26] sm:$0x3]  ;;  %v315_v44 = vld [vmem:[%s8137_s26 + $0x2] sm:$0x3]  ;;  %v316_v45 = vld [vmem:[%s8137_s26 + $0x4] sm:$0x3] }
  0x6d   :  { %494 = vmatpush.msra.mxu1 %v331_v25  ;;  %471 = vmatpush.msra.mxu0 %v330_v26  ;;  %v317_v48 = vld [vmem:[%s8137_s26 + $0x6] sm:$0x3]  ;;  %436 = vst [vmem:[#allocation1] ss:$4 sm:$0xff] %v314_v43  ;;  %v6277_v56 = vld [vmem:[#allocation7 + $0x130] sm:$0xff]  ;;  %v6279_v57 = vld [vmem:[#allocation7 + $0x180] sm:$0xff] }
  0x6e   :  { %518 = vmatpush.msra.mxu2 %v328_v23  ;;  %541 = vmatpush.msra.mxu3 %v329_v24  ;;  %438 = vst [vmem:[#allocation1 + $0x1] ss:$4 sm:$0xff] %v315_v44  ;;  %v6271_v54 = vld [vmem:[#allocation7 + $0x158] sm:$0xff]  ;;  %v6285_v59 = vld [vmem:[#allocation7 + $0x168] sm:$0xff]  ;;  %v6292_v61 = vld [vmem:[#allocation7 + $0x160] sm:$0xff] }
  0x6f   :  { %495 = vmatpush.msra.mxu1 %v327_v31  ;;  %472 = vmatpush.msra.mxu0 %v326_v32  ;;  %440 = vst [vmem:[#allocation1 + $0x2] ss:$4 sm:$0xff] %v316_v45  ;;  %v6283_v58 = vld [vmem:[#allocation7 + $0x138] sm:$0xff]  ;;  %v319_v62 = vld [vmem:[%s8137_s26 + $0xa] sm:$0x3]  ;;  %v6302_v0 = vld [vmem:[#allocation7 + $0x110] sm:$0xff] }
  0x70   :  { %519 = vmatpush.msra.mxu2 %v324_v27  ;;  %542 = vmatpush.msra.mxu3 %v325_v28  ;;  %442 = vst [vmem:[#allocation1 + $0x3] ss:$4 sm:$0xff] %v317_v48  ;;  %v318_v60 = vld [vmem:[%s8137_s26 + $0x8] sm:$0x3]  ;;  %v320_v63 = vld [vmem:[%s8137_s26 + $0xc] sm:$0x3] }
  0x71   :  { %496 = vmatpush.msra.mxu1 %v323_v35  ;;  %473 = vmatpush.msra.mxu0 %v322_v36  ;;  %v6304_v1 = vld [vmem:[#allocation7 + $0x118] sm:$0xff]  ;;  %v321_v2 = vld [vmem:[%s8137_s26 + $0xe] sm:$0x3]  ;;  %444 = vst [vmem:[#allocation1 + $0x20] ss:$4 sm:$0xff] %v318_v60  ;;  %v6313_v3 = vld [vmem:[#allocation7 + $0x148] sm:$0xff] }
  0x72   :  { %648 = vmatpush.msrb.mxu2 %v6201_v29  ;;  %668 = vmatpush.msrb.mxu3 %v6203_v30  ;;  %446 = vst [vmem:[#allocation1 + $0x21] ss:$4 sm:$0xff] %v319_v62  ;;  %v6315_v4 = vld [vmem:[#allocation7 + $0xf0] sm:$0xff]  ;;  %v6317_v5 = vld [vmem:[#allocation7 + $0xf8] sm:$0xff]  ;;  %v6321_v7 = vld [vmem:[#allocation7 + $0x140] sm:$0xff]  ;;  %v8012_v62 = vmov 0.0  }
  0x73   :  { %628 = vmatpush.msrb.mxu1 %v6227_v39  ;;  %608 = vmatpush.msrb.mxu0 %v6235_v42  ;;  %448 = vst [vmem:[#allocation1 + $0x22] ss:$4 sm:$0xff] %v320_v63  ;;  %v6325_v8 = vld [vmem:[#allocation7 + $0x128] sm:$0xff]  ;;  %v6327_v9 = vld [vmem:[#allocation7 + $0xd0] sm:$0xff]  ;;  %v6331_v10 = vld [vmem:[#allocation7 + $0xd8] sm:$0xff] }
  0x74   :  { %649 = vmatpush.msrb.mxu2 %v6211_v33  ;;  %669 = vmatpush.msrb.mxu3 %v6213_v34  ;;  %450 = vst [vmem:[#allocation1 + $0x23] ss:$4 sm:$0xff] %v321_v2  ;;  %v6333_v11 = vld [vmem:[#allocation7 + $0x120] sm:$0xff]  ;;  %v6337_v12 = vld [vmem:[#allocation7 + $0x108] sm:$0xff]  ;;  %v6339_v13 = vld [vmem:[#allocation7 + $0xb0] sm:$0xff] }
  0x75   :  { %629 = vmatpush.msrb.mxu1 %v6248_v46  ;;  %609 = vmatpush.msrb.mxu0 %v6250_v47  ;;  %8138 = vst [vmem:[#allocation41_spill] sm:$0xff] %v6327_v9  ;;  %v6343_v14 = vld [vmem:[#allocation7 + $0xb8] sm:$0xff]  ;;  %v6345_v15 = vld [vmem:[#allocation7 + $0x100] sm:$0xff]  ;;  %v6347_v16 = vld [vmem:[#allocation7 + $0xe8] sm:$0xff] }
  0x76   :  { %650 = vmatpush.msrb.mxu2 %v6223_v37  ;;  %670 = vmatpush.msrb.mxu3 %v6225_v38  ;;  %8139 = vst [vmem:[#allocation42_spill] sm:$0xff] %v6331_v10  ;;  %v6351_v17 = vld [vmem:[#allocation7 + $0x90] sm:$0xff]  ;;  %v6353_v18 = vld [vmem:[#allocation7 + $0x98] sm:$0xff]  ;;  %v6357_v19 = vld [vmem:[#allocation7 + $0xe0] sm:$0xff] }
  0x77   :  { %630 = vmatpush.msrb.mxu1 %v6263_v51  ;;  %610 = vmatpush.msrb.mxu0 %v6265_v52  ;;  %v451_v6 = vld.sshfl [vmem:[#allocation1] sm:$0xff pattern:$0x73625140]  ;;  %8140 = vst [vmem:[#allocation43_spill] sm:$0xff] %v6339_v13  ;;  %v6361_v21 = vld [vmem:[#allocation7 + $0xc8] sm:$0xff]  ;;  %v6373_v24 = vld [vmem:[#allocation7 + $0xc0] sm:$0xff] }
  0x78   :  { %651 = vmatpush.msrb.mxu2 %v6231_v40  ;;  %671 = vmatpush.msrb.mxu3 %v6233_v41  ;;  %8141 = vst [vmem:[#allocation44_spill] sm:$0xff] %v6343_v14  ;;  %v6367_v22 = vld [vmem:[#allocation7 + $0x70] sm:$0xff]  ;;  %v6371_v23 = vld [vmem:[#allocation7 + $0x78] sm:$0xff]  ;;  %v6377_v25 = vld [vmem:[#allocation7 + $0xa8] sm:$0xff] }
  0x79   :  { %631 = vmatpush.msrb.mxu1 %v6275_v55  ;;  %611 = vmatpush.msrb.mxu0 %v6279_v57  ;;  %8142 = vst [vmem:[#allocation45_spill] sm:$0xff] %v6351_v17  ;;  %v6379_v26 = vld [vmem:[#allocation7 + $0x50] sm:$0xff]  ;;  %v6383_v27 = vld [vmem:[#allocation7 + $0x58] sm:$0xff]  ;;  %v6385_v28 = vld [vmem:[#allocation7 + $0xa0] sm:$0xff] }
  0x7a   :  { %652 = vmatpush.msrb.mxu2 %v6257_v49  ;;  %672 = vmatpush.msrb.mxu3 %v6259_v50  ;;  %8143 = vst [vmem:[#allocation46_spill] sm:$0xff] %v6353_v18  ;;  %v6389_v31 = vld [vmem:[#allocation7 + $0x88] sm:$0xff]  ;;  %v6391_v32 = vld [vmem:[#allocation7 + $0x30] sm:$0xff]  ;;  %v6395_v35 = vld [vmem:[#allocation7 + $0x38] sm:$0xff] }
  0x7b   :  { %632 = vmatpush.msrb.mxu1 %v6285_v59  ;;  %612 = vmatpush.msrb.mxu0 %v6292_v61  ;;  %v452_v20 = vld.sshfl [vmem:[#allocation1 + $0x20] sm:$0xff pattern:$0x73625140]  ;;  %8144 = vst [vmem:[#allocation47_spill] sm:$0xff] %v6361_v21  ;;  %v6399_v36 = vld [vmem:[#allocation7 + $0x80] sm:$0xff]  ;;  %v6401_v43 = vld [vmem:[#allocation7 + $0x68] sm:$0xff] }
  0x7c   :  { %653 = vmatpush.msrb.mxu2 %v6269_v53  ;;  %673 = vmatpush.msrb.mxu3 %v6271_v54  ;;  %8145 = vst [vmem:[#allocation48_spill] sm:$0xff] %v6367_v22  ;;  %v6405_v44 = vld [vmem:[#allocation7 + $0x10] sm:$0xff]  ;;  %v6407_v45 = vld [vmem:[#allocation7 + $0x18] sm:$0xff]  ;;  %v6413_v48 = vld [vmem:[#allocation7 + $0x60] sm:$0xff] }
  0x7d   :  { %4939 = vmatmul.msk.f32.vlgmr.msra.gmra.mxu2 %vm453_vm0, %v451_v6  ;;  %4941 = vmatmul.msk.f32.vlgmr.msra.gmra.mxu3 %vm453_vm0, %v451_v6  ;;  %8146 = vst [vmem:[#allocation49_spill] sm:$0xff] %v6371_v23  ;;  %v6417_v60 = vld [vmem:[#allocation7 + $0x48] sm:$0xff]  ;;  %v6421_v63 = vld [vmem:[#allocation7 + $0x40] sm:$0xff] }
  0x7e   :  { %654 = vmatpush.msrb.mxu2 %v6277_v56  ;;  %674 = vmatpush.msrb.mxu3 %v6283_v58  ;;  %8147 = vst [vmem:[#allocation50_spill] sm:$0xff] %v6373_v24  ;;  %v6425_v2 = vld [vmem:[#allocation7 + $0x28] sm:$0xff] }
  0x7f   :  { %633 = vmatpush.msrb.mxu1 %v6313_v3  ;;  %613 = vmatpush.msrb.mxu0 %v6321_v7  ;;  %8148 = vst [vmem:[#allocation51_spill] sm:$0xff] %v6377_v25 }
  0x80   :  { %655 = vmatpush.msrb.mxu2 %v6302_v0  ;;  %675 = vmatpush.msrb.mxu3 %v6304_v1  ;;  %8149 = vst [vmem:[#allocation52_spill] sm:$0xff] %v6379_v26 }
  0x81   :  { %634 = vmatpush.msrb.mxu1 %v6325_v8  ;;  %614 = vmatpush.msrb.mxu0 %v6333_v11  ;;  %8150 = vst [vmem:[#allocation53_spill] sm:$0xff] %v6383_v27 }
  0x82   :  { %656 = vmatpush.msrb.mxu2 %v6315_v4  ;;  %676 = vmatpush.msrb.mxu3 %v6317_v5  ;;  %8151 = vst [vmem:[#allocation54_spill] sm:$0xff] %v6385_v28 }
  0x83   :  { %635 = vmatpush.msrb.mxu1 %v6337_v12  ;;  %615 = vmatpush.msrb.mxu0 %v6345_v15  ;;  %8152 = vst [vmem:[#allocation55_spill] sm:$0xff] %v6389_v31 }
  0x84   :  { %657 = vmatpush.msrb.mxu2 %v6327_v9  ;;  %677 = vmatpush.msrb.mxu3 %v6331_v10  ;;  %8153 = vst [vmem:[#allocation56_spill] sm:$0xff] %v6391_v32 }
  0x85   :  { %4937 = vmatmul.msk.f32.vlgmr.msra.gmra.mxu1 %vm453_vm0, %v451_v6  ;;  %4935 = vmatmul.msk.f32.vlgmr.msra.gmra.mxu0 %vm453_vm0, %v451_v6  ;;  %8154 = vst [vmem:[#allocation57_spill] sm:$0xff] %v6395_v35  ;;  %v6428_v6 = vld [vmem:[#allocation7 + $0x20] sm:$0xff] }
  0x86   :  { %658 = vmatpush.msrb.mxu2 %v6339_v13  ;;  %678 = vmatpush.msrb.mxu3 %v6343_v14  ;;  %8155 = vst [vmem:[#allocation58_spill] sm:$0xff] %v6399_v36 }
  0x87   :  { %636 = vmatpush.msrb.mxu1 %v6347_v16  ;;  %4940 = vmatmul.msk.f32.gmra.mxu2 %vm453_vm0, %v452_v20  ;;  %8156 = vst [vmem:[#allocation59_spill] sm:$0xff] %v6401_v43 }
  0x88   :  { %659 = vmatpush.msrb.mxu2 %v6351_v17  ;;  %679 = vmatpush.msrb.mxu3 %v6353_v18  ;;  %8157 = vst [vmem:[#allocation60_spill] sm:$0xff] %v6405_v44 }
  0x89   :  { %4942 = vmatmul.msk.f32.gmra.mxu3 %vm453_vm0, %v452_v20  ;;  %616 = vmatpush.msrb.mxu0 %v6357_v19  ;;  %8158 = vst [vmem:[#allocation61_spill] sm:$0xff] %v6407_v45 }
  0x8a   :  { %637 = vmatpush.msrb.mxu1 %v6361_v21  ;;  %660 = vmatpush.msrb.mxu2 %v6367_v22  ;;  %8159 = vst [vmem:[#allocation62_spill] sm:$0xff] %v6413_v48 }
  0x8b   :  { %680 = vmatpush.msrb.mxu3 %v6371_v23  ;;  %617 = vmatpush.msrb.mxu0 %v6373_v24  ;;  %8160 = vst [vmem:[#allocation63_spill] sm:$0xff] %v6417_v60 }
  0x8c   :  { %638 = vmatpush.msrb.mxu1 %v6377_v25  ;;  %661 = vmatpush.msrb.mxu2 %v6379_v26  ;;  %8161 = vst [vmem:[#allocation64_spill] sm:$0xff] %v6421_v63 }
  0x8d   :  { %681 = vmatpush.msrb.mxu3 %v6383_v27  ;;  %618 = vmatpush.msrb.mxu0 %v6385_v28  ;;  %8162 = vst [vmem:[#allocation65_spill] sm:$0xff] %v6425_v2 }
  0x8e   :  { %639 = vmatpush.msrb.mxu1 %v6389_v31  ;;  %662 = vmatpush.msrb.mxu2 %v6391_v32  ;;  %8163 = vst [vmem:[#allocation66_spill] sm:$0xff] %v6428_v6 }
  0x8f   :  { %682 = vmatpush.msrb.mxu3 %v6395_v35  ;;  %4938 = vmatmul.msk.f32.gmra.mxu1 %vm453_vm0, %v452_v20 }
  0x90   :  { %619 = vmatpush.msrb.mxu0 %v6399_v36  ;;  %640 = vmatpush.msrb.mxu1 %v6401_v43 }
  0x91   :  { %663 = vmatpush.msrb.mxu2 %v6405_v44  ;;  %683 = vmatpush.msrb.mxu3 %v6407_v45  ;;  %v6436_v45 = vld [vmem:[#allocation7] sm:$0xff] }
  0x92   :  { %4936 = vmatmul.msk.f32.gmra.mxu0 %vm453_vm0, %v452_v20  ;;  %664 = vmatmul.f32.vlgmr.msrb.gmra.mxu2 %v8012_v62  ;;  %v6432_v20 = vld [vmem:[#allocation7 + $0x8] sm:$0xff]  ;;  %8165 = vst [vmem:[#allocation68_spill] sm:$0xff] %v6436_v45 }
  0x93   :  { %684 = vmatmul.f32.vlgmr.msrb.gmra.mxu3 %v8012_v62  ;;  %620 = vmatpush.msrb.mxu0 %v6413_v48  ;;  %8164 = vst [vmem:[#allocation67_spill] sm:$0xff] %v6432_v20 }
  0x94   :  { %641 = vmatpush.msrb.mxu1 %v6417_v60  ;;  %774 = vmatpush.msra.mxu2 %v6201_v29 }
  0x95   :  { %621 = vmatpush.msrb.mxu0 %v6421_v63  ;;  %794 = vmatpush.msra.mxu3 %v6203_v30 }
  0x96   :  { %642 = vmatpush.msrb.mxu1 %v6425_v2  ;;  %775 = vmatpush.msra.mxu2 %v6211_v33 }
  0x97   :  { %622 = vmatpush.msrb.mxu0 %v6428_v6  ;;  %795 = vmatpush.msra.mxu3 %v6213_v34 }
  0x98   :  { %643 = vmatpush.msrb.mxu1 %v6432_v20  ;;  %776 = vmatpush.msra.mxu2 %v6223_v37 }
  0x99   :  { %644 = vmatmul.f32.vlgmr.msrb.gmra.mxu1 %v8012_v62  ;;  %623 = vmatpush.msrb.mxu0 %v6436_v45 }
  0x9a   :  { %624 = vmatmul.f32.vlgmr.msrb.gmra.mxu0 %v8012_v62  ;;  %754 = vmatpush.msra.mxu1 %v6227_v39  ;;  %v8166_v62 = vld [vmem:[#allocation61_spill] sm:$0xff] }
  0x9b   :  { %734 = vmatpush.msra.mxu0 %v6235_v42  ;;  %796 = vmatpush.msra.mxu3 %v6225_v38 }
  0x9c   :  { %755 = vmatpush.msra.mxu1 %v6248_v46  ;;  %777 = vmatpush.msra.mxu2 %v6231_v40 }
  0x9d   :  { %735 = vmatpush.msra.mxu0 %v6250_v47  ;;  %797 = vmatpush.msra.mxu3 %v6233_v41 }
  0x9e   :  { %756 = vmatpush.msra.mxu1 %v6263_v51  ;;  %778 = vmatpush.msra.mxu2 %v6257_v49 }
  0x9f   :  { %736 = vmatpush.msra.mxu0 %v6265_v52  ;;  %798 = vmatpush.msra.mxu3 %v6259_v50 }
  0xa0   :  { %757 = vmatpush.msra.mxu1 %v6275_v55  ;;  %779 = vmatpush.msra.mxu2 %v6269_v53 }
  0xa1   :  { %737 = vmatpush.msra.mxu0 %v6279_v57  ;;  %799 = vmatpush.msra.mxu3 %v6271_v54 }
  0xa2   :  { %758 = vmatpush.msra.mxu1 %v6285_v59  ;;  %780 = vmatpush.msra.mxu2 %v6277_v56 }
  0xa3   :  { %738 = vmatpush.msra.mxu0 %v6292_v61  ;;  %800 = vmatpush.msra.mxu3 %v6283_v58 }
  0xa4   :  { %759 = vmatpush.msra.mxu1 %v6313_v3  ;;  %781 = vmatpush.msra.mxu2 %v6302_v0 }
  0xa5   :  { %739 = vmatpush.msra.mxu0 %v6321_v7  ;;  %801 = vmatpush.msra.mxu3 %v6304_v1 }
  0xa6   :  { %760 = vmatpush.msra.mxu1 %v6325_v8  ;;  %782 = vmatpush.msra.mxu2 %v6315_v4 }
  0xa7   :  { %740 = vmatpush.msra.mxu0 %v6333_v11  ;;  %802 = vmatpush.msra.mxu3 %v6317_v5 }
  0xa8   :  { %761 = vmatpush.msra.mxu1 %v6337_v12  ;;  %783 = vmatpush.msra.mxu2 %v6327_v9 }
  0xa9   :  { %741 = vmatpush.msra.mxu0 %v6345_v15  ;;  %803 = vmatpush.msra.mxu3 %v6331_v10 }
  0xaa   :  { %762 = vmatpush.msra.mxu1 %v6347_v16  ;;  %784 = vmatpush.msra.mxu2 %v6339_v13 }
  0xab   :  { %742 = vmatpush.msra.mxu0 %v6357_v19  ;;  %804 = vmatpush.msra.mxu3 %v6343_v14 }
  0xac   :  { %763 = vmatpush.msra.mxu1 %v6361_v21  ;;  %785 = vmatpush.msra.mxu2 %v6351_v17 }
  0xad   :  { %743 = vmatpush.msra.mxu0 %v6373_v24  ;;  %805 = vmatpush.msra.mxu3 %v6353_v18 }
  0xae   :  { %764 = vmatpush.msra.mxu1 %v6377_v25  ;;  %786 = vmatpush.msra.mxu2 %v6367_v22 }
  0xaf   :  { %744 = vmatpush.msra.mxu0 %v6385_v28  ;;  %806 = vmatpush.msra.mxu3 %v6371_v23 }
  0xb0   :  { %765 = vmatpush.msra.mxu1 %v6389_v31  ;;  %787 = vmatpush.msra.mxu2 %v6379_v26 }
  0xb1   :  { %745 = vmatpush.msra.mxu0 %v6399_v36  ;;  %807 = vmatpush.msra.mxu3 %v6383_v27 }
  0xb2   :  { %766 = vmatpush.msra.mxu1 %v6401_v43  ;;  %788 = vmatpush.msra.mxu2 %v6391_v32 }
  0xb3   :  { %746 = vmatpush.msra.mxu0 %v6413_v48  ;;  %808 = vmatpush.msra.mxu3 %v6395_v35 }
  0xb4   :  { %767 = vmatpush.msra.mxu1 %v6417_v60  ;;  %789 = vmatpush.msra.mxu2 %v6405_v44 }
  0xb5   :  { %747 = vmatpush.msra.mxu0 %v6421_v63  ;;  %809 = vmatpush.msra.mxu3 %v8166_v62 }
  0xb6   :  { %768 = vmatpush.msra.mxu1 %v6425_v2  ;;  %901 = vmatpush.msrb.mxu2 %v6201_v29 }
  0xb7   :  { %748 = vmatpush.msra.mxu0 %v6428_v6  ;;  %921 = vmatpush.msrb.mxu3 %v6203_v30 }
  0xb8   :  { %769 = vmatpush.msra.mxu1 %v6432_v20  ;;  %902 = vmatpush.msrb.mxu2 %v6211_v33 }
  0xb9   :  { %749 = vmatpush.msra.mxu0 %v6436_v45  ;;  %922 = vmatpush.msrb.mxu3 %v6213_v34 }
  0xba   :  { %881 = vmatpush.msrb.mxu1 %v6227_v39  ;;  %903 = vmatpush.msrb.mxu2 %v6223_v37 }
  0xbb   :  { %861 = vmatpush.msrb.mxu0 %v6235_v42  ;;  %923 = vmatpush.msrb.mxu3 %v6225_v38 }
  0xbc   :  { %882 = vmatpush.msrb.mxu1 %v6248_v46  ;;  %904 = vmatpush.msrb.mxu2 %v6231_v40 }
  0xbd   :  { %862 = vmatpush.msrb.mxu0 %v6250_v47  ;;  %924 = vmatpush.msrb.mxu3 %v6233_v41 }
  0xbe   :  { %883 = vmatpush.msrb.mxu1 %v6263_v51  ;;  %905 = vmatpush.msrb.mxu2 %v6257_v49 }
  0xbf   :  { %863 = vmatpush.msrb.mxu0 %v6265_v52  ;;  %925 = vmatpush.msrb.mxu3 %v6259_v50 }
  0xc0   :  { %884 = vmatpush.msrb.mxu1 %v6275_v55  ;;  %906 = vmatpush.msrb.mxu2 %v6269_v53 }
  0xc1   :  { %864 = vmatpush.msrb.mxu0 %v6279_v57  ;;  %926 = vmatpush.msrb.mxu3 %v6271_v54 }
  0xc2   :  { %885 = vmatpush.msrb.mxu1 %v6285_v59  ;;  %907 = vmatpush.msrb.mxu2 %v6277_v56 }
  0xc3   :  { %865 = vmatpush.msrb.mxu0 %v6292_v61  ;;  %927 = vmatpush.msrb.mxu3 %v6283_v58 }
  0xc4   :  { %886 = vmatpush.msrb.mxu1 %v6313_v3  ;;  %908 = vmatpush.msrb.mxu2 %v6302_v0 }
  0xc5   :  { %866 = vmatpush.msrb.mxu0 %v6321_v7  ;;  %928 = vmatpush.msrb.mxu3 %v6304_v1 }
  0xc6   :  { %887 = vmatpush.msrb.mxu1 %v6325_v8  ;;  %909 = vmatpush.msrb.mxu2 %v6315_v4 }
  0xc7   :  { %867 = vmatpush.msrb.mxu0 %v6333_v11  ;;  %929 = vmatpush.msrb.mxu3 %v6317_v5 }
  0xc8   :  { %888 = vmatpush.msrb.mxu1 %v6337_v12  ;;  %910 = vmatpush.msrb.mxu2 %v6327_v9 }
  0xc9   :  { %868 = vmatpush.msrb.mxu0 %v6345_v15  ;;  %930 = vmatpush.msrb.mxu3 %v6331_v10 }
  0xca   :  { %889 = vmatpush.msrb.mxu1 %v6347_v16  ;;  %911 = vmatpush.msrb.mxu2 %v6339_v13 }
  0xcb   :  { %869 = vmatpush.msrb.mxu0 %v6357_v19  ;;  %931 = vmatpush.msrb.mxu3 %v6343_v14 }
  0xcc   :  { %890 = vmatpush.msrb.mxu1 %v6361_v21  ;;  %912 = vmatpush.msrb.mxu2 %v6351_v17 }
  0xcd   :  { %870 = vmatpush.msrb.mxu0 %v6373_v24  ;;  %932 = vmatpush.msrb.mxu3 %v6353_v18 }
  0xce   :  { %891 = vmatpush.msrb.mxu1 %v6377_v25  ;;  %913 = vmatpush.msrb.mxu2 %v6367_v22 }
  0xcf   :  { %871 = vmatpush.msrb.mxu0 %v6385_v28  ;;  %933 = vmatpush.msrb.mxu3 %v6371_v23 }
  0xd0   :  { %892 = vmatpush.msrb.mxu1 %v6389_v31  ;;  %914 = vmatpush.msrb.mxu2 %v6379_v26 }
  0xd1   :  { %872 = vmatpush.msrb.mxu0 %v6399_v36  ;;  %934 = vmatpush.msrb.mxu3 %v6383_v27  ;;  %v418_v27 = vld [vmem:[#allocation9] sm:$0xf] }
  0xd2   :  { %893 = vmatpush.msrb.mxu1 %v6401_v43  ;;  %915 = vmatpush.msrb.mxu2 %v6391_v32  ;;  %v421_v26 = vperm.slane %v418_v27, 1  ;;  %v423_v32 = vperm.slane %v418_v27, 3  ;;  %v420_v22 = vperm.slane %v418_v27, 0 }
  0xd3   :  { %873 = vmatpush.msrb.mxu0 %v6413_v48  ;;  %935 = vmatpush.msrb.mxu3 %v6395_v35 }
  0xd4   :  { %894 = vmatpush.msrb.mxu1 %v6417_v60  ;;  %916 = vmatpush.msrb.mxu2 %v6405_v44  ;;  %v422_v60 = vperm.slane %v418_v27, 2 }
  0xd5   :  { %874 = vmatpush.msrb.mxu0 %v6421_v63  ;;  %936 = vmatpush.msrb.mxu3 %v8166_v62 }
  0xd6   :  { %895 = vmatpush.msrb.mxu1 %v6425_v2 }
  0xd7   :  { %875 = vmatpush.msrb.mxu0 %v6428_v6 }
  0xd8   :  { %896 = vmatpush.msrb.mxu1 %v6432_v20 }
  0xd9   :  { %876 = vmatpush.msrb.mxu0 %v6436_v45 }
 0x100   :  { %v521_v63 = vpop.f32.mrf.mxu2  ;;  %v544_v2 = vpop.f32.mrf.mxu3 }
 0x101   :  { %v522_v43 = vadd.f32 %v521_v63, %v422_v60  ;;  %v545_v48 = vadd.f32 %v544_v2, %v423_v32 }
 0x102   :  { %v498_v23 = vpop.f32.mrf.mxu1  ;;  %v475_v62 = vpop.f32.mrf.mxu0 }
 0x103   :  { %v499_v35 = vadd.f32 %v498_v23, %v421_v26  ;;  %v559_v6 = vrot.slane %v522_v43, 4  ;;  %v560_v20 = vrot.slane %v545_v48, 2  ;;  %v476_v18 = vadd.f32 %v475_v62, %v420_v22 }
 0x105   :  { %v558_v44 = vrot.slane %v499_v35, 6  ;;  %v573_v45 = vsel %vm572_vm3, %v560_v20, %v559_v6  ;;  %v578_v17 = vsel %vm564_vm1, %v559_v6, %v560_v20  ;;  %v582_v23 = vsel %vm570_vm2, %v559_v6, %v560_v20 }
 0x107   :  { %v571_v27 = vsel %vm570_vm2, %v476_v18, %v558_v44  ;;  %v577_v63 = vsel %vm566_vm4, %v476_v18, %v558_v44  ;;  %v581_v35 = vsel %vm572_vm3, %v558_v44, %v476_v18 }
 0x108   :  { %v6576_v43 = vsel %vm574_vm6, %v571_v27, %v573_v45  ;;  %v6579_v48 = vsel %vm568_vm5, %v578_v17, %v577_v63  ;;  %v6582_v62 = vsel %vm574_vm6, %v582_v23, %v581_v35 }
 0x109   :  { %8167 = vst [vmem:[#allocation69_spill] sm:$0xff] %v6579_v48 }
 0x10a   :  { %8168 = vst [vmem:[#allocation70_spill] sm:$0xff] %v6582_v62  ;;  %v524_v2 = vpop.f32.mrf.mxu2 }
 0x10b   :  { %v525_v36 = vadd.f32 %v524_v2, %v422_v60 }
 0x10c   :  { %v501_v31 = vpop.f32.mrf.mxu1  ;;  %v547_v14 = vpop.f32.mrf.mxu3 }
 0x10d   :  { %v502_v13 = vadd.f32 %v501_v31, %v421_v26  ;;  %v548_v25 = vadd.f32 %v547_v14, %v423_v32  ;;  %v562_v28 = vrot.slane %v525_v36, 4 }
 0x10f   :  { %v561_v10 = vrot.slane %v502_v13, 6  ;;  %v563_v9 = vrot.slane %v548_v25, 2  ;;  %v478_v21 = vpop.f32.mrf.mxu0 }
 0x110   :  { %v479_v24 = vadd.f32 %v478_v21, %v420_v22 }
 0x111   :  { %v586_v45 = vsel %vm566_vm4, %v562_v28, %v563_v9  ;;  %v589_v27 = vsel %vm572_vm3, %v563_v9, %v562_v28  ;;  %v593_v17 = vsel %vm564_vm1, %v562_v28, %v563_v9  ;;  %v597_v23 = vsel %vm570_vm2, %v562_v28, %v563_v9 }
 0x112   :  { %v585_v63 = vsel %vm564_vm1, %v479_v24, %v561_v10  ;;  %v588_v60 = vsel %vm570_vm2, %v479_v24, %v561_v10  ;;  %v592_v26 = vsel %vm566_vm4, %v479_v24, %v561_v10  ;;  %v596_v14 = vsel %vm572_vm3, %v561_v10, %v479_v24 }
 0x113   :  { %v6593_v13 = vsel %vm568_vm5, %v585_v63, %v586_v45  ;;  %v6596_v21 = vsel %vm574_vm6, %v588_v60, %v589_v27  ;;  %v6599_v22 = vsel %vm568_vm5, %v593_v17, %v592_v26  ;;  %v6602_v25 = vsel %vm574_vm6, %v597_v23, %v596_v14 }
 0x114   :  { %8169 = vst [vmem:[#allocation71_spill] sm:$0xff] %v6593_v13  ;;  %v565_v10 = vsel %vm564_vm1, %v476_v18, %v558_v44  ;;  %v567_v24 = vsel %vm566_vm4, %v559_v6, %v560_v20 }
 0x115   :  { %8170 = vst [vmem:[#allocation72_spill] sm:$0xff] %v6596_v21  ;;  %v665_v9 = vpop.f32.mrf.mxu2  ;;  %v569_v17 = vsel %vm568_vm5, %v565_v10, %v567_v24 }
 0x116   :  { %8171 = vst [vmem:[#allocation73_spill] sm:$0xff] %v6599_v22  ;;  %v645_v28 = vpop.f32.mrf.mxu1  ;;  %v693_v31 = vrot.slane %v665_v9, 4  ;;  %v685_v32 = vpop.f32.mrf.mxu3 }
 0x117   :  { %8172 = vst [vmem:[#allocation74_spill] sm:$0xff] %v6602_v25  ;;  %v692_v36 = vrot.slane %v645_v28, 6  ;;  %v694_v35 = vrot.slane %v685_v32, 2  ;;  %v625_v2 = vpop.f32.mrf.mxu0  ;;  %v8201_v25 = vld [vmem:[#allocation61_spill] sm:$0xff] }
 0x119   :  { %v696_v45 = vsel %vm566_vm4, %v693_v31, %v694_v35  ;;  %v695_v27 = vsel %vm564_vm1, %v625_v2, %v692_v36 }
 0x11a   :  { %v697_v23 = vsel %vm568_vm5, %v695_v27, %v696_v45 }
 0x11b   :  { %v699_v63 = vadd.f32 %v697_v23, %v569_v17 }
 0x11d   :  { %v4943_v60 = vmul.f32 -1.442695, %v699_v63  ;;  %v720_v18 = vrot.slane %v699_v63, 6 }
 0x11f   :  { %5073 = vpow2.f32 %v4943_v60 }
 0x125   :  { %v5074_v26 = vpop.eup %5073 }
 0x126   :  { %v703_v14 = vadd.f32 1.0, %v5074_v26 }
 0x128   :  { %5075 = vrcp.f32 %v703_v14  ;;  %v715_v6 = vand.u32 2147483648, %v703_v14  ;;  %v713_v31 = vand.u32 2147483647, %v703_v14  ;;  %vm709_vm8 = vweird.f32 %v703_v14 }
 0x129   :  { %5077 = vtanh.f32 %v720_v18  ;;  %v8185_v18 = vld [vmem:[#allocation46_spill] sm:$0xff] }
 0x12a   :  { %v716_v36 = vor.u32 1.1754944e-38, %v715_v6  ;;  %vm714_vm10 = vcmp.eq.f32.partialorder %v713_v31, 8.507059e+37  ;;  %v8187_v6 = vld [vmem:[#allocation59_spill] sm:$0xff]  ;;  %v8189_v31 = vld [vmem:[#allocation49_spill] sm:$0xff] }
 0x12e   :  { %v5076_v9 = vpop.eup %5075 }
 0x12f   :  { %v705_v28 = vmul.f32 %v5076_v9, %v703_v14  ;;  %vm710_vm7 = vweird.f32 %v5076_v9  ;;  %v5078_v2 = vpop.eup %5077  ;;  %v8182_v14 = vld [vmem:[#allocation58_spill] sm:$0xff] }
 0x130   :  { %vm711_vm9 = vmor %vm709_vm8, %vm710_vm7 }
 0x131   :  { %v706_v44 = vsub.f32 1.0, %v705_v28  ;;  %v8184_v28 = vld [vmem:[#allocation45_spill] sm:$0xff] }
 0x133   :  { %v707_v20 = vmul.f32 %v5076_v9, %v706_v44  ;;  %v8186_v44 = vld [vmem:[#allocation62_spill] sm:$0xff] }
 0x135   :  { %v708_v32 = vadd.f32 %v5076_v9, %v707_v20  ;;  %v8188_v20 = vld [vmem:[#allocation48_spill] sm:$0xff] }
 0x137   :  { %v712_v35 = vsel %vm711_vm9, %v5076_v9, %v708_v32  ;;  %v8183_v9 = vld [vmem:[#allocation55_spill] sm:$0xff]  ;;  %v8190_v32 = vld [vmem:[#allocation64_spill] sm:$0xff] }
 0x138   :  { %v717_v10 = vsel %vm714_vm10, %v716_v36, %v712_v35  ;;  %v8191_v36 = vld [vmem:[#allocation63_spill] sm:$0xff]  ;;  %v8192_v35 = vld [vmem:[#allocation52_spill] sm:$0xff] }
 0x139   :  { %v724_v24 = vrot.slane %v717_v10, 2  ;;  %v727_v27 = vmul.f32 %v5078_v2, %v717_v10  ;;  %v730_v23 = vrot.slane %v717_v10, 4  ;;  %v8193_v10 = vld [vmem:[#allocation53_spill] sm:$0xff] }
 0x13a   :  { %v8195_v2 = vld [vmem:[#allocation65_spill] sm:$0xff] }
 0x13b   :  { %v726_v45 = vmul.f32 0.0, %v724_v24  ;;  %v8194_v24 = vld [vmem:[#allocation66_spill] sm:$0xff] }
 0x13d   :  { %v6610_v17 = vadd.f32 %v727_v27, %v726_v45  ;;  %v8196_v45 = vld [vmem:[#allocation56_spill] sm:$0xff]  ;;  %v8197_v27 = vld [vmem:[#allocation57_spill] sm:$0xff] }
 0x13f   :  { %5079 = vtanh.f32 %v6610_v17 }
 0x145   :  { %v5080_v63 = vpop.eup %5079 }
 0x146   :  { %v732_v60 = vmul.f32 %v5080_v63, %v730_v23  ;;  %v8198_v23 = vld [vmem:[#allocation68_spill] sm:$0xff]  ;;  %v8199_v63 = vld [vmem:[#allocation67_spill] sm:$0xff] }
 0x148   :  { %733 = vst [vmem:[#allocation2] sm:$0x3] %v732_v60  ;;  %750 = vmatmul.f32.vlgmr.msra.gmra.mxu0 %v732_v60  ;;  %770 = vmatmul.f32.vlgmr.msra.gmra.mxu1 %v732_v60 }
 0x149   :  { %790 = vmatmul.f32.vlgmr.msra.gmra.mxu2 %v732_v60  ;;  %810 = vmatmul.f32.vlgmr.msra.gmra.mxu3 %v732_v60  ;;  %v8200_v60 = vld [vmem:[#allocation60_spill] sm:$0xff] }
 0x14a   :  { %988 = vmatpush.msra.mxu0 %v6235_v42  ;;  %1008 = vmatpush.msra.mxu1 %v6227_v39 }
 0x14b   :  { %1028 = vmatpush.msra.mxu2 %v6201_v29  ;;  %1048 = vmatpush.msra.mxu3 %v6203_v30  ;;  %v8174_v29 = vld [vmem:[#allocation50_spill] sm:$0xff]  ;;  %v8175_v30 = vld [vmem:[#allocation47_spill] sm:$0xff] }
 0x14c   :  { %989 = vmatpush.msra.mxu0 %v6250_v47  ;;  %1009 = vmatpush.msra.mxu1 %v6248_v46 }
 0x14d   :  { %1029 = vmatpush.msra.mxu2 %v6211_v33  ;;  %1049 = vmatpush.msra.mxu3 %v6213_v34  ;;  %v8176_v33 = vld [vmem:[#allocation41_spill] sm:$0xff]  ;;  %v8177_v34 = vld [vmem:[#allocation42_spill] sm:$0xff] }
 0x14e   :  { %990 = vmatpush.msra.mxu0 %v6265_v52  ;;  %1010 = vmatpush.msra.mxu1 %v6263_v51 }
 0x14f   :  { %v6623_v26 = vld [vmem:[#allocation2] sm:$0x3]  ;;  %1030 = vmatpush.msra.mxu2 %v6223_v37  ;;  %1050 = vmatpush.msra.mxu3 %v6225_v38  ;;  %v8179_v38 = vld [vmem:[#allocation51_spill] sm:$0xff] }
 0x150   :  { %8173 = vst [vmem:[#allocation75_spill] sm:$0xff] %v6623_v26  ;;  %991 = vmatpush.msra.mxu0 %v6279_v57  ;;  %1011 = vmatpush.msra.mxu1 %v6275_v55  ;;  %v8178_v37 = vld [vmem:[#allocation54_spill] sm:$0xff] }
 0x151   :  { %1693 = vst [vmem:[#allocation1] ss:$4 sm:$0xff] %v6623_v26  ;;  %1031 = vmatpush.msra.mxu2 %v6231_v40  ;;  %1051 = vmatpush.msra.mxu3 %v6233_v41  ;;  %v8180_v40 = vld [vmem:[#allocation43_spill] sm:$0xff]  ;;  %v8181_v41 = vld [vmem:[#allocation44_spill] sm:$0xff] }
 0x152   :  { %992 = vmatpush.msra.mxu0 %v6292_v61  ;;  %1012 = vmatpush.msra.mxu1 %v6285_v59 }
 0x153   :  { %1032 = vmatpush.msra.mxu2 %v6257_v49  ;;  %1052 = vmatpush.msra.mxu3 %v6259_v50 }
 0x154   :  { %993 = vmatpush.msra.mxu0 %v6321_v7  ;;  %1013 = vmatpush.msra.mxu1 %v6313_v3 }
 0x155   :  { %1033 = vmatpush.msra.mxu2 %v6269_v53  ;;  %1053 = vmatpush.msra.mxu3 %v6271_v54 }
 0x156   :  { %994 = vmatpush.msra.mxu0 %v6333_v11  ;;  %1014 = vmatpush.msra.mxu1 %v6325_v8 }
 0x157   :  { %1034 = vmatpush.msra.mxu2 %v6277_v56  ;;  %1054 = vmatpush.msra.mxu3 %v6283_v58 }
 0x158   :  { %995 = vmatpush.msra.mxu0 %v6345_v15  ;;  %1015 = vmatpush.msra.mxu1 %v6337_v12 }
 0x159   :  { %1035 = vmatpush.msra.mxu2 %v6302_v0  ;;  %1055 = vmatpush.msra.mxu3 %v6304_v1 }
 0x15a   :  { %996 = vmatpush.msra.mxu0 %v6357_v19  ;;  %1016 = vmatpush.msra.mxu1 %v6347_v16 }
 0x15b   :  { %1036 = vmatpush.msra.mxu2 %v6315_v4  ;;  %1056 = vmatpush.msra.mxu3 %v6317_v5 }
 0x15c   :  { %997 = vmatpush.msra.mxu0 %v8174_v29  ;;  %1017 = vmatpush.msra.mxu1 %v8175_v30 }
 0x15d   :  { %1037 = vmatpush.msra.mxu2 %v8176_v33  ;;  %1057 = vmatpush.msra.mxu3 %v8177_v34 }
 0x15e   :  { %998 = vmatpush.msra.mxu0 %v8178_v37  ;;  %1018 = vmatpush.msra.mxu1 %v8179_v38 }
 0x15f   :  { %1038 = vmatpush.msra.mxu2 %v8180_v40  ;;  %1058 = vmatpush.msra.mxu3 %v8181_v41 }
 0x160   :  { %999 = vmatpush.msra.mxu0 %v8182_v14  ;;  %1019 = vmatpush.msra.mxu1 %v8183_v9 }
 0x161   :  { %1039 = vmatpush.msra.mxu2 %v8184_v28  ;;  %1059 = vmatpush.msra.mxu3 %v8185_v18 }
 0x162   :  { %1000 = vmatpush.msra.mxu0 %v8186_v44  ;;  %1020 = vmatpush.msra.mxu1 %v8187_v6 }
 0x163   :  { %1040 = vmatpush.msra.mxu2 %v8188_v20  ;;  %1060 = vmatpush.msra.mxu3 %v8189_v31 }
 0x164   :  { %1001 = vmatpush.msra.mxu0 %v8190_v32  ;;  %1021 = vmatpush.msra.mxu1 %v8191_v36 }
 0x165   :  { %1041 = vmatpush.msra.mxu2 %v8192_v35  ;;  %1061 = vmatpush.msra.mxu3 %v8193_v10 }
 0x166   :  { %1002 = vmatpush.msra.mxu0 %v8194_v24  ;;  %1022 = vmatpush.msra.mxu1 %v8195_v2 }
 0x167   :  { %1042 = vmatpush.msra.mxu2 %v8196_v45  ;;  %1062 = vmatpush.msra.mxu3 %v8197_v27  ;;  %v576_v45 = vrot.slane %v6576_v43, 2 }
 0x168   :  { %1003 = vmatpush.msra.mxu0 %v8198_v23  ;;  %1023 = vmatpush.msra.mxu1 %v8199_v63 }
 0x169   :  { %1043 = vmatpush.msra.mxu2 %v8200_v60  ;;  %1063 = vmatpush.msra.mxu3 %v8201_v25 }
 0x1c5   :  { %v771_v22 = vpop.f32.mrf.mxu1  ;;  %v751_v24 = vpop.f32.mrf.mxu0 }
 0x1c6   :  { %v818_v21 = vrot.slane %v771_v22, 6 }
 0x1c8   :  { %v821_v2 = vsel %vm564_vm1, %v751_v24, %v818_v21 }
 0x1cc   :  { %v791_v13 = vpop.f32.mrf.mxu2  ;;  %v811_v26 = vpop.f32.mrf.mxu3 }
 0x1cd   :  { %v819_v62 = vrot.slane %v791_v13, 4  ;;  %v820_v48 = vrot.slane %v811_v26, 2 }
 0x1cf   :  { %v822_v27 = vsel %vm566_vm4, %v819_v62, %v820_v48 }
 0x1d0   :  { %v823_v23 = vsel %vm568_vm5, %v821_v2, %v822_v27 }
 0x1d1   :  { %v825_v63 = vadd.f32 %v823_v23, %v576_v45 }
 0x1d3   :  { %v4944_v10 = vmul.f32 -1.442695, %v825_v63  ;;  %v846_v36 = vrot.slane %v825_v63, 6 }
 0x1d5   :  { %5081 = vpow2.f32 %v4944_v10 }
 0x1db   :  { %v5082_v60 = vpop.eup %5081 }
 0x1dc   :  { %v829_v25 = vadd.f32 1.0, %v5082_v60 }
 0x1de   :  { %5083 = vrcp.f32 %v829_v25  ;;  %v841_v26 = vand.u32 2147483648, %v829_v25  ;;  %v839_v21 = vand.u32 2147483647, %v829_v25  ;;  %vm835_vm12 = vweird.f32 %v829_v25 }
 0x1df   :  { %5085 = vtanh.f32 %v846_v36  ;;  %v6701_v36 = vld [vmem:[#allocation7 + $0x1d8] sm:$0xff] }
 0x1e0   :  { %v842_v48 = vor.u32 1.1754944e-38, %v841_v26  ;;  %vm840_vm14 = vcmp.eq.f32.partialorder %v839_v21, 8.507059e+37 }
 0x1e4   :  { %v5084_v22 = vpop.eup %5083 }
 0x1e5   :  { %v831_v35 = vmul.f32 %v5084_v22, %v829_v25  ;;  %vm836_vm11 = vweird.f32 %v5084_v22  ;;  %v5086_v2 = vpop.eup %5085  ;;  %v6690_v25 = vld [vmem:[#allocation7 + $0x1f0] sm:$0xff] }
 0x1e6   :  { %vm837_vm13 = vmor %vm835_vm12, %vm836_vm11 }
 0x1e7   :  { %v832_v13 = vsub.f32 1.0, %v831_v35 }
 0x1e9   :  { %v833_v32 = vmul.f32 %v5084_v22, %v832_v13 }
 0x1eb   :  { %v834_v43 = vadd.f32 %v5084_v22, %v833_v32  ;;  %v6698_v32 = vld [vmem:[#allocation7 + $0x1d0] sm:$0xff] }
 0x1ed   :  { %v838_v62 = vsel %vm837_vm13, %v5084_v22, %v834_v43 }
 0x1ee   :  { %v843_v24 = vsel %vm840_vm14, %v842_v48, %v838_v62 }
 0x1ef   :  { %v850_v10 = vrot.slane %v843_v24, 2  ;;  %v853_v27 = vmul.f32 %v5086_v2, %v843_v24  ;;  %v856_v35 = vrot.slane %v843_v24, 4  ;;  %v6782_v2 = vld [vmem:[#allocation7 + $0x1e8] sm:$0xff] }
 0x1f1   :  { %v852_v45 = vmul.f32 %v850_v10, %v6610_v17  ;;  %v6693_v17 = vld [vmem:[#allocation7 + $0x1f8] sm:$0xff]  ;;  %v6779_v10 = vld [vmem:[#allocation7 + $0x1e0] sm:$0xff] }
 0x1f3   :  { %v6685_v23 = vadd.f32 %v853_v27, %v852_v45  ;;  %v6787_v45 = vld [vmem:[#allocation7 + $0x1c0] sm:$0xff]  ;;  %v6790_v27 = vld [vmem:[#allocation7 + $0x1c8] sm:$0xff] }
 0x1f5   :  { %5087 = vtanh.f32 %v6685_v23 }
 0x1fb   :  { %v5088_v63 = vpop.eup %5087 }
 0x1fc   :  { %v858_v60 = vmul.f32 %v5088_v63, %v856_v35  ;;  %v6798_v35 = vld [vmem:[#allocation7 + $0x1a8] sm:$0xff] }
 0x1fe   :  { %860 = vst [vmem:[#allocation2 + $0x2] sm:$0x3] %v858_v60  ;;  %877 = vmatmul.f32.vlgmr.msrb.gmra.mxu0 %v858_v60  ;;  %897 = vmatmul.f32.vlgmr.msrb.gmra.mxu1 %v858_v60 }
 0x1ff   :  { %917 = vmatmul.f32.vlgmr.msrb.gmra.mxu2 %v858_v60  ;;  %937 = vmatmul.f32.vlgmr.msrb.gmra.mxu3 %v858_v60  ;;  %v6806_v60 = vld [vmem:[#allocation7 + $0x180] sm:$0xff] }
 0x200   :  { %1115 = vmatpush.msrb.mxu0 %v6235_v42  ;;  %1135 = vmatpush.msrb.mxu1 %v6227_v39  ;;  %v6708_v42 = vld [vmem:[#allocation7 + $0x1b0] sm:$0xff] }
 0x201   :  { %1155 = vmatpush.msrb.mxu2 %v6690_v25  ;;  %1175 = vmatpush.msrb.mxu3 %v6693_v17 }
 0x202   :  { %1116 = vmatpush.msrb.mxu0 %v6250_v47  ;;  %1136 = vmatpush.msrb.mxu1 %v6248_v46  ;;  %v6711_v47 = vld [vmem:[#allocation7 + $0x1b8] sm:$0xff]  ;;  %v6717_v46 = vld [vmem:[#allocation7 + $0x190] sm:$0xff] }
 0x203   :  { %1156 = vmatpush.msrb.mxu2 %v6698_v32  ;;  %1176 = vmatpush.msrb.mxu3 %v6701_v36 }
 0x204   :  { %1117 = vmatpush.msrb.mxu0 %v6265_v52  ;;  %1137 = vmatpush.msrb.mxu1 %v6263_v51  ;;  %v6720_v51 = vld [vmem:[#allocation7 + $0x198] sm:$0xff]  ;;  %v8204_v52 = vld [vmem:[#allocation52_spill] sm:$0xff] }
 0x205   :  { %v6706_v39 = vld [vmem:[#allocation2 + $0x2] sm:$0x3]  ;;  %1157 = vmatpush.msrb.mxu2 %v6708_v42  ;;  %1177 = vmatpush.msrb.mxu3 %v6711_v47 }
 0x206   :  { %1695 = vst [vmem:[#allocation1 + $0x1] ss:$4 sm:$0xff] %v6706_v39  ;;  %1118 = vmatpush.msrb.mxu0 %v6279_v57  ;;  %1138 = vmatpush.msrb.mxu1 %v6275_v55  ;;  %v8207_v55 = vld [vmem:[#allocation65_spill] sm:$0xff] }
 0x207   :  { %1158 = vmatpush.msrb.mxu2 %v6717_v46  ;;  %1178 = vmatpush.msrb.mxu3 %v6720_v51  ;;  %v8209_v57 = vld [vmem:[#allocation57_spill] sm:$0xff] }
 0x208   :  { %1119 = vmatpush.msrb.mxu0 %v6292_v61  ;;  %1139 = vmatpush.msrb.mxu1 %v6285_v59  ;;  %v8211_v59 = vld [vmem:[#allocation67_spill] sm:$0xff]  ;;  %v8212_v61 = vld [vmem:[#allocation60_spill] sm:$0xff] }
 0x209   :  { %1159 = vmatpush.msrb.mxu2 %v6257_v49  ;;  %1179 = vmatpush.msrb.mxu3 %v6259_v50  ;;  %v8202_v49 = vld [vmem:[#allocation64_spill] sm:$0xff]  ;;  %v8203_v50 = vld [vmem:[#allocation63_spill] sm:$0xff] }
 0x20a   :  { %1120 = vmatpush.msrb.mxu0 %v6321_v7  ;;  %1140 = vmatpush.msrb.mxu1 %v6313_v3 }
 0x20b   :  { %1160 = vmatpush.msrb.mxu2 %v6269_v53  ;;  %1180 = vmatpush.msrb.mxu3 %v6271_v54  ;;  %v8205_v53 = vld [vmem:[#allocation53_spill] sm:$0xff]  ;;  %v8206_v54 = vld [vmem:[#allocation66_spill] sm:$0xff] }
 0x20c   :  { %1121 = vmatpush.msrb.mxu0 %v6333_v11  ;;  %1141 = vmatpush.msrb.mxu1 %v6325_v8 }
 0x20d   :  { %1161 = vmatpush.msrb.mxu2 %v6277_v56  ;;  %1181 = vmatpush.msrb.mxu3 %v6283_v58  ;;  %v8208_v56 = vld [vmem:[#allocation56_spill] sm:$0xff] }
 0x20e   :  { %1122 = vmatpush.msrb.mxu0 %v6345_v15  ;;  %1142 = vmatpush.msrb.mxu1 %v6337_v12  ;;  %v8210_v58 = vld [vmem:[#allocation68_spill] sm:$0xff]  ;;  %v8214_v15 = vld [vmem:[#allocation69_spill] sm:$0xff] }
 0x20f   :  { %1162 = vmatpush.msrb.mxu2 %v6302_v0  ;;  %1182 = vmatpush.msrb.mxu3 %v6304_v1  ;;  %v8213_v0 = vld [vmem:[#allocation61_spill] sm:$0xff] }
 0x210   :  { %1123 = vmatpush.msrb.mxu0 %v6357_v19  ;;  %1143 = vmatpush.msrb.mxu1 %v6347_v16  ;;  %v580_v16 = vrot.slane %v8214_v15, 4  ;;  %v6871_v15 = vld [vmem:[#allocation7 + $0xf8] sm:$0xff] }
 0x211   :  { %1163 = vmatpush.msrb.mxu2 %v6315_v4  ;;  %1183 = vmatpush.msrb.mxu3 %v6317_v5 }
 0x212   :  { %1124 = vmatpush.msrb.mxu0 %v8174_v29  ;;  %1144 = vmatpush.msrb.mxu1 %v8175_v30 }
 0x213   :  { %1164 = vmatpush.msrb.mxu2 %v8176_v33  ;;  %1184 = vmatpush.msrb.mxu3 %v8177_v34 }
 0x214   :  { %1125 = vmatpush.msrb.mxu0 %v8178_v37  ;;  %1145 = vmatpush.msrb.mxu1 %v8179_v38 }
 0x215   :  { %1165 = vmatpush.msrb.mxu2 %v8180_v40  ;;  %1185 = vmatpush.msrb.mxu3 %v8181_v41 }
 0x216   :  { %1126 = vmatpush.msrb.mxu0 %v8182_v14  ;;  %1146 = vmatpush.msrb.mxu1 %v8183_v9 }
 0x217   :  { %1166 = vmatpush.msrb.mxu2 %v8184_v28  ;;  %1186 = vmatpush.msrb.mxu3 %v8185_v18 }
 0x218   :  { %1127 = vmatpush.msrb.mxu0 %v8186_v44  ;;  %1147 = vmatpush.msrb.mxu1 %v8187_v6 }
 0x219   :  { %1167 = vmatpush.msrb.mxu2 %v8188_v20  ;;  %1187 = vmatpush.msrb.mxu3 %v8189_v31 }
 0x21a   :  { %1128 = vmatpush.msrb.mxu0 %v8202_v49  ;;  %1148 = vmatpush.msrb.mxu1 %v8203_v50  ;;  %v6809_v49 = vld [vmem:[#allocation7 + $0x188] sm:$0xff]  ;;  %v6814_v50 = vld [vmem:[#allocation7 + $0x160] sm:$0xff] }
 0x21b   :  { %1168 = vmatpush.msrb.mxu2 %v8204_v52  ;;  %1188 = vmatpush.msrb.mxu3 %v8205_v53  ;;  %v6817_v52 = vld [vmem:[#allocation7 + $0x168] sm:$0xff]  ;;  %v6820_v53 = vld [vmem:[#allocation7 + $0x170] sm:$0xff] }
 0x21c   :  { %1129 = vmatpush.msrb.mxu0 %v8206_v54  ;;  %1149 = vmatpush.msrb.mxu1 %v8207_v55  ;;  %v6823_v54 = vld [vmem:[#allocation7 + $0x178] sm:$0xff]  ;;  %v6826_v55 = vld [vmem:[#allocation7 + $0x140] sm:$0xff] }
 0x21d   :  { %1169 = vmatpush.msrb.mxu2 %v8208_v56  ;;  %1189 = vmatpush.msrb.mxu3 %v8209_v57  ;;  %v6829_v56 = vld [vmem:[#allocation7 + $0x148] sm:$0xff]  ;;  %v6832_v57 = vld [vmem:[#allocation7 + $0x150] sm:$0xff] }
 0x21e   :  { %1130 = vmatpush.msrb.mxu0 %v8210_v58  ;;  %1150 = vmatpush.msrb.mxu1 %v8211_v59  ;;  %v6835_v58 = vld [vmem:[#allocation7 + $0x158] sm:$0xff]  ;;  %v6838_v59 = vld [vmem:[#allocation7 + $0x120] sm:$0xff] }
 0x21f   :  { %1170 = vmatpush.msrb.mxu2 %v8212_v61  ;;  %1190 = vmatpush.msrb.mxu3 %v8213_v0  ;;  %v6841_v61 = vld [vmem:[#allocation7 + $0x128] sm:$0xff]  ;;  %v6844_v0 = vld [vmem:[#allocation7 + $0x130] sm:$0xff] }
 0x27b   :  { %v898_v1 = vpop.f32.mrf.mxu1  ;;  %v878_v11 = vpop.f32.mrf.mxu0 }
 0x27c   :  { %v945_v3 = vrot.slane %v898_v1, 6  ;;  %v6847_v1 = vld [vmem:[#allocation7 + $0x138] sm:$0xff] }
 0x27e   :  { %v948_v12 = vsel %vm564_vm1, %v878_v11, %v945_v3  ;;  %v6850_v3 = vld [vmem:[#allocation7 + $0x100] sm:$0xff]  ;;  %v6865_v11 = vld [vmem:[#allocation7 + $0xe8] sm:$0xff] }
 0x282   :  { %v918_v4 = vpop.f32.mrf.mxu2  ;;  %v938_v5 = vpop.f32.mrf.mxu3 }
 0x283   :  { %v946_v7 = vrot.slane %v918_v4, 4  ;;  %v947_v8 = vrot.slane %v938_v5, 2  ;;  %v6853_v4 = vld [vmem:[#allocation7 + $0x108] sm:$0xff]  ;;  %v6856_v5 = vld [vmem:[#allocation7 + $0x110] sm:$0xff] }
 0x285   :  { %v949_v19 = vsel %vm566_vm4, %v946_v7, %v947_v8  ;;  %v6859_v7 = vld [vmem:[#allocation7 + $0x118] sm:$0xff]  ;;  %v6862_v8 = vld [vmem:[#allocation7 + $0xe0] sm:$0xff] }
 0x286   :  { %v950_v29 = vsel %vm568_vm5, %v948_v12, %v949_v19  ;;  %v6868_v12 = vld [vmem:[#allocation7 + $0xf0] sm:$0xff]  ;;  %v6877_v19 = vld [vmem:[#allocation7 + $0xc8] sm:$0xff] }
 0x287   :  { %v952_v30 = vadd.f32 %v950_v29, %v580_v16  ;;  %v6874_v16 = vld [vmem:[#allocation7 + $0xc0] sm:$0xff]  ;;  %v6880_v29 = vld [vmem:[#allocation7 + $0xd0] sm:$0xff] }
 0x289   :  { %v4945_v33 = vmul.f32 -1.442695, %v952_v30  ;;  %v973_v41 = vrot.slane %v952_v30, 6  ;;  %v6883_v30 = vld [vmem:[#allocation7 + $0xd8] sm:$0xff] }
 0x28b   :  { %5089 = vpow2.f32 %v4945_v33  ;;  %v6886_v33 = vld [vmem:[#allocation7 + $0xa0] sm:$0xff] }
 0x291   :  { %v5090_v34 = vpop.eup %5089 }
 0x292   :  { %v956_v37 = vadd.f32 1.0, %v5090_v34  ;;  %v6889_v34 = vld [vmem:[#allocation7 + $0xa8] sm:$0xff] }
 0x294   :  { %5091 = vrcp.f32 %v956_v37  ;;  %v968_v9 = vand.u32 2147483648, %v956_v37  ;;  %v966_v18 = vand.u32 2147483647, %v956_v37  ;;  %vm962_vm6 = vweird.f32 %v956_v37 }
 0x295   :  { %5093 = vtanh.f32 %v973_v41  ;;  %v6901_v41 = vld [vmem:[#allocation7 + $0x88] sm:$0xff] }
 0x296   :  { %v969_v6 = vor.u32 1.1754944e-38, %v968_v9  ;;  %vm967_vm8 = vcmp.eq.f32.partialorder %v966_v18, 8.507059e+37  ;;  %8218 = vst [vmem:[#allocation42_spill] sm:$0xff] %v6901_v41  ;;  %v6907_v9 = vld [vmem:[#allocation7 + $0x98] sm:$0xff]  ;;  %v6913_v18 = vld [vmem:[#allocation7 + $0x68] sm:$0xff] }
 0x297   :  { %8220 = vst [vmem:[#allocation51_spill] sm:$0xff] %v6907_v9 }
 0x298   :  { %8222 = vst [vmem:[#allocation44_spill] sm:$0xff] %v6913_v18 }
 0x29a   :  { %v5092_v38 = vpop.eup %5091 }
 0x29b   :  { %v958_v40 = vmul.f32 %v5092_v38, %v956_v37  ;;  %vm963_vm15 = vweird.f32 %v5092_v38  ;;  %v5094_v13 = vpop.eup %5093  ;;  %v6892_v37 = vld [vmem:[#allocation7 + $0xb0] sm:$0xff] }
 0x29c   :  { %vm964_vm7 = vmor %vm962_vm6, %vm963_vm15  ;;  %8215 = vst [vmem:[#allocation50_spill] sm:$0xff] %v6892_v37 }
 0x29d   :  { %v959_v14 = vsub.f32 1.0, %v958_v40  ;;  %v6898_v40 = vld [vmem:[#allocation7 + $0x80] sm:$0xff] }
 0x29e   :  { %8217 = vst [vmem:[#allocation41_spill] sm:$0xff] %v6898_v40 }
 0x29f   :  { %v960_v28 = vmul.f32 %v5092_v38, %v959_v14  ;;  %v6904_v14 = vld [vmem:[#allocation7 + $0x90] sm:$0xff] }
 0x2a0   :  { %8219 = vst [vmem:[#allocation54_spill] sm:$0xff] %v6904_v14 }
 0x2a1   :  { %v961_v44 = vadd.f32 %v5092_v38, %v960_v28  ;;  %v6910_v28 = vld [vmem:[#allocation7 + $0x60] sm:$0xff] }
 0x2a2   :  { %8221 = vst [vmem:[#allocation43_spill] sm:$0xff] %v6910_v28 }
 0x2a3   :  { %v965_v20 = vsel %vm964_vm7, %v5092_v38, %v961_v44  ;;  %v6895_v38 = vld [vmem:[#allocation7 + $0xb8] sm:$0xff]  ;;  %v6916_v44 = vld [vmem:[#allocation7 + $0x70] sm:$0xff] }
 0x2a4   :  { %v970_v31 = vsel %vm967_vm8, %v969_v6, %v965_v20  ;;  %8216 = vst [vmem:[#allocation47_spill] sm:$0xff] %v6895_v38  ;;  %v6919_v6 = vld [vmem:[#allocation7 + $0x78] sm:$0xff]  ;;  %v6922_v20 = vld [vmem:[#allocation7 + $0x40] sm:$0xff] }
 0x2a5   :  { %v977_v22 = vrot.slane %v970_v31, 2  ;;  %v980_v21 = vmul.f32 %v5094_v13, %v970_v31  ;;  %v983_v48 = vrot.slane %v970_v31, 4  ;;  %8223 = vst [vmem:[#allocation58_spill] sm:$0xff] %v6916_v44  ;;  %v6925_v31 = vld [vmem:[#allocation7 + $0x48] sm:$0xff]  ;;  %v6931_v13 = vld [vmem:[#allocation7 + $0x58] sm:$0xff] }
 0x2a6   :  { %8224 = vst [vmem:[#allocation55_spill] sm:$0xff] %v6919_v6 }
 0x2a7   :  { %v979_v26 = vmul.f32 %v977_v22, %v6685_v23  ;;  %v6795_v23 = vld [vmem:[#allocation7 + $0x1a0] sm:$0xff]  ;;  %8225 = vst [vmem:[#allocation45_spill] sm:$0xff] %v6922_v20  ;;  %v6928_v22 = vld [vmem:[#allocation7 + $0x50] sm:$0xff] }
 0x2a8   :  { %8226 = vst [vmem:[#allocation46_spill] sm:$0xff] %v6925_v31 }
 0x2a9   :  { %v6776_v43 = vadd.f32 %v980_v21, %v979_v26  ;;  %8227 = vst [vmem:[#allocation62_spill] sm:$0xff] %v6928_v22  ;;  %v6934_v26 = vld [vmem:[#allocation7 + $0x20] sm:$0xff]  ;;  %v6937_v21 = vld [vmem:[#allocation7 + $0x28] sm:$0xff] }
 0x2aa   :  { %8228 = vst [vmem:[#allocation59_spill] sm:$0xff] %v6931_v13 }
 0x2ab   :  { %5095 = vtanh.f32 %v6776_v43  ;;  %8229 = vst [vmem:[#allocation48_spill] sm:$0xff] %v6934_v26 }
 0x2ac   :  { %8230 = vst [vmem:[#allocation49_spill] sm:$0xff] %v6937_v21 }
 0x2b1   :  { %v5096_v62 = vpop.eup %5095 }
 0x2b2   :  { %v985_v24 = vmul.f32 %v5096_v62, %v983_v48  ;;  %v6940_v48 = vld [vmem:[#allocation7 + $0x30] sm:$0xff]  ;;  %v6943_v62 = vld [vmem:[#allocation7 + $0x38] sm:$0xff] }
 0x2b3   :  { %8231 = vst [vmem:[#allocation64_spill] sm:$0xff] %v6940_v48 }
 0x2b4   :  { %987 = vst [vmem:[#allocation2 + $0x4] sm:$0x3] %v985_v24  ;;  %1004 = vmatmul.f32.vlgmr.msra.gmra.mxu0 %v985_v24  ;;  %1024 = vmatmul.f32.vlgmr.msra.gmra.mxu1 %v985_v24 }
 0x2b5   :  { %1044 = vmatmul.f32.vlgmr.msra.gmra.mxu2 %v985_v24  ;;  %1064 = vmatmul.f32.vlgmr.msra.gmra.mxu3 %v985_v24  ;;  %8232 = vst [vmem:[#allocation63_spill] sm:$0xff] %v6943_v62  ;;  %v6946_v24 = vld [vmem:[#allocation7] sm:$0xff] }
 0x2b6   :  { %1242 = vmatpush.msra.mxu0 %v6779_v10  ;;  %1262 = vmatpush.msra.mxu1 %v6782_v2  ;;  %8233 = vst [vmem:[#allocation52_spill] sm:$0xff] %v6946_v24 }
 0x2b7   :  { %1282 = vmatpush.msra.mxu2 %v6690_v25  ;;  %1302 = vmatpush.msra.mxu3 %v6693_v17 }
 0x2b8   :  { %1243 = vmatpush.msra.mxu0 %v6787_v45  ;;  %1263 = vmatpush.msra.mxu1 %v6790_v27 }
 0x2b9   :  { %1283 = vmatpush.msra.mxu2 %v6698_v32  ;;  %1303 = vmatpush.msra.mxu3 %v6701_v36 }
 0x2ba   :  { %1244 = vmatpush.msra.mxu0 %v6795_v23  ;;  %1264 = vmatpush.msra.mxu1 %v6798_v35 }
 0x2bb   :  { %v6801_v63 = vld [vmem:[#allocation2 + $0x4] sm:$0x3]  ;;  %1284 = vmatpush.msra.mxu2 %v6708_v42  ;;  %1304 = vmatpush.msra.mxu3 %v6711_v47 }
 0x2bc   :  { %1697 = vst [vmem:[#allocation1 + $0x2] ss:$4 sm:$0xff] %v6801_v63  ;;  %1245 = vmatpush.msra.mxu0 %v6806_v60  ;;  %1265 = vmatpush.msra.mxu1 %v6809_v49 }
 0x2bd   :  { %1285 = vmatpush.msra.mxu2 %v6717_v46  ;;  %1305 = vmatpush.msra.mxu3 %v6720_v51 }
 0x2be   :  { %1246 = vmatpush.msra.mxu0 %v6814_v50  ;;  %1266 = vmatpush.msra.mxu1 %v6817_v52 }
 0x2bf   :  { %1286 = vmatpush.msra.mxu2 %v6820_v53  ;;  %1306 = vmatpush.msra.mxu3 %v6823_v54 }
 0x2c0   :  { %1247 = vmatpush.msra.mxu0 %v6826_v55  ;;  %1267 = vmatpush.msra.mxu1 %v6829_v56 }
 0x2c1   :  { %1287 = vmatpush.msra.mxu2 %v6832_v57  ;;  %1307 = vmatpush.msra.mxu3 %v6835_v58 }
 0x2c2   :  { %1248 = vmatpush.msra.mxu0 %v6838_v59  ;;  %1268 = vmatpush.msra.mxu1 %v6841_v61 }
 0x2c3   :  { %1288 = vmatpush.msra.mxu2 %v6844_v0  ;;  %1308 = vmatpush.msra.mxu3 %v6847_v1 }
 0x2c4   :  { %1249 = vmatpush.msra.mxu0 %v6850_v3  ;;  %1269 = vmatpush.msra.mxu1 %v6853_v4 }
 0x2c5   :  { %1289 = vmatpush.msra.mxu2 %v6856_v5  ;;  %1309 = vmatpush.msra.mxu3 %v6859_v7 }
 0x2c6   :  { %1250 = vmatpush.msra.mxu0 %v6862_v8  ;;  %1270 = vmatpush.msra.mxu1 %v6865_v11 }
 0x2c7   :  { %1290 = vmatpush.msra.mxu2 %v6868_v12  ;;  %1310 = vmatpush.msra.mxu3 %v6871_v15 }
 0x2c8   :  { %1251 = vmatpush.msra.mxu0 %v6874_v16  ;;  %1271 = vmatpush.msra.mxu1 %v6877_v19 }
 0x2c9   :  { %1291 = vmatpush.msra.mxu2 %v6880_v29  ;;  %1311 = vmatpush.msra.mxu3 %v6883_v30 }
 0x2ca   :  { %1252 = vmatpush.msra.mxu0 %v6886_v33  ;;  %1272 = vmatpush.msra.mxu1 %v6889_v34 }
 0x2cb   :  { %1292 = vmatpush.msra.mxu2 %v6892_v37  ;;  %1312 = vmatpush.msra.mxu3 %v6895_v38 }
 0x2cc   :  { %1253 = vmatpush.msra.mxu0 %v6898_v40  ;;  %1273 = vmatpush.msra.mxu1 %v6901_v41 }
 0x2cd   :  { %1293 = vmatpush.msra.mxu2 %v6904_v14  ;;  %1313 = vmatpush.msra.mxu3 %v6907_v9 }
 0x2ce   :  { %1254 = vmatpush.msra.mxu0 %v6910_v28  ;;  %1274 = vmatpush.msra.mxu1 %v6913_v18  ;;  %v8237_v18 = vld [vmem:[#allocation70_spill] sm:$0xff] }
 0x2cf   :  { %1294 = vmatpush.msra.mxu2 %v6916_v44  ;;  %1314 = vmatpush.msra.mxu3 %v6919_v6  ;;  %v584_v28 = vrot.slane %v8237_v18, 6 }
 0x2d0   :  { %1255 = vmatpush.msra.mxu0 %v6922_v20  ;;  %1275 = vmatpush.msra.mxu1 %v6925_v31 }
 0x2d1   :  { %1295 = vmatpush.msra.mxu2 %v6928_v22  ;;  %1315 = vmatpush.msra.mxu3 %v6931_v13  ;;  %v6949_v13 = vld [vmem:[#allocation7 + $0x8] sm:$0xff] }
 0x2d2   :  { %1256 = vmatpush.msra.mxu0 %v6934_v26  ;;  %1276 = vmatpush.msra.mxu1 %v6937_v21  ;;  %8234 = vst [vmem:[#allocation53_spill] sm:$0xff] %v6949_v13  ;;  %v6952_v26 = vld [vmem:[#allocation7 + $0x10] sm:$0xff]  ;;  %v6955_v21 = vld [vmem:[#allocation7 + $0x18] sm:$0xff] }
 0x2d3   :  { %1296 = vmatpush.msra.mxu2 %v6940_v48  ;;  %1316 = vmatpush.msra.mxu3 %v6943_v62  ;;  %8235 = vst [vmem:[#allocation66_spill] sm:$0xff] %v6952_v26 }
 0x2d4   :  { %1257 = vmatpush.msra.mxu0 %v6946_v24  ;;  %1277 = vmatpush.msra.mxu1 %v6949_v13  ;;  %8236 = vst [vmem:[#allocation65_spill] sm:$0xff] %v6955_v21 }
 0x2d5   :  { %1297 = vmatpush.msra.mxu2 %v6952_v26  ;;  %1317 = vmatpush.msra.mxu3 %v6955_v21 }
 0x331   :  { %v1025_v48 = vpop.f32.mrf.mxu1  ;;  %v1005_v44 = vpop.f32.mrf.mxu0 }
 0x332   :  { %v1072_v22 = vrot.slane %v1025_v48, 6 }
 0x334   :  { %v1075_v24 = vsel %vm564_vm1, %v1005_v44, %v1072_v22 }
 0x338   :  { %v1045_v31 = vpop.f32.mrf.mxu2  ;;  %v1065_v62 = vpop.f32.mrf.mxu3 }
 0x339   :  { %v1073_v20 = vrot.slane %v1045_v31, 4  ;;  %v1074_v6 = vrot.slane %v1065_v62, 2 }
 0x33b   :  { %v1076_v13 = vsel %vm566_vm4, %v1073_v20, %v1074_v6 }
 0x33c   :  { %v1077_v9 = vsel %vm568_vm5, %v1075_v24, %v1076_v13 }
 0x33d   :  { %v1079_v26 = vadd.f32 %v1077_v9, %v584_v28 }
 0x33f   :  { %v4946_v14 = vmul.f32 -1.442695, %v1079_v26  ;;  %v1100_v38 = vrot.slane %v1079_v26, 6 }
 0x341   :  { %5097 = vpow2.f32 %v4946_v14 }
 0x347   :  { %v5098_v41 = vpop.eup %5097 }
 0x348   :  { %v1083_v21 = vadd.f32 1.0, %v5098_v41 }
 0x34a   :  { %5099 = vrcp.f32 %v1083_v21  ;;  %v1095_v62 = vand.u32 2147483648, %v1083_v21  ;;  %v1093_v44 = vand.u32 2147483647, %v1083_v21  ;;  %vm1089_vm10 = vweird.f32 %v1083_v21 }
 0x34b   :  { %5101 = vtanh.f32 %v1100_v38  ;;  %v8239_v38 = vld [vmem:[#allocation75_spill] sm:$0xff] }
 0x34c   :  { %v1096_v6 = vor.u32 1.1754944e-38, %v1095_v62  ;;  %vm1094_vm12 = vcmp.eq.f32.partialorder %v1093_v44, 8.507059e+37  ;;  %v8245_v62 = vld [vmem:[#allocation51_spill] sm:$0xff] }
 0x34d   :  { %v8246_v44 = vld [vmem:[#allocation43_spill] sm:$0xff] }
 0x350   :  { %v5100_v48 = vpop.eup %5099 }
 0x351   :  { %v1085_v40 = vmul.f32 %v5100_v48, %v1083_v21  ;;  %vm1090_vm9 = vweird.f32 %v5100_v48  ;;  %v5102_v28 = vpop.eup %5101  ;;  %v8242_v21 = vld [vmem:[#allocation41_spill] sm:$0xff] }
 0x352   :  { %vm1091_vm11 = vmor %vm1089_vm10, %vm1090_vm9 }
 0x353   :  { %v1086_v31 = vsub.f32 1.0, %v1085_v40 }
 0x355   :  { %v1087_v37 = vmul.f32 %v5100_v48, %v1086_v31  ;;  %v8244_v31 = vld [vmem:[#allocation54_spill] sm:$0xff] }
 0x357   :  { %v1088_v18 = vadd.f32 %v5100_v48, %v1087_v37 }
 0x359   :  { %v1092_v20 = vsel %vm1091_vm11, %v5100_v48, %v1088_v18  ;;  %v8243_v48 = vld [vmem:[#allocation42_spill] sm:$0xff]  ;;  %v8247_v18 = vld [vmem:[#allocation44_spill] sm:$0xff] }
 0x35a   :  { %v1097_v9 = vsel %vm1094_vm12, %v1096_v6, %v1092_v20  ;;  %v8248_v6 = vld [vmem:[#allocation58_spill] sm:$0xff]  ;;  %v8249_v20 = vld [vmem:[#allocation55_spill] sm:$0xff] }
 0x35b   :  { %v1104_v14 = vrot.slane %v1097_v9, 2  ;;  %v1107_v22 = vmul.f32 %v5102_v28, %v1097_v9  ;;  %v1110_v40 = vrot.slane %v1097_v9, 4  ;;  %v8250_v9 = vld [vmem:[#allocation45_spill] sm:$0xff]  ;;  %v8252_v28 = vld [vmem:[#allocation62_spill] sm:$0xff] }
 0x35d   :  { %v1106_v41 = vmul.f32 %v1104_v14, %v6776_v43  ;;  %v8251_v14 = vld [vmem:[#allocation46_spill] sm:$0xff] }
 0x35f   :  { %v6963_v13 = vadd.f32 %v1107_v22, %v1106_v41  ;;  %v8253_v41 = vld [vmem:[#allocation59_spill] sm:$0xff]  ;;  %v8254_v22 = vld [vmem:[#allocation48_spill] sm:$0xff] }
 0x361   :  { %5103 = vtanh.f32 %v6963_v13 }
 0x367   :  { %v5104_v26 = vpop.eup %5103 }
 0x368   :  { %v1112_v24 = vmul.f32 %v5104_v26, %v1110_v40  ;;  %v8255_v40 = vld [vmem:[#allocation49_spill] sm:$0xff]  ;;  %v8256_v26 = vld [vmem:[#allocation64_spill] sm:$0xff] }
 0x36a   :  { %1114 = vst [vmem:[#allocation2 + $0x6] sm:$0x3] %v1112_v24  ;;  %1131 = vmatmul.f32.vlgmr.msrb.gmra.mxu0 %v1112_v24  ;;  %1151 = vmatmul.f32.vlgmr.msrb.gmra.mxu1 %v1112_v24 }
 0x36b   :  { %1171 = vmatmul.f32.vlgmr.msrb.gmra.mxu2 %v1112_v24  ;;  %1191 = vmatmul.f32.vlgmr.msrb.gmra.mxu3 %v1112_v24  ;;  %v8257_v24 = vld [vmem:[#allocation63_spill] sm:$0xff] }
 0x36c   :  { %1369 = vmatpush.msrb.mxu0 %v6779_v10  ;;  %1389 = vmatpush.msrb.mxu1 %v6782_v2 }
 0x36d   :  { %1409 = vmatpush.msrb.mxu2 %v6690_v25  ;;  %1429 = vmatpush.msrb.mxu3 %v6693_v17 }
 0x36e   :  { %1370 = vmatpush.msrb.mxu0 %v6787_v45  ;;  %1390 = vmatpush.msrb.mxu1 %v6790_v27 }
 0x36f   :  { %1410 = vmatpush.msrb.mxu2 %v6698_v32  ;;  %1430 = vmatpush.msrb.mxu3 %v6701_v36 }
 0x370   :  { %1371 = vmatpush.msrb.mxu0 %v6795_v23  ;;  %1391 = vmatpush.msrb.mxu1 %v6798_v35 }
 0x371   :  { %v1626_v43 = vld [vmem:[#allocation2 + $0x6] sm:$0x3]  ;;  %1411 = vmatpush.msrb.mxu2 %v6708_v42  ;;  %1431 = vmatpush.msrb.mxu3 %v6711_v47 }
 0x372   :  { %1699 = vst [vmem:[#allocation1 + $0x3] ss:$4 sm:$0xff] %v1626_v43  ;;  %1372 = vmatpush.msrb.mxu0 %v6806_v60  ;;  %1392 = vmatpush.msrb.mxu1 %v6809_v49 }
 0x373   :  { %1412 = vmatpush.msrb.mxu2 %v6717_v46  ;;  %1432 = vmatpush.msrb.mxu3 %v6720_v51 }
 0x374   :  { %1373 = vmatpush.msrb.mxu0 %v6814_v50  ;;  %1393 = vmatpush.msrb.mxu1 %v6817_v52 }
 0x375   :  { %1413 = vmatpush.msrb.mxu2 %v6820_v53  ;;  %1433 = vmatpush.msrb.mxu3 %v6823_v54 }
 0x376   :  { %1374 = vmatpush.msrb.mxu0 %v6826_v55  ;;  %1394 = vmatpush.msrb.mxu1 %v6829_v56 }
 0x377   :  { %1414 = vmatpush.msrb.mxu2 %v6832_v57  ;;  %1434 = vmatpush.msrb.mxu3 %v6835_v58 }
 0x378   :  { %1375 = vmatpush.msrb.mxu0 %v6838_v59  ;;  %1395 = vmatpush.msrb.mxu1 %v6841_v61 }
 0x379   :  { %v6992_v37 = vld.sshfl [vmem:[#allocation1] sm:$0xff pattern:$0x73625140]  ;;  %1415 = vmatpush.msrb.mxu2 %v6844_v0  ;;  %1435 = vmatpush.msrb.mxu3 %v6847_v1 }
 0x37a   :  { %8238 = vst [vmem:[#allocation56_spill] sm:$0xff] %v6992_v37  ;;  %1376 = vmatpush.msrb.mxu0 %v6850_v3  ;;  %1396 = vmatpush.msrb.mxu1 %v6853_v4  ;;  %v8260_v37 = vld [vmem:[#allocation66_spill] sm:$0xff] }
 0x37b   :  { %1806 = vst [vmem:[#allocation1] ss:$4 sm:$0xff] %v8239_v38  ;;  %1416 = vmatpush.msrb.mxu2 %v6856_v5  ;;  %1436 = vmatpush.msrb.mxu3 %v6859_v7  ;;  %v8259_v38 = vld [vmem:[#allocation53_spill] sm:$0xff] }
 0x37c   :  { %1808 = vst [vmem:[#allocation1 + $0x1] ss:$4 sm:$0xff] %v6706_v39  ;;  %1377 = vmatpush.msrb.mxu0 %v6862_v8  ;;  %1397 = vmatpush.msrb.mxu1 %v6865_v11  ;;  %v8240_v39 = vld [vmem:[#allocation50_spill] sm:$0xff] }
 0x37d   :  { %1810 = vst [vmem:[#allocation1 + $0x2] ss:$4 sm:$0xff] %v6801_v63  ;;  %1417 = vmatpush.msrb.mxu2 %v6868_v12  ;;  %1437 = vmatpush.msrb.mxu3 %v6871_v15  ;;  %v8241_v63 = vld [vmem:[#allocation47_spill] sm:$0xff] }
 0x37e   :  { %1812 = vst [vmem:[#allocation1 + $0x3] ss:$4 sm:$0xff] %v1626_v43  ;;  %1378 = vmatpush.msrb.mxu0 %v6874_v16  ;;  %1398 = vmatpush.msrb.mxu1 %v6877_v19  ;;  %v8258_v43 = vld [vmem:[#allocation52_spill] sm:$0xff] }
 0x37f   :  { %1418 = vmatpush.msrb.mxu2 %v6880_v29  ;;  %1438 = vmatpush.msrb.mxu3 %v6883_v30 }
 0x380   :  { %1379 = vmatpush.msrb.mxu0 %v6886_v33  ;;  %1399 = vmatpush.msrb.mxu1 %v6889_v34 }
 0x381   :  { %1419 = vmatpush.msrb.mxu2 %v8240_v39  ;;  %1439 = vmatpush.msrb.mxu3 %v8241_v63 }
 0x382   :  { %1380 = vmatpush.msrb.mxu0 %v8242_v21  ;;  %1400 = vmatpush.msrb.mxu1 %v8243_v48 }
 0x383   :  { %1420 = vmatpush.msrb.mxu2 %v8244_v31  ;;  %1440 = vmatpush.msrb.mxu3 %v8245_v62 }
 0x384   :  { %1381 = vmatpush.msrb.mxu0 %v8246_v44  ;;  %1401 = vmatpush.msrb.mxu1 %v8247_v18 }
 0x385   :  { %1421 = vmatpush.msrb.mxu2 %v8248_v6  ;;  %1441 = vmatpush.msrb.mxu3 %v8249_v20 }
 0x386   :  { %1382 = vmatpush.msrb.mxu0 %v8250_v9  ;;  %1402 = vmatpush.msrb.mxu1 %v8251_v14  ;;  %v8261_v9 = vld [vmem:[#allocation65_spill] sm:$0xff] }
 0x387   :  { %1422 = vmatpush.msrb.mxu2 %v8252_v28  ;;  %1442 = vmatpush.msrb.mxu3 %v8253_v41 }
 0x388   :  { %1383 = vmatpush.msrb.mxu0 %v8254_v22  ;;  %1403 = vmatpush.msrb.mxu1 %v8255_v40 }
 0x389   :  { %1423 = vmatpush.msrb.mxu2 %v8256_v26  ;;  %1443 = vmatpush.msrb.mxu3 %v8257_v24 }
 0x38a   :  { %1384 = vmatpush.msrb.mxu0 %v8258_v43  ;;  %1404 = vmatpush.msrb.mxu1 %v8259_v38  ;;  %v8262_v43 = vld [vmem:[#allocation71_spill] sm:$0xff] }
 0x38b   :  { %1424 = vmatpush.msrb.mxu2 %v8260_v37  ;;  %1444 = vmatpush.msrb.mxu3 %v8261_v9 }
 0x3e7   :  { %v1152_v14 = vpop.f32.mrf.mxu1  ;;  %v1132_v18 = vpop.f32.mrf.mxu0 }
 0x3e8   :  { %v1199_v28 = vrot.slane %v1152_v14, 6 }
 0x3ea   :  { %v1202_v40 = vsel %vm564_vm1, %v1132_v18, %v1199_v28 }
 0x3ee   :  { %v1172_v20 = vpop.f32.mrf.mxu2  ;;  %v1192_v41 = vpop.f32.mrf.mxu3 }
 0x3ef   :  { %v1200_v6 = vrot.slane %v1172_v20, 4  ;;  %v1201_v22 = vrot.slane %v1192_v41, 2 }
 0x3f1   :  { %v1203_v26 = vsel %vm566_vm4, %v1200_v6, %v1201_v22 }
 0x3f2   :  { %v1204_v24 = vsel %vm568_vm5, %v1202_v40, %v1203_v26 }
 0x3f3   :  { %v1206_v44 = vadd.f32 %v1204_v24, %v8262_v43 }
 0x3f5   :  { %v4947_v38 = vmul.f32 -1.442695, %v1206_v44  ;;  %v1227_v31 = vrot.slane %v1206_v44, 6 }
 0x3f7   :  { %5105 = vpow2.f32 %v4947_v38 }
 0x3fd   :  { %v5106_v37 = vpop.eup %5105 }
 0x3fe   :  { %v1210_v62 = vadd.f32 1.0, %v5106_v37 }
 0x400   :  { %5107 = vrcp.f32 %v1210_v62  ;;  %v1222_v20 = vand.u32 2147483648, %v1210_v62  ;;  %v1220_v21 = vand.u32 2147483647, %v1210_v62  ;;  %vm1216_vm14 = vweird.f32 %v1210_v62 }
 0x401   :  { %5109 = vtanh.f32 %v1227_v31 }
 0x402   :  { %v1223_v6 = vor.u32 1.1754944e-38, %v1222_v20  ;;  %vm1221_vm6 = vcmp.eq.f32.partialorder %v1220_v21, 8.507059e+37 }
 0x406   :  { %v5108_v9 = vpop.eup %5107 }
 0x407   :  { %v1212_v14 = vmul.f32 %v5108_v9, %v1210_v62  ;;  %vm1217_vm13 = vweird.f32 %v5108_v9  ;;  %v5110_v26 = vpop.eup %5109 }
 0x408   :  { %vm1218_vm15 = vmor %vm1216_vm14, %vm1217_vm13 }
 0x409   :  { %v1213_v48 = vsub.f32 1.0, %v1212_v14 }
 0x40b   :  { %v1214_v41 = vmul.f32 %v5108_v9, %v1213_v48 }
 0x40d   :  { %v1215_v18 = vadd.f32 %v5108_v9, %v1214_v41 }
 0x40f   :  { %v1219_v28 = vsel %vm1218_vm15, %v5108_v9, %v1215_v18 }
 0x410   :  { %v1224_v22 = vsel %vm1221_vm6, %v1223_v6, %v1219_v28 }
 0x411   :  { %v1231_v40 = vrot.slane %v1224_v22, 2  ;;  %v1234_v24 = vmul.f32 %v5110_v26, %v1224_v22  ;;  %v1237_v48 = vrot.slane %v1224_v22, 4  ;;  %v1661_v26 = vld [vmem:[#allocation11 + $0xf0] sm:$0xff] }
 0x413   :  { %v1233_v37 = vmul.f32 %v1231_v40, %v6963_v13 }
 0x415   :  { %v7040_v43 = vadd.f32 %v1234_v24, %v1233_v37  ;;  %v1662_v37 = vld [vmem:[#allocation11 + $0xf8] sm:$0xff]  ;;  %v1801_v24 = vld [vmem:[%s8284_s13 + $0x78] sm:$0xff] }
 0x417   :  { %5111 = vtanh.f32 %v7040_v43 }
 0x41d   :  { %v5112_v44 = vpop.eup %5111 }
 0x41e   :  { %v1239_v38 = vmul.f32 %v5112_v44, %v1237_v48  ;;  %v1659_v48 = vld [vmem:[#allocation11 + $0xe0] sm:$0xff]  ;;  %v1660_v44 = vld [vmem:[#allocation11 + $0xe8] sm:$0xff] }
 0x420   :  { %1241 = vst [vmem:[#allocation2 + $0x8] sm:$0x3] %v1239_v38  ;;  %1258 = vmatmul.f32.vlgmr.msra.gmra.mxu0 %v1239_v38  ;;  %1278 = vmatmul.f32.vlgmr.msra.gmra.mxu1 %v1239_v38 }
 0x421   :  { %1298 = vmatmul.f32.vlgmr.msra.gmra.mxu2 %v1239_v38  ;;  %1318 = vmatmul.f32.vlgmr.msra.gmra.mxu3 %v1239_v38  ;;  %v1800_v38 = vld [vmem:[%s8284_s13 + $0x70] sm:$0xff] }
 0x422   :  { %1496 = vmatpush.msra.mxu0 %v6779_v10  ;;  %1516 = vmatpush.msra.mxu1 %v6782_v2  ;;  %v8271_v10 = vld [vmem:[#allocation45_spill] sm:$0xff]  ;;  %v8272_v2 = vld [vmem:[#allocation46_spill] sm:$0xff] }
 0x423   :  { %1536 = vmatpush.msra.mxu2 %v6690_v25  ;;  %1556 = vmatpush.msra.mxu3 %v6693_v17  ;;  %v8263_v25 = vld [vmem:[#allocation41_spill] sm:$0xff]  ;;  %v8264_v17 = vld [vmem:[#allocation42_spill] sm:$0xff] }
 0x424   :  { %1497 = vmatpush.msra.mxu0 %v6787_v45  ;;  %1517 = vmatpush.msra.mxu1 %v6790_v27  ;;  %v8273_v45 = vld [vmem:[#allocation62_spill] sm:$0xff]  ;;  %v8274_v27 = vld [vmem:[#allocation59_spill] sm:$0xff] }
 0x425   :  { %1537 = vmatpush.msra.mxu2 %v6698_v32  ;;  %1557 = vmatpush.msra.mxu3 %v6701_v36  ;;  %v8265_v32 = vld [vmem:[#allocation54_spill] sm:$0xff]  ;;  %v8266_v36 = vld [vmem:[#allocation51_spill] sm:$0xff] }
 0x426   :  { %1498 = vmatpush.msra.mxu0 %v6795_v23  ;;  %1518 = vmatpush.msra.mxu1 %v6798_v35  ;;  %v8275_v23 = vld [vmem:[#allocation48_spill] sm:$0xff]  ;;  %v8276_v35 = vld [vmem:[#allocation49_spill] sm:$0xff] }
 0x427   :  { %v7053_v13 = vld [vmem:[#allocation2 + $0x8] sm:$0x3]  ;;  %1538 = vmatpush.msra.mxu2 %v6708_v42  ;;  %1558 = vmatpush.msra.mxu3 %v6711_v47  ;;  %v8268_v47 = vld [vmem:[#allocation44_spill] sm:$0xff] }
 0x428   :  { %1701 = vst [vmem:[#allocation1 + $0x20] ss:$4 sm:$0xff] %v7053_v13  ;;  %1499 = vmatpush.msra.mxu0 %v6806_v60  ;;  %1519 = vmatpush.msra.mxu1 %v6809_v49  ;;  %v8267_v42 = vld [vmem:[#allocation43_spill] sm:$0xff]  ;;  %v8277_v60 = vld [vmem:[#allocation64_spill] sm:$0xff] }
 0x429   :  { %1539 = vmatpush.msra.mxu2 %v6717_v46  ;;  %1559 = vmatpush.msra.mxu3 %v6720_v51  ;;  %v8269_v46 = vld [vmem:[#allocation58_spill] sm:$0xff]  ;;  %v8270_v51 = vld [vmem:[#allocation55_spill] sm:$0xff] }
 0x42a   :  { %1500 = vmatpush.msra.mxu0 %v6814_v50  ;;  %1520 = vmatpush.msra.mxu1 %v6817_v52  ;;  %v8278_v49 = vld [vmem:[#allocation63_spill] sm:$0xff]  ;;  %v8279_v50 = vld [vmem:[#allocation52_spill] sm:$0xff]  ;;  %v8280_v52 = vld [vmem:[#allocation53_spill] sm:$0xff] }
 0x42b   :  { %1540 = vmatpush.msra.mxu2 %v6820_v53  ;;  %1560 = vmatpush.msra.mxu3 %v6823_v54  ;;  %v8281_v53 = vld [vmem:[#allocation66_spill] sm:$0xff]  ;;  %v8282_v54 = vld [vmem:[#allocation65_spill] sm:$0xff] }
 0x42c   :  { %1501 = vmatpush.msra.mxu0 %v6826_v55  ;;  %1521 = vmatpush.msra.mxu1 %v6829_v56 }
 0x42d   :  { %1541 = vmatpush.msra.mxu2 %v6832_v57  ;;  %1561 = vmatpush.msra.mxu3 %v6835_v58 }
 0x42e   :  { %1502 = vmatpush.msra.mxu0 %v6838_v59  ;;  %1522 = vmatpush.msra.mxu1 %v6841_v61 }
 0x42f   :  { %1542 = vmatpush.msra.mxu2 %v6844_v0  ;;  %1562 = vmatpush.msra.mxu3 %v6847_v1 }
 0x430   :  { %1503 = vmatpush.msra.mxu0 %v6850_v3  ;;  %1523 = vmatpush.msra.mxu1 %v6853_v4  ;;  %v8283_v3 = vld [vmem:[#allocation72_spill] sm:$0xff] }
 0x431   :  { %1543 = vmatpush.msra.mxu2 %v6856_v5  ;;  %1563 = vmatpush.msra.mxu3 %v6859_v7  ;;  %v591_v4 = vrot.slane %v8283_v3, 2  ;;  %v1649_v3 = vld [vmem:[#allocation11 + $0x90] sm:$0xff] }
 0x432   :  { %1504 = vmatpush.msra.mxu0 %v6862_v8  ;;  %1524 = vmatpush.msra.mxu1 %v6865_v11 }
 0x433   :  { %1544 = vmatpush.msra.mxu2 %v6868_v12  ;;  %1564 = vmatpush.msra.mxu3 %v6871_v15 }
 0x434   :  { %1505 = vmatpush.msra.mxu0 %v6874_v16  ;;  %1525 = vmatpush.msra.mxu1 %v6877_v19 }
 0x435   :  { %1545 = vmatpush.msra.mxu2 %v6880_v29  ;;  %1565 = vmatpush.msra.mxu3 %v6883_v30 }
 0x436   :  { %1506 = vmatpush.msra.mxu0 %v6886_v33  ;;  %1526 = vmatpush.msra.mxu1 %v6889_v34 }
 0x437   :  { %1546 = vmatpush.msra.mxu2 %v8240_v39  ;;  %1566 = vmatpush.msra.mxu3 %v8241_v63 }
 0x438   :  { %1507 = vmatpush.msra.mxu0 %v8263_v25  ;;  %1527 = vmatpush.msra.mxu1 %v8264_v17  ;;  %v1657_v25 = vld [vmem:[#allocation11 + $0xd0] sm:$0xff]  ;;  %v1658_v17 = vld [vmem:[#allocation11 + $0xd8] sm:$0xff] }
 0x439   :  { %1547 = vmatpush.msra.mxu2 %v8265_v32  ;;  %1567 = vmatpush.msra.mxu3 %v8266_v36  ;;  %v1799_v32 = vld [vmem:[%s8284_s13 + $0x68] sm:$0xff] }
 0x43a   :  { %1508 = vmatpush.msra.mxu0 %v8267_v42  ;;  %1528 = vmatpush.msra.mxu1 %v8268_v47  ;;  %v1655_v42 = vld [vmem:[#allocation11 + $0xc0] sm:$0xff]  ;;  %v1656_v47 = vld [vmem:[#allocation11 + $0xc8] sm:$0xff] }
 0x43b   :  { %1548 = vmatpush.msra.mxu2 %v8269_v46  ;;  %1568 = vmatpush.msra.mxu3 %v8270_v51 }
 0x43c   :  { %1509 = vmatpush.msra.mxu0 %v8271_v10  ;;  %1529 = vmatpush.msra.mxu1 %v8272_v2  ;;  %v1798_v10 = vld [vmem:[%s8284_s13 + $0x60] sm:$0xff] }
 0x43d   :  { %1549 = vmatpush.msra.mxu2 %v8273_v45  ;;  %1569 = vmatpush.msra.mxu3 %v8274_v27  ;;  %v7133_v2 = vld [vmem:[#allocation12 + $0x70] sm:$0xff] }
 0x43e   :  { %1510 = vmatpush.msra.mxu0 %v8275_v23  ;;  %1530 = vmatpush.msra.mxu1 %v8276_v35  ;;  %v1653_v23 = vld [vmem:[#allocation11 + $0xb0] sm:$0xff]  ;;  %v1654_v35 = vld [vmem:[#allocation11 + $0xb8] sm:$0xff] }
 0x43f   :  { %1550 = vmatpush.msra.mxu2 %v8277_v60  ;;  %1570 = vmatpush.msra.mxu3 %v8278_v49  ;;  %v7136_v60 = vld [vmem:[#allocation12 + $0x60] sm:$0xff] }
 0x440   :  { %1511 = vmatpush.msra.mxu0 %v8279_v50  ;;  %1531 = vmatpush.msra.mxu1 %v8280_v52  ;;  %v1797_v50 = vld [vmem:[%s8284_s13 + $0x58] sm:$0xff] }
 0x441   :  { %1551 = vmatpush.msra.mxu2 %v8281_v53  ;;  %1571 = vmatpush.msra.mxu3 %v8282_v54  ;;  %v7141_v52 = vld [vmem:[#allocation12 + $0x50] sm:$0xff] }
 0x442   :  { %v8285_v54 = vld [vmem:[#allocation73_spill] sm:$0xff] }
 0x49d   :  { %v1279_v55 = vpop.f32.mrf.mxu1  ;;  %v1259_v0 = vpop.f32.mrf.mxu0 }
 0x49e   :  { %v1326_v56 = vrot.slane %v1279_v55, 6  ;;  %v595_v55 = vrot.slane %v8285_v54, 4 }
 0x4a0   :  { %v1329_v1 = vsel %vm564_vm1, %v1259_v0, %v1326_v56  ;;  %v7151_v0 = vld [vmem:[#allocation12 + $0x40] sm:$0xff] }
 0x4a4   :  { %v1299_v57 = vpop.f32.mrf.mxu2  ;;  %v1319_v58 = vpop.f32.mrf.mxu3 }
 0x4a5   :  { %v1327_v59 = vrot.slane %v1299_v57, 4  ;;  %v1328_v61 = vrot.slane %v1319_v58, 2  ;;  %v1651_v57 = vld [vmem:[#allocation11 + $0xa0] sm:$0xff]  ;;  %v1652_v58 = vld [vmem:[#allocation11 + $0xa8] sm:$0xff] }
 0x4a7   :  { %v1330_v5 = vsel %vm566_vm4, %v1327_v59, %v1328_v61  ;;  %v1796_v61 = vld [vmem:[%s8284_s13 + $0x50] sm:$0xff] }
 0x4a8   :  { %v1331_v7 = vsel %vm568_vm5, %v1329_v1, %v1330_v5  ;;  %v1795_v5 = vld [vmem:[%s8284_s13 + $0x48] sm:$0xff] }
 0x4a9   :  { %v1333_v8 = vadd.f32 %v1331_v7, %v591_v4  ;;  %v1650_v4 = vld [vmem:[#allocation11 + $0x98] sm:$0xff]  ;;  %v7159_v7 = vld [vmem:[#allocation12 + $0x30] sm:$0xff] }
 0x4ab   :  { %v4948_v11 = vmul.f32 -1.442695, %v1333_v8  ;;  %v1354_v29 = vrot.slane %v1333_v8, 6 }
 0x4ad   :  { %5113 = vpow2.f32 %v4948_v11  ;;  %v1647_v11 = vld [vmem:[#allocation11 + $0x80] sm:$0xff] }
 0x4b3   :  { %v5114_v12 = vpop.eup %5113 }
 0x4b4   :  { %v1337_v15 = vadd.f32 1.0, %v5114_v12  ;;  %v1648_v12 = vld [vmem:[#allocation11 + $0x88] sm:$0xff] }
 0x4b6   :  { %5115 = vrcp.f32 %v1337_v15  ;;  %v1349_v33 = vand.u32 2147483648, %v1337_v15  ;;  %v1347_v39 = vand.u32 2147483647, %v1337_v15  ;;  %vm1343_vm8 = vweird.f32 %v1337_v15 }
 0x4b7   :  { %5117 = vtanh.f32 %v1354_v29  ;;  %v1646_v29 = vld [vmem:[#allocation11 + $0x78] sm:$0xff] }
 0x4b8   :  { %v1350_v21 = vor.u32 1.1754944e-38, %v1349_v33  ;;  %vm1348_vm10 = vcmp.eq.f32.partialorder %v1347_v39, 8.507059e+37  ;;  %v7172_v33 = vld [vmem:[#allocation12 + $0x10] sm:$0xff]  ;;  %v1644_v39 = vld [vmem:[#allocation11 + $0x68] sm:$0xff] }
 0x4bc   :  { %v5116_v16 = vpop.eup %5115 }
 0x4bd   :  { %v1339_v19 = vmul.f32 %v5116_v16, %v1337_v15  ;;  %vm1344_vm7 = vweird.f32 %v5116_v16  ;;  %v5118_v14 = vpop.eup %5117  ;;  %v1794_v15 = vld [vmem:[%s8284_s13 + $0x40] sm:$0xff] }
 0x4be   :  { %vm1345_vm9 = vmor %vm1343_vm8, %vm1344_vm7 }
 0x4bf   :  { %v1340_v30 = vsub.f32 1.0, %v1339_v19  ;;  %v1645_v19 = vld [vmem:[#allocation11 + $0x70] sm:$0xff] }
 0x4c1   :  { %v1341_v34 = vmul.f32 %v5116_v16, %v1340_v30  ;;  %v1793_v30 = vld [vmem:[%s8284_s13 + $0x38] sm:$0xff] }
 0x4c3   :  { %v1342_v63 = vadd.f32 %v5116_v16, %v1341_v34  ;;  %v1643_v34 = vld [vmem:[#allocation11 + $0x60] sm:$0xff] }
 0x4c5   :  { %v1346_v31 = vsel %vm1345_vm9, %v5116_v16, %v1342_v63  ;;  %v7166_v16 = vld [vmem:[#allocation12 + $0x20] sm:$0xff] }
 0x4c6   :  { %v1351_v62 = vsel %vm1348_vm10, %v1350_v21, %v1346_v31  ;;  %v1792_v63 = vld [vmem:[%s8284_s13 + $0x30] sm:$0xff]  ;;  %v1641_v21 = vld [vmem:[#allocation11 + $0x50] sm:$0xff]  ;;  %v1642_v31 = vld [vmem:[#allocation11 + $0x58] sm:$0xff] }
 0x4c7   :  { %v1358_v9 = vrot.slane %v1351_v62, 2  ;;  %v1361_v41 = vmul.f32 %v5118_v14, %v1351_v62  ;;  %v1364_v6 = vrot.slane %v1351_v62, 4  ;;  %v1791_v62 = vld [vmem:[%s8284_s13 + $0x28] sm:$0xff] }
 0x4c8   :  { %v1639_v14 = vld [vmem:[#allocation11 + $0x40] sm:$0xff] }
 0x4c9   :  { %v1360_v20 = vmul.f32 %v1358_v9, %v7040_v43 }
 0x4cb   :  { %v7115_v18 = vadd.f32 %v1361_v41, %v1360_v20  ;;  %v1640_v20 = vld [vmem:[#allocation11 + $0x48] sm:$0xff] }
 0x4cd   :  { %5119 = vtanh.f32 %v7115_v18 }
 0x4d3   :  { %v5120_v28 = vpop.eup %5119 }
 0x4d4   :  { %v1366_v22 = vmul.f32 %v5120_v28, %v1364_v6  ;;  %v1790_v6 = vld [vmem:[%s8284_s13 + $0x20] sm:$0xff]  ;;  %v7185_v28 = vld [vmem:[#allocation12] sm:$0xff] }
 0x4d6   :  { %1368 = vst [vmem:[#allocation2 + $0xa] sm:$0x3] %v1366_v22  ;;  %1385 = vmatmul.f32.vlgmr.msrb.gmra.mxu0 %v1366_v22  ;;  %1405 = vmatmul.f32.vlgmr.msrb.gmra.mxu1 %v1366_v22 }
 0x4d7   :  { %1425 = vmatmul.f32.vlgmr.msrb.gmra.mxu2 %v1366_v22  ;;  %1445 = vmatmul.f32.vlgmr.msrb.gmra.mxu3 %v1366_v22  ;;  %v1637_v22 = vld [vmem:[#allocation11 + $0x30] sm:$0xff] }
 0x4d8   :  { %1712 = vmatpush.msrb.mxu0 %v1661_v26  ;;  %1735 = vmatpush.msrb.mxu1 %v1662_v37  ;;  %v1638_v26 = vld [vmem:[#allocation11 + $0x38] sm:$0xff]  ;;  %v1789_v37 = vld [vmem:[%s8284_s13 + $0x18] sm:$0xff] }
 0x4d9   :  { %1825 = vmatpush.msrb.mxu2 %v1801_v24  ;;  %1913 = vmatpush.msrb.mxu3 %v7133_v2  ;;  %v1635_v24 = vld [vmem:[#allocation11 + $0x20] sm:$0xff] }
 0x4da   :  { %1713 = vmatpush.msrb.mxu0 %v1659_v48  ;;  %1736 = vmatpush.msrb.mxu1 %v1660_v44  ;;  %v1788_v48 = vld [vmem:[%s8284_s13 + $0x10] sm:$0xff]  ;;  %v1633_v44 = vld [vmem:[#allocation11 + $0x10] sm:$0xff] }
 0x4db   :  { %1826 = vmatpush.msrb.mxu2 %v1800_v38  ;;  %1914 = vmatpush.msrb.mxu3 %v7136_v60  ;;  %v1634_v38 = vld [vmem:[#allocation11 + $0x18] sm:$0xff] }
 0x4dc   :  { %1714 = vmatpush.msrb.mxu0 %v1657_v25  ;;  %1737 = vmatpush.msrb.mxu1 %v1658_v17  ;;  %v1787_v25 = vld [vmem:[%s8284_s13 + $0x8] sm:$0xff] }
 0x4dd   :  { %v7118_v40 = vld [vmem:[#allocation2 + $0xa] sm:$0x3]  ;;  %1827 = vmatpush.msrb.mxu2 %v1799_v32  ;;  %1915 = vmatpush.msrb.mxu3 %v7141_v52 }
 0x4de   :  { %1703 = vst [vmem:[#allocation1 + $0x21] ss:$4 sm:$0xff] %v7118_v40  ;;  %1715 = vmatpush.msrb.mxu0 %v1655_v42  ;;  %1738 = vmatpush.msrb.mxu1 %v1656_v47  ;;  %v1632_v42 = vld [vmem:[#allocation11 + $0x8] sm:$0xff]  ;;  %v1786_v47 = vld [vmem:[%s8284_s13] sm:$0xff]  ;;  %s5910_s13 = smov 64  }
 0x4df   :  { %1828 = vmatpush.msrb.mxu2 %v1798_v10  ;;  %1916 = vmatpush.msrb.mxu3 %v7151_v0 }
 0x4e0   :  { %1716 = vmatpush.msrb.mxu0 %v1653_v23  ;;  %1739 = vmatpush.msrb.mxu1 %v1654_v35 }
 0x4e1   :  { %1829 = vmatpush.msrb.mxu2 %v1797_v50  ;;  %1917 = vmatpush.msrb.mxu3 %v7159_v7 }
 0x4e2   :  { %1717 = vmatpush.msrb.mxu0 %v1651_v57  ;;  %1740 = vmatpush.msrb.mxu1 %v1652_v58 }
 0x4e3   :  { %1830 = vmatpush.msrb.mxu2 %v1796_v61  ;;  %1918 = vmatpush.msrb.mxu3 %v7166_v16 }
 0x4e4   :  { %1718 = vmatpush.msrb.mxu0 %v1649_v3  ;;  %1741 = vmatpush.msrb.mxu1 %v1650_v4  ;;  %v7207_v3 = vld [vmem:[#allocation12 + $0x68] sm:$0xff] }
 0x4e5   :  { %1831 = vmatpush.msrb.mxu2 %v1795_v5  ;;  %1919 = vmatpush.msrb.mxu3 %v7172_v33  ;;  %v7217_v4 = vld [vmem:[#allocation12 + $0x48] sm:$0xff] }
 0x4e6   :  { %1719 = vmatpush.msrb.mxu0 %v1647_v11  ;;  %1742 = vmatpush.msrb.mxu1 %v1648_v12  ;;  %v8286_v11 = vld [vmem:[#allocation56_spill] sm:$0xff]  ;;  %v7230_v12 = vld [vmem:[#allocation12 + $0x38] sm:$0xff] }
 0x4e7   :  { %1832 = vmatpush.msrb.mxu2 %v1794_v15  ;;  %1920 = vmatpush.msrb.mxu3 %v7185_v28  ;;  %v8287_v15 = vmov 0.0  }
 0x4e8   :  { %1720 = vmatpush.msrb.mxu0 %v1645_v19  ;;  %1743 = vmatpush.msrb.mxu1 %v1646_v29  ;;  %v7234_v19 = vld [vmem:[#allocation12 + $0x28] sm:$0xff]  ;;  %v7239_v29 = vld [vmem:[#allocation12 + $0x18] sm:$0xff] }
 0x4e9   :  { %1833 = vmatpush.msrb.mxu2 %v1793_v30  ;;  %v7245_v30 = vld [vmem:[#allocation12 + $0x8] sm:$0xff] }
 0x4ea   :  { %1721 = vmatpush.msrb.mxu0 %v1643_v34  ;;  %1744 = vmatpush.msrb.mxu1 %v1644_v39 }
 0x4eb   :  { %1834 = vmatpush.msrb.mxu2 %v1792_v63  ;;  %v7300_v63 = vld [vmem:[#allocation14] sm:$0x3] }
 0x4ec   :  { %1722 = vmatpush.msrb.mxu0 %v1641_v21  ;;  %1745 = vmatpush.msrb.mxu1 %v1642_v31  ;;  %v1682_v31 = vperm.slane %v7300_v63, 1 }
 0x4ed   :  { %1835 = vmatpush.msrb.mxu2 %v1791_v62 }
 0x4ee   :  { %1723 = vmatpush.msrb.mxu0 %v1639_v14  ;;  %1746 = vmatpush.msrb.mxu1 %v1640_v20 }
 0x4ef   :  { %1836 = vmatpush.msrb.mxu2 %v1790_v6 }
 0x4f0   :  { %1724 = vmatpush.msrb.mxu0 %v1637_v22  ;;  %1747 = vmatpush.msrb.mxu1 %v1638_v26 }
 0x4f1   :  { %1837 = vmatpush.msrb.mxu2 %v1789_v37  ;;  %v8288_v37 = vld [vmem:[#allocation74_spill] sm:$0xff] }
 0x4f2   :  { %1725 = vmatpush.msrb.mxu0 %v1635_v24  ;;  %v599_v24 = vrot.slane %v8288_v37, 6 }
 0x4f3   :  { %1838 = vmatpush.msrb.mxu2 %v1788_v48 }
 0x4f4   :  { %1726 = vmatpush.msrb.mxu0 %v1633_v44 }
 0x4f5   :  { %1839 = vmatpush.msrb.mxu2 %v1787_v25 }
 0x4f7   :  { %1840 = vmatpush.msrb.mxu2 %v1786_v47 }
 0x553   :  { %v1406_v43 = vpop.f32.mrf.mxu1  ;;  %v1386_v49 = vpop.f32.mrf.mxu0 }
 0x554   :  { %v1453_v36 = vrot.slane %v1406_v43, 6  ;;  %v1636_v43 = vld [vmem:[#allocation11 + $0x28] sm:$0xff] }
 0x555   :  { %1748 = vmatpush.msrb.mxu1 %v1636_v43 }
 0x556   :  { %v1456_v53 = vsel %vm564_vm1, %v1386_v49, %v1453_v36  ;;  %v1631_v36 = vld [vmem:[#allocation11] sm:$0xff] }
 0x557   :  { %1749 = vmatpush.msrb.mxu1 %v1634_v38  ;;  %1727 = vmatpush.msrb.mxu0 %v1631_v36 }
 0x559   :  { %1750 = vmatpush.msrb.mxu1 %v1632_v42 }
 0x55a   :  { %v1426_v46 = vpop.f32.mrf.mxu2  ;;  %v1446_v51 = vpop.f32.mrf.mxu3 }
 0x55b   :  { %v1454_v45 = vrot.slane %v1426_v46, 4  ;;  %v1455_v27 = vrot.slane %v1446_v51, 2 }
 0x55d   :  { %v1457_v56 = vsel %vm566_vm4, %v1454_v45, %v1455_v27 }
 0x55e   :  { %v1458_v59 = vsel %vm568_vm5, %v1456_v53, %v1457_v56 }
 0x55f   :  { %v7153_v1 = vadd.f32 %v1458_v59, %v595_v55 }
 0x561   :  { %v4949_v8 = vmul.f32 -1.442695, %v7153_v1  ;;  %v1481_v46 = vrot.slane %v7153_v1, 6  ;;  %v7205_v1 = vld [vmem:[#allocation12 + $0x78] sm:$0xff] }
 0x563   :  { %5121 = vpow2.f32 %v4949_v8  ;;  %v1821_v8 = vld.sshfl [vmem:[#allocation1] sm:$0xff pattern:$0x73625140] }
 0x569   :  { %v5122_v9 = vpop.eup %5121 }
 0x56a   :  { %v1464_v41 = vadd.f32 1.0, %v5122_v9 }
 0x56c   :  { %5123 = vrcp.f32 %v1464_v41  ;;  %v1476_v10 = vand.u32 2147483648, %v1464_v41  ;;  %v1474_v27 = vand.u32 2147483647, %v1464_v41  ;;  %vm1470_vm12 = vweird.f32 %v1464_v41 }
 0x56d   :  { %5125 = vtanh.f32 %v1481_v46 }
 0x56e   :  { %v1477_v35 = vor.u32 1.1754944e-38, %v1476_v10  ;;  %vm1475_vm14 = vcmp.eq.f32.partialorder %v1474_v27, 8.507059e+37 }
 0x572   :  { %v5124_v17 = vpop.eup %5123 }
 0x573   :  { %v1466_v32 = vmul.f32 %v5124_v17, %v1464_v41  ;;  %vm1471_vm11 = vweird.f32 %v5124_v17  ;;  %v5126_v54 = vpop.eup %5125  ;;  %v1681_v41 = vperm.slane %v7300_v63, 0 }
 0x574   :  { %vm1472_vm13 = vmor %vm1470_vm12, %vm1471_vm11 }
 0x575   :  { %v1467_v51 = vsub.f32 1.0, %v1466_v32 }
 0x577   :  { %v1468_v45 = vmul.f32 %v5124_v17, %v1467_v51 }
 0x579   :  { %v1469_v23 = vadd.f32 %v5124_v17, %v1468_v45 }
 0x57b   :  { %v1473_v49 = vsel %vm1472_vm13, %v5124_v17, %v1469_v23  ;;  %vm1993_vm13 = vcmask 517120  }
 0x57c   :  { %v1478_v50 = vsel %vm1475_vm14, %v1477_v35, %v1473_v49 }
 0x57d   :  { %v1485_v53 = vrot.slane %v1478_v50, 2  ;;  %v1488_v56 = vmul.f32 %v5126_v54, %v1478_v50  ;;  %v1491_v58 = vrot.slane %v1478_v50, 4 }
 0x57f   :  { %v1487_v55 = vmul.f32 %v1485_v53, %v7115_v18  ;;  %v7211_v18 = vld [vmem:[#allocation12 + $0x58] sm:$0xff] }
 0x581   :  { %v7202_v57 = vadd.f32 %v1488_v56, %v1487_v55 }
 0x583   :  { %5127 = vtanh.f32 %v7202_v57 }
 0x589   :  { %v5128_v59 = vpop.eup %5127 }
 0x58a   :  { %v1493_v61 = vmul.f32 %v5128_v59, %v1491_v58 }
 0x58c   :  { %1495 = vst [vmem:[#allocation2 + $0xc] sm:$0x3] %v1493_v61  ;;  %1512 = vmatmul.f32.vlgmr.msra.gmra.mxu0 %v1493_v61  ;;  %1532 = vmatmul.f32.vlgmr.msra.gmra.mxu1 %v1493_v61 }
 0x58d   :  { %1552 = vmatmul.f32.vlgmr.msra.gmra.mxu2 %v1493_v61  ;;  %1572 = vmatmul.f32.vlgmr.msra.gmra.mxu3 %v1493_v61 }
 0x58e   :  { %1933 = vmatpush.msra.mxu3 %v7205_v1  ;;  %2026 = vmatpush.msra.mxu1 %v7205_v1 }
 0x58f   :  { %2006 = vmatpush.msra.mxu0 %v7133_v2  ;;  %2099 = vmatpush.msra.mxu2 %v7133_v2 }
 0x590   :  { %1934 = vmatpush.msra.mxu3 %v7207_v3  ;;  %2027 = vmatpush.msra.mxu1 %v7207_v3 }
 0x591   :  { %2007 = vmatpush.msra.mxu0 %v7136_v60  ;;  %2100 = vmatpush.msra.mxu2 %v7136_v60 }
 0x592   :  { %1935 = vmatpush.msra.mxu3 %v7211_v18  ;;  %2028 = vmatpush.msra.mxu1 %v7211_v18 }
 0x593   :  { %v7223_v5 = vld [vmem:[#allocation2 + $0xc] sm:$0x3]  ;;  %2008 = vmatpush.msra.mxu0 %v7141_v52  ;;  %2101 = vmatpush.msra.mxu2 %v7141_v52 }
 0x594   :  { %1705 = vst [vmem:[#allocation1 + $0x22] ss:$4 sm:$0xff] %v7223_v5  ;;  %1936 = vmatpush.msra.mxu3 %v7217_v4  ;;  %1728 = vmatmul.f32.vlgmr.msrb.gmra.mxu0 %v8286_v11 }
 0x595   :  { %1751 = vmatmul.f32.vlgmr.msrb.gmra.mxu1 %v8286_v11  ;;  %1841 = vmatmul.f32.vlgmr.msrb.gmra.mxu2 %v1821_v8 }
 0x596   :  { %1921 = vmatmul.f32.vlgmr.msrb.gmra.mxu3 %v8287_v15  ;;  %2029 = vmatpush.msra.mxu1 %v7217_v4 }
 0x597   :  { %1937 = vmatpush.msra.mxu3 %v7230_v12  ;;  %2009 = vmatpush.msra.mxu0 %v7151_v0 }
 0x598   :  { %2030 = vmatpush.msra.mxu1 %v7230_v12  ;;  %2102 = vmatpush.msra.mxu2 %v7151_v0 }
 0x599   :  { %1938 = vmatpush.msra.mxu3 %v7234_v19  ;;  %2010 = vmatpush.msra.mxu0 %v7159_v7 }
 0x59a   :  { %2031 = vmatpush.msra.mxu1 %v7234_v19  ;;  %2103 = vmatpush.msra.mxu2 %v7159_v7 }
 0x59b   :  { %1939 = vmatpush.msra.mxu3 %v7239_v29  ;;  %2011 = vmatpush.msra.mxu0 %v7166_v16 }
 0x59c   :  { %2032 = vmatpush.msra.mxu1 %v7239_v29  ;;  %2104 = vmatpush.msra.mxu2 %v7166_v16 }
 0x59d   :  { %1940 = vmatpush.msra.mxu3 %v7245_v30  ;;  %2012 = vmatpush.msra.mxu0 %v7172_v33 }
 0x59e   :  { %1941 = vmatmul.f32.vlgmr.msra.gmra.mxu3 %v8287_v15  ;;  %2033 = vmatpush.msra.mxu1 %v7245_v30 }
 0x59f   :  { %2013 = vmatpush.msra.mxu0 %v7185_v28  ;;  %2119 = vmatpush.msrb.mxu3 %v7205_v1 }
 0x5a0   :  { %2105 = vmatpush.msra.mxu2 %v7172_v33  ;;  %2212 = vmatpush.msrb.mxu1 %v7205_v1 }
 0x5a1   :  { %2192 = vmatpush.msrb.mxu0 %v7133_v2  ;;  %2120 = vmatpush.msrb.mxu3 %v7207_v3 }
 0x5a2   :  { %2106 = vmatpush.msra.mxu2 %v7185_v28  ;;  %2213 = vmatpush.msrb.mxu1 %v7207_v3 }
 0x5a3   :  { %2193 = vmatpush.msrb.mxu0 %v7136_v60  ;;  %2121 = vmatpush.msrb.mxu3 %v7211_v18 }
 0x5a4   :  { %2285 = vmatpush.msrb.mxu2 %v7133_v2  ;;  %2214 = vmatpush.msrb.mxu1 %v7211_v18 }
 0x5a5   :  { %2194 = vmatpush.msrb.mxu0 %v7141_v52  ;;  %2122 = vmatpush.msrb.mxu3 %v7217_v4 }
 0x5a6   :  { %2286 = vmatpush.msrb.mxu2 %v7136_v60  ;;  %2215 = vmatpush.msrb.mxu1 %v7217_v4 }
 0x5a7   :  { %2195 = vmatpush.msrb.mxu0 %v7151_v0  ;;  %2123 = vmatpush.msrb.mxu3 %v7230_v12 }
 0x5a8   :  { %2287 = vmatpush.msrb.mxu2 %v7141_v52  ;;  %2216 = vmatpush.msrb.mxu1 %v7230_v12 }
 0x5a9   :  { %2196 = vmatpush.msrb.mxu0 %v7159_v7  ;;  %2124 = vmatpush.msrb.mxu3 %v7234_v19 }
 0x5aa   :  { %2288 = vmatpush.msrb.mxu2 %v7151_v0  ;;  %2217 = vmatpush.msrb.mxu1 %v7234_v19 }
 0x5ab   :  { %2197 = vmatpush.msrb.mxu0 %v7166_v16  ;;  %2125 = vmatpush.msrb.mxu3 %v7239_v29 }
 0x5ac   :  { %2289 = vmatpush.msrb.mxu2 %v7159_v7  ;;  %2218 = vmatpush.msrb.mxu1 %v7239_v29 }
 0x5ad   :  { %2198 = vmatpush.msrb.mxu0 %v7172_v33  ;;  %2126 = vmatpush.msrb.mxu3 %v7245_v30 }
 0x5ae   :  { %2219 = vmatpush.msrb.mxu1 %v7245_v30  ;;  %2290 = vmatpush.msrb.mxu2 %v7166_v16 }
 0x5af   :  { %2199 = vmatpush.msrb.mxu0 %v7185_v28  ;;  %2305 = vmatpush.msra.mxu3 %v7205_v1 }
 0x5b0   :  { %2291 = vmatpush.msrb.mxu2 %v7172_v33 }
 0x5b1   :  { %2306 = vmatpush.msra.mxu3 %v7207_v3 }
 0x5b2   :  { %2292 = vmatpush.msrb.mxu2 %v7185_v28 }
 0x5b3   :  { %2307 = vmatpush.msra.mxu3 %v7211_v18 }
 0x5b5   :  { %2308 = vmatpush.msra.mxu3 %v7217_v4 }
 0x5b7   :  { %2309 = vmatpush.msra.mxu3 %v7230_v12 }
 0x5b9   :  { %2310 = vmatpush.msra.mxu3 %v7234_v19 }
 0x5bb   :  { %2311 = vmatpush.msra.mxu3 %v7239_v29 }
 0x5bd   :  { %2312 = vmatpush.msra.mxu3 %v7245_v30 }
 0x609   :  { %v1513_v34 = vpop.f32.mrf.mxu0  ;;  %v1533_v39 = vpop.f32.mrf.mxu1 }
 0x60a   :  { %v1580_v21 = vrot.slane %v1533_v39, 6 }
 0x60c   :  { %v1583_v26 = vsel %vm564_vm1, %v1513_v34, %v1580_v21 }
 0x610   :  { %v1553_v62 = vpop.f32.mrf.mxu2  ;;  %v1573_v9 = vpop.f32.mrf.mxu3 }
 0x611   :  { %v1581_v14 = vrot.slane %v1553_v62, 4  ;;  %v1582_v20 = vrot.slane %v1573_v9, 2  ;;  %v1729_v6 = vpop.f32.mrf.mxu0 }
 0x612   :  { %v1752_v22 = vpop.f32.mrf.mxu1  ;;  %v1730_v25 = vadd.f32 %v1729_v6, %v1681_v41 }
 0x613   :  { %v1584_v43 = vsel %vm566_vm4, %v1581_v14, %v1582_v20  ;;  %v1753_v48 = vadd.f32 %v1752_v22, %v1682_v31 }
 0x614   :  { %v1585_v44 = vsel %vm568_vm5, %v1583_v26, %v1584_v43 }
 0x615   :  { %v1587_v38 = vadd.f32 %v1585_v44, %v599_v24  ;;  %v1762_v17 = vrot.slane %v1753_v48, 6 }
 0x617   :  { %v4950_v32 = vmul.f32 -1.442695, %v1587_v38  ;;  %v7313_v36 = vsel %vm570_vm2, %v1730_v25, %v1762_v17  ;;  %v7316_v42 = vsel %vm566_vm4, %v1730_v25, %v1762_v17  ;;  %v7319_v47 = vsel %vm572_vm3, %v1762_v17, %v1730_v25 }
 0x618   :  { %v1764_v35 = vsel %vm564_vm1, %v1730_v25, %v1762_v17  ;;  %v1608_v54 = vrot.slane %v1587_v38, 6 }
 0x619   :  { %5129 = vpow2.f32 %v4950_v32  ;;  %v1922_v46 = vpop.f32.mrf.mxu3 }
 0x61f   :  { %v5130_v51 = vpop.eup %5129 }
 0x620   :  { %v1591_v10 = vadd.f32 1.0, %v5130_v51 }
 0x621   :  { %v1942_v45 = vpop.f32.mrf.mxu3 }
 0x622   :  { %5131 = vrcp.f32 %v1591_v10  ;;  %v1947_v27 = vrot.slane %v1942_v45, 6  ;;  %v1603_v56 = vand.u32 2147483648, %v1591_v10  ;;  %v1601_v59 = vand.u32 2147483647, %v1591_v10 }
 0x623   :  { %5133 = vtanh.f32 %v1608_v54  ;;  %vm1597_vm15 = vweird.f32 %v1591_v10 }
 0x624   :  { %v1948_v23 = vsel %vm564_vm1, %v1922_v46, %v1947_v27  ;;  %v1604_v8 = vor.u32 1.1754944e-38, %v1603_v56  ;;  %vm1602_vm7 = vcmp.eq.f32.partialorder %v1601_v59, 8.507059e+37 }
 0x625   :  { %v1950_v49 = vadd.f32 %v1948_v23, %v1764_v35 }
 0x627   :  { %1971 = vrot.lane.b32.xlu0 %v1950_v49, %s5910_s13  ;;  %v4953_v24 = vmul.f32 -1.442695, %v1950_v49 }
 0x628   :  { %v5132_v50 = vpop.eup %5131 }
 0x629   :  { %v1593_v53 = vmul.f32 %v5132_v50, %v1591_v10  ;;  %vm1598_vm5 = vweird.f32 %v5132_v50  ;;  %v5134_v21 = vpop.eup %5133 }
 0x62a   :  { %vm1599_vm6 = vmor %vm1597_vm15, %vm1598_vm5 }
 0x62b   :  { %v1594_v55 = vsub.f32 1.0, %v1593_v53 }
 0x62d   :  { %v1595_v58 = vmul.f32 %v5132_v50, %v1594_v55 }
 0x62f   :  { %v1596_v61 = vadd.f32 %v5132_v50, %v1595_v58 }
 0x631   :  { %v1600_v11 = vsel %vm1599_vm6, %v5132_v50, %v1596_v61  ;;  %v7356_v61 = vld [vmem:[#allocation15] ss:$0 sm:$0xff] }
 0x632   :  { %v1605_v34 = vsel %vm1602_vm7, %v1604_v8, %v1600_v11  ;;  %v1842_v8 = vpop.f32.mrf.mxu2 }
 0x633   :  { %v1612_v39 = vrot.slane %v1605_v34, 2  ;;  %v1615_v9 = vmul.f32 %v5134_v21, %v1605_v34  ;;  %v1618_v20 = vrot.slane %v1605_v34, 4  ;;  %v1843_v11 = vadd.f32 %v7356_v61, %v1842_v8 }
 0x635   :  { %v1614_v62 = vmul.f32 %v1612_v39, %v7202_v57  ;;  %v4951_v34 = vmul.f32 -1.442695, %v1843_v11 }
 0x637   :  { %v1616_v14 = vadd.f32 %v1615_v9, %v1614_v62 }
 0x639   :  { %5135 = vtanh.f32 %v1616_v14 }
 0x63a   :  { %5137 = vpow2.f32 %v4953_v24 }
 0x63f   :  { %v5136_v6 = vpop.eup %5135 }
 0x640   :  { %v1620_v22 = vmul.f32 %v5136_v6, %v1618_v20  ;;  %v5138_v43 = vpop.eup %5137 }
 0x641   :  { %v1954_v48 = vadd.f32 1.0, %v5138_v43 }
 0x642   :  { %1622 = vst [vmem:[#allocation2 + $0xe] sm:$0x3] %v1620_v22 }
 0x643   :  { %5139 = vrcp.f32 %v1954_v48  ;;  %vm1960_vm9 = vweird.f32 %v1954_v48 }
 0x649   :  { %v1630_v26 = vld [vmem:[#allocation2 + $0xe] sm:$0x3]  ;;  %v5140_v44 = vpop.eup %5139 }
 0x64a   :  { %1707 = vst [vmem:[#allocation1 + $0x23] ss:$4 sm:$0xff] %v1630_v26  ;;  %v1956_v38 = vmul.f32 %v5140_v44, %v1954_v48  ;;  %vm1961_vm8 = vweird.f32 %v5140_v44 }
 0x64b   :  { %vm1962_vm10 = vmor %vm1960_vm9, %vm1961_vm8 }
 0x64c   :  { %v1957_v25 = vsub.f32 1.0, %v1956_v38 }
 0x64e   :  { %v1958_v17 = vmul.f32 %v5140_v44, %v1957_v25 }
 0x650   :  { %v1959_v46 = vadd.f32 %v5140_v44, %v1958_v17 }
 0x651   :  { %v1709_v37 = vld.sshfl [vmem:[#allocation1 + $0x20] sm:$0xff pattern:$0x73625140] }
 0x652   :  { %1814 = vst [vmem:[#allocation1 + $0x20] ss:$4 sm:$0xff] %v7053_v13  ;;  %1731 = vmatmul.f32.gmra.mxu0 %v1709_v37  ;;  %1754 = vmatmul.f32.gmra.mxu1 %v1709_v37  ;;  %v1963_v51 = vsel %vm1962_vm10, %v5140_v44, %v1959_v46 }
 0x653   :  { %1816 = vst [vmem:[#allocation1 + $0x21] ss:$4 sm:$0xff] %v7118_v40  ;;  %v1966_v40 = vand.u32 2147483648, %v1954_v48 }
 0x654   :  { %1818 = vst [vmem:[#allocation1 + $0x22] ss:$4 sm:$0xff] %v7223_v5  ;;  %v1964_v5 = vand.u32 2147483647, %v1954_v48 }
 0x655   :  { %1820 = vst [vmem:[#allocation1 + $0x23] ss:$4 sm:$0xff] %v1630_v26  ;;  %v1967_v10 = vor.u32 1.1754944e-38, %v1966_v40  ;;  %v1766_v40 = vrot.slane %v7313_v36, 2 }
 0x656   :  { %vm1965_vm11 = vcmp.eq.f32.partialorder %v1964_v5, 8.507059e+37 }
 0x657   :  { %v1968_v27 = vsel %vm1965_vm11, %v1967_v10, %v1963_v51 }
 0x658   :  { %v1976_v63 = vmul.f32 0.0, %v1968_v27  ;;  %v1985_v43 = vrot.slane %v1968_v27, 2 }
 0x65c   :  { %v1822_v57 = vld.sshfl [vmem:[#allocation1 + $0x20] sm:$0xff pattern:$0x73625140] }
 0x65d   :  { %1844 = vmatmul.f32.gmra.mxu2 %v1822_v57 }
 0x699   :  { %v1972_v32 = vpop.permute.xlu0 %1971 }
 0x69a   :  { %v1973_v13 = vrot.slane %v1972_v32, 2 }
 0x69c   :  { %5141 = vtanh.f32 %v1973_v13 }
 0x6a2   :  { %v5142_v45 = vpop.eup %5141 }
 0x6a3   :  { %v1977_v23 = vmul.f32 %v5142_v45, %v1968_v27 }
 0x6a5   :  { %1979 = vrot.lane.b32.xlu0 %v1977_v23, %s5910_s13 }
 0x6cf   :  { %v1732_v35 = vpop.f32.mrf.mxu0  ;;  %v1755_v49 = vpop.f32.mrf.mxu1 }
 0x6d0   :  { %v1756_v50 = vadd.f32 %v1755_v49, %v1682_v31  ;;  %v7333_v53 = vadd.f32 %v1732_v35, %v1681_v41 }
 0x6d2   :  { %v7335_v54 = vrot.slane %v1756_v50, 6 }
 0x6d4   :  { %v7340_v55 = vsel %vm570_vm2, %v7333_v53, %v7335_v54  ;;  %v7345_v56 = vsel %vm566_vm4, %v7333_v53, %v7335_v54  ;;  %v7350_v31 = vsel %vm572_vm3, %v7335_v54, %v7333_v53 }
 0x717   :  { %v1980_v41 = vpop.permute.xlu0 %1979 }
 0x718   :  { %v7352_v58 = vadd.f32 %v1980_v41, %v1976_v63 }
 0x71a   :  { %5143 = vtanh.f32 %v7352_v58 }
 0x71b   :  { %5145 = vpow2.f32 %v4951_v34 }
 0x720   :  { %v5144_v59 = vpop.eup %5143 }
 0x721   :  { %1988 = vrot.lane.b32.xlu1 %v5144_v59, %s5910_s13  ;;  %v5146_v39 = vpop.eup %5145 }
 0x722   :  { %v1854_v21 = vadd.f32 1.0, %v5146_v39 }
 0x724   :  { %5147 = vrcp.f32 %v1854_v21  ;;  %v1867_v22 = vand.u32 2147483648, %v1854_v21  ;;  %vm1861_vm3 = vweird.f32 %v1854_v21  ;;  %v1865_v26 = vand.u32 2147483647, %v1854_v21 }
 0x726   :  { %v1868_v57 = vor.u32 1.1754944e-38, %v1867_v22  ;;  %vm1866_vm12 = vcmp.eq.f32.partialorder %v1865_v26, 8.507059e+37 }
 0x72a   :  { %v5148_v62 = vpop.eup %5147 }
 0x72b   :  { %v1857_v9 = vmul.f32 %v5148_v62, %v1854_v21  ;;  %vm1862_vm2 = vweird.f32 %v5148_v62 }
 0x72c   :  { %vm1863_vm4 = vmor %vm1861_vm3, %vm1862_vm2 }
 0x72d   :  { %v1858_v14 = vsub.f32 1.0, %v1857_v9 }
 0x72f   :  { %v1859_v20 = vmul.f32 %v5148_v62, %v1858_v14 }
 0x731   :  { %v1860_v6 = vadd.f32 %v5148_v62, %v1859_v20 }
 0x733   :  { %v1864_v37 = vsel %vm1863_vm4, %v5148_v62, %v1860_v6 }
 0x734   :  { %v1869_v24 = vsel %vm1866_vm12, %v1868_v57, %v1864_v37 }
 0x735   :  { %v7359_v44 = vmul.f32 %v1869_v24, %v1843_v11 }
 0x737   :  { %v1890_v37 = vrot.slane %v7359_v44, 2 }
 0x793   :  { %v1989_v48 = vpop.permute.xlu1 %1988 }
 0x794   :  { %v1991_v38 = vmul.f32 %v1989_v48, %v1985_v43  ;;  %v7416_v43 = vpop.f32.mrf.mxu2 }
 0x796   :  { %v1992_v25 = vadd.f32 %v1991_v38, %v7359_v44  ;;  %4954 = vmatmul.msk.f32.vlgmr.msra.gmra.mxu0 %vm453_vm0, %v1991_v38  ;;  %4955 = vmatmul.msk.f32.vlgmr.msra.gmra.mxu1 %vm453_vm0, %v1991_v38 }
 0x797   :  { %2378 = vmatpush.msra.mxu0 %v7133_v2  ;;  %2398 = vmatpush.msra.mxu1 %v7205_v1 }
 0x798   :  { %1994 = vst.msk [vmem:[#allocation3] sm:$0x3] %vm1993_vm13, %v1992_v25 }
 0x799   :  { %2379 = vmatpush.msra.mxu0 %v7136_v60  ;;  %2399 = vmatpush.msra.mxu1 %v7207_v3 }
 0x79b   :  { %2380 = vmatpush.msra.mxu0 %v7141_v52  ;;  %2400 = vmatpush.msra.mxu1 %v7211_v18 }
 0x79d   :  { %2381 = vmatpush.msra.mxu0 %v7151_v0  ;;  %2401 = vmatpush.msra.mxu1 %v7217_v4 }
 0x79f   :  { %v7373_v17 = vld [vmem:[#allocation3] sm:$0x3]  ;;  %2382 = vmatpush.msra.mxu0 %v7159_v7  ;;  %2402 = vmatpush.msra.mxu1 %v7230_v12 }
 0x7a0   :  { %2678 = vst [vmem:[#allocation1] ss:$4 sm:$0xff] %v7373_v17 }
 0x7a1   :  { %2383 = vmatpush.msra.mxu0 %v7166_v16  ;;  %2403 = vmatpush.msra.mxu1 %v7234_v19 }
 0x7a3   :  { %2384 = vmatpush.msra.mxu0 %v7172_v33  ;;  %2404 = vmatpush.msra.mxu1 %v7239_v29 }
 0x7a5   :  { %2385 = vmatpush.msra.mxu0 %v7185_v28  ;;  %2405 = vmatpush.msra.mxu1 %v7245_v30 }
 0x813   :  { %v2035_v32 = vpop.f32.mrf.mxu1  ;;  %v2015_v46 = vpop.f32.mrf.mxu0 }
 0x814   :  { %v2040_v13 = vrot.slane %v2035_v32, 6  ;;  %v1768_v32 = vrot.slane %v7316_v42, 4 }
 0x816   :  { %v2041_v5 = vsel %vm564_vm1, %v2015_v46, %v2040_v13 }
 0x817   :  { %v2043_v51 = vadd.f32 %v2041_v5, %v1766_v40 }
 0x819   :  { %2064 = vrot.lane.b32.xlu1 %v2043_v51, %s5910_s13  ;;  %v4956_v10 = vmul.f32 -1.442695, %v2043_v51 }
 0x81b   :  { %5149 = vpow2.f32 %v4956_v10 }
 0x821   :  { %v5150_v45 = vpop.eup %5149 }
 0x822   :  { %v2047_v27 = vadd.f32 1.0, %v5150_v45 }
 0x824   :  { %5151 = vrcp.f32 %v2047_v27  ;;  %v2059_v36 = vand.u32 2147483648, %v2047_v27  ;;  %vm2053_vm5 = vweird.f32 %v2047_v27  ;;  %v2057_v8 = vand.u32 2147483647, %v2047_v27 }
 0x826   :  { %v2060_v34 = vor.u32 1.1754944e-38, %v2059_v36  ;;  %vm2058_vm6 = vcmp.eq.f32.partialorder %v2057_v8, 8.507059e+37 }
 0x82a   :  { %v5152_v23 = vpop.eup %5151 }
 0x82b   :  { %v2049_v35 = vmul.f32 %v5152_v23, %v2047_v27  ;;  %vm2054_vm14 = vweird.f32 %v5152_v23 }
 0x82c   :  { %vm2055_vm15 = vmor %vm2053_vm5, %vm2054_vm14 }
 0x82d   :  { %v2050_v49 = vsub.f32 1.0, %v2049_v35 }
 0x82f   :  { %v2051_v50 = vmul.f32 %v5152_v23, %v2050_v49 }
 0x831   :  { %v2052_v59 = vadd.f32 %v5152_v23, %v2051_v50 }
 0x833   :  { %v2056_v11 = vsel %vm2055_vm15, %v5152_v23, %v2052_v59 }
 0x834   :  { %v2061_v21 = vsel %vm2058_vm6, %v2060_v34, %v2056_v11 }
 0x835   :  { %v2069_v9 = vmul.f32 %v2061_v21, %v7352_v58  ;;  %v2078_v22 = vrot.slane %v2061_v21, 2 }
 0x88b   :  { %v2065_v63 = vpop.permute.xlu1 %2064 }
 0x88c   :  { %v2066_v41 = vrot.slane %v2065_v63, 2 }
 0x88e   :  { %5153 = vtanh.f32 %v2066_v41 }
 0x894   :  { %v5154_v39 = vpop.eup %5153 }
 0x895   :  { %v2070_v62 = vmul.f32 %v5154_v39, %v2061_v21 }
 0x897   :  { %2072 = vrot.lane.b32.xlu2 %v2070_v62, %s5910_s13 }
 0x8f1   :  { %v2073_v14 = vpop.permute.xlu2 %2072 }
 0x8f2   :  { %v7389_v20 = vadd.f32 %v2073_v14, %v2069_v9 }
 0x8f4   :  { %5155 = vtanh.f32 %v7389_v20 }
 0x8fa   :  { %v5156_v6 = vpop.eup %5155 }
 0x8fb   :  { %2081 = vrot.lane.b32.xlu2 %v5156_v6, %s5910_s13  ;;  %v1891_v6 = vrot.slane %v7359_v44, 4 }
 0x955   :  { %v2082_v26 = vpop.permute.xlu2 %2081 }
 0x956   :  { %v2084_v57 = vmul.f32 %v2082_v26, %v2078_v22 }
 0x958   :  { %v2085_v24 = vadd.f32 %v2084_v57, %v1890_v37  ;;  %4957 = vmatmul.msk.f32.vlgmr.msra.gmra.mxu2 %vm453_vm0, %v2084_v57  ;;  %4958 = vmatmul.msk.f32.vlgmr.msrb.gmra.mxu3 %vm453_vm0, %v2084_v57 }
 0x959   :  { %2471 = vmatpush.msra.mxu2 %v7133_v2  ;;  %2491 = vmatpush.msrb.mxu3 %v7205_v1 }
 0x95a   :  { %2087 = vst.msk [vmem:[#allocation3 + $0x2] sm:$0x3] %vm1993_vm13, %v2085_v24 }
 0x95b   :  { %2472 = vmatpush.msra.mxu2 %v7136_v60  ;;  %2492 = vmatpush.msrb.mxu3 %v7207_v3 }
 0x95d   :  { %2473 = vmatpush.msra.mxu2 %v7141_v52  ;;  %2493 = vmatpush.msrb.mxu3 %v7211_v18 }
 0x95f   :  { %2474 = vmatpush.msra.mxu2 %v7151_v0  ;;  %2494 = vmatpush.msrb.mxu3 %v7217_v4 }
 0x961   :  { %v7405_v58 = vld [vmem:[#allocation3 + $0x2] sm:$0x3]  ;;  %2475 = vmatpush.msra.mxu2 %v7159_v7  ;;  %2495 = vmatpush.msrb.mxu3 %v7230_v12 }
 0x962   :  { %2680 = vst [vmem:[#allocation1 + $0x1] ss:$4 sm:$0xff] %v7405_v58 }
 0x963   :  { %2476 = vmatpush.msra.mxu2 %v7166_v16  ;;  %2496 = vmatpush.msrb.mxu3 %v7234_v19 }
 0x965   :  { %2477 = vmatpush.msra.mxu2 %v7172_v33  ;;  %2497 = vmatpush.msrb.mxu3 %v7239_v29 }
 0x967   :  { %2478 = vmatpush.msra.mxu2 %v7185_v28  ;;  %2498 = vmatpush.msrb.mxu3 %v7245_v30 }
 0x9db   :  { %v2128_v48 = vpop.f32.mrf.mxu3  ;;  %v2108_v25 = vpop.f32.mrf.mxu2 }
 0x9dc   :  { %v2133_v38 = vrot.slane %v2128_v48, 6 }
 0x9de   :  { %v2134_v13 = vsel %vm564_vm1, %v2108_v25, %v2133_v38 }
 0x9df   :  { %v2136_v46 = vadd.f32 %v2134_v13, %v1768_v32 }
 0x9e1   :  { %2157 = vrot.lane.b32.xlu0 %v2136_v46, %s5910_s13  ;;  %v4959_v40 = vmul.f32 -1.442695, %v2136_v46 }
 0x9e3   :  { %5157 = vpow2.f32 %v4959_v40 }
 0x9e9   :  { %v5158_v5 = vpop.eup %5157 }
 0x9ea   :  { %v2140_v51 = vadd.f32 1.0, %v5158_v5 }
 0x9ec   :  { %5159 = vrcp.f32 %v2140_v51  ;;  %v2152_v42 = vand.u32 2147483648, %v2140_v51  ;;  %vm2146_vm8 = vweird.f32 %v2140_v51  ;;  %v2150_v63 = vand.u32 2147483647, %v2140_v51 }
 0x9ee   :  { %v2153_v59 = vor.u32 1.1754944e-38, %v2152_v42  ;;  %vm2151_vm10 = vcmp.eq.f32.partialorder %v2150_v63, 8.507059e+37  ;;  %v1771_v42 = vsel %vm564_vm1, %v7333_v53, %v7335_v54 }
 0x9f2   :  { %v5160_v10 = vpop.eup %5159 }
 0x9f3   :  { %v2142_v45 = vmul.f32 %v5160_v10, %v2140_v51  ;;  %vm2147_vm7 = vweird.f32 %v5160_v10 }
 0x9f4   :  { %vm2148_vm9 = vmor %vm2146_vm8, %vm2147_vm7 }
 0x9f5   :  { %v2143_v27 = vsub.f32 1.0, %v2142_v45 }
 0x9f7   :  { %v2144_v23 = vmul.f32 %v5160_v10, %v2143_v27 }
 0x9f9   :  { %v2145_v50 = vadd.f32 %v5160_v10, %v2144_v23 }
 0x9fb   :  { %v2149_v41 = vsel %vm2148_vm9, %v5160_v10, %v2145_v50  ;;  %v1892_v10 = vrot.slane %v7359_v44, 6 }
 0x9fc   :  { %v2154_v8 = vsel %vm2151_vm10, %v2153_v59, %v2149_v41 }
 0x9fd   :  { %v2162_v34 = vmul.f32 %v2154_v8, %v7389_v20  ;;  %v2171_v9 = vrot.slane %v2154_v8, 2 }
 0xa53   :  { %v2158_v35 = vpop.permute.xlu0 %2157 }
 0xa54   :  { %v2159_v49 = vrot.slane %v2158_v35, 2 }
 0xa56   :  { %5161 = vtanh.f32 %v2159_v49 }
 0xa5c   :  { %v5162_v36 = vpop.eup %5161 }
 0xa5d   :  { %v2163_v11 = vmul.f32 %v5162_v36, %v2154_v8 }
 0xa5f   :  { %2165 = vrot.lane.b32.xlu1 %v2163_v11, %s5910_s13 }
 0xad1   :  { %v2166_v39 = vpop.permute.xlu1 %2165 }
 0xad2   :  { %v2168_v21 = vadd.f32 %v2166_v39, %v2162_v34 }
 0xad4   :  { %5163 = vtanh.f32 %v2168_v21 }
 0xada   :  { %v5164_v62 = vpop.eup %5163 }
 0xadb   :  { %2174 = vrot.lane.b32.xlu2 %v5164_v62, %s5910_s13 }
 0xb35   :  { %v2175_v14 = vpop.permute.xlu2 %2174 }
 0xb36   :  { %v2177_v22 = vmul.f32 %v2175_v14, %v2171_v9 }
 0xb38   :  { %v2178_v26 = vadd.f32 %v2177_v22, %v1891_v6  ;;  %4960 = vmatmul.msk.f32.vlgmr.msrb.gmra.mxu0 %vm453_vm0, %v2177_v22  ;;  %4961 = vmatmul.msk.f32.vlgmr.msrb.gmra.mxu1 %vm453_vm0, %v2177_v22 }
 0xb39   :  { %2564 = vmatpush.msrb.mxu0 %v7133_v2  ;;  %2584 = vmatpush.msrb.mxu1 %v7205_v1 }
 0xb3a   :  { %2180 = vst.msk [vmem:[#allocation3 + $0x4] sm:$0x3] %vm1993_vm13, %v2178_v26 }
 0xb3b   :  { %2565 = vmatpush.msrb.mxu0 %v7136_v60  ;;  %2585 = vmatpush.msrb.mxu1 %v7207_v3 }
 0xb3d   :  { %2566 = vmatpush.msrb.mxu0 %v7141_v52  ;;  %2586 = vmatpush.msrb.mxu1 %v7211_v18 }
 0xb3f   :  { %2567 = vmatpush.msrb.mxu0 %v7151_v0  ;;  %2587 = vmatpush.msrb.mxu1 %v7217_v4  ;;  %v1770_v0 = vrot.slane %v7319_v47, 6 }
 0xb41   :  { %v2648_v20 = vld [vmem:[#allocation3 + $0x4] sm:$0x3]  ;;  %2568 = vmatpush.msrb.mxu0 %v7159_v7  ;;  %2588 = vmatpush.msrb.mxu1 %v7230_v12 }
 0xb42   :  { %2682 = vst [vmem:[#allocation1 + $0x2] ss:$4 sm:$0xff] %v2648_v20 }
 0xb43   :  { %2569 = vmatpush.msrb.mxu0 %v7166_v16  ;;  %2589 = vmatpush.msrb.mxu1 %v7234_v19 }
 0xb45   :  { %2570 = vmatpush.msrb.mxu0 %v7172_v33  ;;  %2590 = vmatpush.msrb.mxu1 %v7239_v29 }
 0xb47   :  { %2571 = vmatpush.msrb.mxu0 %v7185_v28  ;;  %2591 = vmatpush.msrb.mxu1 %v7245_v30 }
 0xbb5   :  { %v2221_v2 = vpop.f32.mrf.mxu1  ;;  %v2201_v52 = vpop.f32.mrf.mxu0 }
 0xbb6   :  { %v2226_v60 = vrot.slane %v2221_v2, 6 }
 0xbb8   :  { %v2227_v7 = vsel %vm564_vm1, %v2201_v52, %v2226_v60 }
 0xbb9   :  { %v2229_v1 = vadd.f32 %v2227_v7, %v1770_v0  ;;  %v1846_v0 = vadd.f32 %v7356_v61, %v7416_v43 }
 0xbbb   :  { %2250 = vrot.lane.b32.xlu0 %v2229_v1, %s5910_s13  ;;  %v4962_v16 = vmul.f32 -1.442695, %v2229_v1  ;;  %v4952_v7 = vmul.f32 -1.442695, %v1846_v0 }
 0xbbd   :  { %5165 = vpow2.f32 %v4962_v16 }
 0xbc3   :  { %v5166_v3 = vpop.eup %5165 }
 0xbc4   :  { %v2233_v33 = vadd.f32 1.0, %v5166_v3 }
 0xbc6   :  { %5167 = vrcp.f32 %v2233_v33  ;;  %v2245_v47 = vand.u32 2147483648, %v2233_v33  ;;  %vm2239_vm2 = vweird.f32 %v2233_v33  ;;  %v2243_v37 = vand.u32 2147483647, %v2233_v33 }
 0xbc8   :  { %v2246_v24 = vor.u32 1.1754944e-38, %v2245_v47  ;;  %vm2244_vm4 = vcmp.eq.f32.partialorder %v2243_v37, 8.507059e+37 }
 0xbcc   :  { %v5168_v18 = vpop.eup %5167 }
 0xbcd   :  { %v2235_v4 = vmul.f32 %v5168_v18, %v2233_v33  ;;  %vm2240_vm11 = vweird.f32 %v5168_v18 }
 0xbce   :  { %vm2241_vm3 = vmor %vm2239_vm2, %vm2240_vm11 }
 0xbcf   :  { %v2236_v28 = vsub.f32 1.0, %v2235_v4 }
 0xbd1   :  { %v2237_v12 = vmul.f32 %v5168_v18, %v2236_v28 }
 0xbd3   :  { %v2238_v30 = vadd.f32 %v5168_v18, %v2237_v12 }
 0xbd5   :  { %v2242_v57 = vsel %vm2241_vm3, %v5168_v18, %v2238_v30 }
 0xbd6   :  { %v2247_v38 = vsel %vm2244_vm4, %v2246_v24, %v2242_v57 }
 0xbd7   :  { %v2255_v32 = vmul.f32 %v2247_v38, %v2168_v21  ;;  %v2264_v5 = vrot.slane %v2247_v38, 2 }
 0xc2d   :  { %v2251_v19 = vpop.permute.xlu0 %2250 }
 0xc2e   :  { %v2252_v29 = vrot.slane %v2251_v19, 2 }
 0xc30   :  { %5169 = vtanh.f32 %v2252_v29 }
 0xc36   :  { %v5170_v48 = vpop.eup %5169 }
 0xc37   :  { %v2256_v25 = vmul.f32 %v5170_v48, %v2247_v38 }
 0xc39   :  { %2258 = vrot.lane.b32.xlu1 %v2256_v25, %s5910_s13 }
 0xcab   :  { %v2259_v13 = vpop.permute.xlu1 %2258 }
 0xcac   :  { %v2261_v46 = vadd.f32 %v2259_v13, %v2255_v32  ;;  %v1773_v13 = vrot.slane %v7340_v55, 2 }
 0xcae   :  { %5171 = vtanh.f32 %v2261_v46 }
 0xcb4   :  { %v5172_v40 = vpop.eup %5171 }
 0xcb5   :  { %2267 = vrot.lane.b32.xlu2 %v5172_v40, %s5910_s13 }
 0xd0f   :  { %v2268_v51 = vpop.permute.xlu2 %2267 }
 0xd10   :  { %v2270_v45 = vmul.f32 %v2268_v51, %v2264_v5 }
 0xd12   :  { %v2271_v27 = vadd.f32 %v2270_v45, %v1892_v10  ;;  %4963 = vmatmul.msk.f32.vlgmr.msrb.gmra.mxu2 %vm453_vm0, %v2270_v45  ;;  %4964 = vmatmul.msk.f32.vlgmr.msra.gmra.mxu3 %vm453_vm0, %v2270_v45 }
 0xd14   :  { %2273 = vst.msk [vmem:[#allocation3 + $0x6] sm:$0x3] %vm1993_vm13, %v2271_v27 }
 0xd1b   :  { %v2649_v23 = vld [vmem:[#allocation3 + $0x6] sm:$0x3] }
 0xd1c   :  { %2684 = vst [vmem:[#allocation1 + $0x3] ss:$4 sm:$0xff] %v2649_v23 }
 0xd23   :  { %v7453_v35 = vld.sshfl [vmem:[#allocation1] sm:$0xff pattern:$0x73625140] }
 0xd24   :  { %2748 = vst [vmem:[#allocation1] ss:$4 sm:$0xff] %v7373_v17 }
 0xd25   :  { %2750 = vst [vmem:[#allocation1 + $0x1] ss:$4 sm:$0xff] %v7405_v58 }
 0xd26   :  { %2752 = vst [vmem:[#allocation1 + $0x2] ss:$4 sm:$0xff] %v2648_v20 }
 0xd27   :  { %2754 = vst [vmem:[#allocation1 + $0x3] ss:$4 sm:$0xff] %v2649_v23 }
 0xd95   :  { %v2314_v49 = vpop.f32.mrf.mxu3  ;;  %v2294_v50 = vpop.f32.mrf.mxu2 }
 0xd96   :  { %v2319_v44 = vrot.slane %v2314_v49, 6 }
 0xd98   :  { %v2320_v63 = vsel %vm564_vm1, %v2294_v50, %v2319_v44 }
 0xd99   :  { %v2322_v41 = vadd.f32 %v2320_v63, %v1771_v42 }
 0xd9b   :  { %2343 = vrot.lane.b32.xlu0 %v2322_v41, %s5910_s13  ;;  %v4965_v59 = vmul.f32 -1.442695, %v2322_v41 }
 0xd9d   :  { %5173 = vpow2.f32 %v4965_v59 }
 0xda3   :  { %v5174_v36 = vpop.eup %5173 }
 0xda4   :  { %v2326_v17 = vadd.f32 1.0, %v5174_v36 }
 0xda6   :  { %5175 = vrcp.f32 %v2326_v17  ;;  %v2338_v53 = vand.u32 2147483648, %v2326_v17  ;;  %vm2332_vm14 = vweird.f32 %v2326_v17  ;;  %v2336_v54 = vand.u32 2147483647, %v2326_v17 }
 0xda8   :  { %v2339_v14 = vor.u32 1.1754944e-38, %v2338_v53  ;;  %vm2337_vm15 = vcmp.eq.f32.partialorder %v2336_v54, 8.507059e+37 }
 0xdac   :  { %v5176_v58 = vpop.eup %5175 }
 0xdad   :  { %v2328_v8 = vmul.f32 %v5176_v58, %v2326_v17  ;;  %vm2333_vm12 = vweird.f32 %v5176_v58 }
 0xdae   :  { %vm2334_vm5 = vmor %vm2332_vm14, %vm2333_vm12 }
 0xdaf   :  { %v2329_v11 = vsub.f32 1.0, %v2328_v8  ;;  %v2661_v8 = vld [vmem:[#allocation17 + $0x38] sm:$0xff] }
 0xdb0   :  { %2707 = vmatpush.msrb.mxu2 %v2661_v8 }
 0xdb1   :  { %v2330_v34 = vmul.f32 %v5176_v58, %v2329_v11  ;;  %v2743_v11 = vld [vmem:[%s7991_s12 + $0x38] sm:$0xff] }
 0xdb2   :  { %2777 = vmatpush.msra.mxu3 %v2743_v11 }
 0xdb3   :  { %v2331_v62 = vadd.f32 %v5176_v58, %v2330_v34  ;;  %v2660_v34 = vld [vmem:[#allocation17 + $0x30] sm:$0xff] }
 0xdb4   :  { %2708 = vmatpush.msrb.mxu2 %v2660_v34 }
 0xdb5   :  { %v2335_v9 = vsel %vm2334_vm5, %v5176_v58, %v2331_v62  ;;  %v2741_v62 = vld [vmem:[%s7991_s12 + $0x28] sm:$0xff] }
 0xdb6   :  { %v2340_v22 = vsel %vm2337_vm15, %v2339_v14, %v2335_v9 }
 0xdb7   :  { %v2348_v20 = vmul.f32 %v2340_v22, %v2261_v46  ;;  %v2357_v61 = vrot.slane %v2340_v22, 2 }
 0xe0d   :  { %v2344_v39 = vpop.permute.xlu0 %2343 }
 0xe0e   :  { %v2345_v21 = vrot.slane %v2344_v39, 2  ;;  %v2742_v39 = vld [vmem:[%s7991_s12 + $0x30] sm:$0xff] }
 0xe0f   :  { %2778 = vmatpush.msra.mxu3 %v2742_v39 }
 0xe10   :  { %5177 = vtanh.f32 %v2345_v21  ;;  %v2659_v21 = vld [vmem:[#allocation17 + $0x28] sm:$0xff] }
 0xe11   :  { %2709 = vmatpush.msrb.mxu2 %v2659_v21  ;;  %2779 = vmatpush.msra.mxu3 %v2741_v62  ;;  %v7574_v21 = vld [vmem:[#allocation21] ss:$0 sm:$0xff] }
 0xe16   :  { %v5178_v6 = vpop.eup %5177 }
 0xe17   :  { %v2349_v26 = vmul.f32 %v5178_v6, %v2340_v22  ;;  %v2658_v6 = vld [vmem:[#allocation17 + $0x20] sm:$0xff]  ;;  %v2740_v22 = vld [vmem:[%s7991_s12 + $0x20] sm:$0xff] }
 0xe18   :  { %2710 = vmatpush.msrb.mxu2 %v2658_v6  ;;  %2780 = vmatpush.msra.mxu3 %v2740_v22 }
 0xe19   :  { %2351 = vrot.lane.b32.xlu1 %v2349_v26, %s5910_s13  ;;  %v2657_v26 = vld [vmem:[#allocation17 + $0x18] sm:$0xff] }
 0xe1a   :  { %2711 = vmatpush.msrb.mxu2 %v2657_v26 }
 0xe8b   :  { %v2352_v2 = vpop.permute.xlu1 %2351 }
 0xe8c   :  { %v7463_v60 = vadd.f32 %v2352_v2, %v2348_v20  ;;  %v2739_v20 = vld [vmem:[%s7991_s12 + $0x18] sm:$0xff]  ;;  %v2656_v2 = vld [vmem:[#allocation17 + $0x10] sm:$0xff] }
 0xe8d   :  { %2781 = vmatpush.msra.mxu3 %v2739_v20  ;;  %2712 = vmatpush.msrb.mxu2 %v2656_v2 }
 0xe8e   :  { %5179 = vtanh.f32 %v7463_v60 }
 0xe8f   :  { %5181 = vpow2.f32 %v4952_v7  ;;  %v2654_v7 = vld [vmem:[#allocation17] sm:$0xff] }
 0xe94   :  { %v5180_v52 = vpop.eup %5179 }
 0xe95   :  { %2360 = vrot.lane.b32.xlu2 %v5180_v52, %s5910_s13  ;;  %v5182_v1 = vpop.eup %5181  ;;  %v2655_v52 = vld [vmem:[#allocation17 + $0x8] sm:$0xff] }
 0xe96   :  { %v1855_v16 = vadd.f32 1.0, %v5182_v1  ;;  %2713 = vmatpush.msrb.mxu2 %v2655_v52  ;;  %v2736_v1 = vld [vmem:[%s7991_s12] sm:$0xff]  ;;  %v7578_v52 = vld [vmem:[#allocation20] ss:$0 sm:$0xff] }
 0xe98   :  { %5183 = vrcp.f32 %v1855_v16  ;;  %v1882_v12 = vand.u32 2147483648, %v1855_v16  ;;  %vm1876_vm7 = vweird.f32 %v1855_v16  ;;  %v1880_v19 = vand.u32 2147483647, %v1855_v16  ;;  %2714 = vmatpush.msrb.mxu2 %v2654_v7 }
 0xe9a   :  { %v1883_v30 = vor.u32 1.1754944e-38, %v1882_v12  ;;  %vm1881_vm9 = vcmp.eq.f32.partialorder %v1880_v19, 8.507059e+37 }
 0xe9e   :  { %v5184_v3 = vpop.eup %5183 }
 0xe9f   :  { %v1872_v33 = vmul.f32 %v5184_v3, %v1855_v16  ;;  %vm1877_vm6 = vweird.f32 %v5184_v3 }
 0xea0   :  { %vm1878_vm8 = vmor %vm1876_vm7, %vm1877_vm6 }
 0xea1   :  { %v1873_v18 = vsub.f32 1.0, %v1872_v33 }
 0xea3   :  { %v1874_v4 = vmul.f32 %v5184_v3, %v1873_v18 }
 0xea5   :  { %v1875_v28 = vadd.f32 %v5184_v3, %v1874_v4 }
 0xea7   :  { %v1879_v29 = vsel %vm1878_vm8, %v5184_v3, %v1875_v28  ;;  %v2763_v28 = vld.sshfl [vmem:[#allocation1] sm:$0xff pattern:$0x73625140] }
 0xea8   :  { %v1884_v47 = vsel %vm1881_vm9, %v1883_v30, %v1879_v29 }
 0xea9   :  { %v7469_v37 = vmul.f32 %v1884_v47, %v1846_v0  ;;  %v2737_v0 = vld [vmem:[%s7991_s12 + $0x8] sm:$0xff]  ;;  %v1775_v47 = vrot.slane %v7345_v56, 4 }
 0xeab   :  { %v1893_v33 = vrot.slane %v7469_v37, 2  ;;  %v1894_v8 = vrot.slane %v7469_v37, 4 }
 0xeef   :  { %v2361_v43 = vpop.permute.xlu2 %2360 }
 0xef0   :  { %v2363_v57 = vmul.f32 %v2361_v43, %v2357_v61 }
 0xef2   :  { %v2364_v24 = vadd.f32 %v2363_v57, %v7469_v37  ;;  %4966 = vmatmul.msk.f32.vlgmr.msra.gmra.mxu0 %vm453_vm0, %v2363_v57  ;;  %4967 = vmatmul.msk.f32.vlgmr.msra.gmra.mxu1 %vm453_vm0, %v2363_v57 }
 0xef4   :  { %2366 = vst.msk [vmem:[#allocation3 + $0x8] sm:$0x3] %vm1993_vm13, %v2364_v24 }
 0xefb   :  { %v7475_v48 = vld [vmem:[#allocation3 + $0x8] sm:$0x3] }
 0xefc   :  { %2686 = vst [vmem:[#allocation1 + $0x20] ss:$4 sm:$0xff] %v7475_v48 }
 0xf6f   :  { %v2407_v38 = vpop.f32.mrf.mxu1  ;;  %v2387_v32 = vpop.f32.mrf.mxu0 }
 0xf70   :  { %v2412_v25 = vrot.slane %v2407_v38, 6 }
 0xf72   :  { %v2413_v46 = vsel %vm564_vm1, %v2387_v32, %v2412_v25 }
 0xf73   :  { %v2415_v40 = vadd.f32 %v2413_v46, %v1773_v13 }
 0xf75   :  { %2436 = vrot.lane.b32.xlu0 %v2415_v40, %s5910_s13  ;;  %v4968_v5 = vmul.f32 -1.442695, %v2415_v40 }
 0xf77   :  { %5185 = vpow2.f32 %v4968_v5 }
 0xf7d   :  { %v5186_v51 = vpop.eup %5185 }
 0xf7e   :  { %v2419_v10 = vadd.f32 1.0, %v5186_v51 }
 0xf80   :  { %5187 = vrcp.f32 %v2419_v10  ;;  %v2431_v55 = vand.u32 2147483648, %v2419_v10  ;;  %vm2425_vm11 = vweird.f32 %v2419_v10  ;;  %v2429_v63 = vand.u32 2147483647, %v2419_v10 }
 0xf82   :  { %v2432_v59 = vor.u32 1.1754944e-38, %v2431_v55  ;;  %vm2430_vm3 = vcmp.eq.f32.partialorder %v2429_v63, 8.507059e+37  ;;  %v7530_v63 = vld [vmem:[#allocation18 + $0x18] sm:$0xff] }
 0xf83   :  { %2855 = vmatpush.msra.mxu0 %v7530_v63  ;;  %2932 = vmatpush.msra.mxu1 %v7530_v63 }
 0xf86   :  { %v5188_v45 = vpop.eup %5187 }
 0xf87   :  { %v2421_v27 = vmul.f32 %v5188_v45, %v2419_v10  ;;  %vm2426_vm10 = vweird.f32 %v5188_v45 }
 0xf88   :  { %vm2427_vm2 = vmor %vm2425_vm11, %vm2426_vm10 }
 0xf89   :  { %v2422_v23 = vsub.f32 1.0, %v2421_v27 }
 0xf8b   :  { %v2423_v49 = vmul.f32 %v5188_v45, %v2422_v23 }
 0xf8d   :  { %v2424_v42 = vadd.f32 %v5188_v45, %v2423_v49 }
 0xf8f   :  { %v2428_v41 = vsel %vm2427_vm2, %v5188_v45, %v2424_v42  ;;  %vm2840_vm2 = vcmask 261120  }
 0xf90   :  { %v2433_v17 = vsel %vm2430_vm3, %v2432_v59, %v2428_v41  ;;  %v7534_v41 = vld [vmem:[#allocation18 + $0x10] sm:$0xff]  ;;  %v7540_v59 = vld [vmem:[#allocation18 + $0x8] sm:$0xff] }
 0xf91   :  { %v2441_v53 = vmul.f32 %v2433_v17, %v7463_v60  ;;  %v2738_v60 = vld [vmem:[%s7991_s12 + $0x10] sm:$0xff]  ;;  %v2450_v16 = vrot.slane %v2433_v17, 2  ;;  %2856 = vmatpush.msra.mxu0 %v7534_v41  ;;  %2933 = vmatpush.msra.mxu1 %v7534_v41 }
 0xf92   :  { %2782 = vmatpush.msra.mxu3 %v2738_v60  ;;  %v1777_v60 = vrot.slane %v7350_v31, 6 }
 0xf93   :  { %2857 = vmatpush.msra.mxu0 %v7540_v59  ;;  %2934 = vmatpush.msra.mxu1 %v7540_v59 }
 0xf94   :  { %2783 = vmatpush.msra.mxu3 %v2737_v0 }
 0xf96   :  { %2784 = vmatpush.msra.mxu3 %v2736_v1 }
 0xfe7   :  { %v2437_v44 = vpop.permute.xlu0 %2436 }
 0xfe8   :  { %v2438_v50 = vrot.slane %v2437_v44, 2 }
 0xfea   :  { %5189 = vtanh.f32 %v2438_v50 }
 0xff0   :  { %v5190_v36 = vpop.eup %5189 }
 0xff1   :  { %v2442_v58 = vmul.f32 %v5190_v36, %v2433_v17  ;;  %v7546_v36 = vld [vmem:[#allocation18] sm:$0xff] }
 0xff2   :  { %2858 = vmatpush.msra.mxu0 %v7546_v36  ;;  %2935 = vmatpush.msra.mxu1 %v7546_v36 }
 0xff3   :  { %2444 = vrot.lane.b32.xlu1 %v2442_v58, %s5910_s13 }
0x1065   :  { %v2445_v54 = vpop.permute.xlu1 %2444 }
0x1066   :  { %v7492_v9 = vadd.f32 %v2445_v54, %v2441_v53 }
0x1068   :  { %5191 = vtanh.f32 %v7492_v9 }
0x106e   :  { %v5192_v14 = vpop.eup %5191 }
0x106f   :  { %2453 = vrot.lane.b32.xlu2 %v5192_v14, %s5910_s13 }
0x10c9   :  { %v2454_v3 = vpop.permute.xlu2 %2453 }
0x10ca   :  { %v2456_v18 = vmul.f32 %v2454_v3, %v2450_v16 }
0x10cc   :  { %v2457_v4 = vadd.f32 %v2456_v18, %v1893_v33  ;;  %4969 = vmatmul.msk.f32.vlgmr.msra.gmra.mxu2 %vm453_vm0, %v2456_v18  ;;  %4970 = vmatmul.msk.f32.vlgmr.msrb.gmra.mxu3 %vm453_vm0, %v2456_v18 }
0x10cd   :  { %3163 = vmatpush.msra.mxu2 %v7530_v63  ;;  %3240 = vmatpush.msrb.mxu3 %v7530_v63 }
0x10ce   :  { %2459 = vst.msk [vmem:[#allocation3 + $0xa] sm:$0x3] %vm1993_vm13, %v2457_v4 }
0x10cf   :  { %3164 = vmatpush.msra.mxu2 %v7534_v41  ;;  %3241 = vmatpush.msrb.mxu3 %v7534_v41 }
0x10d1   :  { %3165 = vmatpush.msra.mxu2 %v7540_v59  ;;  %3242 = vmatpush.msrb.mxu3 %v7540_v59 }
0x10d3   :  { %3166 = vmatpush.msra.mxu2 %v7546_v36  ;;  %3243 = vmatpush.msrb.mxu3 %v7546_v36 }
0x10d4   :  { %4975 = vmatmul.msk.f32.vlgmr.msrb.gmra.mxu2 %vm453_vm0, %v7453_v35  ;;  %4977 = vmatmul.msk.f32.vlgmr.msra.gmra.mxu3 %vm453_vm0, %v2763_v28 }
0x10d5   :  { %v7518_v12 = vld [vmem:[#allocation3 + $0xa] sm:$0x3] }
0x10d6   :  { %2688 = vst [vmem:[#allocation1 + $0x21] ss:$4 sm:$0xff] %v7518_v12 }
0x114f   :  { %v2500_v19 = vpop.f32.mrf.mxu3  ;;  %v2480_v30 = vpop.f32.mrf.mxu2 }
0x1150   :  { %v2505_v29 = vrot.slane %v2500_v19, 6 }
0x1152   :  { %v2506_v61 = vsel %vm564_vm1, %v2480_v30, %v2505_v29 }
0x1153   :  { %v2508_v43 = vadd.f32 %v2506_v61, %v1775_v47 }
0x1155   :  { %2529 = vrot.lane.b32.xlu0 %v2508_v43, %s5910_s13  ;;  %v4971_v57 = vmul.f32 -1.442695, %v2508_v43 }
0x1157   :  { %5193 = vpow2.f32 %v4971_v57  ;;  %v2786_v62 = vpop.f32.mrf.mxu3  ;;  %v2716_v7 = vpop.f32.mrf.mxu2 }
0x1158   :  { %v2787_v53 = vadd.f32 %v7574_v21, %v2786_v62  ;;  %v7584_v3 = vadd.f32 %v7578_v52, %v2716_v7 }
0x115a   :  { %v4979_v54 = vmul.f32 -1.442695, %v2787_v53 }
0x115d   :  { %v5194_v24 = vpop.eup %5193 }
0x115e   :  { %v2512_v35 = vadd.f32 1.0, %v5194_v24 }
0x1160   :  { %5195 = vrcp.f32 %v2512_v35  ;;  %v2524_v56 = vand.u32 2147483648, %v2512_v35  ;;  %vm2518_vm12 = vweird.f32 %v2512_v35  ;;  %v2522_v51 = vand.u32 2147483647, %v2512_v35 }
0x1162   :  { %v2525_v45 = vor.u32 1.1754944e-38, %v2524_v56  ;;  %vm2523_vm5 = vcmp.eq.f32.partialorder %v2522_v51, 8.507059e+37 }
0x1166   :  { %v5196_v38 = vpop.eup %5195 }
0x1167   :  { %v2514_v25 = vmul.f32 %v5196_v38, %v2512_v35  ;;  %vm2519_vm4 = vweird.f32 %v5196_v38 }
0x1168   :  { %vm2520_vm14 = vmor %vm2518_vm12, %vm2519_vm4 }
0x1169   :  { %v2515_v32 = vsub.f32 1.0, %v2514_v25 }
0x116b   :  { %v2516_v13 = vmul.f32 %v5196_v38, %v2515_v32 }
0x116d   :  { %v2517_v5 = vadd.f32 %v5196_v38, %v2516_v13 }
0x116f   :  { %v2521_v10 = vsel %vm2520_vm14, %v5196_v38, %v2517_v5 }
0x1170   :  { %v2526_v23 = vsel %vm2523_vm5, %v2525_v45, %v2521_v10 }
0x1171   :  { %v2534_v44 = vmul.f32 %v2526_v23, %v7492_v9  ;;  %v2543_v17 = vrot.slane %v2526_v23, 2 }
0x11c7   :  { %v2530_v46 = vpop.permute.xlu0 %2529 }
0x11c8   :  { %v2531_v40 = vrot.slane %v2530_v46, 2 }
0x11ca   :  { %5197 = vtanh.f32 %v2531_v40 }
0x11d0   :  { %v5198_v27 = vpop.eup %5197 }
0x11d1   :  { %v2535_v49 = vmul.f32 %v5198_v27, %v2526_v23 }
0x11d3   :  { %2537 = vrot.lane.b32.xlu1 %v2535_v49, %s5910_s13 }
0x1245   :  { %v2538_v50 = vpop.permute.xlu1 %2537 }
0x1246   :  { %v7526_v42 = vadd.f32 %v2538_v50, %v2534_v44 }
0x1248   :  { %5199 = vtanh.f32 %v7526_v42 }
0x1249   :  { %5201 = vpow2.f32 %v4979_v54 }
0x124e   :  { %v5200_v55 = vpop.eup %5199 }
0x124f   :  { %2546 = vrot.lane.b32.xlu2 %v5200_v55, %s5910_s13  ;;  %v5202_v9 = vpop.eup %5201 }
0x1250   :  { %v2798_v14 = vadd.f32 1.0, %v5202_v9 }
0x1252   :  { %5203 = vrcp.f32 %v2798_v14  ;;  %v2811_v19 = vand.u32 2147483648, %v2798_v14  ;;  %vm2805_vm6 = vweird.f32 %v2798_v14  ;;  %v2809_v31 = vand.u32 2147483647, %v2798_v14 }
0x1254   :  { %v2812_v47 = vor.u32 1.1754944e-38, %v2811_v19 }
0x1258   :  { %v5204_v6 = vpop.eup %5203 }
0x1259   :  { %v2801_v2 = vmul.f32 %v5204_v6, %v2798_v14  ;;  %vm2806_vm15 = vweird.f32 %v5204_v6 }
0x125a   :  { %vm2807_vm7 = vmor %vm2805_vm6, %vm2806_vm15 }
0x125b   :  { %v2802_v16 = vsub.f32 1.0, %v2801_v2 }
0x125d   :  { %v2803_v4 = vmul.f32 %v5204_v6, %v2802_v16 }
0x125f   :  { %v2804_v28 = vadd.f32 %v5204_v6, %v2803_v4 }
0x1261   :  { %v2808_v30 = vsel %vm2807_vm7, %v5204_v6, %v2804_v28 }
0x12a9   :  { %v2547_v58 = vpop.permute.xlu2 %2546 }
0x12aa   :  { %v2549_v11 = vmul.f32 %v2547_v58, %v2543_v17 }
0x12ac   :  { %v2550_v34 = vadd.f32 %v2549_v11, %v1894_v8  ;;  %4972 = vmatmul.msk.f32.vlgmr.msrb.gmra.mxu0 %vm453_vm0, %v2549_v11  ;;  %4973 = vmatmul.msk.f32.vlgmr.msrb.gmra.mxu1 %vm453_vm0, %v2549_v11 }
0x12ad   :  { %3009 = vmatpush.msrb.mxu0 %v7530_v63  ;;  %3086 = vmatpush.msrb.mxu1 %v7530_v63 }
0x12ae   :  { %2552 = vst.msk [vmem:[#allocation3 + $0xc] sm:$0x3] %vm1993_vm13, %v2550_v34 }
0x12af   :  { %3010 = vmatpush.msrb.mxu0 %v7534_v41  ;;  %3087 = vmatpush.msrb.mxu1 %v7534_v41 }
0x12b1   :  { %3011 = vmatpush.msrb.mxu0 %v7540_v59  ;;  %3088 = vmatpush.msrb.mxu1 %v7540_v59 }
0x12b3   :  { %3012 = vmatpush.msrb.mxu0 %v7546_v36  ;;  %3089 = vmatpush.msrb.mxu1 %v7546_v36 }
0x12b4   :  { %2859 = vmatmul.f32.vlgmr.msra.gmra.mxu0 %v8287_v15 }
0x12b5   :  { %v7567_v39 = vld [vmem:[#allocation3 + $0xc] sm:$0x3]  ;;  %3317 = vmatpush.msra.mxu0 %v7530_v63 }
0x12b6   :  { %2690 = vst [vmem:[#allocation1 + $0x22] ss:$4 sm:$0xff] %v7567_v39 }
0x12b7   :  { %3318 = vmatpush.msra.mxu0 %v7534_v41 }
0x12b9   :  { %3319 = vmatpush.msra.mxu0 %v7540_v59 }
0x12bb   :  { %3320 = vmatpush.msra.mxu0 %v7546_v36 }
0x1329   :  { %v2573_v22 = vpop.f32.mrf.mxu0  ;;  %v2593_v26 = vpop.f32.mrf.mxu1 }
0x132a   :  { %v2598_v20 = vrot.slane %v2593_v26, 6 }
0x132c   :  { %v2599_v0 = vsel %vm564_vm1, %v2573_v22, %v2598_v20  ;;  %vm2810_vm1 = vcmp.eq.f32.partialorder %v2809_v31, 8.507059e+37 }
0x132d   :  { %v7581_v1 = vadd.f32 %v2599_v0, %v1777_v60  ;;  %v2813_v61 = vsel %vm2810_vm1, %v2812_v47, %v2808_v30 }
0x132e   :  { %v7588_v43 = vmul.f32 %v2813_v61, %v2787_v53  ;;  %v2724_v53 = vrot.slane %v7584_v3, 2 }
0x1330   :  { %v2834_v6 = vrot.slane %v7588_v43, 2 }
0x1331   :  { %v2860_v33 = vpop.f32.mrf.mxu0 }
0x1332   :  { %v2863_v18 = vadd.f32 %v2860_v33, %v7584_v3 }
0x1334   :  { %5205 = vtanh.f32 %v2863_v18  ;;  %v4981_v57 = vmul.f32 -1.442695, %v2863_v18 }
0x1336   :  { %5207 = vpow2.f32 %v4981_v57 }
0x133a   :  { %v5206_v29 = vpop.eup %5205 }
0x133b   :  { %2886 = vrot.lane.b32.xlu0 %v5206_v29, %s5900_s4 }
0x133c   :  { %v5208_v24 = vpop.eup %5207 }
0x133d   :  { %v2867_v35 = vadd.f32 1.0, %v5208_v24 }
0x133f   :  { %5209 = vrcp.f32 %v2867_v35  ;;  %v2879_v40 = vand.u32 2147483648, %v2867_v35  ;;  %vm2873_vm9 = vweird.f32 %v2867_v35  ;;  %v2877_v5 = vand.u32 2147483647, %v2867_v35 }
0x1341   :  { %v2880_v51 = vor.u32 1.1754944e-38, %v2879_v40  ;;  %vm2878_vm11 = vcmp.eq.f32.partialorder %v2877_v5, 8.507059e+37  ;;  %v2835_v40 = vrot.slane %v7588_v43, 4 }
0x1343   :  { %2901 = vrot.lane.b32.xlu0 %v7588_v43, %s5910_s13 }
0x1345   :  { %v5210_v38 = vpop.eup %5209 }
0x1346   :  { %v2869_v25 = vmul.f32 %v5210_v38, %v2867_v35  ;;  %vm2874_vm8 = vweird.f32 %v5210_v38 }
0x1347   :  { %vm2875_vm10 = vmor %vm2873_vm9, %vm2874_vm8 }
0x1348   :  { %v2870_v32 = vsub.f32 1.0, %v2869_v25  ;;  %v2725_v25 = vrot.slane %v7584_v3, 4 }
0x134a   :  { %v2871_v13 = vmul.f32 %v5210_v38, %v2870_v32 }
0x134c   :  { %v2872_v46 = vadd.f32 %v5210_v38, %v2871_v13 }
0x134e   :  { %v2876_v56 = vsel %vm2875_vm10, %v5210_v38, %v2872_v46 }
0x134f   :  { %v2881_v45 = vsel %vm2878_vm11, %v2880_v51, %v2876_v56 }
0x1350   :  { %v2884_v23 = vmul.f32 0.0, %v2881_v45 }
0x13ad   :  { %v2887_v10 = vpop.permute.xlu0 %2886 }
0x13ae   :  { %v2889_v27 = vmul.f32 %v2887_v10, %v2881_v45 }
0x13b0   :  { %2891 = vrot.lane.b32.xlu1 %v2889_v27, %s5900_s4 }
0x13b5   :  { %v2902_v58 = vpop.permute.xlu0 %2901 }
0x1422   :  { %v2892_v49 = vpop.permute.xlu1 %2891 }
0x1423   :  { %v2894_v44 = vadd.f32 %v2892_v49, %v2884_v23 }
0x1425   :  { %5211 = vtanh.f32 %v2894_v44 }
0x142b   :  { %v5212_v50 = vpop.eup %5211 }
0x142c   :  { %2897 = vrot.lane.b32.xlu2 %v5212_v50, %s5900_s4 }
0x1486   :  { %v2898_v55 = vpop.permute.xlu2 %2897 }
0x1487   :  { %v2900_v17 = vmul.f32 %v2898_v55, %v2881_v45 }
0x1489   :  { %v2904_v8 = vadd.f32 %v2902_v58, %v2900_v17 }
0x148b   :  { %2906 = vst [vmem:[#allocation1] ss:$4 sm:$0xff] %v2904_v8 }
0x1492   :  { %v7594_v11 = vld.sshfl [vmem:[#allocation1] sm:$0xff pattern:$0x73625140] }
0x1493   :  { %2914 = vst [vmem:[#allocation1] ss:$4 sm:$0xff] %v2900_v17 }
0x149a   :  { %v2915_v34 = vld.sshfl [vmem:[#allocation1] sm:$0xff pattern:$0x73625140] }
0x149b   :  { %2916 = vrot.lane.b32.xlu1 %v2915_v34, %s5910_s13 }
0x150d   :  { %v2917_v62 = vpop.permute.xlu1 %2916 }
0x150e   :  { %4982 = vmatmul.msk.f32.vlgmr.msra.gmra.mxu1 %vm2840_vm2, %v2917_v62 }
0x150f   :  { %3394 = vmatpush.msra.mxu1 %v7530_v63 }
0x1511   :  { %3395 = vmatpush.msra.mxu1 %v7534_v41 }
0x1513   :  { %3396 = vmatpush.msra.mxu1 %v7540_v59 }
0x1515   :  { %3397 = vmatpush.msra.mxu1 %v7546_v36 }
0x158b   :  { %v2937_v54 = vpop.f32.mrf.mxu1 }
0x158c   :  { %v2940_v9 = vadd.f32 %v2937_v54, %v2724_v53 }
0x158e   :  { %5213 = vtanh.f32 %v2940_v9  ;;  %v4983_v22 = vmul.f32 -1.442695, %v2940_v9 }
0x1590   :  { %5215 = vpow2.f32 %v4983_v22 }
0x1594   :  { %v5214_v14 = vpop.eup %5213 }
0x1595   :  { %2963 = vrot.lane.b32.xlu2 %v5214_v14, %s5900_s4 }
0x1596   :  { %v5216_v63 = vpop.eup %5215 }
0x1597   :  { %v2944_v41 = vadd.f32 1.0, %v5216_v63 }
0x1599   :  { %5217 = vrcp.f32 %v2944_v41  ;;  %v2956_v60 = vand.u32 2147483648, %v2944_v41  ;;  %vm2950_vm4 = vweird.f32 %v2944_v41  ;;  %v2954_v0 = vand.u32 2147483647, %v2944_v41 }
0x159b   :  { %v2957_v16 = vor.u32 1.1754944e-38, %v2956_v60  ;;  %vm2955_vm14 = vcmp.eq.f32.partialorder %v2954_v0, 8.507059e+37 }
0x159d   :  { %2978 = vrot.lane.b32.xlu2 %v2834_v6, %s5910_s13 }
0x159f   :  { %v5218_v59 = vpop.eup %5217 }
0x15a0   :  { %v2946_v26 = vmul.f32 %v5218_v59, %v2944_v41  ;;  %vm2951_vm3 = vweird.f32 %v5218_v59 }
0x15a1   :  { %vm2952_vm12 = vmor %vm2950_vm4, %vm2951_vm3 }
0x15a2   :  { %v2947_v36 = vsub.f32 1.0, %v2946_v26 }
0x15a4   :  { %v2948_v20 = vmul.f32 %v5218_v59, %v2947_v36  ;;  %v4974_v36 = vmul.f32 -1.442695, %v7581_v1 }
0x15a6   :  { %v2949_v2 = vadd.f32 %v5218_v59, %v2948_v20 }
0x15a8   :  { %v2953_v7 = vsel %vm2952_vm12, %v5218_v59, %v2949_v2 }
0x15a9   :  { %v2958_v18 = vsel %vm2955_vm14, %v2957_v16, %v2953_v7  ;;  %v2726_v7 = vrot.slane %v7584_v3, 6 }
0x15aa   :  { %v2961_v28 = vmul.f32 %v2958_v18, %v2894_v44 }
0x15ef   :  { %v2964_v33 = vpop.permute.xlu2 %2963 }
0x15f0   :  { %v2966_v4 = vmul.f32 %v2964_v33, %v2958_v18 }
0x15f2   :  { %2968 = vrot.lane.b32.xlu0 %v2966_v4, %s5900_s4 }
0x15f7   :  { %v2979_v61 = vpop.permute.xlu2 %2978 }
0x1664   :  { %v2969_v19 = vpop.permute.xlu0 %2968 }
0x1665   :  { %v2971_v31 = vadd.f32 %v2969_v19, %v2961_v28 }
0x1667   :  { %5219 = vtanh.f32 %v2971_v31 }
0x166d   :  { %v5220_v29 = vpop.eup %5219 }
0x166e   :  { %2974 = vrot.lane.b32.xlu1 %v5220_v29, %s5900_s4 }
0x16e0   :  { %v2975_v30 = vpop.permute.xlu1 %2974 }
0x16e1   :  { %v2977_v47 = vmul.f32 %v2975_v30, %v2958_v18 }
0x16e3   :  { %v2981_v57 = vadd.f32 %v2979_v61, %v2977_v47 }
0x16e5   :  { %2983 = vst [vmem:[#allocation1] ss:$4 sm:$0xff] %v2981_v57 }
0x16ec   :  { %v7608_v24 = vld.sshfl [vmem:[#allocation1] sm:$0xff pattern:$0x73625140] }
0x16ed   :  { %2991 = vst [vmem:[#allocation1] ss:$4 sm:$0xff] %v2977_v47 }
0x16f4   :  { %v2992_v35 = vld.sshfl [vmem:[#allocation1] sm:$0xff pattern:$0x73625140] }
0x16f5   :  { %2993 = vrot.lane.b32.xlu0 %v2992_v35, %s5910_s13 }
0x1767   :  { %v2994_v38 = vpop.permute.xlu0 %2993 }
0x1768   :  { %4984 = vmatmul.msk.f32.vlgmr.msrb.gmra.mxu0 %vm2840_vm2, %v2994_v38 }
0x17e5   :  { %v3014_v32 = vpop.f32.mrf.mxu0 }
0x17e6   :  { %v3017_v13 = vadd.f32 %v3014_v32, %v2725_v25 }
0x17e8   :  { %5221 = vtanh.f32 %v3017_v13  ;;  %v4985_v5 = vmul.f32 -1.442695, %v3017_v13 }
0x17ea   :  { %5223 = vpow2.f32 %v4985_v5 }
0x17ee   :  { %v5222_v46 = vpop.eup %5221 }
0x17ef   :  { %3040 = vrot.lane.b32.xlu1 %v5222_v46, %s5900_s4 }
0x17f0   :  { %v5224_v56 = vpop.eup %5223 }
0x17f1   :  { %v3021_v51 = vadd.f32 1.0, %v5224_v56 }
0x17f3   :  { %5225 = vrcp.f32 %v3021_v51  ;;  %v3033_v44 = vand.u32 2147483648, %v3021_v51  ;;  %vm3027_vm15 = vweird.f32 %v3021_v51  ;;  %v3031_v50 = vand.u32 2147483647, %v3021_v51 }
0x17f5   :  { %v3034_v17 = vor.u32 1.1754944e-38, %v3033_v44  ;;  %vm3032_vm7 = vcmp.eq.f32.partialorder %v3031_v50, 8.507059e+37 }
0x17f7   :  { %3055 = vrot.lane.b32.xlu1 %v2835_v40, %s5910_s13 }
0x17f9   :  { %v5226_v10 = vpop.eup %5225 }
0x17fa   :  { %v3023_v45 = vmul.f32 %v5226_v10, %v3021_v51  ;;  %vm3028_vm5 = vweird.f32 %v5226_v10 }
0x17fb   :  { %vm3029_vm6 = vmor %vm3027_vm15, %vm3028_vm5 }
0x17fc   :  { %v3024_v27 = vsub.f32 1.0, %v3023_v45 }
0x17fe   :  { %v3025_v23 = vmul.f32 %v5226_v10, %v3024_v27 }
0x17ff   :  { %2622 = vrot.lane.b32.xlu1 %v7581_v1, %s5910_s13 }
0x1800   :  { %v3026_v49 = vadd.f32 %v5226_v10, %v3025_v23 }
0x1802   :  { %v3030_v55 = vsel %vm3029_vm6, %v5226_v10, %v3026_v49 }
0x1803   :  { %v3035_v8 = vsel %vm3032_vm7, %v3034_v17, %v3030_v55 }
0x1804   :  { %v3038_v62 = vmul.f32 %v3035_v8, %v2971_v31 }
0x1861   :  { %v3041_v58 = vpop.permute.xlu1 %3040 }
0x1862   :  { %v3043_v34 = vmul.f32 %v3041_v58, %v3035_v8  ;;  %v2836_v58 = vrot.slane %v7588_v43, 6  ;;  %v1895_v43 = vrot.slane %v7469_v37, 6 }
0x1864   :  { %3045 = vrot.lane.b32.xlu2 %v3043_v34, %s5900_s4 }
0x1869   :  { %v3056_v22 = vpop.permute.xlu1 %3055 }
0x1871   :  { %v2623_v16 = vpop.permute.xlu1 %2622 }
0x1872   :  { %v2624_v28 = vrot.slane %v2623_v16, 2 }
0x18be   :  { %v3046_v53 = vpop.permute.xlu2 %3045 }
0x18bf   :  { %v7619_v54 = vadd.f32 %v3046_v53, %v3038_v62 }
0x18c1   :  { %5227 = vtanh.f32 %v7619_v54 }
0x18c2   :  { %5229 = vpow2.f32 %v4974_v36 }
0x18c7   :  { %v5228_v9 = vpop.eup %5227 }
0x18c8   :  { %3051 = vrot.lane.b32.xlu0 %v5228_v9, %s5900_s4  ;;  %v5230_v20 = vpop.eup %5229 }
0x18c9   :  { %v2605_v2 = vadd.f32 1.0, %v5230_v20 }
0x18cb   :  { %5231 = vrcp.f32 %v2605_v2  ;;  %v2617_v1 = vand.u32 2147483648, %v2605_v2  ;;  %vm2611_vm8 = vweird.f32 %v2605_v2  ;;  %v2615_v30 = vand.u32 2147483647, %v2605_v2 }
0x18cd   :  { %v2618_v3 = vor.u32 1.1754944e-38, %v2617_v1  ;;  %vm2616_vm10 = vcmp.eq.f32.partialorder %v2615_v30, 8.507059e+37 }
0x18d1   :  { %v5232_v60 = vpop.eup %5231 }
0x18d2   :  { %v2607_v0 = vmul.f32 %v5232_v60, %v2605_v2  ;;  %vm2612_vm1 = vweird.f32 %v5232_v60 }
0x18d3   :  { %vm2613_vm9 = vmor %vm2611_vm8, %vm2612_vm1 }
0x18d4   :  { %v2608_v18 = vsub.f32 1.0, %v2607_v0 }
0x18d6   :  { %v2609_v19 = vmul.f32 %v5232_v60, %v2608_v18 }
0x18d8   :  { %v2610_v31 = vadd.f32 %v5232_v60, %v2609_v19 }
0x18da   :  { %v2614_v47 = vsel %vm2613_vm9, %v5232_v60, %v2610_v31 }
0x18db   :  { %v2619_v57 = vsel %vm2616_vm10, %v2618_v3, %v2614_v47 }
0x18dc   :  { %v2627_v50 = vmul.f32 %v2619_v57, %v7526_v42  ;;  %v2636_v42 = vrot.slane %v2619_v57, 2 }
0x193a   :  { %v3052_v14 = vpop.permute.xlu0 %3051 }
0x193b   :  { %v3054_v6 = vmul.f32 %v3052_v14, %v3035_v8 }
0x193d   :  { %v3058_v63 = vadd.f32 %v3056_v22, %v3054_v6 }
0x193f   :  { %3060 = vst [vmem:[#allocation1] ss:$4 sm:$0xff] %v3058_v63 }
0x1946   :  { %v7623_v41 = vld.sshfl [vmem:[#allocation1] sm:$0xff pattern:$0x73625140] }
0x1947   :  { %3068 = vst [vmem:[#allocation1] ss:$4 sm:$0xff] %v3054_v6 }
0x194e   :  { %v3069_v59 = vld.sshfl [vmem:[#allocation1] sm:$0xff pattern:$0x73625140] }
0x194f   :  { %3070 = vrot.lane.b32.xlu2 %v3069_v59, %s5910_s13 }
0x19a9   :  { %v3071_v26 = vpop.permute.xlu2 %3070 }
0x19aa   :  { %4986 = vmatmul.msk.f32.vlgmr.msrb.gmra.mxu1 %vm2840_vm2, %v3071_v26 }
0x1a27   :  { %v3091_v33 = vpop.f32.mrf.mxu1 }
0x1a28   :  { %v3094_v4 = vadd.f32 %v3091_v33, %v2726_v7 }
0x1a2a   :  { %5233 = vtanh.f32 %v3094_v4  ;;  %v4987_v38 = vmul.f32 -1.442695, %v3094_v4 }
0x1a2b   :  { %5235 = vtanh.f32 %v2624_v28 }
0x1a2c   :  { %5237 = vpow2.f32 %v4987_v38 }
0x1a30   :  { %v5234_v29 = vpop.eup %5233 }
0x1a31   :  { %3117 = vrot.lane.b32.xlu0 %v5234_v29, %s5900_s4  ;;  %v5236_v61 = vpop.eup %5235 }
0x1a32   :  { %v2628_v35 = vmul.f32 %v5236_v61, %v2619_v57  ;;  %v5238_v25 = vpop.eup %5237 }
0x1a33   :  { %v3098_v32 = vadd.f32 1.0, %v5238_v25 }
0x1a35   :  { %5239 = vrcp.f32 %v3098_v32  ;;  %v3110_v51 = vand.u32 2147483648, %v3098_v32  ;;  %vm3104_vm3 = vweird.f32 %v3098_v32  ;;  %v3108_v10 = vand.u32 2147483647, %v3098_v32 }
0x1a37   :  { %v3111_v27 = vor.u32 1.1754944e-38, %v3110_v51  ;;  %vm3109_vm12 = vcmp.eq.f32.partialorder %v3108_v10, 8.507059e+37 }
0x1a39   :  { %2630 = vrot.lane.b32.xlu0 %v2628_v35, %s5910_s13 }
0x1a3b   :  { %v5240_v13 = vpop.eup %5239 }
0x1a3c   :  { %v3100_v46 = vmul.f32 %v5240_v13, %v3098_v32  ;;  %vm3105_vm11 = vweird.f32 %v5240_v13 }
0x1a3d   :  { %vm3106_vm4 = vmor %vm3104_vm3, %vm3105_vm11 }
0x1a3e   :  { %v3101_v40 = vsub.f32 1.0, %v3100_v46 }
0x1a40   :  { %v3102_v5 = vmul.f32 %v5240_v13, %v3101_v40 }
0x1a42   :  { %v3103_v56 = vadd.f32 %v5240_v13, %v3102_v5 }
0x1a44   :  { %v3107_v45 = vsel %vm3106_vm4, %v5240_v13, %v3103_v56 }
0x1a45   :  { %v3112_v49 = vsel %vm3109_vm12, %v3111_v27, %v3107_v45 }
0x1a46   :  { %v3115_v34 = vmul.f32 %v3112_v49, %v7619_v54 }
0x1aa3   :  { %v3118_v23 = vpop.permute.xlu0 %3117 }
0x1aa4   :  { %v3120_v44 = vmul.f32 %v3118_v23, %v3112_v49 }
0x1aa6   :  { %3122 = vrot.lane.b32.xlu2 %v3120_v44, %s5900_s4 }
0x1aab   :  { %v2631_v55 = vpop.permute.xlu0 %2630 }
0x1aac   :  { %v2633_v17 = vadd.f32 %v2631_v55, %v2627_v50 }
0x1aae   :  { %5241 = vtanh.f32 %v2633_v17  ;;  %3132 = vrot.lane.b32.xlu2 %v2836_v58, %s5910_s13 }
0x1ab4   :  { %v5242_v8 = vpop.eup %5241 }
0x1ab5   :  { %2639 = vrot.lane.b32.xlu0 %v5242_v8, %s5910_s13 }
0x1b00   :  { %v3123_v62 = vpop.permute.xlu2 %3122 }
0x1b01   :  { %v7637_v53 = vadd.f32 %v3123_v62, %v3115_v34 }
0x1b03   :  { %5243 = vtanh.f32 %v7637_v53 }
0x1b08   :  { %v3133_v36 = vpop.permute.xlu2 %3132 }
0x1b09   :  { %v5244_v9 = vpop.eup %5243 }
0x1b0a   :  { %3128 = vrot.lane.b32.xlu1 %v5244_v9, %s5900_s4 }
0x1b27   :  { %v2640_v14 = vpop.permute.xlu0 %2639 }
0x1b28   :  { %v2642_v6 = vmul.f32 %v2640_v14, %v2636_v42 }
0x1b2a   :  { %v2643_v22 = vadd.f32 %v2642_v6, %v1895_v43 }
0x1b2c   :  { %2645 = vst.msk [vmem:[#allocation3 + $0xe] sm:$0x3] %vm1993_vm13, %v2643_v22 }
0x1b33   :  { %v2653_v63 = vld [vmem:[#allocation3 + $0xe] sm:$0x3] }
0x1b34   :  { %2692 = vst [vmem:[#allocation1 + $0x23] ss:$4 sm:$0xff] %v2653_v63 }
0x1b3b   :  { %v2694_v59 = vld.sshfl [vmem:[#allocation1 + $0x20] sm:$0xff pattern:$0x73625140] }
0x1b3c   :  { %2762 = vst [vmem:[#allocation1 + $0x23] ss:$4 sm:$0xff] %v2653_v63  ;;  %4976 = vmatmul.msk.f32.gmra.mxu2 %vm453_vm0, %v2694_v59 }
0x1b3d   :  { %2756 = vst [vmem:[#allocation1 + $0x20] ss:$4 sm:$0xff] %v7475_v48 }
0x1b3e   :  { %2758 = vst [vmem:[#allocation1 + $0x21] ss:$4 sm:$0xff] %v7518_v12 }
0x1b3f   :  { %2760 = vst [vmem:[#allocation1 + $0x22] ss:$4 sm:$0xff] %v7567_v39 }
0x1b46   :  { %v2764_v54 = vld.sshfl [vmem:[#allocation1 + $0x20] sm:$0xff pattern:$0x73625140] }
0x1b47   :  { %4978 = vmatmul.msk.f32.gmra.mxu3 %vm453_vm0, %v2764_v54 }
0x1b7c   :  { %v3129_v37 = vpop.permute.xlu1 %3128 }
0x1b7d   :  { %v3131_v26 = vmul.f32 %v3129_v37, %v3112_v49 }
0x1b7f   :  { %v3135_v20 = vadd.f32 %v3133_v36, %v3131_v26 }
0x1b81   :  { %3137 = vst [vmem:[#allocation1] ss:$4 sm:$0xff] %v3135_v20 }
0x1b88   :  { %v7648_v2 = vld.sshfl [vmem:[#allocation1] sm:$0xff pattern:$0x73625140] }
0x1b89   :  { %3145 = vst [vmem:[#allocation1] ss:$4 sm:$0xff] %v3131_v26 }
0x1b90   :  { %v3146_v60 = vld.sshfl [vmem:[#allocation1] sm:$0xff pattern:$0x73625140] }
0x1b91   :  { %3147 = vrot.lane.b32.xlu1 %v3146_v60, %s5910_s13 }
0x1bbf   :  { %v2719_v18 = vpop.f32.mrf.mxu2 }
0x1bc0   :  { %v7654_v19 = vadd.f32 %v7578_v52, %v2719_v18 }
0x1bca   :  { %v2789_v48 = vpop.f32.mrf.mxu3 }
0x1bcb   :  { %v2790_v12 = vadd.f32 %v7574_v21, %v2789_v48 }
0x1bcd   :  { %v4980_v39 = vmul.f32 -1.442695, %v2790_v12 }
0x1bcf   :  { %5245 = vpow2.f32 %v4980_v39 }
0x1bd5   :  { %v5246_v7 = vpop.eup %5245 }
0x1bd6   :  { %v2799_v16 = vadd.f32 1.0, %v5246_v7 }
0x1bd8   :  { %5247 = vrcp.f32 %v2799_v16  ;;  %v2826_v21 = vand.u32 2147483648, %v2799_v16  ;;  %vm2820_vm13 = vweird.f32 %v2799_v16  ;;  %v2824_v47 = vand.u32 2147483647, %v2799_v16 }
0x1bda   :  { %v2827_v57 = vor.u32 1.1754944e-38, %v2826_v21  ;;  %vm2825_vm5 = vcmp.eq.f32.partialorder %v2824_v47, 8.507059e+37 }
0x1bde   :  { %v5248_v33 = vpop.eup %5247 }
0x1bdf   :  { %v2816_v4 = vmul.f32 %v5248_v33, %v2799_v16  ;;  %vm2821_vm0 = vweird.f32 %v5248_v33 }
0x1be0   :  { %vm2822_vm14 = vmor %vm2820_vm13, %vm2821_vm0 }
0x1be1   :  { %v2817_v28 = vsub.f32 1.0, %v2816_v4 }
0x1be3   :  { %v2818_v1 = vmul.f32 %v5248_v33, %v2817_v28 }
0x1be5   :  { %v2819_v30 = vadd.f32 %v5248_v33, %v2818_v1 }
0x1be7   :  { %v2823_v3 = vsel %vm2822_vm14, %v5248_v33, %v2819_v30 }
0x1be8   :  { %v2828_v35 = vsel %vm2825_vm5, %v2827_v57, %v2823_v3 }
0x1be9   :  { %v7658_v52 = vmul.f32 %v2828_v35, %v2790_v12 }
0x1beb   :  { %v2837_v59 = vrot.slane %v7658_v52, 2 }
0x1c03   :  { %v3148_v0 = vpop.permute.xlu1 %3147 }
0x1c04   :  { %4988 = vmatmul.msk.f32.vlgmr.msra.gmra.mxu2 %vm2840_vm2, %v3148_v0 }
0x1c87   :  { %v3168_v31 = vpop.f32.mrf.mxu2 }
0x1c88   :  { %v3171_v29 = vadd.f32 %v3168_v31, %v7654_v19 }
0x1c8a   :  { %5249 = vtanh.f32 %v3171_v29  ;;  %v4989_v38 = vmul.f32 -1.442695, %v3171_v29 }
0x1c8c   :  { %5251 = vpow2.f32 %v4989_v38  ;;  %v2728_v38 = vrot.slane %v7654_v19, 4 }
0x1c90   :  { %v5250_v61 = vpop.eup %5249 }
0x1c91   :  { %3194 = vrot.lane.b32.xlu2 %v5250_v61, %s5900_s4 }
0x1c92   :  { %v5252_v25 = vpop.eup %5251 }
0x1c93   :  { %v3175_v32 = vadd.f32 1.0, %v5252_v25 }
0x1c95   :  { %5253 = vrcp.f32 %v3175_v32  ;;  %v3187_v51 = vand.u32 2147483648, %v3175_v32  ;;  %vm3181_vm6 = vweird.f32 %v3175_v32  ;;  %v3185_v10 = vand.u32 2147483647, %v3175_v32 }
0x1c97   :  { %v3188_v27 = vor.u32 1.1754944e-38, %v3187_v51  ;;  %vm3186_vm1 = vcmp.eq.f32.partialorder %v3185_v10, 8.507059e+37 }
0x1c99   :  { %3209 = vrot.lane.b32.xlu2 %v7658_v52, %s5910_s13 }
0x1c9b   :  { %v5254_v13 = vpop.eup %5253 }
0x1c9c   :  { %v3177_v46 = vmul.f32 %v5254_v13, %v3175_v32  ;;  %vm3182_vm15 = vweird.f32 %v5254_v13 }
0x1c9d   :  { %vm3183_vm7 = vmor %vm3181_vm6, %vm3182_vm15  ;;  %vm2911_vm6 = vcmask 254976  }
0x1c9e   :  { %v3178_v40 = vsub.f32 1.0, %v3177_v46  ;;  %v2838_v46 = vrot.slane %v7658_v52, 4 }
0x1ca0   :  { %v3179_v5 = vmul.f32 %v5254_v13, %v3178_v40 }
0x1ca2   :  { %v3180_v56 = vadd.f32 %v5254_v13, %v3179_v5 }
0x1ca4   :  { %v3184_v45 = vsel %vm3183_vm7, %v5254_v13, %v3180_v56 }
0x1ca5   :  { %v3189_v49 = vsel %vm3186_vm1, %v3188_v27, %v3184_v45 }
0x1ca6   :  { %v3192_v50 = vmul.f32 %v3189_v49, %v7637_v53  ;;  %v2727_v53 = vrot.slane %v7654_v19, 2 }
0x1ceb   :  { %v3195_v23 = vpop.permute.xlu2 %3194 }
0x1cec   :  { %v3197_v44 = vmul.f32 %v3195_v23, %v3189_v49 }
0x1cee   :  { %3199 = vrot.lane.b32.xlu0 %v3197_v44, %s5900_s4 }
0x1cf3   :  { %v3210_v62 = vpop.permute.xlu2 %3209 }
0x1d60   :  { %v3200_v55 = vpop.permute.xlu0 %3199 }
0x1d61   :  { %v3202_v17 = vadd.f32 %v3200_v55, %v3192_v50 }
0x1d63   :  { %5255 = vtanh.f32 %v3202_v17 }
0x1d69   :  { %v5256_v58 = vpop.eup %5255 }
0x1d6a   :  { %3205 = vrot.lane.b32.xlu1 %v5256_v58, %s5900_s4 }
0x1ddc   :  { %v3206_v8 = vpop.permute.xlu1 %3205 }
0x1ddd   :  { %v3208_v34 = vmul.f32 %v3206_v8, %v3189_v49 }
0x1ddf   :  { %v3212_v9 = vadd.f32 %v3210_v62, %v3208_v34 }
0x1de1   :  { %3214 = vst [vmem:[#allocation1] ss:$4 sm:$0xff] %v3212_v9 }
0x1de8   :  { %v7665_v42 = vld.sshfl [vmem:[#allocation1] sm:$0xff pattern:$0x73625140] }
0x1de9   :  { %3222 = vst [vmem:[#allocation1] ss:$4 sm:$0xff] %v3208_v34 }
0x1df0   :  { %v3223_v14 = vld.sshfl [vmem:[#allocation1] sm:$0xff pattern:$0x73625140] }
0x1df1   :  { %3224 = vrot.lane.b32.xlu0 %v3223_v14, %s5910_s13 }
0x1e63   :  { %v3225_v43 = vpop.permute.xlu0 %3224 }
0x1e64   :  { %4990 = vmatmul.msk.f32.vlgmr.msrb.gmra.mxu3 %vm2840_vm2, %v3225_v43 }
0x1ee7   :  { %v3245_v6 = vpop.f32.mrf.mxu3 }
0x1ee8   :  { %v3248_v22 = vadd.f32 %v3245_v6, %v2727_v53 }
0x1eea   :  { %5257 = vtanh.f32 %v3248_v22  ;;  %v4991_v54 = vmul.f32 -1.442695, %v3248_v22 }
0x1eec   :  { %5259 = vpow2.f32 %v4991_v54 }
0x1ef0   :  { %v5258_v63 = vpop.eup %5257 }
0x1ef1   :  { %3271 = vrot.lane.b32.xlu1 %v5258_v63, %s5900_s4 }
0x1ef2   :  { %v5260_v37 = vpop.eup %5259 }
0x1ef3   :  { %v3252_v26 = vadd.f32 1.0, %v5260_v37  ;;  %v2729_v37 = vrot.slane %v7654_v19, 6 }
0x1ef5   :  { %5261 = vrcp.f32 %v3252_v26  ;;  %v3264_v12 = vand.u32 2147483648, %v3252_v26  ;;  %vm3258_vm9 = vweird.f32 %v3252_v26  ;;  %v3262_v39 = vand.u32 2147483647, %v3252_v26 }
0x1ef7   :  { %v3265_v16 = vor.u32 1.1754944e-38, %v3264_v12  ;;  %vm3263_vm11 = vcmp.eq.f32.partialorder %v3262_v39, 8.507059e+37 }
0x1ef9   :  { %3286 = vrot.lane.b32.xlu1 %v2837_v59, %s5910_s13 }
0x1efb   :  { %v5262_v36 = vpop.eup %5261 }
0x1efc   :  { %v3254_v20 = vmul.f32 %v5262_v36, %v3252_v26  ;;  %vm3259_vm8 = vweird.f32 %v5262_v36 }
0x1efd   :  { %vm3260_vm10 = vmor %vm3258_vm9, %vm3259_vm8 }
0x1efe   :  { %v3255_v60 = vsub.f32 1.0, %v3254_v20 }
0x1f00   :  { %v3256_v0 = vmul.f32 %v5262_v36, %v3255_v60  ;;  %v2839_v60 = vrot.slane %v7658_v52, 6 }
0x1f02   :  { %v3257_v48 = vadd.f32 %v5262_v36, %v3256_v0 }
0x1f04   :  { %v3261_v7 = vsel %vm3260_vm10, %v5262_v36, %v3257_v48 }
0x1f05   :  { %v3266_v18 = vsel %vm3263_vm11, %v3265_v16, %v3261_v7 }
0x1f06   :  { %v3269_v28 = vmul.f32 %v3266_v18, %v3202_v17 }
0x1f63   :  { %v3272_v33 = vpop.permute.xlu1 %3271 }
0x1f64   :  { %v3274_v4 = vmul.f32 %v3272_v33, %v3266_v18 }
0x1f66   :  { %3276 = vrot.lane.b32.xlu2 %v3274_v4, %s5900_s4 }
0x1f6b   :  { %v3287_v47 = vpop.permute.xlu1 %3286 }
0x1fc0   :  { %v3277_v31 = vpop.permute.xlu2 %3276 }
0x1fc1   :  { %v3279_v29 = vadd.f32 %v3277_v31, %v3269_v28 }
0x1fc3   :  { %5263 = vtanh.f32 %v3279_v29 }
0x1fc9   :  { %v5264_v1 = vpop.eup %5263 }
0x1fca   :  { %3282 = vrot.lane.b32.xlu0 %v5264_v1, %s5900_s4 }
0x203c   :  { %v3283_v30 = vpop.permute.xlu0 %3282 }
0x203d   :  { %v3285_v21 = vmul.f32 %v3283_v30, %v3266_v18 }
0x203f   :  { %v3289_v61 = vadd.f32 %v3287_v47, %v3285_v21 }
0x2041   :  { %3291 = vst [vmem:[#allocation1] ss:$4 sm:$0xff] %v3289_v61 }
0x2048   :  { %v7675_v3 = vld.sshfl [vmem:[#allocation1] sm:$0xff pattern:$0x73625140] }
0x2049   :  { %3299 = vst [vmem:[#allocation1] ss:$4 sm:$0xff] %v3285_v21 }
0x2050   :  { %v3300_v57 = vld.sshfl [vmem:[#allocation1] sm:$0xff pattern:$0x73625140] }
0x2051   :  { %3301 = vrot.lane.b32.xlu2 %v3300_v57, %s5910_s13 }
0x20ab   :  { %v3302_v35 = vpop.permute.xlu2 %3301 }
0x20ac   :  { %4992 = vmatmul.msk.f32.vlgmr.msra.gmra.mxu0 %vm2840_vm2, %v3302_v35 }
0x2129   :  { %v3322_v25 = vpop.f32.mrf.mxu0 }
0x212a   :  { %v3325_v32 = vadd.f32 %v3322_v25, %v2728_v38  ;;  %v3462_v25 = vld [vmem:[#allocation23 + $0x10] sm:$0xff] }
0x212c   :  { %5265 = vtanh.f32 %v3325_v32  ;;  %v4993_v40 = vmul.f32 -1.442695, %v3325_v32  ;;  %v3460_v32 = vld [vmem:[#allocation23] sm:$0xff] }
0x212e   :  { %5267 = vpow2.f32 %v4993_v40  ;;  %v7721_v40 = vld [vmem:[%s7994_s15] sm:$0xff] }
0x2132   :  { %v5266_v13 = vpop.eup %5265 }
0x2133   :  { %3348 = vrot.lane.b32.xlu0 %v5266_v13, %s5900_s4  ;;  %v7709_v13 = vld [vmem:[%s7994_s15 + $0x8] sm:$0xff]  ;;  %s5911_s15 = smov 80  }
0x2134   :  { %v5268_v5 = vpop.eup %5267  ;;  %3653 = vmatpush.msrb.mxu0 %v7709_v13  ;;  %3730 = vmatpush.msrb.mxu1 %v7709_v13 }
0x2135   :  { %v3329_v56 = vadd.f32 1.0, %v5268_v5  ;;  %v3537_v5 = vld [vmem:[%s7996_s17 + $0x8] sm:$0xff] }
0x2136   :  { %3654 = vmatpush.msrb.mxu0 %v7721_v40  ;;  %3731 = vmatpush.msrb.mxu1 %v7721_v40 }
0x2137   :  { %5269 = vrcp.f32 %v3329_v56  ;;  %v3341_v49 = vand.u32 2147483648, %v3329_v56  ;;  %vm3335_vm4 = vweird.f32 %v3329_v56  ;;  %v3339_v44 = vand.u32 2147483647, %v3329_v56  ;;  %3655 = vmatmul.f32.vlgmr.msrb.gmra.mxu0 %v8287_v15 }
0x2138   :  { %3807 = vmatpush.msra.mxu0 %v7709_v13 }
0x2139   :  { %v3342_v55 = vor.u32 1.1754944e-38, %v3341_v49  ;;  %vm3340_vm0 = vcmp.eq.f32.partialorder %v3339_v44, 8.507059e+37 }
0x213a   :  { %3808 = vmatpush.msra.mxu0 %v7721_v40 }
0x213b   :  { %3363 = vrot.lane.b32.xlu0 %v2838_v46, %s5910_s13  ;;  %v3539_v46 = vld [vmem:[%s7996_s17 + $0x18] sm:$0xff] }
0x213c   :  { %3577 = vmatpush.msra.mxu3 %v3539_v46  ;;  %4115 = vmatpush.msrb.mxu0 %v7709_v13 }
0x213d   :  { %v5270_v51 = vpop.eup %5269 }
0x213e   :  { %v3331_v10 = vmul.f32 %v5270_v51, %v3329_v56  ;;  %vm3336_vm3 = vweird.f32 %v5270_v51  ;;  %4116 = vmatpush.msrb.mxu0 %v7721_v40 }
0x213f   :  { %vm3337_vm12 = vmor %vm3335_vm4, %vm3336_vm3 }
0x2140   :  { %v3332_v45 = vsub.f32 1.0, %v3331_v10 }
0x2142   :  { %v3333_v27 = vmul.f32 %v5270_v51, %v3332_v45 }
0x2144   :  { %v3334_v23 = vadd.f32 %v5270_v51, %v3333_v27 }
0x2146   :  { %v3338_v50 = vsel %vm3337_vm12, %v5270_v51, %v3334_v23  ;;  %v3536_v51 = vld [vmem:[%s7996_s17] sm:$0xff]  ;;  %vm3636_vm12 = vcmask 130048  }
0x2147   :  { %v3343_v58 = vsel %vm3340_vm0, %v3342_v55, %v3338_v50 }
0x2148   :  { %v3346_v34 = vmul.f32 %v3343_v58, %v3279_v29 }
0x21a5   :  { %v3349_v17 = vpop.permute.xlu0 %3348 }
0x21a6   :  { %v3351_v8 = vmul.f32 %v3349_v17, %v3343_v58 }
0x21a8   :  { %3353 = vrot.lane.b32.xlu1 %v3351_v8, %s5900_s4  ;;  %v7748_v8 = vld [vmem:[#allocation24] ss:$0 sm:$0xff] }
0x21ad   :  { %v3364_v6 = vpop.permute.xlu0 %3363 }
0x221a   :  { %v3354_v62 = vpop.permute.xlu1 %3353 }
0x221b   :  { %v3356_v9 = vadd.f32 %v3354_v62, %v3346_v34  ;;  %v3656_v62 = vpop.f32.mrf.mxu0 }
0x221d   :  { %5271 = vtanh.f32 %v3356_v9 }
0x2223   :  { %v5272_v14 = vpop.eup %5271 }
0x2224   :  { %3359 = vrot.lane.b32.xlu2 %v5272_v14, %s5900_s4 }
0x227e   :  { %v3360_v43 = vpop.permute.xlu2 %3359 }
0x227f   :  { %v3362_v53 = vmul.f32 %v3360_v43, %v3343_v58  ;;  %v7754_v43 = vld [vmem:[#allocation26] ss:$0 sm:$0xff] }
0x2281   :  { %v3366_v22 = vadd.f32 %v3364_v6, %v3362_v53 }
0x2283   :  { %3368 = vst [vmem:[#allocation1] ss:$4 sm:$0xff] %v3366_v22 }
0x228a   :  { %v7685_v63 = vld.sshfl [vmem:[#allocation1] sm:$0xff pattern:$0x73625140] }
0x228b   :  { %3376 = vst [vmem:[#allocation1] ss:$4 sm:$0xff] %v3362_v53 }
0x2292   :  { %v3377_v59 = vld.sshfl [vmem:[#allocation1] sm:$0xff pattern:$0x73625140] }
0x2293   :  { %3378 = vrot.lane.b32.xlu1 %v3377_v59, %s5910_s13 }
0x2305   :  { %v3379_v54 = vpop.permute.xlu1 %3378 }
0x2306   :  { %4994 = vmatmul.msk.f32.vlgmr.msra.gmra.mxu1 %vm2840_vm2, %v3379_v54 }
0x2307   :  { %3884 = vmatpush.msra.mxu1 %v7709_v13 }
0x2309   :  { %3885 = vmatpush.msra.mxu1 %v7721_v40 }
0x2383   :  { %v3399_v26 = vpop.f32.mrf.mxu1 }
0x2384   :  { %v3402_v36 = vadd.f32 %v3399_v26, %v2729_v37 }
0x2386   :  { %5273 = vtanh.f32 %v3402_v36  ;;  %v4995_v0 = vmul.f32 -1.442695, %v3402_v36 }
0x2388   :  { %5275 = vpow2.f32 %v4995_v0 }
0x238c   :  { %v5274_v20 = vpop.eup %5273 }
0x238d   :  { %3425 = vrot.lane.b32.xlu2 %v5274_v20, %s5900_s4 }
0x238e   :  { %v5276_v48 = vpop.eup %5275 }
0x238f   :  { %v3406_v12 = vadd.f32 1.0, %v5276_v48 }
0x2391   :  { %5277 = vrcp.f32 %v3406_v12  ;;  %v3418_v18 = vand.u32 2147483648, %v3406_v12  ;;  %vm3412_vm14 = vweird.f32 %v3406_v12  ;;  %v3416_v4 = vand.u32 2147483647, %v3406_v12 }
0x2393   :  { %v3419_v28 = vor.u32 1.1754944e-38, %v3418_v18  ;;  %vm3417_vm15 = vcmp.eq.f32.partialorder %v3416_v4, 8.507059e+37 }
0x2395   :  { %3440 = vrot.lane.b32.xlu2 %v2839_v60, %s5910_s13 }
0x2397   :  { %v5278_v39 = vpop.eup %5277 }
0x2398   :  { %v3408_v19 = vmul.f32 %v5278_v39, %v3406_v12  ;;  %vm3413_vm13 = vweird.f32 %v5278_v39 }
0x2399   :  { %vm3414_vm5 = vmor %vm3412_vm14, %vm3413_vm13 }
0x239a   :  { %v3409_v7 = vsub.f32 1.0, %v3408_v19 }
0x239c   :  { %v3410_v16 = vmul.f32 %v5278_v39, %v3409_v7 }
0x239d   :  { %3062 = vrot.lane.b32.xlu2 %v7623_v41, %s5910_s13 }
0x239e   :  { %v3411_v33 = vadd.f32 %v5278_v39, %v3410_v16 }
0x23a0   :  { %v3415_v52 = vsel %vm3414_vm5, %v5278_v39, %v3411_v33 }
0x23a1   :  { %v3420_v41 = vsel %vm3417_vm15, %v3419_v28, %v3415_v52 }
0x23a2   :  { %v3423_v21 = vmul.f32 %v3420_v41, %v3356_v9 }
0x23e7   :  { %v3426_v31 = vpop.permute.xlu2 %3425 }
0x23e8   :  { %v3428_v29 = vmul.f32 %v3426_v31, %v3420_v41 }
0x23ea   :  { %3430 = vrot.lane.b32.xlu0 %v3428_v29, %s5900_s4 }
0x23ef   :  { %v3441_v1 = vpop.permute.xlu2 %3440 }
0x23f2   :  { %2908 = vrot.lane.b32.xlu0 %v7594_v11, %s5910_s13  ;;  %v3463_v11 = vld [vmem:[#allocation23 + $0x18] sm:$0xff] }
0x23f3   :  { %3511 = vmatpush.msrb.mxu2 %v3463_v11 }
0x23f5   :  { %3512 = vmatpush.msrb.mxu2 %v3462_v25 }
0x23f7   :  { %v3063_v30 = vpop.permute.xlu2 %3062 }
0x23f8   :  { %3066 = vst.msk [vmem:[#allocation4 + $0x4] sm:$0x3] %vm2911_vm6, %v3063_v30 }
0x23fa   :  { %3139 = vrot.lane.b32.xlu0 %v7648_v2, %s5910_s13  ;;  %v3461_v2 = vld [vmem:[#allocation23 + $0x8] sm:$0xff] }
0x23fb   :  { %3513 = vmatpush.msrb.mxu2 %v3461_v2 }
0x23fd   :  { %3514 = vmatpush.msrb.mxu2 %v3460_v32 }
0x23ff   :  { %3961 = vmatpush.msra.mxu2 %v7709_v13  ;;  %v3454_v44 = vld [vmem:[#allocation4 + $0x4] sm:$0x3] }
0x2401   :  { %3962 = vmatpush.msra.mxu2 %v7721_v40 }
0x245c   :  { %v3431_v47 = vpop.permute.xlu0 %3430 }
0x245d   :  { %v3433_v61 = vadd.f32 %v3431_v47, %v3423_v21 }
0x245f   :  { %5279 = vtanh.f32 %v3433_v61 }
0x2464   :  { %v2909_v57 = vpop.permute.xlu0 %2908 }
0x2465   :  { %v5280_v35 = vpop.eup %5279  ;;  %2912 = vst.msk [vmem:[#allocation4] sm:$0x3] %vm2911_vm6, %v2909_v57 }
0x2466   :  { %3436 = vrot.lane.b32.xlu1 %v5280_v35, %s5900_s4 }
0x246c   :  { %v3140_v38 = vpop.permute.xlu0 %3139  ;;  %v3452_v23 = vld [vmem:[#allocation4] sm:$0x3] }
0x246d   :  { %3143 = vst.msk [vmem:[#allocation4 + $0x6] sm:$0x3] %vm2911_vm6, %v3140_v38 }
0x246e   :  { %2985 = vrot.lane.b32.xlu1 %v7608_v24, %s5910_s13  ;;  %v3538_v24 = vld [vmem:[%s7996_s17 + $0x10] sm:$0xff]  ;;  %s5912_s17 = smov 96  }
0x246f   :  { %3578 = vmatpush.msra.mxu3 %v3538_v24 }
0x2471   :  { %3579 = vmatpush.msra.mxu3 %v3537_v5 }
0x2473   :  { %3580 = vmatpush.msra.mxu3 %v3536_v51 }
0x2474   :  { %v3455_v50 = vld [vmem:[#allocation4 + $0x6] sm:$0x3] }
0x2475   :  { %4038 = vmatpush.msrb.mxu3 %v7709_v13 }
0x2477   :  { %4039 = vmatpush.msrb.mxu3 %v7721_v40 }
0x24d8   :  { %v3437_v56 = vpop.permute.xlu1 %3436 }
0x24d9   :  { %v3439_v10 = vmul.f32 %v3437_v56, %v3420_v41 }
0x24db   :  { %v3443_v45 = vadd.f32 %v3441_v1, %v3439_v10 }
0x24dd   :  { %3445 = vst [vmem:[#allocation1] ss:$4 sm:$0xff] %v3443_v45 }
0x24e0   :  { %v2986_v27 = vpop.permute.xlu1 %2985 }
0x24e1   :  { %2989 = vst.msk [vmem:[#allocation4 + $0x2] sm:$0x3] %vm2911_vm6, %v2986_v27 }
0x24e4   :  { %v7744_v49 = vld.sshfl [vmem:[#allocation1] sm:$0xff pattern:$0x73625140] }
0x24e5   :  { %3478 = vst [vmem:[#allocation1] ss:$4 sm:$0xff] %v3452_v23 }
0x24e6   :  { %3482 = vst [vmem:[#allocation1 + $0x2] ss:$4 sm:$0xff] %v3454_v44 }
0x24e7   :  { %3484 = vst [vmem:[#allocation1 + $0x3] ss:$4 sm:$0xff] %v3455_v50 }
0x24e8   :  { %v3453_v55 = vld [vmem:[#allocation4 + $0x2] sm:$0x3] }
0x24e9   :  { %3480 = vst [vmem:[#allocation1 + $0x1] ss:$4 sm:$0xff] %v3453_v55 }
0x24f0   :  { %v3493_v17 = vld.sshfl [vmem:[#allocation1] sm:$0xff pattern:$0x73625140] }
0x24f1   :  { %3546 = vst [vmem:[#allocation1 + $0x1] ss:$4 sm:$0xff] %v3453_v55  ;;  %4996 = vmatmul.msk.f32.vlgmr.msrb.gmra.mxu2 %vm2840_vm2, %v3493_v17 }
0x24f2   :  { %3544 = vst [vmem:[#allocation1] ss:$4 sm:$0xff] %v3452_v23 }
0x24f3   :  { %3548 = vst [vmem:[#allocation1 + $0x2] ss:$4 sm:$0xff] %v3454_v44 }
0x24f4   :  { %3550 = vst [vmem:[#allocation1 + $0x3] ss:$4 sm:$0xff] %v3455_v50 }
0x24fb   :  { %v3559_v58 = vld.sshfl [vmem:[#allocation1] sm:$0xff pattern:$0x73625140] }
0x24fc   :  { %4998 = vmatmul.msk.f32.vlgmr.msra.gmra.mxu3 %vm2840_vm2, %v3559_v58 }
0x2574   :  { %v3516_v34 = vpop.f32.mrf.mxu2 }
0x2575   :  { %v7751_v9 = vadd.f32 %v7748_v8, %v3516_v34 }
0x2577   :  { %v3659_v14 = vadd.f32 %v3656_v62, %v7751_v9  ;;  %v3524_v45 = vrot.slane %v7751_v9, 2 }
0x2579   :  { %5281 = vtanh.f32 %v3659_v14  ;;  %v5002_v33 = vmul.f32 -1.442695, %v3659_v14 }
0x257f   :  { %v5282_v53 = vpop.eup %5281  ;;  %v3582_v6 = vpop.f32.mrf.mxu3 }
0x2580   :  { %v3583_v22 = vadd.f32 %v7754_v43, %v3582_v6  ;;  %3682 = vrot.lane.b32.xlu1 %v5282_v53, %s5911_s15 }
0x2582   :  { %v5000_v59 = vmul.f32 -1.442695, %v3583_v22 }
0x2584   :  { %5283 = vpow2.f32 %v5000_v59 }
0x258a   :  { %v5284_v54 = vpop.eup %5283 }
0x258b   :  { %v3594_v37 = vadd.f32 1.0, %v5284_v54 }
0x258d   :  { %5285 = vrcp.f32 %v3594_v37  ;;  %v3607_v60 = vand.u32 2147483648, %v3594_v37  ;;  %v3605_v48 = vand.u32 2147483647, %v3594_v37  ;;  %vm3601_vm1 = vweird.f32 %v3594_v37 }
0x258e   :  { %5287 = vpow2.f32 %v5002_v33 }
0x258f   :  { %v3608_v39 = vor.u32 1.1754944e-38, %v3607_v60  ;;  %vm3606_vm9 = vcmp.eq.f32.partialorder %v3605_v48, 8.507059e+37 }
0x2593   :  { %v5286_v26 = vpop.eup %5285 }
0x2594   :  { %v3597_v36 = vmul.f32 %v5286_v26, %v3594_v37  ;;  %vm3602_vm7 = vweird.f32 %v5286_v26  ;;  %v5288_v18 = vpop.eup %5287 }
0x2595   :  { %vm3603_vm8 = vmor %vm3601_vm1, %vm3602_vm7  ;;  %v3663_v4 = vadd.f32 1.0, %v5288_v18 }
0x2596   :  { %v3598_v20 = vsub.f32 1.0, %v3597_v36 }
0x2597   :  { %5289 = vrcp.f32 %v3663_v4  ;;  %v3675_v1 = vand.u32 2147483648, %v3663_v4  ;;  %vm3669_vm11 = vweird.f32 %v3663_v4  ;;  %v3673_v30 = vand.u32 2147483647, %v3663_v4 }
0x2598   :  { %v3599_v0 = vmul.f32 %v5286_v26, %v3598_v20 }
0x2599   :  { %v3676_v47 = vor.u32 1.1754944e-38, %v3675_v1  ;;  %vm3674_vm4 = vcmp.eq.f32.partialorder %v3673_v30, 8.507059e+37 }
0x259a   :  { %v3600_v12 = vadd.f32 %v5286_v26, %v3599_v0 }
0x259c   :  { %v3604_v19 = vsel %vm3603_vm8, %v5286_v26, %v3600_v12 }
0x259d   :  { %v3609_v7 = vsel %vm3606_vm9, %v3608_v39, %v3604_v19  ;;  %v5290_v52 = vpop.eup %5289 }
0x259e   :  { %v7758_v16 = vmul.f32 %v3609_v7, %v3583_v22  ;;  %v3665_v28 = vmul.f32 %v5290_v52, %v3663_v4  ;;  %vm3670_vm10 = vweird.f32 %v5290_v52  ;;  %v3525_v4 = vrot.slane %v7751_v9, 4 }
0x259f   :  { %vm3671_vm3 = vmor %vm3669_vm11, %vm3670_vm10 }
0x25a0   :  { %3697 = vrot.lane.b32.xlu1 %v7758_v16, %s5900_s4  ;;  %v3666_v31 = vsub.f32 1.0, %v3665_v28  ;;  %v3630_v50 = vrot.slane %v7758_v16, 2 }
0x25a2   :  { %v3667_v41 = vmul.f32 %v5290_v52, %v3666_v31 }
0x25a4   :  { %v3668_v29 = vadd.f32 %v5290_v52, %v3667_v41  ;;  %v3631_v41 = vrot.slane %v7758_v16, 4 }
0x25a6   :  { %v3672_v21 = vsel %vm3671_vm3, %v5290_v52, %v3668_v29 }
0x25a7   :  { %v3677_v57 = vsel %vm3674_vm4, %v3676_v47, %v3672_v21 }
0x25a8   :  { %v3680_v38 = vmul.f32 0.0, %v3677_v57 }
0x25f2   :  { %v3683_v61 = vpop.permute.xlu1 %3682 }
0x25f3   :  { %v3685_v35 = vmul.f32 %v3683_v61, %v3677_v57 }
0x25f5   :  { %3687 = vrot.lane.b32.xlu2 %v3685_v35, %s5890_s28 }
0x2612   :  { %v3698_v24 = vpop.permute.xlu1 %3697 }
0x264f   :  { %v3688_v11 = vpop.permute.xlu2 %3687 }
0x2650   :  { %v3690_v25 = vadd.f32 %v3688_v11, %v3680_v38 }
0x2652   :  { %5291 = vtanh.f32 %v3690_v25 }
0x2658   :  { %v5292_v2 = vpop.eup %5291 }
0x2659   :  { %3693 = vrot.lane.b32.xlu0 %v5292_v2, %s5890_s28 }
0x26cb   :  { %v3694_v32 = vpop.permute.xlu0 %3693 }
0x26cc   :  { %v3696_v46 = vmul.f32 %v3694_v32, %v3677_v57 }
0x26ce   :  { %v3700_v5 = vadd.f32 %v3698_v24, %v3696_v46 }
0x26d0   :  { %3702 = vst [vmem:[#allocation1] ss:$4 sm:$0xff] %v3700_v5 }
0x26d7   :  { %v7764_v56 = vld.sshfl [vmem:[#allocation1] sm:$0xff pattern:$0x73625140] }
0x26d8   :  { %3710 = vst [vmem:[#allocation1] ss:$4 sm:$0xff] %v3696_v46 }
0x26df   :  { %v3711_v51 = vld.sshfl [vmem:[#allocation1] sm:$0xff pattern:$0x73625140] }
0x26e0   :  { %3712 = vrot.lane.b32.xlu2 %v3711_v51, %s5912_s17 }
0x273a   :  { %v3713_v10 = vpop.permute.xlu2 %3712 }
0x273b   :  { %5003 = vmatmul.msk.f32.vlgmr.msrb.gmra.mxu1 %vm3636_vm12, %v3713_v10 }
0x273c   :  { %4192 = vmatpush.msrb.mxu1 %v7709_v13 }
0x273e   :  { %4193 = vmatpush.msrb.mxu1 %v7721_v40 }
0x27b8   :  { %v3733_v27 = vpop.f32.mrf.mxu1 }
0x27b9   :  { %v3736_v23 = vadd.f32 %v3733_v27, %v3524_v45 }
0x27bb   :  { %5293 = vtanh.f32 %v3736_v23  ;;  %v5004_v55 = vmul.f32 -1.442695, %v3736_v23 }
0x27bd   :  { %5295 = vpow2.f32 %v5004_v55 }
0x27c1   :  { %v5294_v44 = vpop.eup %5293 }
0x27c2   :  { %3759 = vrot.lane.b32.xlu0 %v5294_v44, %s5911_s15 }
0x27c3   :  { %v5296_v17 = vpop.eup %5295 }
0x27c4   :  { %v3740_v58 = vadd.f32 1.0, %v5296_v17 }
0x27c6   :  { %5297 = vrcp.f32 %v3740_v58  ;;  %v3752_v53 = vand.u32 2147483648, %v3740_v58  ;;  %vm3746_vm13 = vweird.f32 %v3740_v58  ;;  %v3750_v6 = vand.u32 2147483647, %v3740_v58 }
0x27c8   :  { %v3753_v59 = vor.u32 1.1754944e-38, %v3752_v53  ;;  %vm3751_vm5 = vcmp.eq.f32.partialorder %v3750_v6, 8.507059e+37 }
0x27ca   :  { %3774 = vrot.lane.b32.xlu0 %v3630_v50, %s5900_s4 }
0x27cc   :  { %v5298_v13 = vpop.eup %5297 }
0x27cd   :  { %v3742_v34 = vmul.f32 %v5298_v13, %v3740_v58  ;;  %vm3747_vm0 = vweird.f32 %v5298_v13 }
0x27ce   :  { %vm3748_vm14 = vmor %vm3746_vm13, %vm3747_vm0 }
0x27cf   :  { %v3743_v40 = vsub.f32 1.0, %v3742_v34 }
0x27d1   :  { %v3744_v62 = vmul.f32 %v5298_v13, %v3743_v40 }
0x27d3   :  { %v3745_v14 = vadd.f32 %v5298_v13, %v3744_v62 }
0x27d5   :  { %v3749_v22 = vsel %vm3748_vm14, %v5298_v13, %v3745_v14  ;;  %v3526_v13 = vrot.slane %v7751_v9, 6  ;;  %v3632_v14 = vrot.slane %v7758_v16, 6 }
0x27d6   :  { %v3754_v37 = vsel %vm3751_vm5, %v3753_v59, %v3749_v22 }
0x27d7   :  { %v3757_v36 = vmul.f32 %v3754_v37, %v3690_v25 }
0x2834   :  { %v3760_v54 = vpop.permute.xlu0 %3759 }
0x2835   :  { %v3762_v26 = vmul.f32 %v3760_v54, %v3754_v37 }
0x2837   :  { %3764 = vrot.lane.b32.xlu1 %v3762_v26, %s5890_s28 }
0x283c   :  { %v3775_v39 = vpop.permute.xlu0 %3774 }
0x28a9   :  { %v3765_v20 = vpop.permute.xlu1 %3764 }
0x28aa   :  { %v3767_v60 = vadd.f32 %v3765_v20, %v3757_v36 }
0x28ac   :  { %5299 = vtanh.f32 %v3767_v60 }
0x28b2   :  { %v5300_v0 = vpop.eup %5299 }
0x28b3   :  { %3770 = vrot.lane.b32.xlu2 %v5300_v0, %s5890_s28 }
0x290d   :  { %v3771_v48 = vpop.permute.xlu2 %3770 }
0x290e   :  { %v3773_v12 = vmul.f32 %v3771_v48, %v3754_v37 }
0x2910   :  { %v3777_v19 = vadd.f32 %v3775_v39, %v3773_v12 }
0x2912   :  { %3779 = vst [vmem:[#allocation1] ss:$4 sm:$0xff] %v3777_v19 }
0x2919   :  { %v7776_v7 = vld.sshfl [vmem:[#allocation1] sm:$0xff pattern:$0x73625140] }
0x291a   :  { %3787 = vst [vmem:[#allocation1] ss:$4 sm:$0xff] %v3773_v12 }
0x2921   :  { %v3788_v33 = vld.sshfl [vmem:[#allocation1] sm:$0xff pattern:$0x73625140] }
0x2922   :  { %3789 = vrot.lane.b32.xlu1 %v3788_v33, %s5912_s17 }
0x2994   :  { %v3790_v18 = vpop.permute.xlu1 %3789 }
0x2995   :  { %5005 = vmatmul.msk.f32.vlgmr.msra.gmra.mxu0 %vm3636_vm12, %v3790_v18 }
0x2a12   :  { %v3810_v52 = vpop.f32.mrf.mxu0 }
0x2a13   :  { %v3813_v28 = vadd.f32 %v3810_v52, %v3525_v4 }
0x2a15   :  { %5301 = vtanh.f32 %v3813_v28  ;;  %v5006_v29 = vmul.f32 -1.442695, %v3813_v28 }
0x2a17   :  { %5303 = vpow2.f32 %v5006_v29 }
0x2a1b   :  { %v5302_v31 = vpop.eup %5301 }
0x2a1c   :  { %3836 = vrot.lane.b32.xlu2 %v5302_v31, %s5911_s15 }
0x2a1d   :  { %v5304_v1 = vpop.eup %5303 }
0x2a1e   :  { %v3817_v30 = vadd.f32 1.0, %v5304_v1 }
0x2a20   :  { %5305 = vrcp.f32 %v3817_v30  ;;  %v3829_v38 = vand.u32 2147483648, %v3817_v30  ;;  %vm3823_vm7 = vweird.f32 %v3817_v30  ;;  %v3827_v11 = vand.u32 2147483647, %v3817_v30 }
0x2a22   :  { %v3830_v2 = vor.u32 1.1754944e-38, %v3829_v38  ;;  %vm3828_vm8 = vcmp.eq.f32.partialorder %v3827_v11, 8.507059e+37 }
0x2a24   :  { %3851 = vrot.lane.b32.xlu2 %v3631_v41, %s5900_s4 }
0x2a26   :  { %v5306_v21 = vpop.eup %5305 }
0x2a27   :  { %v3819_v47 = vmul.f32 %v5306_v21, %v3817_v30  ;;  %vm3824_vm15 = vweird.f32 %v5306_v21 }
0x2a28   :  { %vm3825_vm1 = vmor %vm3823_vm7, %vm3824_vm15 }
0x2a29   :  { %v3820_v61 = vsub.f32 1.0, %v3819_v47 }
0x2a2b   :  { %v3821_v57 = vmul.f32 %v5306_v21, %v3820_v61 }
0x2a2d   :  { %v3822_v35 = vadd.f32 %v5306_v21, %v3821_v57 }
0x2a2f   :  { %v3826_v25 = vsel %vm3825_vm1, %v5306_v21, %v3822_v35 }
0x2a30   :  { %v3831_v46 = vsel %vm3828_vm8, %v3830_v2, %v3826_v25 }
0x2a31   :  { %v3834_v5 = vmul.f32 %v3831_v46, %v3767_v60 }
0x2a76   :  { %v3837_v32 = vpop.permute.xlu2 %3836 }
0x2a77   :  { %v3839_v24 = vmul.f32 %v3837_v32, %v3831_v46 }
0x2a79   :  { %3841 = vrot.lane.b32.xlu0 %v3839_v24, %s5890_s28 }
0x2a7e   :  { %v3852_v44 = vpop.permute.xlu2 %3851 }
0x2aeb   :  { %v3842_v51 = vpop.permute.xlu0 %3841 }
0x2aec   :  { %v3844_v10 = vadd.f32 %v3842_v51, %v3834_v5 }
0x2aee   :  { %5307 = vtanh.f32 %v3844_v10 }
0x2af4   :  { %v5308_v45 = vpop.eup %5307 }
0x2af5   :  { %3847 = vrot.lane.b32.xlu1 %v5308_v45, %s5890_s28 }
0x2b67   :  { %v3848_v27 = vpop.permute.xlu1 %3847 }
0x2b68   :  { %v3850_v23 = vmul.f32 %v3848_v27, %v3831_v46 }
0x2b6a   :  { %v3854_v50 = vadd.f32 %v3852_v44, %v3850_v23 }
0x2b6c   :  { %3856 = vst [vmem:[#allocation1] ss:$4 sm:$0xff] %v3854_v50 }
0x2b73   :  { %v7786_v55 = vld.sshfl [vmem:[#allocation1] sm:$0xff pattern:$0x73625140] }
0x2b74   :  { %3864 = vst [vmem:[#allocation1] ss:$4 sm:$0xff] %v3850_v23 }
0x2b7b   :  { %v3865_v17 = vld.sshfl [vmem:[#allocation1] sm:$0xff pattern:$0x73625140] }
0x2b7c   :  { %3866 = vrot.lane.b32.xlu0 %v3865_v17, %s5912_s17 }
0x2bee   :  { %v3867_v58 = vpop.permute.xlu0 %3866 }
0x2bef   :  { %5007 = vmatmul.msk.f32.vlgmr.msra.gmra.mxu1 %vm3636_vm12, %v3867_v58 }
0x2c6c   :  { %v3887_v34 = vpop.f32.mrf.mxu1 }
0x2c6d   :  { %v3890_v40 = vadd.f32 %v3887_v34, %v3526_v13 }
0x2c6f   :  { %5309 = vtanh.f32 %v3890_v40  ;;  %v5008_v53 = vmul.f32 -1.442695, %v3890_v40 }
0x2c71   :  { %5311 = vpow2.f32 %v5008_v53 }
0x2c75   :  { %v5310_v62 = vpop.eup %5309 }
0x2c76   :  { %3913 = vrot.lane.b32.xlu1 %v5310_v62, %s5911_s15 }
0x2c77   :  { %v5312_v6 = vpop.eup %5311 }
0x2c78   :  { %v3894_v22 = vadd.f32 1.0, %v5312_v6 }
0x2c7a   :  { %5313 = vrcp.f32 %v3894_v22  ;;  %v3906_v36 = vand.u32 2147483648, %v3894_v22  ;;  %vm3900_vm10 = vweird.f32 %v3894_v22  ;;  %v3904_v20 = vand.u32 2147483647, %v3894_v22 }
0x2c7c   :  { %v3907_v60 = vor.u32 1.1754944e-38, %v3906_v36  ;;  %vm3905_vm3 = vcmp.eq.f32.partialorder %v3904_v20, 8.507059e+37 }
0x2c7e   :  { %3928 = vrot.lane.b32.xlu1 %v3632_v14, %s5900_s4 }
0x2c80   :  { %v5314_v59 = vpop.eup %5313 }
0x2c81   :  { %v3896_v9 = vmul.f32 %v5314_v59, %v3894_v22  ;;  %vm3901_vm9 = vweird.f32 %v5314_v59 }
0x2c82   :  { %vm3902_vm11 = vmor %vm3900_vm10, %vm3901_vm9 }
0x2c83   :  { %v3897_v54 = vsub.f32 1.0, %v3896_v9 }
0x2c85   :  { %v3898_v37 = vmul.f32 %v5314_v59, %v3897_v54 }
0x2c86   :  { %3370 = vrot.lane.b32.xlu1 %v7685_v63, %s5910_s13 }
0x2c87   :  { %v3899_v26 = vadd.f32 %v5314_v59, %v3898_v37 }
0x2c89   :  { %v3903_v16 = vsel %vm3902_vm11, %v5314_v59, %v3899_v26 }
0x2c8a   :  { %v3908_v63 = vsel %vm3905_vm3, %v3907_v60, %v3903_v16 }
0x2c8b   :  { %v3911_v33 = vmul.f32 %v3908_v63, %v3844_v10 }
0x2ce8   :  { %v3914_v0 = vpop.permute.xlu1 %3913 }
0x2ce9   :  { %v3916_v48 = vmul.f32 %v3914_v0, %v3908_v63 }
0x2ceb   :  { %3918 = vrot.lane.b32.xlu2 %v3916_v48, %s5890_s28 }
0x2cf0   :  { %v3929_v12 = vpop.permute.xlu1 %3928 }
0x2cf3   :  { %3216 = vrot.lane.b32.xlu2 %v7665_v42, %s5910_s13 }
0x2cf8   :  { %v3371_v39 = vpop.permute.xlu1 %3370 }
0x2cf9   :  { %3374 = vst.msk [vmem:[#allocation4 + $0xc] sm:$0x3] %vm2911_vm6, %v3371_v39 }
0x2cfb   :  { %3447 = vrot.lane.b32.xlu2 %v7744_v49, %s5910_s13 }
0x2d00   :  { %v3458_v19 = vld [vmem:[#allocation4 + $0xc] sm:$0x3] }
0x2d01   :  { %3490 = vst [vmem:[#allocation1 + $0x22] ss:$4 sm:$0xff] %v3458_v19 }
0x2d45   :  { %v3919_v18 = vpop.permute.xlu2 %3918 }
0x2d46   :  { %v7802_v4 = vadd.f32 %v3919_v18, %v3911_v33 }
0x2d48   :  { %5315 = vtanh.f32 %v7802_v4 }
0x2d4d   :  { %v3217_v52 = vpop.permute.xlu2 %3216 }
0x2d4e   :  { %v5316_v28 = vpop.eup %5315  ;;  %3220 = vst.msk [vmem:[#allocation4 + $0x8] sm:$0x3] %vm2911_vm6, %v3217_v52 }
0x2d4f   :  { %3924 = vrot.lane.b32.xlu0 %v5316_v28, %s5890_s28 }
0x2d55   :  { %v3456_v42 = vld [vmem:[#allocation4 + $0x8] sm:$0x3]  ;;  %v3448_v31 = vpop.permute.xlu2 %3447 }
0x2d56   :  { %3486 = vst [vmem:[#allocation1 + $0x20] ss:$4 sm:$0xff] %v3456_v42 }
0x2d57   :  { %3451 = vst.msk [vmem:[#allocation4 + $0xe] sm:$0x3] %vm2911_vm6, %v3448_v31  ;;  %3293 = vrot.lane.b32.xlu0 %v7675_v3, %s5910_s13 }
0x2d5e   :  { %v3459_v49 = vld [vmem:[#allocation4 + $0xe] sm:$0x3] }
0x2d5f   :  { %3492 = vst [vmem:[#allocation1 + $0x23] ss:$4 sm:$0xff] %v3459_v49 }
0x2dc1   :  { %v3925_v41 = vpop.permute.xlu0 %3924 }
0x2dc2   :  { %v3927_v29 = vmul.f32 %v3925_v41, %v3908_v63 }
0x2dc4   :  { %v3931_v1 = vadd.f32 %v3929_v12, %v3927_v29 }
0x2dc6   :  { %3933 = vst [vmem:[#allocation1] ss:$4 sm:$0xff] %v3931_v1 }
0x2dc9   :  { %v3294_v30 = vpop.permute.xlu0 %3293 }
0x2dca   :  { %3297 = vst.msk [vmem:[#allocation4 + $0xa] sm:$0x3] %vm2911_vm6, %v3294_v30 }
0x2dcd   :  { %v7811_v21 = vld.sshfl [vmem:[#allocation1] sm:$0xff pattern:$0x73625140] }
0x2dce   :  { %3941 = vst [vmem:[#allocation1] ss:$4 sm:$0xff] %v3927_v29 }
0x2dd1   :  { %v3457_v47 = vld [vmem:[#allocation4 + $0xa] sm:$0x3] }
0x2dd2   :  { %3488 = vst [vmem:[#allocation1 + $0x21] ss:$4 sm:$0xff] %v3457_v47 }
0x2dd5   :  { %v3942_v61 = vld.sshfl [vmem:[#allocation1] sm:$0xff pattern:$0x73625140] }
0x2dd6   :  { %3943 = vrot.lane.b32.xlu0 %v3942_v61, %s5912_s17 }
0x2dd9   :  { %v3494_v57 = vld.sshfl [vmem:[#allocation1 + $0x20] sm:$0xff pattern:$0x73625140] }
0x2dda   :  { %4997 = vmatmul.msk.f32.gmra.mxu2 %vm2840_vm2, %v3494_v57  ;;  %3552 = vst [vmem:[#allocation1 + $0x20] ss:$4 sm:$0xff] %v3456_v42 }
0x2ddb   :  { %3554 = vst [vmem:[#allocation1 + $0x21] ss:$4 sm:$0xff] %v3457_v47 }
0x2ddc   :  { %3556 = vst [vmem:[#allocation1 + $0x22] ss:$4 sm:$0xff] %v3458_v19 }
0x2ddd   :  { %3558 = vst [vmem:[#allocation1 + $0x23] ss:$4 sm:$0xff] %v3459_v49 }
0x2de4   :  { %v3560_v3 = vld.sshfl [vmem:[#allocation1 + $0x20] sm:$0xff pattern:$0x73625140] }
0x2de5   :  { %4999 = vmatmul.msk.f32.gmra.mxu3 %vm2840_vm2, %v3560_v3 }
0x2e48   :  { %v3944_v35 = vpop.permute.xlu0 %3943 }
0x2e49   :  { %5009 = vmatmul.msk.f32.vlgmr.msra.gmra.mxu2 %vm3636_vm12, %v3944_v35 }
0x2e5d   :  { %v3519_v24 = vpop.f32.mrf.mxu2 }
0x2e5e   :  { %v7819_v10 = vadd.f32 %v7748_v8, %v3519_v24 }
0x2e68   :  { %v3585_v38 = vpop.f32.mrf.mxu3 }
0x2e69   :  { %v3586_v11 = vadd.f32 %v7754_v43, %v3585_v38 }
0x2e6b   :  { %v5001_v25 = vmul.f32 -1.442695, %v3586_v11 }
0x2e6d   :  { %5317 = vpow2.f32 %v5001_v25 }
0x2e73   :  { %v5318_v2 = vpop.eup %5317 }
0x2e74   :  { %v3595_v32 = vadd.f32 1.0, %v5318_v2 }
0x2e76   :  { %5319 = vrcp.f32 %v3595_v32  ;;  %v3622_v43 = vand.u32 2147483648, %v3595_v32  ;;  %vm3616_vm6 = vweird.f32 %v3595_v32  ;;  %v3620_v50 = vand.u32 2147483647, %v3595_v32 }
0x2e78   :  { %v3623_v13 = vor.u32 1.1754944e-38, %v3622_v43  ;;  %vm3621_vm0 = vcmp.eq.f32.partialorder %v3620_v50, 8.507059e+37 }
0x2e7c   :  { %v5320_v46 = vpop.eup %5319 }
0x2e7d   :  { %v3612_v5 = vmul.f32 %v5320_v46, %v3595_v32  ;;  %vm3617_vm2 = vweird.f32 %v5320_v46 }
0x2e7e   :  { %vm3618_vm4 = vmor %vm3616_vm6, %vm3617_vm2 }
0x2e7f   :  { %v3613_v51 = vsub.f32 1.0, %v3612_v5 }
0x2e81   :  { %v3614_v23 = vmul.f32 %v5320_v46, %v3613_v51 }
0x2e83   :  { %v3615_v44 = vadd.f32 %v5320_v46, %v3614_v23 }
0x2e85   :  { %v3619_v58 = vsel %vm3618_vm4, %v5320_v46, %v3615_v44 }
0x2e86   :  { %v3624_v34 = vsel %vm3621_vm0, %v3623_v13, %v3619_v58 }
0x2e87   :  { %v7823_v8 = vmul.f32 %v3624_v34, %v3586_v11 }
0x2e89   :  { %v3633_v29 = vrot.slane %v7823_v8, 2 }
0x2ecc   :  { %v3964_v45 = vpop.f32.mrf.mxu2 }
0x2ecd   :  { %v3967_v27 = vadd.f32 %v3964_v45, %v7819_v10 }
0x2ecf   :  { %5321 = vtanh.f32 %v3967_v27  ;;  %v5010_v40 = vmul.f32 -1.442695, %v3967_v27 }
0x2ed1   :  { %5323 = vpow2.f32 %v5010_v40  ;;  %v3528_v40 = vrot.slane %v7819_v10, 4 }
0x2ed5   :  { %v5322_v17 = vpop.eup %5321 }
0x2ed6   :  { %3990 = vrot.lane.b32.xlu1 %v5322_v17, %s5911_s15 }
0x2ed7   :  { %v5324_v62 = vpop.eup %5323 }
0x2ed8   :  { %v3971_v14 = vadd.f32 1.0, %v5324_v62 }
0x2eda   :  { %5325 = vrcp.f32 %v3971_v14  ;;  %v3983_v54 = vand.u32 2147483648, %v3971_v14  ;;  %vm3977_vm14 = vweird.f32 %v3971_v14  ;;  %v3981_v37 = vand.u32 2147483647, %v3971_v14 }
0x2edc   :  { %v3984_v36 = vor.u32 1.1754944e-38, %v3983_v54  ;;  %vm3982_vm15 = vcmp.eq.f32.partialorder %v3981_v37, 8.507059e+37 }
0x2ede   :  { %4005 = vrot.lane.b32.xlu1 %v7823_v8, %s5900_s4 }
0x2ee0   :  { %v5326_v53 = vpop.eup %5325 }
0x2ee1   :  { %v3973_v6 = vmul.f32 %v5326_v53, %v3971_v14  ;;  %vm3978_vm13 = vweird.f32 %v5326_v53 }
0x2ee2   :  { %vm3979_vm5 = vmor %vm3977_vm14, %vm3978_vm13  ;;  %vm3707_vm14 = vcmask 123904  }
0x2ee3   :  { %v3974_v22 = vsub.f32 1.0, %v3973_v6  ;;  %v3634_v6 = vrot.slane %v7823_v8, 4 }
0x2ee5   :  { %v3975_v59 = vmul.f32 %v5326_v53, %v3974_v22 }
0x2ee7   :  { %v3976_v9 = vadd.f32 %v5326_v53, %v3975_v59 }
0x2ee9   :  { %v3980_v26 = vsel %vm3979_vm5, %v5326_v53, %v3976_v9 }
0x2eea   :  { %v3985_v16 = vsel %vm3982_vm15, %v3984_v36, %v3980_v26 }
0x2eeb   :  { %v3988_v0 = vmul.f32 %v3985_v16, %v7802_v4  ;;  %v3527_v4 = vrot.slane %v7819_v10, 2 }
0x2f48   :  { %v3991_v20 = vpop.permute.xlu1 %3990 }
0x2f49   :  { %v3993_v60 = vmul.f32 %v3991_v20, %v3985_v16 }
0x2f4b   :  { %3995 = vrot.lane.b32.xlu2 %v3993_v60, %s5890_s28 }
0x2f50   :  { %v4006_v33 = vpop.permute.xlu1 %4005 }
0x2fa5   :  { %v3996_v63 = vpop.permute.xlu2 %3995 }
0x2fa6   :  { %v3998_v48 = vadd.f32 %v3996_v63, %v3988_v0 }
0x2fa8   :  { %5327 = vtanh.f32 %v3998_v48 }
0x2fae   :  { %v5328_v12 = vpop.eup %5327 }
0x2faf   :  { %4001 = vrot.lane.b32.xlu0 %v5328_v12, %s5890_s28 }
0x3021   :  { %v4002_v39 = vpop.permute.xlu0 %4001 }
0x3022   :  { %v4004_v19 = vmul.f32 %v4002_v39, %v3985_v16 }
0x3024   :  { %v4008_v18 = vadd.f32 %v4006_v33, %v4004_v19 }
0x3026   :  { %4010 = vst [vmem:[#allocation1] ss:$4 sm:$0xff] %v4008_v18 }
0x302d   :  { %v7830_v52 = vld.sshfl [vmem:[#allocation1] sm:$0xff pattern:$0x73625140] }
0x302e   :  { %4018 = vst [vmem:[#allocation1] ss:$4 sm:$0xff] %v4004_v19 }
0x3035   :  { %v4019_v28 = vld.sshfl [vmem:[#allocation1] sm:$0xff pattern:$0x73625140] }
0x3036   :  { %4020 = vrot.lane.b32.xlu2 %v4019_v28, %s5912_s17 }
0x3090   :  { %v4021_v42 = vpop.permute.xlu2 %4020 }
0x3091   :  { %5011 = vmatmul.msk.f32.vlgmr.msrb.gmra.mxu3 %vm3636_vm12, %v4021_v42 }
0x3114   :  { %v4041_v31 = vpop.f32.mrf.mxu3 }
0x3115   :  { %v4044_v49 = vadd.f32 %v4041_v31, %v3527_v4 }
0x3117   :  { %5329 = vtanh.f32 %v4044_v49  ;;  %v5012_v1 = vmul.f32 -1.442695, %v4044_v49 }
0x3119   :  { %5331 = vpow2.f32 %v5012_v1 }
0x311d   :  { %v5330_v41 = vpop.eup %5329 }
0x311e   :  { %4067 = vrot.lane.b32.xlu0 %v5330_v41, %s5911_s15 }
0x311f   :  { %v5332_v30 = vpop.eup %5331 }
0x3120   :  { %v4048_v47 = vadd.f32 1.0, %v5332_v30  ;;  %v3529_v30 = vrot.slane %v7819_v10, 6 }
0x3122   :  { %5333 = vrcp.f32 %v4048_v47  ;;  %v4060_v11 = vand.u32 2147483648, %v4048_v47  ;;  %vm4054_vm1 = vweird.f32 %v4048_v47  ;;  %v4058_v25 = vand.u32 2147483647, %v4048_v47 }
0x3124   :  { %v4061_v32 = vor.u32 1.1754944e-38, %v4060_v11  ;;  %vm4059_vm9 = vcmp.eq.f32.partialorder %v4058_v25, 8.507059e+37 }
0x3126   :  { %4082 = vrot.lane.b32.xlu0 %v3633_v29, %s5900_s4 }
0x3128   :  { %v5334_v61 = vpop.eup %5333 }
0x3129   :  { %v4050_v57 = vmul.f32 %v5334_v61, %v4048_v47  ;;  %vm4055_vm7 = vweird.f32 %v5334_v61 }
0x312a   :  { %vm4056_vm8 = vmor %vm4054_vm1, %vm4055_vm7 }
0x312b   :  { %v4051_v3 = vsub.f32 1.0, %v4050_v57 }
0x312d   :  { %v4052_v35 = vmul.f32 %v5334_v61, %v4051_v3  ;;  %v3635_v3 = vrot.slane %v7823_v8, 6 }
0x312f   :  { %v4053_v38 = vadd.f32 %v5334_v61, %v4052_v35 }
0x3131   :  { %v4057_v2 = vsel %vm4056_vm8, %v5334_v61, %v4053_v38  ;;  %vm4377_vm8 = vcmask 64512  }
0x3132   :  { %v4062_v24 = vsel %vm4059_vm9, %v4061_v32, %v4057_v2 }
0x3133   :  { %v4065_v51 = vmul.f32 %v4062_v24, %v3998_v48 }
0x3190   :  { %v4068_v46 = vpop.permute.xlu0 %4067 }
0x3191   :  { %v4070_v5 = vmul.f32 %v4068_v46, %v4062_v24 }
0x3193   :  { %4072 = vrot.lane.b32.xlu1 %v4070_v5, %s5890_s28 }
0x3198   :  { %v4083_v50 = vpop.permute.xlu0 %4082 }
0x3205   :  { %v4073_v45 = vpop.permute.xlu1 %4072 }
0x3206   :  { %v4075_v27 = vadd.f32 %v4073_v45, %v4065_v51 }
0x3208   :  { %5335 = vtanh.f32 %v4075_v27 }
0x320e   :  { %v5336_v23 = vpop.eup %5335 }
0x320f   :  { %4078 = vrot.lane.b32.xlu2 %v5336_v23, %s5890_s28 }
0x3269   :  { %v4079_v44 = vpop.permute.xlu2 %4078 }
0x326a   :  { %v4081_v43 = vmul.f32 %v4079_v44, %v4062_v24 }
0x326c   :  { %v4085_v17 = vadd.f32 %v4083_v50, %v4081_v43 }
0x326e   :  { %4087 = vst [vmem:[#allocation1] ss:$4 sm:$0xff] %v4085_v17 }
0x3275   :  { %v7840_v58 = vld.sshfl [vmem:[#allocation1] sm:$0xff pattern:$0x73625140] }
0x3276   :  { %4095 = vst [vmem:[#allocation1] ss:$4 sm:$0xff] %v4081_v43 }
0x327d   :  { %v4096_v13 = vld.sshfl [vmem:[#allocation1] sm:$0xff pattern:$0x73625140] }
0x327e   :  { %4097 = vrot.lane.b32.xlu1 %v4096_v13, %s5912_s17 }
0x32f0   :  { %v4098_v34 = vpop.permute.xlu1 %4097 }
0x32f1   :  { %5013 = vmatmul.msk.f32.vlgmr.msrb.gmra.mxu0 %vm3636_vm12, %v4098_v34 }
0x336e   :  { %v4118_v62 = vpop.f32.mrf.mxu0 }
0x336f   :  { %v4121_v14 = vadd.f32 %v4118_v62, %v3528_v40  ;;  %v7880_v62 = vld [vmem:[%s7999_s20] sm:$0xff]  ;;  %s5914_s20 = smov 112  }
0x3370   :  { %4395 = vmatpush.msra.mxu0 %v7880_v62  ;;  %4460 = vmatpush.msra.mxu1 %v7880_v62 }
0x3371   :  { %5337 = vtanh.f32 %v4121_v14  ;;  %v5014_v22 = vmul.f32 -1.442695, %v4121_v14  ;;  %4396 = vmatmul.f32.vlgmr.msra.gmra.mxu0 %v8287_v15 }
0x3372   :  { %4590 = vmatpush.msrb.mxu0 %v7880_v62 }
0x3373   :  { %5339 = vpow2.f32 %v5014_v22 }
0x3374   :  { %4850 = vmatpush.msra.mxu0 %v7880_v62 }
0x3377   :  { %v5338_v53 = vpop.eup %5337 }
0x3378   :  { %4144 = vrot.lane.b32.xlu2 %v5338_v53, %s5911_s15 }
0x3379   :  { %v5340_v59 = vpop.eup %5339 }
0x337a   :  { %v4125_v9 = vadd.f32 1.0, %v5340_v59 }
0x337c   :  { %5341 = vrcp.f32 %v4125_v9  ;;  %v4137_v16 = vand.u32 2147483648, %v4125_v9  ;;  %vm4131_vm11 = vweird.f32 %v4125_v9  ;;  %v4135_v60 = vand.u32 2147483647, %v4125_v9 }
0x337e   :  { %v4138_v63 = vor.u32 1.1754944e-38, %v4137_v16  ;;  %vm4136_vm2 = vcmp.eq.f32.partialorder %v4135_v60, 8.507059e+37 }
0x3380   :  { %4159 = vrot.lane.b32.xlu2 %v3634_v6, %s5900_s4 }
0x3382   :  { %v5342_v54 = vpop.eup %5341 }
0x3383   :  { %v4127_v37 = vmul.f32 %v5342_v54, %v4125_v9  ;;  %vm4132_vm10 = vweird.f32 %v5342_v54 }
0x3384   :  { %vm4133_vm3 = vmor %vm4131_vm11, %vm4132_vm10 }
0x3385   :  { %v4128_v26 = vsub.f32 1.0, %v4127_v37 }
0x3387   :  { %v4129_v36 = vmul.f32 %v5342_v54, %v4128_v26  ;;  %v7891_v26 = vld [vmem:[#allocation27] ss:$0 sm:$0xff] }
0x3389   :  { %v4130_v20 = vadd.f32 %v5342_v54, %v4129_v36 }
0x338b   :  { %v4134_v0 = vsel %vm4133_vm3, %v5342_v54, %v4130_v20 }
0x338c   :  { %v4139_v12 = vsel %vm4136_vm2, %v4138_v63, %v4134_v0 }
0x338d   :  { %v4142_v19 = vmul.f32 %v4139_v12, %v4075_v27 }
0x33d2   :  { %v4145_v48 = vpop.permute.xlu2 %4144 }
0x33d3   :  { %v4147_v39 = vmul.f32 %v4145_v48, %v4139_v12 }
0x33d5   :  { %4149 = vrot.lane.b32.xlu0 %v4147_v39, %s5890_s28 }
0x33da   :  { %v4160_v31 = vpop.permute.xlu2 %4159 }
0x33ee   :  { %v4397_v20 = vpop.f32.mrf.mxu0 }
0x3447   :  { %v4150_v33 = vpop.permute.xlu0 %4149 }
0x3448   :  { %v4152_v18 = vadd.f32 %v4150_v33, %v4142_v19 }
0x344a   :  { %5343 = vtanh.f32 %v4152_v18 }
0x3450   :  { %v5344_v28 = vpop.eup %5343 }
0x3451   :  { %4155 = vrot.lane.b32.xlu1 %v5344_v28, %s5890_s28 }
0x34c3   :  { %v4156_v42 = vpop.permute.xlu1 %4155 }
0x34c4   :  { %v4158_v4 = vmul.f32 %v4156_v42, %v4139_v12 }
0x34c6   :  { %v4162_v49 = vadd.f32 %v4160_v31, %v4158_v4 }
0x34c8   :  { %4164 = vst [vmem:[#allocation1] ss:$4 sm:$0xff] %v4162_v49 }
0x34cf   :  { %v7850_v41 = vld.sshfl [vmem:[#allocation1] sm:$0xff pattern:$0x73625140] }
0x34d0   :  { %4172 = vst [vmem:[#allocation1] ss:$4 sm:$0xff] %v4158_v4 }
0x34d7   :  { %v4173_v29 = vld.sshfl [vmem:[#allocation1] sm:$0xff pattern:$0x73625140] }
0x34d8   :  { %4174 = vrot.lane.b32.xlu0 %v4173_v29, %s5912_s17 }
0x354a   :  { %v4175_v1 = vpop.permute.xlu0 %4174 }
0x354b   :  { %5015 = vmatmul.msk.f32.vlgmr.msrb.gmra.mxu1 %vm3636_vm12, %v4175_v1 }
0x354c   :  { %4655 = vmatpush.msrb.mxu1 %v7880_v62 }
0x35c8   :  { %v4195_v47 = vpop.f32.mrf.mxu1 }
0x35c9   :  { %v4198_v61 = vadd.f32 %v4195_v47, %v3529_v30 }
0x35cb   :  { %5345 = vtanh.f32 %v4198_v61  ;;  %v5016_v35 = vmul.f32 -1.442695, %v4198_v61 }
0x35cd   :  { %5347 = vpow2.f32 %v5016_v35 }
0x35d1   :  { %v5346_v57 = vpop.eup %5345 }
0x35d2   :  { %4221 = vrot.lane.b32.xlu1 %v5346_v57, %s5911_s15 }
0x35d3   :  { %v5348_v38 = vpop.eup %5347 }
0x35d4   :  { %v4202_v11 = vadd.f32 1.0, %v5348_v38 }
0x35d6   :  { %5349 = vrcp.f32 %v4202_v11  ;;  %v4214_v24 = vand.u32 2147483648, %v4202_v11  ;;  %vm4208_vm4 = vweird.f32 %v4202_v11  ;;  %v4212_v5 = vand.u32 2147483647, %v4202_v11 }
0x35d8   :  { %v4215_v51 = vor.u32 1.1754944e-38, %v4214_v24  ;;  %vm4213_vm13 = vcmp.eq.f32.partialorder %v4212_v5, 8.507059e+37 }
0x35da   :  { %4236 = vrot.lane.b32.xlu1 %v3635_v3, %s5900_s4 }
0x35dc   :  { %v5350_v25 = vpop.eup %5349 }
0x35dd   :  { %v4204_v10 = vmul.f32 %v5350_v25, %v4202_v11  ;;  %vm4209_vm6 = vweird.f32 %v5350_v25 }
0x35de   :  { %vm4210_vm0 = vmor %vm4208_vm4, %vm4209_vm6 }
0x35df   :  { %v4205_v2 = vsub.f32 1.0, %v4204_v10 }
0x35e1   :  { %v4206_v32 = vmul.f32 %v5350_v25, %v4205_v2 }
0x35e2   :  { %3858 = vrot.lane.b32.xlu1 %v7786_v55, %s5912_s17 }
0x35e3   :  { %v4207_v46 = vadd.f32 %v5350_v25, %v4206_v32 }
0x35e5   :  { %v4211_v8 = vsel %vm4210_vm0, %v5350_v25, %v4207_v46 }
0x35e6   :  { %v4216_v55 = vsel %vm4213_vm13, %v4215_v51, %v4211_v8  ;;  %v4330_v51 = vld [vmem:[%s8289_s21 + $0x8] sm:$0xff] }
0x35e7   :  { %v4219_v43 = vmul.f32 %v4216_v55, %v4152_v18  ;;  %4351 = vmatpush.msra.mxu3 %v4330_v51 }
0x3644   :  { %v4222_v45 = vpop.permute.xlu1 %4221 }
0x3645   :  { %v4224_v27 = vmul.f32 %v4222_v45, %v4216_v55  ;;  %v4329_v45 = vld [vmem:[%s8289_s21] sm:$0xff] }
0x3646   :  { %4352 = vmatpush.msra.mxu3 %v4329_v45 }
0x3647   :  { %4226 = vrot.lane.b32.xlu2 %v4224_v27, %s5890_s28 }
0x3648   :  { %4525 = vmatpush.msrb.mxu3 %v7880_v62 }
0x364c   :  { %v4237_v23 = vpop.permute.xlu1 %4236 }
0x364f   :  { %3704 = vrot.lane.b32.xlu2 %v7764_v56, %s5912_s17  ;;  %v4257_v56 = vld [vmem:[%s7998_s19 + $0x8] sm:$0xff] }
0x3650   :  { %4306 = vmatpush.msrb.mxu2 %v4257_v56 }
0x3654   :  { %v3859_v44 = vpop.permute.xlu1 %3858 }
0x3655   :  { %3862 = vst.msk [vmem:[#allocation5 + $0x4] sm:$0x3] %vm3707_vm14, %v3859_v44 }
0x3657   :  { %3935 = vrot.lane.b32.xlu2 %v7811_v21, %s5912_s17  ;;  %v4256_v21 = vld [vmem:[%s7998_s19] sm:$0xff]  ;;  %s5913_s19 = smov 104  }
0x3658   :  { %4307 = vmatpush.msrb.mxu2 %v4256_v21 }
0x365a   :  { %4720 = vmatpush.msra.mxu2 %v7880_v62 }
0x365c   :  { %v4250_v9 = vld [vmem:[#allocation5 + $0x4] sm:$0x3] }
0x36a1   :  { %v4227_v50 = vpop.permute.xlu2 %4226 }
0x36a2   :  { %v4229_v17 = vadd.f32 %v4227_v50, %v4219_v43 }
0x36a4   :  { %5351 = vtanh.f32 %v4229_v17 }
0x36a9   :  { %v3705_v13 = vpop.permute.xlu2 %3704 }
0x36aa   :  { %v5352_v34 = vpop.eup %5351  ;;  %3708 = vst.msk [vmem:[#allocation5] sm:$0x3] %vm3707_vm14, %v3705_v13 }
0x36ab   :  { %4232 = vrot.lane.b32.xlu0 %v5352_v34, %s5890_s28 }
0x36b1   :  { %v3936_v40 = vpop.permute.xlu2 %3935  ;;  %v4248_v22 = vld [vmem:[#allocation5] sm:$0x3] }
0x36b2   :  { %3939 = vst.msk [vmem:[#allocation5 + $0x6] sm:$0x3] %vm3707_vm14, %v3936_v40 }
0x36b3   :  { %3781 = vrot.lane.b32.xlu0 %v7776_v7, %s5912_s17 }
0x36b9   :  { %v4251_v15 = vld [vmem:[#allocation5 + $0x6] sm:$0x3] }
0x371d   :  { %v4233_v7 = vpop.permute.xlu0 %4232 }
0x371e   :  { %v4235_v14 = vmul.f32 %v4233_v7, %v4216_v55 }
0x3720   :  { %v4239_v53 = vadd.f32 %v4237_v23, %v4235_v14 }
0x3722   :  { %4241 = vst [vmem:[#allocation1] ss:$4 sm:$0xff] %v4239_v53 }
0x3725   :  { %v3782_v6 = vpop.permute.xlu0 %3781 }
0x3726   :  { %3785 = vst.msk [vmem:[#allocation5 + $0x2] sm:$0x3] %vm3707_vm14, %v3782_v6 }
0x3729   :  { %v4242_v59 = vld.sshfl [vmem:[#allocation1] sm:$0xff pattern:$0x73625140] }
0x372a   :  { %4271 = vst [vmem:[#allocation1] ss:$4 sm:$0xff] %v4248_v22 }
0x372b   :  { %4275 = vst [vmem:[#allocation1 + $0x2] ss:$4 sm:$0xff] %v4250_v9 }
0x372c   :  { %4277 = vst [vmem:[#allocation1 + $0x3] ss:$4 sm:$0xff] %v4251_v15 }
0x372d   :  { %v4249_v54 = vld [vmem:[#allocation5 + $0x2] sm:$0x3] }
0x372e   :  { %4273 = vst [vmem:[#allocation1 + $0x1] ss:$4 sm:$0xff] %v4249_v54 }
0x3735   :  { %v4286_v37 = vld.sshfl [vmem:[#allocation1] sm:$0xff pattern:$0x73625140] }
0x3736   :  { %5017 = vmatmul.msk.f32.vlgmr.msrb.gmra.mxu2 %vm3636_vm12, %v4286_v37 }
0x37b9   :  { %v4309_v36 = vpop.f32.mrf.mxu2 }
0x37ba   :  { %v7894_v16 = vadd.f32 %v7891_v26, %v4309_v36 }
0x37bc   :  { %v4400_v60 = vadd.f32 %v4397_v20, %v7894_v16  ;;  %v4317_v10 = vrot.slane %v7894_v16, 2 }
0x37be   :  { %5353 = vtanh.f32 %v4400_v60  ;;  %v5021_v63 = vmul.f32 -1.442695, %v4400_v60 }
0x37c0   :  { %5355 = vpow2.f32 %v5021_v63 }
0x37c4   :  { %v5354_v0 = vpop.eup %5353 }
0x37c5   :  { %4423 = vrot.lane.b32.xlu0 %v5354_v0, %s5913_s19 }
0x37c6   :  { %v5356_v48 = vpop.eup %5355 }
0x37c7   :  { %v4404_v12 = vadd.f32 1.0, %v5356_v48 }
0x37c9   :  { %5357 = vrcp.f32 %v4404_v12  ;;  %v4416_v42 = vand.u32 2147483648, %v4404_v12  ;;  %vm4410_vm15 = vweird.f32 %v4404_v12  ;;  %v4414_v4 = vand.u32 2147483647, %v4404_v12 }
0x37cb   :  { %v4417_v49 = vor.u32 1.1754944e-38, %v4416_v42  ;;  %vm4415_vm1 = vcmp.eq.f32.partialorder %v4414_v4, 8.507059e+37 }
0x37cf   :  { %v5358_v39 = vpop.eup %5357 }
0x37d0   :  { %v4406_v19 = vmul.f32 %v5358_v39, %v4404_v12  ;;  %vm4411_vm5 = vweird.f32 %v5358_v39 }
0x37d1   :  { %vm4412_vm7 = vmor %vm4410_vm15, %vm4411_vm5 }
0x37d2   :  { %v4407_v33 = vsub.f32 1.0, %v4406_v19 }
0x37d4   :  { %v4408_v18 = vmul.f32 %v5358_v39, %v4407_v33 }
0x37d6   :  { %v4409_v28 = vadd.f32 %v5358_v39, %v4408_v18 }
0x37d8   :  { %v4413_v31 = vsel %vm4412_vm7, %v5358_v39, %v4409_v28 }
0x37d9   :  { %v4418_v1 = vsel %vm4415_vm1, %v4417_v49, %v4413_v31 }
0x37da   :  { %v4421_v47 = vmul.f32 0.0, %v4418_v1 }
0x3837   :  { %v4424_v29 = vpop.permute.xlu0 %4423 }
0x3838   :  { %v4426_v30 = vmul.f32 %v4424_v29, %v4418_v1 }
0x383a   :  { %4428 = vrot.lane.b32.xlu1 %v4426_v30, %s5894_s22 }
0x38ac   :  { %v4429_v61 = vpop.permute.xlu1 %4428 }
0x38ad   :  { %v4431_v57 = vadd.f32 %v4429_v61, %v4421_v47 }
0x38af   :  { %5359 = vtanh.f32 %v4431_v57 }
0x38b5   :  { %v5360_v3 = vpop.eup %5359 }
0x38b6   :  { %4434 = vrot.lane.b32.xlu2 %v5360_v3, %s5894_s22 }
0x3910   :  { %v4435_v35 = vpop.permute.xlu2 %4434 }
0x3911   :  { %v4437_v38 = vmul.f32 %v4435_v35, %v4418_v1 }
0x3913   :  { %4439 = vst [vmem:[#allocation1] ss:$4 sm:$0xff] %v4437_v38 }
0x391a   :  { %v4440_v11 = vld.sshfl [vmem:[#allocation1] sm:$0xff pattern:$0x73625140] }
0x391b   :  { %4441 = vrot.lane.b32.xlu0 %v4440_v11, %s5914_s20 }
0x398d   :  { %v4442_v25 = vpop.permute.xlu0 %4441 }
0x398e   :  { %5022 = vmatmul.msk.f32.vlgmr.msra.gmra.mxu1 %vm4377_vm8, %v4442_v25 }
0x3a0b   :  { %v4462_v2 = vpop.f32.mrf.mxu1 }
0x3a0c   :  { %v4465_v32 = vadd.f32 %v4462_v2, %v4317_v10  ;;  %v4319_v10 = vrot.slane %v7894_v16, 6 }
0x3a0e   :  { %5361 = vtanh.f32 %v4465_v32  ;;  %v5023_v24 = vmul.f32 -1.442695, %v4465_v32 }
0x3a10   :  { %5363 = vpow2.f32 %v5023_v24 }
0x3a14   :  { %v5362_v46 = vpop.eup %5361 }
0x3a15   :  { %4488 = vrot.lane.b32.xlu1 %v5362_v46, %s5913_s19 }
0x3a16   :  { %v5364_v5 = vpop.eup %5363 }
0x3a17   :  { %v4469_v8 = vadd.f32 1.0, %v5364_v5 }
0x3a19   :  { %5365 = vrcp.f32 %v4469_v8  ;;  %v4481_v50 = vand.u32 2147483648, %v4469_v8  ;;  %vm4475_vm10 = vweird.f32 %v4469_v8  ;;  %v4479_v17 = vand.u32 2147483647, %v4469_v8 }
0x3a1b   :  { %v4482_v34 = vor.u32 1.1754944e-38, %v4481_v50  ;;  %vm4480_vm3 = vcmp.eq.f32.partialorder %v4479_v17, 8.507059e+37 }
0x3a1d   :  { %4243 = vrot.lane.b32.xlu1 %v4242_v59, %s5912_s17 }
0x3a1f   :  { %v5366_v55 = vpop.eup %5365 }
0x3a20   :  { %v4471_v27 = vmul.f32 %v5366_v55, %v4469_v8  ;;  %vm4476_vm9 = vweird.f32 %v5366_v55 }
0x3a21   :  { %vm4477_vm11 = vmor %vm4475_vm10, %vm4476_vm9 }
0x3a22   :  { %v4472_v23 = vsub.f32 1.0, %v4471_v27 }
0x3a24   :  { %v4473_v44 = vmul.f32 %v5366_v55, %v4472_v23 }
0x3a26   :  { %v4474_v43 = vadd.f32 %v5366_v55, %v4473_v44 }
0x3a28   :  { %v4478_v13 = vsel %vm4477_vm11, %v5366_v55, %v4474_v43 }
0x3a29   :  { %v4483_v56 = vsel %vm4480_vm3, %v4482_v34, %v4478_v13 }
0x3a2a   :  { %v4486_v53 = vmul.f32 %v4483_v56, %v4431_v57 }
0x3a87   :  { %v4489_v40 = vpop.permute.xlu1 %4488 }
0x3a88   :  { %v4491_v21 = vmul.f32 %v4489_v40, %v4483_v56 }
0x3a8a   :  { %4493 = vrot.lane.b32.xlu2 %v4491_v21, %s5894_s22 }
0x3a8f   :  { %v4244_v7 = vpop.permute.xlu1 %4243 }
0x3a90   :  { %4247 = vst.msk [vmem:[#allocation5 + $0xe] sm:$0x3] %vm3707_vm14, %v4244_v7 }
0x3a97   :  { %v4255_v14 = vld [vmem:[#allocation5 + $0xe] sm:$0x3] }
0x3a98   :  { %4285 = vst [vmem:[#allocation1 + $0x23] ss:$4 sm:$0xff] %v4255_v14  ;;  %5019 = vmatmul.msk.f32.vlgmr.msra.gmra.mxu3 %vm3636_vm12, %v4255_v14 }
0x3a99   :  { %4785 = vmatpush.msra.mxu3 %v7880_v62  ;;  %v4318_v62 = vrot.slane %v7894_v16, 4 }
0x3ae4   :  { %v4494_v6 = vpop.permute.xlu2 %4493 }
0x3ae5   :  { %v4496_v22 = vadd.f32 %v4494_v6, %v4486_v53 }
0x3ae7   :  { %5367 = vtanh.f32 %v4496_v22 }
0x3aed   :  { %v5368_v59 = vpop.eup %5367 }
0x3aee   :  { %4499 = vrot.lane.b32.xlu0 %v5368_v59, %s5894_s22 }
0x3b1b   :  { %v7919_v36 = vpop.f32.mrf.mxu3 }
0x3b60   :  { %v4500_v9 = vpop.permute.xlu0 %4499 }
0x3b61   :  { %v4502_v15 = vmul.f32 %v4500_v9, %v4483_v56 }
0x3b63   :  { %4504 = vst [vmem:[#allocation1] ss:$4 sm:$0xff] %v4502_v15 }
0x3b6a   :  { %v4505_v54 = vld.sshfl [vmem:[#allocation1] sm:$0xff pattern:$0x73625140] }
0x3b6b   :  { %4506 = vrot.lane.b32.xlu2 %v4505_v54, %s5914_s20 }
0x3bc5   :  { %v4507_v37 = vpop.permute.xlu2 %4506 }
0x3bc6   :  { %5024 = vmatmul.msk.f32.vlgmr.msrb.gmra.mxu3 %vm4377_vm8, %v4507_v37 }
0x3c49   :  { %v4527_v20 = vpop.f32.mrf.mxu3 }
0x3c4a   :  { %v4530_v60 = vadd.f32 %v4527_v20, %v4318_v62 }
0x3c4c   :  { %5369 = vtanh.f32 %v4530_v60  ;;  %v5025_v63 = vmul.f32 -1.442695, %v4530_v60 }
0x3c4e   :  { %5371 = vpow2.f32 %v5025_v63 }
0x3c52   :  { %v5370_v0 = vpop.eup %5369 }
0x3c53   :  { %4553 = vrot.lane.b32.xlu0 %v5370_v0, %s5913_s19 }
0x3c54   :  { %v5372_v48 = vpop.eup %5371 }
0x3c55   :  { %v4534_v12 = vadd.f32 1.0, %v5372_v48 }
0x3c57   :  { %5373 = vrcp.f32 %v4534_v12  ;;  %v4546_v42 = vand.u32 2147483648, %v4534_v12  ;;  %vm4540_vm6 = vweird.f32 %v4534_v12  ;;  %v4544_v4 = vand.u32 2147483647, %v4534_v12 }
0x3c59   :  { %v4547_v49 = vor.u32 1.1754944e-38, %v4546_v42  ;;  %vm4545_vm0 = vcmp.eq.f32.partialorder %v4544_v4, 8.507059e+37 }
0x3c5d   :  { %v5374_v39 = vpop.eup %5373 }
0x3c5e   :  { %v4536_v19 = vmul.f32 %v5374_v39, %v4534_v12  ;;  %vm4541_vm2 = vweird.f32 %v5374_v39 }
0x3c5f   :  { %vm4542_vm4 = vmor %vm4540_vm6, %vm4541_vm2 }
0x3c60   :  { %v4537_v33 = vsub.f32 1.0, %v4536_v19 }
0x3c62   :  { %v4538_v18 = vmul.f32 %v5374_v39, %v4537_v33 }
0x3c64   :  { %v4539_v28 = vadd.f32 %v5374_v39, %v4538_v18 }
0x3c66   :  { %v4543_v31 = vsel %vm4542_vm4, %v5374_v39, %v4539_v28 }
0x3c67   :  { %v4548_v1 = vsel %vm4545_vm0, %v4547_v49, %v4543_v31 }
0x3c68   :  { %v4551_v47 = vmul.f32 %v4548_v1, %v4496_v22 }
0x3cc5   :  { %v4554_v29 = vpop.permute.xlu0 %4553 }
0x3cc6   :  { %v4556_v30 = vmul.f32 %v4554_v29, %v4548_v1 }
0x3cc8   :  { %4558 = vrot.lane.b32.xlu1 %v4556_v30, %s5894_s22 }
0x3d3a   :  { %v4559_v61 = vpop.permute.xlu1 %4558 }
0x3d3b   :  { %v4561_v57 = vadd.f32 %v4559_v61, %v4551_v47 }
0x3d3d   :  { %5375 = vtanh.f32 %v4561_v57 }
0x3d43   :  { %v5376_v3 = vpop.eup %5375 }
0x3d44   :  { %4564 = vrot.lane.b32.xlu2 %v5376_v3, %s5894_s22 }
0x3d9e   :  { %v4565_v35 = vpop.permute.xlu2 %4564 }
0x3d9f   :  { %v4567_v38 = vmul.f32 %v4565_v35, %v4548_v1 }
0x3da1   :  { %4569 = vst [vmem:[#allocation1] ss:$4 sm:$0xff] %v4567_v38 }
0x3da8   :  { %v4570_v11 = vld.sshfl [vmem:[#allocation1] sm:$0xff pattern:$0x73625140] }
0x3da9   :  { %4571 = vrot.lane.b32.xlu0 %v4570_v11, %s5914_s20 }
0x3e1b   :  { %v4572_v25 = vpop.permute.xlu0 %4571 }
0x3e1c   :  { %5026 = vmatmul.msk.f32.vlgmr.msrb.gmra.mxu0 %vm4377_vm8, %v4572_v25 }
0x3e99   :  { %v4592_v2 = vpop.f32.mrf.mxu0 }
0x3e9a   :  { %v4595_v32 = vadd.f32 %v4592_v2, %v4319_v10 }
0x3e9c   :  { %5377 = vtanh.f32 %v4595_v32  ;;  %v5027_v24 = vmul.f32 -1.442695, %v4595_v32 }
0x3e9e   :  { %5379 = vpow2.f32 %v5027_v24 }
0x3ea2   :  { %v5378_v46 = vpop.eup %5377 }
0x3ea3   :  { %4618 = vrot.lane.b32.xlu1 %v5378_v46, %s5913_s19 }
0x3ea4   :  { %v5380_v5 = vpop.eup %5379 }
0x3ea5   :  { %v4599_v8 = vadd.f32 1.0, %v5380_v5 }
0x3ea7   :  { %5381 = vrcp.f32 %v4599_v8  ;;  %v4611_v16 = vand.u32 2147483648, %v4599_v8  ;;  %vm4605_vm5 = vweird.f32 %v4599_v8  ;;  %v4609_v44 = vand.u32 2147483647, %v4599_v8 }
0x3ea9   :  { %v4612_v50 = vor.u32 1.1754944e-38, %v4611_v16  ;;  %vm4610_vm7 = vcmp.eq.f32.partialorder %v4609_v44, 8.507059e+37 }
0x3eab   :  { %4012 = vrot.lane.b32.xlu1 %v7830_v52, %s5912_s17 }
0x3ead   :  { %v5382_v51 = vpop.eup %5381 }
0x3eae   :  { %v4601_v45 = vmul.f32 %v5382_v51, %v4599_v8  ;;  %vm4606_vm13 = vweird.f32 %v5382_v51 }
0x3eaf   :  { %vm4607_vm15 = vmor %vm4605_vm5, %vm4606_vm13 }
0x3eb0   :  { %v4602_v55 = vsub.f32 1.0, %v4601_v45 }
0x3eb2   :  { %v4603_v27 = vmul.f32 %v5382_v51, %v4602_v55 }
0x3eb4   :  { %v4604_v23 = vadd.f32 %v5382_v51, %v4603_v27 }
0x3eb6   :  { %v4608_v43 = vsel %vm4607_vm15, %v5382_v51, %v4604_v23 }
0x3eb7   :  { %v4613_v52 = vsel %vm4610_vm7, %v4612_v50, %v4608_v43 }
0x3eb8   :  { %v4616_v56 = vmul.f32 %v4613_v52, %v4561_v57 }
0x3f15   :  { %v4619_v17 = vpop.permute.xlu1 %4618 }
0x3f16   :  { %v4621_v13 = vmul.f32 %v4619_v17, %v4613_v52 }
0x3f18   :  { %4623 = vrot.lane.b32.xlu2 %v4621_v13, %s5894_s22 }
0x3f1d   :  { %v4013_v34 = vpop.permute.xlu1 %4012 }
0x3f1e   :  { %4016 = vst.msk [vmem:[#allocation5 + $0x8] sm:$0x3] %vm3707_vm14, %v4013_v34 }
0x3f20   :  { %4089 = vrot.lane.b32.xlu2 %v7840_v58, %s5912_s17 }
0x3f25   :  { %v4252_v40 = vld [vmem:[#allocation5 + $0x8] sm:$0x3] }
0x3f26   :  { %4279 = vst [vmem:[#allocation1 + $0x20] ss:$4 sm:$0xff] %v4252_v40 }
0x3f72   :  { %v4624_v21 = vpop.permute.xlu2 %4623 }
0x3f73   :  { %v4626_v7 = vadd.f32 %v4624_v21, %v4616_v56 }
0x3f75   :  { %5383 = vtanh.f32 %v4626_v7 }
0x3f7a   :  { %v4090_v14 = vpop.permute.xlu2 %4089 }
0x3f7b   :  { %v5384_v53 = vpop.eup %5383  ;;  %4093 = vst.msk [vmem:[#allocation5 + $0xa] sm:$0x3] %vm3707_vm14, %v4090_v14 }
0x3f7c   :  { %4629 = vrot.lane.b32.xlu0 %v5384_v53, %s5894_s22 }
0x3f82   :  { %v4253_v6 = vld [vmem:[#allocation5 + $0xa] sm:$0x3] }
0x3f83   :  { %4281 = vst [vmem:[#allocation1 + $0x21] ss:$4 sm:$0xff] %v4253_v6 }
0x3f84   :  { %4166 = vrot.lane.b32.xlu0 %v7850_v41, %s5912_s17 }
0x3fee   :  { %v4630_v22 = vpop.permute.xlu0 %4629 }
0x3fef   :  { %v4632_v59 = vmul.f32 %v4630_v22, %v4613_v52 }
0x3ff1   :  { %4634 = vst [vmem:[#allocation1] ss:$4 sm:$0xff] %v4632_v59 }
0x3ff6   :  { %v4167_v58 = vpop.permute.xlu0 %4166 }
0x3ff7   :  { %4170 = vst.msk [vmem:[#allocation5 + $0xc] sm:$0x3] %vm3707_vm14, %v4167_v58 }
0x3ff8   :  { %v4635_v9 = vld.sshfl [vmem:[#allocation1] sm:$0xff pattern:$0x73625140] }
0x3ff9   :  { %4636 = vrot.lane.b32.xlu1 %v4635_v9, %s5914_s20 }
0x3ffe   :  { %v4254_v15 = vld [vmem:[#allocation5 + $0xc] sm:$0x3] }
0x3fff   :  { %4283 = vst [vmem:[#allocation1 + $0x22] ss:$4 sm:$0xff] %v4254_v15 }
0x4006   :  { %v4287_v54 = vld.sshfl [vmem:[#allocation1 + $0x20] sm:$0xff pattern:$0x73625140] }
0x4007   :  { %5018 = vmatmul.msk.f32.gmra.mxu2 %vm3636_vm12, %v4287_v54 }
0x406b   :  { %v4637_v37 = vpop.permute.xlu1 %4636 }
0x406c   :  { %5028 = vmatmul.msk.f32.vlgmr.msrb.gmra.mxu1 %vm4377_vm8, %v4637_v37 }
0x408a   :  { %v4312_v62 = vpop.f32.mrf.mxu2 }
0x408b   :  { %v7944_v41 = vadd.f32 %v7891_v26, %v4312_v62 }
0x408d   :  { %v4320_v25 = vrot.slane %v7944_v41, 2  ;;  %v4321_v6 = vrot.slane %v7944_v41, 4 }
0x40e9   :  { %v4657_v20 = vpop.f32.mrf.mxu1 }
0x40ea   :  { %v4660_v60 = vadd.f32 %v4657_v20, %v7944_v41 }
0x40ec   :  { %5385 = vtanh.f32 %v4660_v60  ;;  %v5029_v63 = vmul.f32 -1.442695, %v4660_v60 }
0x40ee   :  { %5387 = vpow2.f32 %v5029_v63 }
0x40f2   :  { %v5386_v0 = vpop.eup %5385 }
0x40f3   :  { %4683 = vrot.lane.b32.xlu2 %v5386_v0, %s5913_s19 }
0x40f4   :  { %v5388_v48 = vpop.eup %5387 }
0x40f5   :  { %v4664_v12 = vadd.f32 1.0, %v5388_v48 }
0x40f7   :  { %5389 = vrcp.f32 %v4664_v12  ;;  %v4676_v26 = vand.u32 2147483648, %v4664_v12  ;;  %vm4670_vm14 = vweird.f32 %v4664_v12  ;;  %v4674_v42 = vand.u32 2147483647, %v4664_v12 }
0x40f9   :  { %v4677_v31 = vor.u32 1.1754944e-38, %v4676_v26  ;;  %vm4675_vm9 = vcmp.eq.f32.partialorder %v4674_v42, 8.507059e+37 }
0x40fd   :  { %v5390_v39 = vpop.eup %5389 }
0x40fe   :  { %v4666_v19 = vmul.f32 %v5390_v39, %v4664_v12  ;;  %vm4671_vm12 = vweird.f32 %v5390_v39 }
0x40ff   :  { %vm4672_vm1 = vmor %vm4670_vm14, %vm4671_vm12 }
0x4100   :  { %v4667_v33 = vsub.f32 1.0, %v4666_v19 }
0x4102   :  { %v4668_v18 = vmul.f32 %v5390_v39, %v4667_v33 }
0x4104   :  { %v4669_v28 = vadd.f32 %v5390_v39, %v4668_v18 }
0x4106   :  { %v4673_v4 = vsel %vm4672_vm1, %v5390_v39, %v4669_v28 }
0x4107   :  { %v4678_v29 = vsel %vm4675_vm9, %v4677_v31, %v4673_v4 }
0x4108   :  { %v4681_v30 = vmul.f32 %v4678_v29, %v4626_v7 }
0x414d   :  { %v4684_v49 = vpop.permute.xlu2 %4683 }
0x414e   :  { %v4686_v1 = vmul.f32 %v4684_v49, %v4678_v29 }
0x4150   :  { %4688 = vrot.lane.b32.xlu0 %v4686_v1, %s5894_s22 }
0x41c2   :  { %v4689_v47 = vpop.permute.xlu0 %4688 }
0x41c3   :  { %v4691_v61 = vadd.f32 %v4689_v47, %v4681_v30  ;;  %v5070_v30 = vld [vmem:[#allocation29] ss:$0 sm:$0xff] }
0x41c4   :  { %v4355_v47 = vadd.f32 %v5070_v30, %v7919_v36 }
0x41c5   :  { %5391 = vtanh.f32 %v4691_v61 }
0x41cb   :  { %v5392_v57 = vpop.eup %5391 }
0x41cc   :  { %4694 = vrot.lane.b32.xlu1 %v5392_v57, %s5894_s22 }
0x423e   :  { %v4695_v3 = vpop.permute.xlu1 %4694 }
0x423f   :  { %v4697_v35 = vmul.f32 %v4695_v3, %v4678_v29 }
0x4241   :  { %4699 = vst [vmem:[#allocation1] ss:$4 sm:$0xff] %v4697_v35 }
0x4248   :  { %v4700_v38 = vld.sshfl [vmem:[#allocation1] sm:$0xff pattern:$0x73625140] }
0x4249   :  { %4701 = vrot.lane.b32.xlu2 %v4700_v38, %s5914_s20 }
0x42a3   :  { %v4702_v11 = vpop.permute.xlu2 %4701 }
0x42a4   :  { %5030 = vmatmul.msk.f32.vlgmr.msra.gmra.mxu2 %vm4377_vm8, %v4702_v11 }
0x4327   :  { %v4722_v10 = vpop.f32.mrf.mxu2 }
0x4328   :  { %v4725_v2 = vadd.f32 %v4722_v10, %v4320_v25  ;;  %v4322_v25 = vrot.slane %v7944_v41, 6 }
0x432a   :  { %5393 = vtanh.f32 %v4725_v2  ;;  %v5031_v46 = vmul.f32 -1.442695, %v4725_v2 }
0x432c   :  { %5395 = vpow2.f32 %v5031_v46 }
0x4330   :  { %v5394_v32 = vpop.eup %5393 }
0x4331   :  { %4748 = vrot.lane.b32.xlu0 %v5394_v32, %s5913_s19 }
0x4332   :  { %v5396_v24 = vpop.eup %5395 }
0x4333   :  { %v4729_v5 = vadd.f32 1.0, %v5396_v24 }
0x4335   :  { %5397 = vrcp.f32 %v4729_v5  ;;  %v4741_v23 = vand.u32 2147483648, %v4729_v5  ;;  %vm4735_vm11 = vweird.f32 %v4729_v5  ;;  %v4739_v16 = vand.u32 2147483647, %v4729_v5 }
0x4337   :  { %v4742_v43 = vor.u32 1.1754944e-38, %v4741_v23  ;;  %vm4740_vm2 = vcmp.eq.f32.partialorder %v4739_v16, 8.507059e+37 }
0x433b   :  { %v5398_v8 = vpop.eup %5397 }
0x433c   :  { %v4731_v51 = vmul.f32 %v5398_v8, %v4729_v5  ;;  %vm4736_vm10 = vweird.f32 %v5398_v8 }
0x433d   :  { %vm4737_vm3 = vmor %vm4735_vm11, %vm4736_vm10  ;;  %vm4912_vm10 = vcmask 58368   ;;  %vm4920_vm11 = vcmask 1024  }
0x433e   :  { %v4732_v45 = vsub.f32 1.0, %v4731_v51 }
0x4340   :  { %v4733_v55 = vmul.f32 %v5398_v8, %v4732_v45 }
0x4342   :  { %v4734_v27 = vadd.f32 %v5398_v8, %v4733_v55 }
0x4344   :  { %v4738_v44 = vsel %vm4737_vm3, %v5398_v8, %v4734_v27 }
0x4345   :  { %v4743_v17 = vsel %vm4740_vm2, %v4742_v43, %v4738_v44 }
0x4346   :  { %v4746_v13 = vmul.f32 %v4743_v17, %v4691_v61  ;;  %v5020_v61 = vmul.f32 -1.442695, %v4355_v47 }
0x43a3   :  { %v4749_v50 = vpop.permute.xlu0 %4748 }
0x43a4   :  { %v4751_v52 = vmul.f32 %v4749_v50, %v4743_v17 }
0x43a6   :  { %4753 = vrot.lane.b32.xlu1 %v4751_v52, %s5894_s22 }
0x4418   :  { %v4754_v34 = vpop.permute.xlu1 %4753 }
0x4419   :  { %v4756_v40 = vadd.f32 %v4754_v34, %v4746_v13 }
0x441b   :  { %5399 = vtanh.f32 %v4756_v40 }
0x4421   :  { %v5400_v56 = vpop.eup %5399 }
0x4422   :  { %4759 = vrot.lane.b32.xlu2 %v5400_v56, %s5894_s22 }
0x447c   :  { %v4760_v21 = vpop.permute.xlu2 %4759 }
0x447d   :  { %v4762_v7 = vmul.f32 %v4760_v21, %v4743_v17 }
0x447f   :  { %4764 = vst [vmem:[#allocation1] ss:$4 sm:$0xff] %v4762_v7 }
0x4486   :  { %v4765_v14 = vld.sshfl [vmem:[#allocation1] sm:$0xff pattern:$0x73625140] }
0x4487   :  { %4766 = vrot.lane.b32.xlu0 %v4765_v14, %s5914_s20  ;;  %v5071_v14 = vld [vmem:[#allocation30] ss:$0 sm:$0xff] }
0x44f9   :  { %v4767_v53 = vpop.permute.xlu0 %4766 }
0x44fa   :  { %5032 = vmatmul.msk.f32.vlgmr.msra.gmra.mxu3 %vm4377_vm8, %v4767_v53 }
0x457d   :  { %v4787_v22 = vpop.f32.mrf.mxu3 }
0x457e   :  { %v4790_v59 = vadd.f32 %v4787_v22, %v4321_v6 }
0x4580   :  { %5401 = vtanh.f32 %v4790_v59  ;;  %v5033_v9 = vmul.f32 -1.442695, %v4790_v59 }
0x4582   :  { %5403 = vpow2.f32 %v5033_v9 }
0x4586   :  { %v5402_v58 = vpop.eup %5401 }
0x4587   :  { %4813 = vrot.lane.b32.xlu1 %v5402_v58, %s5913_s19 }
0x4588   :  { %v5404_v15 = vpop.eup %5403 }
0x4589   :  { %v4794_v54 = vadd.f32 1.0, %v5404_v15 }
0x458b   :  { %5405 = vrcp.f32 %v4794_v54  ;;  %v4806_v63 = vand.u32 2147483648, %v4794_v54  ;;  %vm4800_vm4 = vweird.f32 %v4794_v54  ;;  %v4804_v48 = vand.u32 2147483647, %v4794_v54 }
0x458d   :  { %v4807_v39 = vor.u32 1.1754944e-38, %v4806_v63  ;;  %vm4805_vm13 = vcmp.eq.f32.partialorder %v4804_v48, 8.507059e+37  ;;  %v5072_v63 = vld [vmem:[#allocation6] ss:$0 sm:$0xff] }
0x4591   :  { %v5406_v37 = vpop.eup %5405 }
0x4592   :  { %v4796_v62 = vmul.f32 %v5406_v37, %v4794_v54  ;;  %vm4801_vm6 = vweird.f32 %v5406_v37 }
0x4593   :  { %vm4802_vm0 = vmor %vm4800_vm4, %vm4801_vm6 }
0x4594   :  { %v4797_v20 = vsub.f32 1.0, %v4796_v62 }
0x4596   :  { %v4798_v60 = vmul.f32 %v5406_v37, %v4797_v20 }
0x4598   :  { %v4799_v0 = vadd.f32 %v5406_v37, %v4798_v60 }
0x459a   :  { %v4803_v12 = vsel %vm4802_vm0, %v5406_v37, %v4799_v0 }
0x459b   :  { %v4808_v33 = vsel %vm4805_vm13, %v4807_v39, %v4803_v12 }
0x459c   :  { %v4811_v28 = vmul.f32 %v4808_v33, %v4756_v40 }
0x45f9   :  { %v4814_v19 = vpop.permute.xlu1 %4813 }
0x45fa   :  { %v4816_v18 = vmul.f32 %v4814_v19, %v4808_v33 }
0x45fc   :  { %4818 = vrot.lane.b32.xlu2 %v4816_v18, %s5894_s22 }
0x4656   :  { %v4819_v26 = vpop.permute.xlu2 %4818 }
0x4657   :  { %v7961_v42 = vadd.f32 %v4819_v26, %v4811_v28 }
0x4659   :  { %5407 = vtanh.f32 %v7961_v42 }
0x465a   :  { %5409 = vpow2.f32 %v5020_v61 }
0x465f   :  { %v5408_v4 = vpop.eup %5407 }
0x4660   :  { %4824 = vrot.lane.b32.xlu0 %v5408_v4, %s5894_s22  ;;  %v5410_v57 = vpop.eup %5409 }
0x4661   :  { %v4360_v3 = vadd.f32 1.0, %v5410_v57 }
0x4663   :  { %5411 = vrcp.f32 %v4360_v3  ;;  %v4372_v24 = vand.u32 2147483648, %v4360_v3  ;;  %v4370_v5 = vand.u32 2147483647, %v4360_v3 }
0x4665   :  { %v4373_v51 = vor.u32 1.1754944e-38, %v4372_v24  ;;  %vm4371_vm7 = vcmp.eq.f32.partialorder %v4370_v5, 8.507059e+37 }
0x4669   :  { %v5412_v35 = vpop.eup %5411 }
0x466a   :  { %v4362_v38 = vmul.f32 %v5412_v35, %v4360_v3  ;;  %vm4367_vm5 = vweird.f32 %v5412_v35 }
0x466c   :  { %v4363_v11 = vsub.f32 1.0, %v4362_v38 }
0x466e   :  { %v4364_v32 = vmul.f32 %v5412_v35, %v4363_v11 }
0x4670   :  { %v4365_v46 = vadd.f32 %v5412_v35, %v4364_v32 }
0x46d2   :  { %v4825_v31 = vpop.permute.xlu0 %4824 }
0x46d3   :  { %v4827_v49 = vmul.f32 %v4825_v31, %v4808_v33 }
0x46d5   :  { %4829 = vst [vmem:[#allocation1] ss:$4 sm:$0xff] %v4827_v49 }
0x46dc   :  { %v4830_v29 = vld.sshfl [vmem:[#allocation1] sm:$0xff pattern:$0x73625140] }
0x46dd   :  { %4831 = vrot.lane.b32.xlu1 %v4830_v29, %s5914_s20 }
0x474f   :  { %v4832_v1 = vpop.permute.xlu1 %4831 }
0x4750   :  { %5034 = vmatmul.msk.f32.vlgmr.msra.gmra.mxu0 %vm4377_vm8, %v4832_v1  ;;  %vm4366_vm8 = vweird.f32 %v4360_v3 }
0x4751   :  { %vm4368_vm15 = vmor %vm4366_vm8, %vm4367_vm5 }
0x4752   :  { %v4369_v8 = vsel %vm4368_vm15, %v5412_v35, %v4365_v46 }
0x4753   :  { %v4374_v45 = vsel %vm4371_vm7, %v4373_v51, %v4369_v8 }
0x4754   :  { %v4376_v55 = vmul.f32 %v4374_v45, %v4355_v47 }
0x47cd   :  { %v4852_v10 = vpop.f32.mrf.mxu0 }
0x47ce   :  { %v4855_v2 = vadd.f32 %v4852_v10, %v4322_v25 }
0x47d0   :  { %5413 = vtanh.f32 %v4855_v2  ;;  %v5035_v41 = vmul.f32 -1.442695, %v4855_v2 }
0x47d2   :  { %5415 = vpow2.f32 %v5035_v41 }
0x47d6   :  { %v5414_v36 = vpop.eup %5413 }
0x47d7   :  { %4878 = vrot.lane.b32.xlu2 %v5414_v36, %s5913_s19 }
0x47d8   :  { %v5416_v27 = vpop.eup %5415 }
0x47d9   :  { %v4859_v23 = vadd.f32 1.0, %v5416_v27 }
0x47db   :  { %5417 = vrcp.f32 %v4859_v23  ;;  %v4871_v52 = vand.u32 2147483648, %v4859_v23  ;;  %vm4865_vm14 = vweird.f32 %v4859_v23  ;;  %v4869_v13 = vand.u32 2147483647, %v4859_v23 }
0x47dd   :  { %v4872_v40 = vor.u32 1.1754944e-38, %v4871_v52  ;;  %vm4870_vm9 = vcmp.eq.f32.partialorder %v4869_v13, 8.507059e+37 }
0x47df   :  { %4894 = vrot.lane.b32.xlu2 %v4376_v55, %s5890_s28 }
0x47e1   :  { %v5418_v16 = vpop.eup %5417 }
0x47e2   :  { %v4861_v44 = vmul.f32 %v5418_v16, %v4859_v23  ;;  %vm4866_vm12 = vweird.f32 %v5418_v16 }
0x47e3   :  { %vm4867_vm1 = vmor %vm4865_vm14, %vm4866_vm12 }
0x47e4   :  { %v4862_v43 = vsub.f32 1.0, %v4861_v44 }
0x47e6   :  { %v4863_v50 = vmul.f32 %v5418_v16, %v4862_v43 }
0x47e8   :  { %v4864_v17 = vadd.f32 %v5418_v16, %v4863_v50 }
0x47ea   :  { %v4868_v34 = vsel %vm4867_vm1, %v5418_v16, %v4864_v17 }
0x47eb   :  { %v4873_v21 = vsel %vm4870_vm9, %v4872_v40, %v4868_v34 }
0x47ec   :  { %v4876_v53 = vmul.f32 %v4873_v21, %v7961_v42 }
0x4831   :  { %v4879_v56 = vpop.permute.xlu2 %4878 }
0x4832   :  { %v4881_v7 = vmul.f32 %v4879_v56, %v4873_v21 }
0x4834   :  { %4883 = vrot.lane.b32.xlu0 %v4881_v7, %s5894_s22 }
0x4839   :  { %v4895_v15 = vpop.permute.xlu2 %4894 }
0x483c   :  { %4902 = vrot.lane.b32.xlu0 %v5071_v14, %s5890_s28 }
0x48a6   :  { %v4884_v6 = vpop.permute.xlu0 %4883 }
0x48a7   :  { %v4886_v22 = vadd.f32 %v4884_v6, %v4876_v53 }
0x48a9   :  { %5419 = vtanh.f32 %v4886_v22 }
0x48ae   :  { %v4903_v54 = vpop.permute.xlu0 %4902 }
0x48af   :  { %v5420_v59 = vpop.eup %5419 }
0x48b0   :  { %4889 = vrot.lane.b32.xlu1 %v5420_v59, %s5894_s22 }
0x4922   :  { %v4890_v58 = vpop.permute.xlu1 %4889 }
0x4923   :  { %v4892_v9 = vmul.f32 %v4890_v58, %v4873_v21 }
0x4925   :  { %v4897_v37 = vadd.f32 %v4895_v15, %v4892_v9 }
0x4927   :  { %v4905_v62 = vmul.f32 %v4903_v54, %v4897_v37 }
0x4929   :  { %4907 = vst [vmem:[#allocation1] ss:$4 sm:$0xff] %v4905_v62 }
0x4930   :  { %v4908_v20 = vld.sshfl [vmem:[#allocation1] sm:$0xff pattern:$0x73625140] }
0x4931   :  { %4909 = vrot.lane.b32.xlu1 %v4908_v20, %s5914_s20 }
0x49a3   :  { %v4910_v60 = vpop.permute.xlu1 %4909 }
0x49a4   :  { %v4913_v0 = vsel %vm4912_vm10, %v4910_v60, 0.0 }
0x49a5   :  { %4914 = vadd.xlane.f32.xlu2 %v4913_v0 }
0x4a18   :  { %v4915_v48 = vpop.xlane.xlu2 %4914 }
0x4a19   :  { %v4919_v12 = vadd.f32 %v5072_v63, %v4915_v48 }
0x4a1b   :  { %4921 = vst.msk [vmem:[%s8290_s18] sm:$0x3] %vm4920_vm11, %v4919_v12 }
0x4a1c   :  { %4926 = vsyncpa [#allocation8], 1 }
0x4a1d   :  { %4927 = vsyncpa [#allocation10], 1 }
0x4a1e   :  { %4928 = vsyncpa [#allocation13], 1 }
0x4a1f   :  { %4929 = vsyncpa [#allocation16], 1 }
0x4a20   :  { %4930 = vsyncpa [#allocation19], 1 }
0x4a21   :  { %4931 = vsyncpa [#allocation22], 1 }
0x4a22   :  { %4932 = vsyncpa [#allocation25], 1 }
0x4a23   :  { %4933 = vsyncpa [#allocation28], 1 }
0x4a24   :  { %4934 = vsyncpa [#allocation31], 1 }

</bundles_post_ra>
